<compile_context>
chip_gen: v6e
topology: v6e:2x2x1
jax: 0.10.0
libtpu: 0.0.40
codegen_flags: <defaults>
</compile_context>

<pallas_src>
import functools
import math

import jax
import jax.numpy as jnp
from jax.experimental import pallas as pl
from jax.experimental.pallas import tpu as pltpu


def _round_up(x, m):
    return (x + m - 1) // m * m


@functools.lru_cache(maxsize=None)
def _mxu_pref_tile():
    """256-wide MXU tiles on v6e/v7x, 128 on v5e and older."""
    try:
        kind = jax.devices()[0].device_kind.lower()
    except Exception:
        return 256
    for old in ("v2", "v3", "v4", "v5"):
        if old in kind:
            return 128
    return 256


def _pick_tile(dim, pref):
    """Largest tile <= pref that evenly divides `dim` (multiples of 128 tried)."""
    if dim <= pref:
        return dim
    t = pref
    while t >= 128:
        if dim % t == 0:
            return t
        t -= 128
    return dim


def _vmem_limit(*buf_bytes):
    """Right-sized VMEM limit: double-buffered tiles + margin, clamped."""
    est = 2 * sum(buf_bytes) + (4 << 20)
    return int(min(max(est, 16 << 20), 48 << 20))


# --------------------------- matmul kernels ----------------------------------

def _epilogue(y, act):
    if act == "lrelu":
        return jnp.where(y > 0, y, 0.2 * y)
    if act == "sigmoid":
        return jax.nn.sigmoid(y)
    return y


def _matmul_wholek_kernel(p_ref, w_ref, o_ref, *, act):
    y = jnp.dot(p_ref[...], w_ref[...], preferred_element_type=jnp.float32)
    o_ref[...] = _epilogue(y, act).astype(o_ref.dtype)


def _matmul_ktiled_kernel(p_ref, w_ref, o_ref, acc_ref, *, act):
    @pl.when(pl.program_id(2) == 0)
    def _():
        acc_ref[...] = jnp.zeros_like(acc_ref)

    acc_ref[...] += jnp.dot(p_ref[...], w_ref[...],
                            preferred_element_type=jnp.float32)

    @pl.when(pl.program_id(2) == pl.num_programs(2) - 1)
    def _():
        o_ref[...] = _epilogue(acc_ref[...], act).astype(o_ref.dtype)


def matmul_fused(p, w, act="none", out_dtype=jnp.bfloat16):
    """(Mp,Kp) @ (Kp,Np) on the MXU.  Inputs are pre-padded bf16; f32 accum;
    fused activation epilogue; output written lane-dense in `out_dtype`."""
    Mp, Kp = p.shape
    Kw, Np = w.shape
    assert Kw == Kp and Kp % 128 == 0 and Np % 128 == 0

    pref = _mxu_pref_tile()
    TM = _pick_tile(Mp, pref)
    TN = _pick_tile(Np, pref)
    # Keep a parallel grid extent >= 2 where possible (v7x has 2 TensorCores).
    if (Mp // TM) * (Np // TN) < 2:
        if Np >= 256:
            TN = 128
        elif Mp >= 32 and (Mp // 2) % 16 == 0:
            TM = Mp // 2

    bpe = 2  # bf16 inputs
    wholek_bytes = 2 * bpe * (TM * Kp + Kp * TN)   # double-buffered input tiles
    if wholek_bytes <= (24 << 20):
        # Whole-K: single dot per output tile, 2-D parallel grid, no scratch.
        return pl.pallas_call(
            functools.partial(_matmul_wholek_kernel, act=act),
            out_shape=jax.ShapeDtypeStruct((Mp, Np), out_dtype),
            grid=(Mp // TM, Np // TN),
            in_specs=[pl.BlockSpec((TM, Kp), lambda i, j: (i, 0)),
                      pl.BlockSpec((Kp, TN), lambda i, j: (0, j))],
            out_specs=pl.BlockSpec((TM, TN), lambda i, j: (i, j)),
            compiler_params=pltpu.CompilerParams(
                dimension_semantics=("parallel", "parallel"),
                vmem_limit_bytes=_vmem_limit(
                    bpe * TM * Kp, bpe * Kp * TN, 4 * TM * TN)),
        )(p, w)

    # Fallback for very large K: tiled reduction with f32 VMEM accumulator.
    TK = _pick_tile(Kp, 2048)
    while 2 * bpe * (TM * TK + TK * TN) > (24 << 20) and TK > 128:
        TK = _pick_tile(Kp, TK - 128)
    return pl.pallas_call(
        functools.partial(_matmul_ktiled_kernel, act=act),
        out_shape=jax.ShapeDtypeStruct((Mp, Np), out_dtype),
        grid=(Mp // TM, Np // TN, Kp // TK),
        in_specs=[pl.BlockSpec((TM, TK), lambda i, j, k: (i, k)),
                  pl.BlockSpec((TK, TN), lambda i, j, k: (k, j))],
        out_specs=pl.BlockSpec((TM, TN), lambda i, j, k: (i, j)),
        scratch_shapes=[pltpu.VMEM((TM, TN), jnp.float32)],
        compiler_params=pltpu.CompilerParams(
            dimension_semantics=("parallel", "parallel", "arbitrary"),
            vmem_limit_bytes=_vmem_limit(
                bpe * TM * TK, bpe * TK * TN, 4 * TM * TN, 4 * TM * TN)),
    )(p, w)


# --------------------------- BatchNorm + LeakyReLU ---------------------------

def _bn_stats_kernel(x_ref, sum_ref, sq_ref):
    @pl.when(pl.program_id(1) == 0)
    def _():
        sum_ref[...] = jnp.zeros_like(sum_ref)
        sq_ref[...] = jnp.zeros_like(sq_ref)
    x = x_ref[...].astype(jnp.float32)
    sum_ref[...] += jnp.sum(x, axis=0, keepdims=True)
    sq_ref[...] += jnp.sum(x * x, axis=0, keepdims=True)


def _affine_lrelu_kernel(x_ref, s_ref, b_ref, o_ref, *, slope):
    y = x_ref[...].astype(jnp.float32) * s_ref[...] + b_ref[...]
    o_ref[...] = jnp.where(y > 0, y, slope * y).astype(o_ref.dtype)


def batchnorm_lrelu_flat(y, m_real, gamma, beta, eps=1e-5, slope=0.2):
    """BatchNorm2d (train-mode batch stats, biased var) + LeakyReLU(0.2).

    y: (Mp, Cp) bf16 flattened NHWC conv output; rows >= m_real and channels
    >= len(gamma) are zero padding (they contribute nothing to the sums and
    are sliced off by the caller).  Two-pass tiled reduction; returns bf16.
    """
    Mp, Cp = y.shape
    C = gamma.shape[0]
    g = jnp.pad(gamma, (0, Cp - C), constant_values=1.0).reshape(1, Cp)
    b = jnp.pad(beta, (0, Cp - C)).reshape(1, Cp)

    TC = 128 if Cp % 128 == 0 else Cp
    TMR = _pick_tile(Mp, 1024)   # stats reduction tile over rows

    sums, sqs = pl.pallas_call(
        _bn_stats_kernel,
        out_shape=(jax.ShapeDtypeStruct((1, Cp), jnp.float32),
                   jax.ShapeDtypeStruct((1, Cp), jnp.float32)),
        grid=(Cp // TC, Mp // TMR),
        in_specs=[pl.BlockSpec((TMR, TC), lambda j, i: (i, j))],
        out_specs=(pl.BlockSpec((1, TC), lambda j, i: (0, j)),
                   pl.BlockSpec((1, TC), lambda j, i: (0, j))),
        compiler_params=pltpu.CompilerParams(
            dimension_semantics=("parallel", "arbitrary"),
            vmem_limit_bytes=_vmem_limit(2 * TMR * TC, 4 * TC, 4 * TC)),
    )(y)

    mean = sums / float(m_real)
    var = jnp.maximum(sqs / float(m_real) - mean * mean, 0.0)   # biased var
    scale = g * jax.lax.rsqrt(var + eps)
    shift = b - mean * scale

    TMA = _pick_tile(Mp, 512)
    return pl.pallas_call(
        functools.partial(_affine_lrelu_kernel, slope=slope),
        out_shape=jax.ShapeDtypeStruct((Mp, Cp), jnp.bfloat16),
        grid=(Mp // TMA, Cp // TC),
        in_specs=[pl.BlockSpec((TMA, TC), lambda i, j: (i, j)),
                  pl.BlockSpec((1, TC), lambda i, j: (0, j)),
                  pl.BlockSpec((1, TC), lambda i, j: (0, j))],
        out_specs=pl.BlockSpec((TMA, TC), lambda i, j: (i, j)),
        compiler_params=pltpu.CompilerParams(
            dimension_semantics=("parallel", "parallel"),
            vmem_limit_bytes=_vmem_limit(2 * TMA * TC, 2 * TMA * TC)),
    )(y, scale, shift)


# --------------------------- conv glue (NHWC im2col) -------------------------

def conv2d_flat(x, w, stride, padding, act="none", out_dtype=jnp.bfloat16):
    """NHWC conv with PyTorch-layout weight (Cout, Cin, kh, kw), bias=False.

    The im2col matrix is built once, directly in bf16, with the spatial and
    channel zero-padding folded into the same pass.  Returns (y_flat, shp)
    where y_flat is (Mp, Np) padded (extra rows/channels are zero-derived) and
    shp = (N, Ho, Wo, Cout) gives the real output geometry.
    """
    N, H, W, Cin = x.shape
    Cout, _, kh, kw = w.shape
    Ho = (H + 2 * padding - kh) // stride + 1
    Wo = (W + 2 * padding - kw) // stride + 1
    M = N * Ho * Wo

    # Pad Cin so that K = kh*kw*Cin_p is a multiple of 128 (lane-aligned K).
    cin_mult = 128 // math.gcd(kh * kw, 128)
    Cin_p = _round_up(Cin, cin_mult)
    K = kh * kw * Cin_p

    xp = jnp.pad(x.astype(jnp.bfloat16),
                 ((0, 0), (padding, padding), (padding, padding),
                  (0, Cin_p - Cin)))

    cols = []
    for i in range(kh):
        for j in range(kw):
            cols.append(xp[:, i: i + stride * (Ho - 1) + 1: stride,
                              j: j + stride * (Wo - 1) + 1: stride, :])
    P = jnp.concatenate(cols, axis=-1).reshape(M, K)        # bf16, (M, K)

    # Pad rows to a bf16-sublane / MXU friendly multiple (padded rows = 0).
    Mp = _round_up(M, 16) if M < 256 else _round_up(M, 256)
    if Mp != M:
        P = jnp.pad(P, ((0, Mp - M), (0, 0)))

    Np = _round_up(Cout, 128)
    W2 = jnp.transpose(w, (2, 3, 1, 0))                      # (kh, kw, Cin, Cout)
    W2 = jnp.pad(W2, ((0, 0), (0, 0), (0, Cin_p - Cin), (0, Np - Cout)))
    W2 = W2.reshape(K, Np).astype(jnp.bfloat16)

    y = matmul_fused(P, W2, act=act, out_dtype=out_dtype)    # (Mp, Np)
    return y, (N, Ho, Wo, Cout)


def _unflatten(y_flat, shp):
    N, Ho, Wo, Cout = shp
    M = N * Ho * Wo
    return y_flat[:M, :Cout].reshape(N, Ho, Wo, Cout)


# --------------------------- D2 forward --------------------------------------

def d2_forward(P, x_nchw):
    x = jnp.transpose(x_nchw, (0, 2, 3, 1))                  # -> NHWC once

    # layer1: Conv(nc, nf, 4, 2, 1); layer2's LeakyReLU fused as epilogue.
    y, shp = conv2d_flat(x, P["w1"], stride=2, padding=1, act="lrelu")
    x = _unflatten(y, shp)

    # layer2: Conv(nf, 2nf, 4, 2, 1) -> BN (+ layer3's LeakyReLU fused).
    y, shp = conv2d_flat(x, P["w2"], stride=2, padding=1, act="none")
    y = batchnorm_lrelu_flat(y, shp[0] * shp[1] * shp[2], P["g2"], P["b2"])
    x = _unflatten(y, shp)

    # layer3: Conv(2nf, 4nf, 4, 2, 1) -> BN (+ LeakyReLU fused).
    y, shp = conv2d_flat(x, P["w3"], stride=2, padding=1, act="none")
    y = batchnorm_lrelu_flat(y, shp[0] * shp[1] * shp[2], P["g3"], P["b3"])
    x = _unflatten(y, shp)

    # layer4: Conv(4nf, 8nf, 4, 1, 1) -> BN (+ LeakyReLU fused).
    y, shp = conv2d_flat(x, P["w4"], stride=1, padding=1, act="none")
    y = batchnorm_lrelu_flat(y, shp[0] * shp[1] * shp[2], P["g4"], P["b4"])
    x = _unflatten(y, shp)

    # layer5: Conv(8nf, 1, 4, 1, 1) -> Sigmoid (fused), f32 output.
    y, shp = conv2d_flat(x, P["w5"], stride=1, padding=1, act="sigmoid",
                         out_dtype=jnp.float32)
    y = _unflatten(y, shp)

    return jnp.transpose(y, (0, 3, 1, 2))                    # -> NCHW out


# --------------------------- deterministic params ----------------------------

def init_params(key, nc=3, nf=64):
    ks = jax.random.split(key, 5)

    def cw(k, cout, cin):
        return 0.05 * jax.random.normal(k, (cout, cin, 4, 4), jnp.float32)

    P = {}
    P["w1"] = cw(ks[0], nf, nc)
    P["w2"] = cw(ks[1], nf * 2, nf)
    P["g2"], P["b2"] = jnp.ones((nf * 2,), jnp.float32), jnp.zeros((nf * 2,), jnp.float32)
    P["w3"] = cw(ks[2], nf * 4, nf * 2)
    P["g3"], P["b3"] = jnp.ones((nf * 4,), jnp.float32), jnp.zeros((nf * 4,), jnp.float32)
    P["w4"] = cw(ks[3], nf * 8, nf * 4)
    P["g4"], P["b4"] = jnp.ones((nf * 8,), jnp.float32), jnp.zeros((nf * 8,), jnp.float32)
    P["w5"] = cw(ks[4], 1, nf * 8)
    return P


# --------------------------- main --------------------------------------------

if __name__ == "__main__":
    key = jax.random.PRNGKey(0)
    pkey, xkey = jax.random.split(key)
    params = init_params(pkey, nc=3, nf=64)

    # 32 -> 16 -> 8 -> 4 (stride-2 convs) -> 3 -> 2 (k=4, s=1, p=1 convs).
    x = jax.random.normal(xkey, (2, 3, 32, 32), jnp.float32)

    fwd = jax.jit(d2_forward)
    out = jax.block_until_ready(fwd(params, x))

    assert out.shape == (2, 1, 2, 2), out.shape
    assert out.dtype == jnp.float32
    assert bool(jnp.all(out > 0.0)) and bool(jnp.all(out < 1.0))  # sigmoid range
    print("KERNEL_OK")
</pallas_src>

<mosaic_0001>
module attributes {stable_mosaic.version = 11 : i64} {
  func.func @_matmul_wholek_kernel(%arg0: i32, %arg1: i32, %arg2: memref<256x128xbf16, #tpu.memory_space<vmem>>, %arg3: memref<128x128xbf16, #tpu.memory_space<vmem>>, %arg4: memref<256x128xbf16, #tpu.memory_space<vmem>>) attributes {dimension_semantics = [#tpu.dimension_semantics<parallel>, #tpu.dimension_semantics<parallel>], iteration_bounds = array<i64: 2, 1>, scalar_prefetch = 0 : i64, scratch_operands = 0 : i64, tpu.core_type = #tpu.core_type<tc>, window_params = [{transform_indices = @transform_0, window_bounds = array<i64: 256, 128>}, {transform_indices = @transform_1, window_bounds = array<i64: 128, 128>}, {transform_indices = @transform_2, window_bounds = array<i64: 256, 128>}]} {
    %c0 = arith.constant 0 : index
    %c0_0 = arith.constant 0 : index
    %0 = vector.load %arg2[%c0, %c0_0] : memref<256x128xbf16, #tpu.memory_space<vmem>>, vector<256x128xbf16>
    %c0_1 = arith.constant 0 : index
    %c0_2 = arith.constant 0 : index
    %1 = vector.load %arg3[%c0_1, %c0_2] : memref<128x128xbf16, #tpu.memory_space<vmem>>, vector<128x128xbf16>
    %cst = arith.constant dense<0.000000e+00> : vector<256x128xf32>
    %2 = tpu.matmul %0, %1, %cst {dimension_numbers = #tpu.dot_dimension_numbers<[1], [0], [0], [1], [0, 0, 1, 1], [], []>} : vector<256x128xbf16>, vector<128x128xbf16>, vector<256x128xf32> -> vector<256x128xf32>
    %cst_3 = arith.constant 0.000000e+00 : f32
    %3 = vector.broadcast %cst_3 : f32 to vector<256x128xf32>
    %4 = arith.cmpf ogt, %2, %3 : vector<256x128xf32>
    %cst_4 = arith.constant 2.000000e-01 : f32
    %5 = vector.broadcast %cst_4 : f32 to vector<256x128xf32>
    %6 = arith.mulf %5, %2 : vector<256x128xf32>
    %7 = arith.select %4, %2, %6 : vector<256x128xi1>, vector<256x128xf32>
    %8 = arith.truncf %7 : vector<256x128xf32> to vector<256x128xbf16>
    %c0_5 = arith.constant 0 : index
    %c0_6 = arith.constant 0 : index
    %9 = vector.load %arg4[%c0_5, %c0_6] : memref<256x128xbf16, #tpu.memory_space<vmem>>, vector<256x128xbf16>
    tpu.vector_store %arg4[%c0_5, %c0_6], %8 {strides = array<i32>} : memref<256x128xbf16, #tpu.memory_space<vmem>>, vector<256x128xbf16>,
    return
  }
  func.func @transform_0(%arg0: i32, %arg1: i32) -> (i32, i32) {
    %c0_i32 = arith.constant 0 : i32
    %c0_i32_0 = arith.constant 0 : i32
    return %arg0, %c0_i32 : i32, i32
  }
  func.func @transform_1(%arg0: i32, %arg1: i32) -> (i32, i32) {
    %c0_i32 = arith.constant 0 : i32
    %c0_i32_0 = arith.constant 0 : i32
    return %c0_i32, %arg1 : i32, i32
  }
  func.func @transform_2(%arg0: i32, %arg1: i32) -> (i32, i32) {
    %c0_i32 = arith.constant 0 : i32
    return %arg0, %arg1 : i32, i32
  }
}

module attributes {stable_mosaic.version = 11 : i64} {
  func.func @_matmul_wholek_kernel(%arg0: i32, %arg1: i32, %arg2: memref<64x1024xbf16, #tpu.memory_space<vmem>>, %arg3: memref<1024x128xbf16, #tpu.memory_space<vmem>>, %arg4: memref<64x128xbf16, #tpu.memory_space<vmem>>) attributes {dimension_semantics = [#tpu.dimension_semantics<parallel>, #tpu.dimension_semantics<parallel>], iteration_bounds = array<i64: 2, 1>, scalar_prefetch = 0 : i64, scratch_operands = 0 : i64, tpu.core_type = #tpu.core_type<tc>, window_params = [{transform_indices = @transform_0, window_bounds = array<i64: 64, 1024>}, {transform_indices = @transform_1, window_bounds = array<i64: 1024, 128>}, {transform_indices = @transform_2, window_bounds = array<i64: 64, 128>}]} {
    %c0 = arith.constant 0 : index
    %c0_0 = arith.constant 0 : index
    %0 = vector.load %arg2[%c0, %c0_0] : memref<64x1024xbf16, #tpu.memory_space<vmem>>, vector<64x1024xbf16>
    %c0_1 = arith.constant 0 : index
    %c0_2 = arith.constant 0 : index
    %1 = vector.load %arg3[%c0_1, %c0_2] : memref<1024x128xbf16, #tpu.memory_space<vmem>>, vector<1024x128xbf16>
    %cst = arith.constant dense<0.000000e+00> : vector<64x128xf32>
    %2 = tpu.matmul %0, %1, %cst {dimension_numbers = #tpu.dot_dimension_numbers<[1], [0], [0], [1], [0, 0, 1, 1], [], []>} : vector<64x1024xbf16>, vector<1024x128xbf16>, vector<64x128xf32> -> vector<64x128xf32>
    %3 = arith.truncf %2 : vector<64x128xf32> to vector<64x128xbf16>
    %c0_3 = arith.constant 0 : index
    %c0_4 = arith.constant 0 : index
    %4 = vector.load %arg4[%c0_3, %c0_4] : memref<64x128xbf16, #tpu.memory_space<vmem>>, vector<64x128xbf16>
    tpu.vector_store %arg4[%c0_3, %c0_4], %3 {strides = array<i32>} : memref<64x128xbf16, #tpu.memory_space<vmem>>, vector<64x128xbf16>,
    return
  }
  func.func @transform_0(%arg0: i32, %arg1: i32) -> (i32, i32) {
    %c0_i32 = arith.constant 0 : i32
    %c0_i32_0 = arith.constant 0 : i32
    return %arg0, %c0_i32 : i32, i32
  }
  func.func @transform_1(%arg0: i32, %arg1: i32) -> (i32, i32) {
    %c0_i32 = arith.constant 0 : i32
    %c0_i32_0 = arith.constant 0 : i32
    return %c0_i32, %arg1 : i32, i32
  }
  func.func @transform_2(%arg0: i32, %arg1: i32) -> (i32, i32) {
    %c0_i32 = arith.constant 0 : i32
    return %arg0, %arg1 : i32, i32
  }
}

module attributes {stable_mosaic.version = 11 : i64} {
  func.func @_bn_stats_kernel(%arg0: i32, %arg1: i32, %arg2: memref<128x128xbf16, #tpu.memory_space<vmem>>, %arg3: memref<1x128xf32, #tpu.memory_space<vmem>>, %arg4: memref<1x128xf32, #tpu.memory_space<vmem>>) attributes {dimension_semantics = [#tpu.dimension_semantics<parallel>, #tpu.dimension_semantics<arbitrary>], iteration_bounds = array<i64: 1, 1>, scalar_prefetch = 0 : i64, scratch_operands = 0 : i64, tpu.core_type = #tpu.core_type<tc>, window_params = [{transform_indices = @transform_0, window_bounds = array<i64: 128, 128>}, {transform_indices = @transform_1, window_bounds = array<i64: 1, 128>}, {transform_indices = @transform_2, window_bounds = array<i64: 1, 128>}]} {
    %c0_i32 = arith.constant 0 : i32
    %0 = arith.cmpi eq, %arg1, %c0_i32 : i32
    %1 = arith.extui %0 : i1 to i32
    %c0_i32_0 = arith.constant 0 : i32
    %2 = arith.cmpi ne, %1, %c0_i32_0 : i32
    scf.if %2 {
      %cst_11 = arith.constant 0.000000e+00 : f32
      %16 = vector.broadcast %cst_11 : f32 to vector<1x128xf32>
      %c0_12 = arith.constant 0 : index
      %c0_13 = arith.constant 0 : index
      %17 = vector.load %arg3[%c0_12, %c0_13] : memref<1x128xf32, #tpu.memory_space<vmem>>, vector<1x128xf32>
      tpu.vector_store %arg3[%c0_12, %c0_13], %16 {strides = array<i32>} : memref<1x128xf32, #tpu.memory_space<vmem>>, vector<1x128xf32>,
      %cst_14 = arith.constant 0.000000e+00 : f32
      %18 = vector.broadcast %cst_14 : f32 to vector<1x128xf32>
      %c0_15 = arith.constant 0 : index
      %c0_16 = arith.constant 0 : index
      %19 = vector.load %arg4[%c0_15, %c0_16] : memref<1x128xf32, #tpu.memory_space<vmem>>, vector<1x128xf32>
      tpu.vector_store %arg4[%c0_15, %c0_16], %18 {strides = array<i32>} : memref<1x128xf32, #tpu.memory_space<vmem>>, vector<1x128xf32>,
    } else {
    }
    %c0 = arith.constant 0 : index
    %c0_1 = arith.constant 0 : index
    %3 = vector.load %arg2[%c0, %c0_1] : memref<128x128xbf16, #tpu.memory_space<vmem>>, vector<128x128xbf16>
    %4 = arith.extf %3 : vector<128x128xbf16> to vector<128x128xf32>
    %c0_2 = arith.constant 0 : index
    %c0_3 = arith.constant 0 : index
    %5 = vector.load %arg3[%c0_2, %c0_3] : memref<1x128xf32, #tpu.memory_space<vmem>>, vector<1x128xf32>
    %cst = arith.constant dense<0.000000e+00> : vector<128xf32>
    %6 = vector.multi_reduction <add>, %4, %cst [0] : vector<128x128xf32> to vector<128xf32>
    %7 = vector.shape_cast %6 : vector<128xf32> to vector<1x128xf32>
    %8 = arith.addf %5, %7 : vector<1x128xf32>
    %c0_4 = arith.constant 0 : index
    %c0_5 = arith.constant 0 : index
    %9 = vector.load %arg3[%c0_4, %c0_5] : memref<1x128xf32, #tpu.memory_space<vmem>>, vector<1x128xf32>
    tpu.vector_store %arg3[%c0_4, %c0_5], %8 {strides = array<i32>} : memref<1x128xf32, #tpu.memory_space<vmem>>, vector<1x128xf32>,
    %c0_6 = arith.constant 0 : index
    %c0_7 = arith.constant 0 : index
    %10 = vector.load %arg4[%c0_6, %c0_7] : memref<1x128xf32, #tpu.memory_space<vmem>>, vector<1x128xf32>
    %11 = arith.mulf %4, %4 : vector<128x128xf32>
    %cst_8 = arith.constant dense<0.000000e+00> : vector<128xf32>
    %12 = vector.multi_reduction <add>, %11, %cst_8 [0] : vector<128x128xf32> to vector<128xf32>
    %13 = vector.shape_cast %12 : vector<128xf32> to vector<1x128xf32>
    %14 = arith.addf %10, %13 : vector<1x128xf32>
    %c0_9 = arith.constant 0 : index
    %c0_10 = arith.constant 0 : index
    %15 = vector.load %arg4[%c0_9, %c0_10] : memref<1x128xf32, #tpu.memory_space<vmem>>, vector<1x128xf32>
    tpu.vector_store %arg4[%c0_9, %c0_10], %14 {strides = array<i32>} : memref<1x128xf32, #tpu.memory_space<vmem>>, vector<1x128xf32>,
    return
  }
  func.func @transform_0(%arg0: i32, %arg1: i32) -> (i32, i32) {
    %c0_i32 = arith.constant 0 : i32
    return %arg1, %arg0 : i32, i32
  }
  func.func @transform_1(%arg0: i32, %arg1: i32) -> (i32, i32) {
    %c0_i32 = arith.constant 0 : i32
    %c0_i32_0 = arith.constant 0 : i32
    return %c0_i32, %arg0 : i32, i32
  }
  func.func @transform_2(%arg0: i32, %arg1: i32) -> (i32, i32) {
    %c0_i32 = arith.constant 0 : i32
    %c0_i32_0 = arith.constant 0 : i32
    return %c0_i32, %arg0 : i32, i32
  }
}

module attributes {stable_mosaic.version = 11 : i64} {
  func.func @_affine_lrelu_kernel(%arg0: i32, %arg1: i32, %arg2: memref<128x128xbf16, #tpu.memory_space<vmem>>, %arg3: memref<1x128xf32, #tpu.memory_space<vmem>>, %arg4: memref<1x128xf32, #tpu.memory_space<vmem>>, %arg5: memref<128x128xbf16, #tpu.memory_space<vmem>>) attributes {dimension_semantics = [#tpu.dimension_semantics<parallel>, #tpu.dimension_semantics<parallel>], iteration_bounds = array<i64: 1, 1>, scalar_prefetch = 0 : i64, scratch_operands = 0 : i64, tpu.core_type = #tpu.core_type<tc>, window_params = [{transform_indices = @transform_0, window_bounds = array<i64: 128, 128>}, {transform_indices = @transform_1, window_bounds = array<i64: 1, 128>}, {transform_indices = @transform_2, window_bounds = array<i64: 1, 128>}, {transform_indices = @transform_3, window_bounds = array<i64: 128, 128>}]} {
    %c0 = arith.constant 0 : index
    %c0_0 = arith.constant 0 : index
    %0 = vector.load %arg2[%c0, %c0_0] : memref<128x128xbf16, #tpu.memory_space<vmem>>, vector<128x128xbf16>
    %1 = arith.extf %0 : vector<128x128xbf16> to vector<128x128xf32>
    %c0_1 = arith.constant 0 : index
    %c0_2 = arith.constant 0 : index
    %2 = vector.load %arg3[%c0_1, %c0_2] : memref<1x128xf32, #tpu.memory_space<vmem>>, vector<1x128xf32>
    %3 = vector.broadcast %2 : vector<1x128xf32> to vector<128x128xf32>
    %4 = arith.mulf %1, %3 : vector<128x128xf32>
    %c0_3 = arith.constant 0 : index
    %c0_4 = arith.constant 0 : index
    %5 = vector.load %arg4[%c0_3, %c0_4] : memref<1x128xf32, #tpu.memory_space<vmem>>, vector<1x128xf32>
    %6 = vector.broadcast %5 : vector<1x128xf32> to vector<128x128xf32>
    %7 = arith.addf %4, %6 : vector<128x128xf32>
    %cst = arith.constant 0.000000e+00 : f32
    %8 = vector.broadcast %cst : f32 to vector<128x128xf32>
    %9 = arith.cmpf ogt, %7, %8 : vector<128x128xf32>
    %cst_5 = arith.constant 2.000000e-01 : f32
    %10 = vector.broadcast %cst_5 : f32 to vector<128x128xf32>
    %11 = arith.mulf %10, %7 : vector<128x128xf32>
    %12 = arith.select %9, %7, %11 : vector<128x128xi1>, vector<128x128xf32>
    %13 = arith.truncf %12 : vector<128x128xf32> to vector<128x128xbf16>
    %c0_6 = arith.constant 0 : index
    %c0_7 = arith.constant 0 : index
    %14 = vector.load %arg5[%c0_6, %c0_7] : memref<128x128xbf16, #tpu.memory_space<vmem>>, vector<128x128xbf16>
    tpu.vector_store %arg5[%c0_6, %c0_7], %13 {strides = array<i32>} : memref<128x128xbf16, #tpu.memory_space<vmem>>, vector<128x128xbf16>,
    return
  }
  func.func @transform_0(%arg0: i32, %arg1: i32) -> (i32, i32) {
    %c0_i32 = arith.constant 0 : i32
    return %arg0, %arg1 : i32, i32
  }
  func.func @transform_1(%arg0: i32, %arg1: i32) -> (i32, i32) {
    %c0_i32 = arith.constant 0 : i32
    %c0_i32_0 = arith.constant 0 : i32
    return %c0_i32, %arg1 : i32, i32
  }
  func.func @transform_2(%arg0: i32, %arg1: i32) -> (i32, i32) {
    %c0_i32 = arith.constant 0 : i32
    %c0_i32_0 = arith.constant 0 : i32
    return %c0_i32, %arg1 : i32, i32
  }
  func.func @transform_3(%arg0: i32, %arg1: i32) -> (i32, i32) {
    %c0_i32 = arith.constant 0 : i32
    return %arg0, %arg1 : i32, i32
  }
}

module attributes {stable_mosaic.version = 11 : i64} {
  func.func @_matmul_wholek_kernel(%arg0: i32, %arg1: i32, %arg2: memref<32x2048xbf16, #tpu.memory_space<vmem>>, %arg3: memref<2048x128xbf16, #tpu.memory_space<vmem>>, %arg4: memref<32x128xbf16, #tpu.memory_space<vmem>>) attributes {dimension_semantics = [#tpu.dimension_semantics<parallel>, #tpu.dimension_semantics<parallel>], iteration_bounds = array<i64: 1, 2>, scalar_prefetch = 0 : i64, scratch_operands = 0 : i64, tpu.core_type = #tpu.core_type<tc>, window_params = [{transform_indices = @transform_0, window_bounds = array<i64: 32, 2048>}, {transform_indices = @transform_1, window_bounds = array<i64: 2048, 128>}, {transform_indices = @transform_2, window_bounds = array<i64: 32, 128>}]} {
    %c0 = arith.constant 0 : index
    %c0_0 = arith.constant 0 : index
    %0 = vector.load %arg2[%c0, %c0_0] : memref<32x2048xbf16, #tpu.memory_space<vmem>>, vector<32x2048xbf16>
    %c0_1 = arith.constant 0 : index
    %c0_2 = arith.constant 0 : index
    %1 = vector.load %arg3[%c0_1, %c0_2] : memref<2048x128xbf16, #tpu.memory_space<vmem>>, vector<2048x128xbf16>
    %cst = arith.constant dense<0.000000e+00> : vector<32x128xf32>
    %2 = tpu.matmul %0, %1, %cst {dimension_numbers = #tpu.dot_dimension_numbers<[1], [0], [0], [1], [0, 0, 1, 1], [], []>} : vector<32x2048xbf16>, vector<2048x128xbf16>, vector<32x128xf32> -> vector<32x128xf32>
    %3 = arith.truncf %2 : vector<32x128xf32> to vector<32x128xbf16>
    %c0_3 = arith.constant 0 : index
    %c0_4 = arith.constant 0 : index
    %4 = vector.load %arg4[%c0_3, %c0_4] : memref<32x128xbf16, #tpu.memory_space<vmem>>, vector<32x128xbf16>
    tpu.vector_store %arg4[%c0_3, %c0_4], %3 {strides = array<i32>} : memref<32x128xbf16, #tpu.memory_space<vmem>>, vector<32x128xbf16>,
    return
  }
  func.func @transform_0(%arg0: i32, %arg1: i32) -> (i32, i32) {
    %c0_i32 = arith.constant 0 : i32
    %c0_i32_0 = arith.constant 0 : i32
    return %arg0, %c0_i32 : i32, i32
  }
  func.func @transform_1(%arg0: i32, %arg1: i32) -> (i32, i32) {
    %c0_i32 = arith.constant 0 : i32
    %c0_i32_0 = arith.constant 0 : i32
    return %c0_i32, %arg1 : i32, i32
  }
  func.func @transform_2(%arg0: i32, %arg1: i32) -> (i32, i32) {
    %c0_i32 = arith.constant 0 : i32
    return %arg0, %arg1 : i32, i32
  }
}

module attributes {stable_mosaic.version = 11 : i64} {
  func.func @_bn_stats_kernel(%arg0: i32, %arg1: i32, %arg2: memref<32x128xbf16, #tpu.memory_space<vmem>>, %arg3: memref<1x128xf32, #tpu.memory_space<vmem>>, %arg4: memref<1x128xf32, #tpu.memory_space<vmem>>) attributes {dimension_semantics = [#tpu.dimension_semantics<parallel>, #tpu.dimension_semantics<arbitrary>], iteration_bounds = array<i64: 2, 1>, scalar_prefetch = 0 : i64, scratch_operands = 0 : i64, tpu.core_type = #tpu.core_type<tc>, window_params = [{transform_indices = @transform_0, window_bounds = array<i64: 32, 128>}, {transform_indices = @transform_1, window_bounds = array<i64: 1, 128>}, {transform_indices = @transform_2, window_bounds = array<i64: 1, 128>}]} {
    %c0_i32 = arith.constant 0 : i32
    %0 = arith.cmpi eq, %arg1, %c0_i32 : i32
    %1 = arith.extui %0 : i1 to i32
    %c0_i32_0 = arith.constant 0 : i32
    %2 = arith.cmpi ne, %1, %c0_i32_0 : i32
    scf.if %2 {
      %cst_11 = arith.constant 0.000000e+00 : f32
      %16 = vector.broadcast %cst_11 : f32 to vector<1x128xf32>
      %c0_12 = arith.constant 0 : index
      %c0_13 = arith.constant 0 : index
      %17 = vector.load %arg3[%c0_12, %c0_13] : memref<1x128xf32, #tpu.memory_space<vmem>>, vector<1x128xf32>
      tpu.vector_store %arg3[%c0_12, %c0_13], %16 {strides = array<i32>} : memref<1x128xf32, #tpu.memory_space<vmem>>, vector<1x128xf32>,
      %cst_14 = arith.constant 0.000000e+00 : f32
      %18 = vector.broadcast %cst_14 : f32 to vector<1x128xf32>
      %c0_15 = arith.constant 0 : index
      %c0_16 = arith.constant 0 : index
      %19 = vector.load %arg4[%c0_15, %c0_16] : memref<1x128xf32, #tpu.memory_space<vmem>>, vector<1x128xf32>
      tpu.vector_store %arg4[%c0_15, %c0_16], %18 {strides = array<i32>} : memref<1x128xf32, #tpu.memory_space<vmem>>, vector<1x128xf32>,
    } else {
    }
    %c0 = arith.constant 0 : index
    %c0_1 = arith.constant 0 : index
    %3 = vector.load %arg2[%c0, %c0_1] : memref<32x128xbf16, #tpu.memory_space<vmem>>, vector<32x128xbf16>
    %4 = arith.extf %3 : vector<32x128xbf16> to vector<32x128xf32>
    %c0_2 = arith.constant 0 : index
    %c0_3 = arith.constant 0 : index
    %5 = vector.load %arg3[%c0_2, %c0_3] : memref<1x128xf32, #tpu.memory_space<vmem>>, vector<1x128xf32>
    %cst = arith.constant dense<0.000000e+00> : vector<128xf32>
    %6 = vector.multi_reduction <add>, %4, %cst [0] : vector<32x128xf32> to vector<128xf32>
    %7 = vector.shape_cast %6 : vector<128xf32> to vector<1x128xf32>
    %8 = arith.addf %5, %7 : vector<1x128xf32>
    %c0_4 = arith.constant 0 : index
    %c0_5 = arith.constant 0 : index
    %9 = vector.load %arg3[%c0_4, %c0_5] : memref<1x128xf32, #tpu.memory_space<vmem>>, vector<1x128xf32>
    tpu.vector_store %arg3[%c0_4, %c0_5], %8 {strides = array<i32>} : memref<1x128xf32, #tpu.memory_space<vmem>>, vector<1x128xf32>,
    %c0_6 = arith.constant 0 : index
    %c0_7 = arith.constant 0 : index
    %10 = vector.load %arg4[%c0_6, %c0_7] : memref<1x128xf32, #tpu.memory_space<vmem>>, vector<1x128xf32>
    %11 = arith.mulf %4, %4 : vector<32x128xf32>
    %cst_8 = arith.constant dense<0.000000e+00> : vector<128xf32>
    %12 = vector.multi_reduction <add>, %11, %cst_8 [0] : vector<32x128xf32> to vector<128xf32>
    %13 = vector.shape_cast %12 : vector<128xf32> to vector<1x128xf32>
    %14 = arith.addf %10, %13 : vector<1x128xf32>
    %c0_9 = arith.constant 0 : index
    %c0_10 = arith.constant 0 : index
    %15 = vector.load %arg4[%c0_9, %c0_10] : memref<1x128xf32, #tpu.memory_space<vmem>>, vector<1x128xf32>
    tpu.vector_store %arg4[%c0_9, %c0_10], %14 {strides = array<i32>} : memref<1x128xf32, #tpu.memory_space<vmem>>, vector<1x128xf32>,
    return
  }
  func.func @transform_0(%arg0: i32, %arg1: i32) -> (i32, i32) {
    %c0_i32 = arith.constant 0 : i32
    return %arg1, %arg0 : i32, i32
  }
  func.func @transform_1(%arg0: i32, %arg1: i32) -> (i32, i32) {
    %c0_i32 = arith.constant 0 : i32
    %c0_i32_0 = arith.constant 0 : i32
    return %c0_i32, %arg0 : i32, i32
  }
  func.func @transform_2(%arg0: i32, %arg1: i32) -> (i32, i32) {
    %c0_i32 = arith.constant 0 : i32
    %c0_i32_0 = arith.constant 0 : i32
    return %c0_i32, %arg0 : i32, i32
  }
}

module attributes {stable_mosaic.version = 11 : i64} {
  func.func @_affine_lrelu_kernel(%arg0: i32, %arg1: i32, %arg2: memref<32x128xbf16, #tpu.memory_space<vmem>>, %arg3: memref<1x128xf32, #tpu.memory_space<vmem>>, %arg4: memref<1x128xf32, #tpu.memory_space<vmem>>, %arg5: memref<32x128xbf16, #tpu.memory_space<vmem>>) attributes {dimension_semantics = [#tpu.dimension_semantics<parallel>, #tpu.dimension_semantics<parallel>], iteration_bounds = array<i64: 1, 2>, scalar_prefetch = 0 : i64, scratch_operands = 0 : i64, tpu.core_type = #tpu.core_type<tc>, window_params = [{transform_indices = @transform_0, window_bounds = array<i64: 32, 128>}, {transform_indices = @transform_1, window_bounds = array<i64: 1, 128>}, {transform_indices = @transform_2, window_bounds = array<i64: 1, 128>}, {transform_indices = @transform_3, window_bounds = array<i64: 32, 128>}]} {
    %c0 = arith.constant 0 : index
    %c0_0 = arith.constant 0 : index
    %0 = vector.load %arg2[%c0, %c0_0] : memref<32x128xbf16, #tpu.memory_space<vmem>>, vector<32x128xbf16>
    %1 = arith.extf %0 : vector<32x128xbf16> to vector<32x128xf32>
    %c0_1 = arith.constant 0 : index
    %c0_2 = arith.constant 0 : index
    %2 = vector.load %arg3[%c0_1, %c0_2] : memref<1x128xf32, #tpu.memory_space<vmem>>, vector<1x128xf32>
    %3 = vector.broadcast %2 : vector<1x128xf32> to vector<32x128xf32>
    %4 = arith.mulf %1, %3 : vector<32x128xf32>
    %c0_3 = arith.constant 0 : index
    %c0_4 = arith.constant 0 : index
    %5 = vector.load %arg4[%c0_3, %c0_4] : memref<1x128xf32, #tpu.memory_space<vmem>>, vector<1x128xf32>
    %6 = vector.broadcast %5 : vector<1x128xf32> to vector<32x128xf32>
    %7 = arith.addf %4, %6 : vector<32x128xf32>
    %cst = arith.constant 0.000000e+00 : f32
    %8 = vector.broadcast %cst : f32 to vector<32x128xf32>
    %9 = arith.cmpf ogt, %7, %8 : vector<32x128xf32>
    %cst_5 = arith.constant 2.000000e-01 : f32
    %10 = vector.broadcast %cst_5 : f32 to vector<32x128xf32>
    %11 = arith.mulf %10, %7 : vector<32x128xf32>
    %12 = arith.select %9, %7, %11 : vector<32x128xi1>, vector<32x128xf32>
    %13 = arith.truncf %12 : vector<32x128xf32> to vector<32x128xbf16>
    %c0_6 = arith.constant 0 : index
    %c0_7 = arith.constant 0 : index
    %14 = vector.load %arg5[%c0_6, %c0_7] : memref<32x128xbf16, #tpu.memory_space<vmem>>, vector<32x128xbf16>
    tpu.vector_store %arg5[%c0_6, %c0_7], %13 {strides = array<i32>} : memref<32x128xbf16, #tpu.memory_space<vmem>>, vector<32x128xbf16>,
    return
  }
  func.func @transform_0(%arg0: i32, %arg1: i32) -> (i32, i32) {
    %c0_i32 = arith.constant 0 : i32
    return %arg0, %arg1 : i32, i32
  }
  func.func @transform_1(%arg0: i32, %arg1: i32) -> (i32, i32) {
    %c0_i32 = arith.constant 0 : i32
    %c0_i32_0 = arith.constant 0 : i32
    return %c0_i32, %arg1 : i32, i32
  }
  func.func @transform_2(%arg0: i32, %arg1: i32) -> (i32, i32) {
    %c0_i32 = arith.constant 0 : i32
    %c0_i32_0 = arith.constant 0 : i32
    return %c0_i32, %arg1 : i32, i32
  }
  func.func @transform_3(%arg0: i32, %arg1: i32) -> (i32, i32) {
    %c0_i32 = arith.constant 0 : i32
    return %arg0, %arg1 : i32, i32
  }
}

module attributes {stable_mosaic.version = 11 : i64} {
  func.func @_matmul_wholek_kernel(%arg0: i32, %arg1: i32, %arg2: memref<32x4096xbf16, #tpu.memory_space<vmem>>, %arg3: memref<4096x256xbf16, #tpu.memory_space<vmem>>, %arg4: memref<32x256xbf16, #tpu.memory_space<vmem>>) attributes {dimension_semantics = [#tpu.dimension_semantics<parallel>, #tpu.dimension_semantics<parallel>], iteration_bounds = array<i64: 1, 2>, scalar_prefetch = 0 : i64, scratch_operands = 0 : i64, tpu.core_type = #tpu.core_type<tc>, window_params = [{transform_indices = @transform_0, window_bounds = array<i64: 32, 4096>}, {transform_indices = @transform_1, window_bounds = array<i64: 4096, 256>}, {transform_indices = @transform_2, window_bounds = array<i64: 32, 256>}]} {
    %c0 = arith.constant 0 : index
    %c0_0 = arith.constant 0 : index
    %0 = vector.load %arg2[%c0, %c0_0] : memref<32x4096xbf16, #tpu.memory_space<vmem>>, vector<32x4096xbf16>
    %c0_1 = arith.constant 0 : index
    %c0_2 = arith.constant 0 : index
    %1 = vector.load %arg3[%c0_1, %c0_2] : memref<4096x256xbf16, #tpu.memory_space<vmem>>, vector<4096x256xbf16>
    %cst = arith.constant dense<0.000000e+00> : vector<32x256xf32>
    %2 = tpu.matmul %0, %1, %cst {dimension_numbers = #tpu.dot_dimension_numbers<[1], [0], [0], [1], [0, 0, 1, 1], [], []>} : vector<32x4096xbf16>, vector<4096x256xbf16>, vector<32x256xf32> -> vector<32x256xf32>
    %3 = arith.truncf %2 : vector<32x256xf32> to vector<32x256xbf16>
    %c0_3 = arith.constant 0 : index
    %c0_4 = arith.constant 0 : index
    %4 = vector.load %arg4[%c0_3, %c0_4] : memref<32x256xbf16, #tpu.memory_space<vmem>>, vector<32x256xbf16>
    tpu.vector_store %arg4[%c0_3, %c0_4], %3 {strides = array<i32>} : memref<32x256xbf16, #tpu.memory_space<vmem>>, vector<32x256xbf16>,
    return
  }
  func.func @transform_0(%arg0: i32, %arg1: i32) -> (i32, i32) {
    %c0_i32 = arith.constant 0 : i32
    %c0_i32_0 = arith.constant 0 : i32
    return %arg0, %c0_i32 : i32, i32
  }
  func.func @transform_1(%arg0: i32, %arg1: i32) -> (i32, i32) {
    %c0_i32 = arith.constant 0 : i32
    %c0_i32_0 = arith.constant 0 : i32
    return %c0_i32, %arg1 : i32, i32
  }
  func.func @transform_2(%arg0: i32, %arg1: i32) -> (i32, i32) {
    %c0_i32 = arith.constant 0 : i32
    return %arg0, %arg1 : i32, i32
  }
}

module attributes {stable_mosaic.version = 11 : i64} {
  func.func @_bn_stats_kernel(%arg0: i32, %arg1: i32, %arg2: memref<32x128xbf16, #tpu.memory_space<vmem>>, %arg3: memref<1x128xf32, #tpu.memory_space<vmem>>, %arg4: memref<1x128xf32, #tpu.memory_space<vmem>>) attributes {dimension_semantics = [#tpu.dimension_semantics<parallel>, #tpu.dimension_semantics<arbitrary>], iteration_bounds = array<i64: 4, 1>, scalar_prefetch = 0 : i64, scratch_operands = 0 : i64, tpu.core_type = #tpu.core_type<tc>, window_params = [{transform_indices = @transform_0, window_bounds = array<i64: 32, 128>}, {transform_indices = @transform_1, window_bounds = array<i64: 1, 128>}, {transform_indices = @transform_2, window_bounds = array<i64: 1, 128>}]} {
    %c0_i32 = arith.constant 0 : i32
    %0 = arith.cmpi eq, %arg1, %c0_i32 : i32
    %1 = arith.extui %0 : i1 to i32
    %c0_i32_0 = arith.constant 0 : i32
    %2 = arith.cmpi ne, %1, %c0_i32_0 : i32
    scf.if %2 {
      %cst_11 = arith.constant 0.000000e+00 : f32
      %16 = vector.broadcast %cst_11 : f32 to vector<1x128xf32>
      %c0_12 = arith.constant 0 : index
      %c0_13 = arith.constant 0 : index
      %17 = vector.load %arg3[%c0_12, %c0_13] : memref<1x128xf32, #tpu.memory_space<vmem>>, vector<1x128xf32>
      tpu.vector_store %arg3[%c0_12, %c0_13], %16 {strides = array<i32>} : memref<1x128xf32, #tpu.memory_space<vmem>>, vector<1x128xf32>,
      %cst_14 = arith.constant 0.000000e+00 : f32
      %18 = vector.broadcast %cst_14 : f32 to vector<1x128xf32>
      %c0_15 = arith.constant 0 : index
      %c0_16 = arith.constant 0 : index
      %19 = vector.load %arg4[%c0_15, %c0_16] : memref<1x128xf32, #tpu.memory_space<vmem>>, vector<1x128xf32>
      tpu.vector_store %arg4[%c0_15, %c0_16], %18 {strides = array<i32>} : memref<1x128xf32, #tpu.memory_space<vmem>>, vector<1x128xf32>,
    } else {
    }
    %c0 = arith.constant 0 : index
    %c0_1 = arith.constant 0 : index
    %3 = vector.load %arg2[%c0, %c0_1] : memref<32x128xbf16, #tpu.memory_space<vmem>>, vector<32x128xbf16>
    %4 = arith.extf %3 : vector<32x128xbf16> to vector<32x128xf32>
    %c0_2 = arith.constant 0 : index
    %c0_3 = arith.constant 0 : index
    %5 = vector.load %arg3[%c0_2, %c0_3] : memref<1x128xf32, #tpu.memory_space<vmem>>, vector<1x128xf32>
    %cst = arith.constant dense<0.000000e+00> : vector<128xf32>
    %6 = vector.multi_reduction <add>, %4, %cst [0] : vector<32x128xf32> to vector<128xf32>
    %7 = vector.shape_cast %6 : vector<128xf32> to vector<1x128xf32>
    %8 = arith.addf %5, %7 : vector<1x128xf32>
    %c0_4 = arith.constant 0 : index
    %c0_5 = arith.constant 0 : index
    %9 = vector.load %arg3[%c0_4, %c0_5] : memref<1x128xf32, #tpu.memory_space<vmem>>, vector<1x128xf32>
    tpu.vector_store %arg3[%c0_4, %c0_5], %8 {strides = array<i32>} : memref<1x128xf32, #tpu.memory_space<vmem>>, vector<1x128xf32>,
    %c0_6 = arith.constant 0 : index
    %c0_7 = arith.constant 0 : index
    %10 = vector.load %arg4[%c0_6, %c0_7] : memref<1x128xf32, #tpu.memory_space<vmem>>, vector<1x128xf32>
    %11 = arith.mulf %4, %4 : vector<32x128xf32>
    %cst_8 = arith.constant dense<0.000000e+00> : vector<128xf32>
    %12 = vector.multi_reduction <add>, %11, %cst_8 [0] : vector<32x128xf32> to vector<128xf32>
    %13 = vector.shape_cast %12 : vector<128xf32> to vector<1x128xf32>
    %14 = arith.addf %10, %13 : vector<1x128xf32>
    %c0_9 = arith.constant 0 : index
    %c0_10 = arith.constant 0 : index
    %15 = vector.load %arg4[%c0_9, %c0_10] : memref<1x128xf32, #tpu.memory_space<vmem>>, vector<1x128xf32>
    tpu.vector_store %arg4[%c0_9, %c0_10], %14 {strides = array<i32>} : memref<1x128xf32, #tpu.memory_space<vmem>>, vector<1x128xf32>,
    return
  }
  func.func @transform_0(%arg0: i32, %arg1: i32) -> (i32, i32) {
    %c0_i32 = arith.constant 0 : i32
    return %arg1, %arg0 : i32, i32
  }
  func.func @transform_1(%arg0: i32, %arg1: i32) -> (i32, i32) {
    %c0_i32 = arith.constant 0 : i32
    %c0_i32_0 = arith.constant 0 : i32
    return %c0_i32, %arg0 : i32, i32
  }
  func.func @transform_2(%arg0: i32, %arg1: i32) -> (i32, i32) {
    %c0_i32 = arith.constant 0 : i32
    %c0_i32_0 = arith.constant 0 : i32
    return %c0_i32, %arg0 : i32, i32
  }
}

module attributes {stable_mosaic.version = 11 : i64} {
  func.func @_affine_lrelu_kernel(%arg0: i32, %arg1: i32, %arg2: memref<32x128xbf16, #tpu.memory_space<vmem>>, %arg3: memref<1x128xf32, #tpu.memory_space<vmem>>, %arg4: memref<1x128xf32, #tpu.memory_space<vmem>>, %arg5: memref<32x128xbf16, #tpu.memory_space<vmem>>) attributes {dimension_semantics = [#tpu.dimension_semantics<parallel>, #tpu.dimension_semantics<parallel>], iteration_bounds = array<i64: 1, 4>, scalar_prefetch = 0 : i64, scratch_operands = 0 : i64, tpu.core_type = #tpu.core_type<tc>, window_params = [{transform_indices = @transform_0, window_bounds = array<i64: 32, 128>}, {transform_indices = @transform_1, window_bounds = array<i64: 1, 128>}, {transform_indices = @transform_2, window_bounds = array<i64: 1, 128>}, {transform_indices = @transform_3, window_bounds = array<i64: 32, 128>}]} {
    %c0 = arith.constant 0 : index
    %c0_0 = arith.constant 0 : index
    %0 = vector.load %arg2[%c0, %c0_0] : memref<32x128xbf16, #tpu.memory_space<vmem>>, vector<32x128xbf16>
    %1 = arith.extf %0 : vector<32x128xbf16> to vector<32x128xf32>
    %c0_1 = arith.constant 0 : index
    %c0_2 = arith.constant 0 : index
    %2 = vector.load %arg3[%c0_1, %c0_2] : memref<1x128xf32, #tpu.memory_space<vmem>>, vector<1x128xf32>
    %3 = vector.broadcast %2 : vector<1x128xf32> to vector<32x128xf32>
    %4 = arith.mulf %1, %3 : vector<32x128xf32>
    %c0_3 = arith.constant 0 : index
    %c0_4 = arith.constant 0 : index
    %5 = vector.load %arg4[%c0_3, %c0_4] : memref<1x128xf32, #tpu.memory_space<vmem>>, vector<1x128xf32>
    %6 = vector.broadcast %5 : vector<1x128xf32> to vector<32x128xf32>
    %7 = arith.addf %4, %6 : vector<32x128xf32>
    %cst = arith.constant 0.000000e+00 : f32
    %8 = vector.broadcast %cst : f32 to vector<32x128xf32>
    %9 = arith.cmpf ogt, %7, %8 : vector<32x128xf32>
    %cst_5 = arith.constant 2.000000e-01 : f32
    %10 = vector.broadcast %cst_5 : f32 to vector<32x128xf32>
    %11 = arith.mulf %10, %7 : vector<32x128xf32>
    %12 = arith.select %9, %7, %11 : vector<32x128xi1>, vector<32x128xf32>
    %13 = arith.truncf %12 : vector<32x128xf32> to vector<32x128xbf16>
    %c0_6 = arith.constant 0 : index
    %c0_7 = arith.constant 0 : index
    %14 = vector.load %arg5[%c0_6, %c0_7] : memref<32x128xbf16, #tpu.memory_space<vmem>>, vector<32x128xbf16>
    tpu.vector_store %arg5[%c0_6, %c0_7], %13 {strides = array<i32>} : memref<32x128xbf16, #tpu.memory_space<vmem>>, vector<32x128xbf16>,
    return
  }
  func.func @transform_0(%arg0: i32, %arg1: i32) -> (i32, i32) {
    %c0_i32 = arith.constant 0 : i32
    return %arg0, %arg1 : i32, i32
  }
  func.func @transform_1(%arg0: i32, %arg1: i32) -> (i32, i32) {
    %c0_i32 = arith.constant 0 : i32
    %c0_i32_0 = arith.constant 0 : i32
    return %c0_i32, %arg1 : i32, i32
  }
  func.func @transform_2(%arg0: i32, %arg1: i32) -> (i32, i32) {
    %c0_i32 = arith.constant 0 : i32
    %c0_i32_0 = arith.constant 0 : i32
    return %c0_i32, %arg1 : i32, i32
  }
  func.func @transform_3(%arg0: i32, %arg1: i32) -> (i32, i32) {
    %c0_i32 = arith.constant 0 : i32
    return %arg0, %arg1 : i32, i32
  }
}

module attributes {stable_mosaic.version = 11 : i64} {
  func.func @_matmul_wholek_kernel(%arg0: i32, %arg1: i32, %arg2: memref<16x8192xbf16, #tpu.memory_space<vmem>>, %arg3: memref<8192x128xbf16, #tpu.memory_space<vmem>>, %arg4: memref<16x128xf32, #tpu.memory_space<vmem>>) attributes {dimension_semantics = [#tpu.dimension_semantics<parallel>, #tpu.dimension_semantics<parallel>], iteration_bounds = array<i64: 1, 1>, scalar_prefetch = 0 : i64, scratch_operands = 0 : i64, tpu.core_type = #tpu.core_type<tc>, window_params = [{transform_indices = @transform_0, window_bounds = array<i64: 16, 8192>}, {transform_indices = @transform_1, window_bounds = array<i64: 8192, 128>}, {transform_indices = @transform_2, window_bounds = array<i64: 16, 128>}]} {
    %c0 = arith.constant 0 : index
    %c0_0 = arith.constant 0 : index
    %0 = vector.load %arg2[%c0, %c0_0] : memref<16x8192xbf16, #tpu.memory_space<vmem>>, vector<16x8192xbf16>
    %c0_1 = arith.constant 0 : index
    %c0_2 = arith.constant 0 : index
    %1 = vector.load %arg3[%c0_1, %c0_2] : memref<8192x128xbf16, #tpu.memory_space<vmem>>, vector<8192x128xbf16>
    %cst = arith.constant dense<0.000000e+00> : vector<16x128xf32>
    %2 = tpu.matmul %0, %1, %cst {dimension_numbers = #tpu.dot_dimension_numbers<[1], [0], [0], [1], [0, 0, 1, 1], [], []>} : vector<16x8192xbf16>, vector<8192x128xbf16>, vector<16x128xf32> -> vector<16x128xf32>
    %3 = arith.negf %2 : vector<16x128xf32>
    %4 = math.exp %3 : vector<16x128xf32>
    %cst_3 = arith.constant 1.000000e+00 : f32
    %5 = vector.broadcast %cst_3 : f32 to vector<16x128xf32>
    %6 = arith.addf %5, %4 : vector<16x128xf32>
    %7 = arith.divf %5, %6 : vector<16x128xf32>
    %c0_4 = arith.constant 0 : index
    %c0_5 = arith.constant 0 : index
    %8 = vector.load %arg4[%c0_4, %c0_5] : memref<16x128xf32, #tpu.memory_space<vmem>>, vector<16x128xf32>
    tpu.vector_store %arg4[%c0_4, %c0_5], %7 {strides = array<i32>} : memref<16x128xf32, #tpu.memory_space<vmem>>, vector<16x128xf32>,
    return
  }
  func.func @transform_0(%arg0: i32, %arg1: i32) -> (i32, i32) {
    %c0_i32 = arith.constant 0 : i32
    %c0_i32_0 = arith.constant 0 : i32
    return %arg0, %c0_i32 : i32, i32
  }
  func.func @transform_1(%arg0: i32, %arg1: i32) -> (i32, i32) {
    %c0_i32 = arith.constant 0 : i32
    %c0_i32_0 = arith.constant 0 : i32
    return %c0_i32, %arg1 : i32, i32
  }
  func.func @transform_2(%arg0: i32, %arg1: i32) -> (i32, i32) {
    %c0_i32 = arith.constant 0 : i32
    return %arg0, %arg1 : i32, i32
  }
}

</mosaic_0001>

<bundles_post_ra>
// kernel: d2_forward.11
= control target key start
LH: loop header
LB: loop body
LE: loop exit
PB: predicated region body
PF: predicated region fallthrough
CT: control target
= control target key end

     0   :  { %s1254_s9 = smov 0   ;;  %s1256_s10 = smov 0   ;;  %s1359_s0 = inlined_call_operand.vmem [shape: bf16[512,128], index: 0, kind: input, shape index: {}]   ;;  %s1360_s1 = inlined_call_operand.vmem [shape: bf16[128,128], index: 1, kind: input, shape index: {}]   ;;  %s1361_s2 = inlined_call_operand.vmem [shape: bf16[512,128], index: 2, kind: output, shape index: {}]  }
   0x1   :  { %s1258_s11 = smov 0  }
   0x2 LB: > { %s24_s12 = sadd.s32 1, %s1233_s10  ;;  %p889_p0 = scmp.ge.s32.totalorder %s1237_s11, 1  ;;  %s1237_s11 = sphi %s1258_s11, %s12_s11   ;;  %s1233_s10 = sphi %s1256_s10, %s1363_s10   ;;  %s1229_s9 = sphi %s1254_s9, %s1362_s9  }
   0x3   : > { %p26_p1 = scmp.ge.s32.totalorder %s24_s12, 2  ;;  %p136_p2 = scmp.lt.s32.totalorder %s1237_s11, 3 }
   0x5   : > { %s1365_s12 = smov (%p26_p1, %s24_s12), 0  ;;  %p137_p3 = pnand %p889_p0, %p136_p2 }
   0x6   : > { %s890_s15 = sshll.u32 (!%p137_p3), %s1229_s9, 5 }
   0x7   : > { %140 = sbr.rel (%p137_p3) target bundleno = 275 (0x113), region = 28  ;;  %p166_p4 = scmp.lt.s32.totalorder (!%p137_p3), %s890_s15, 63 }
   0xc   : > { %v1191_v0 = vld [vmem:[%s1360_s1 + $0x38] sm:$0xff]   ;;  %v1192_v1 = vld [vmem:[%s1360_s1 + $0x30] sm:$0xff]   ;;  %s1367_s15 = smov (!%p166_p4, %s890_s15), 63  ;;  %v1193_v2 = vld [vmem:[%s1360_s1 + $0x28] sm:$0xff]  }
   0xd   : > { %1103 = vmatprep.subr.bf16.mxu0 %v1191_v0  ;;  %1151 = vmatprep.subr.bf16.mxu1 %v1191_v0  ;;  %s891_s20 = sshll.u32 %s1367_s15, 2  ;;  %v1194_v3 = vld [vmem:[%s1360_s1 + $0x20] sm:$0xff]   ;;  %v1195_v6 = vld [vmem:[%s1360_s1 + $0x18] sm:$0xff]   ;;  %v1196_v7 = vld [vmem:[%s1360_s1 + $0x10] sm:$0xff]  }
   0xe   : > { %1104 = vmatpush3.bf16.msra.mxu0 %v1191_v0  ;;  %1159 = vmatpush3.bf16.msra.mxu1 %v1191_v0  ;;  %s1289_s23 = scalar_lea.vmem %s1359_s0, %s891_s20  ;;  %v1197_v8 = vld [vmem:[%s1360_s1 + $0x8] sm:$0xff]   ;;  %v1198_v9 = vld [vmem:[%s1360_s1] sm:$0xff]   ;;  %s1327_s8 = scalar_lea.vmem %s1361_s2, %s891_s20 }
   0xf   : > { %1105 = vmatprep.subr.bf16.mxu0 %v1192_v1  ;;  %1152 = vmatprep.subr.bf16.mxu1 %v1192_v1  ;;  %v1199_v4 = vld [vmem:[%s1289_s23] sm:$0xff]   ;;  %v1201_v10 = vld [vmem:[%s1289_s23 + $0x8] sm:$0xff]   ;;  %v1203_v12 = vld [vmem:[%s1289_s23 + $0x10] sm:$0xff]  }
  0x10   : > { %v1200_v5 = vld [vmem:[%s1289_s23 + $0x40] sm:$0xff]   ;;  %1119 = vmatprep.mubr.bf16.mxu0 %v1199_v4  ;;  %v1202_v11 = vld [vmem:[%s1289_s23 + $0x48] sm:$0xff]   ;;  %v1204_v13 = vld [vmem:[%s1289_s23 + $0x50] sm:$0xff]  }
  0x11   : > { %1135 = vmatprep.mubr.bf16.mxu1 %v1200_v5  ;;  %v1205_v14 = vld [vmem:[%s1289_s23 + $0x18] sm:$0xff]   ;;  %v1207_v16 = vld [vmem:[%s1289_s23 + $0x20] sm:$0xff]   ;;  %v1209_v18 = vld [vmem:[%s1289_s23 + $0x28] sm:$0xff]  }
  0x12   : > { %1106 = vmatpush3.bf16.msra.mxu0 %v1192_v1  ;;  %1160 = vmatpush3.bf16.msra.mxu1 %v1192_v1  ;;  %v1206_v15 = vld [vmem:[%s1289_s23 + $0x58] sm:$0xff]   ;;  %v1208_v17 = vld [vmem:[%s1289_s23 + $0x60] sm:$0xff]   ;;  %v1210_v19 = vld [vmem:[%s1289_s23 + $0x68] sm:$0xff]  }
  0x13   : > { %1107 = vmatprep.subr.bf16.mxu0 %v1193_v2  ;;  %1153 = vmatprep.subr.bf16.mxu1 %v1193_v2  ;;  %v1211_v20 = vld [vmem:[%s1289_s23 + $0x30] sm:$0xff]   ;;  %v1213_v22 = vld [vmem:[%s1289_s23 + $0x38] sm:$0xff]  }
  0x14   : > { %v1212_v21 = vld [vmem:[%s1289_s23 + $0x70] sm:$0xff]   ;;  %v1214_v23 = vld [vmem:[%s1289_s23 + $0x78] sm:$0xff]  }
  0x16   : > { %1108 = vmatpush3.bf16.msra.mxu0 %v1193_v2  ;;  %1161 = vmatpush3.bf16.msra.mxu1 %v1193_v2 }
  0x17   : > { %1109 = vmatprep.subr.bf16.mxu0 %v1194_v3  ;;  %1154 = vmatprep.subr.bf16.mxu1 %v1194_v3 }
  0x1a   : > { %1110 = vmatpush3.bf16.msra.mxu0 %v1194_v3  ;;  %1162 = vmatpush3.bf16.msra.mxu1 %v1194_v3 }
  0x1b   : > { %1111 = vmatprep.subr.bf16.mxu0 %v1195_v6  ;;  %1155 = vmatprep.subr.bf16.mxu1 %v1195_v6 }
  0x1e   : > { %1112 = vmatpush3.bf16.msra.mxu0 %v1195_v6  ;;  %1163 = vmatpush3.bf16.msra.mxu1 %v1195_v6 }
  0x1f   : > { %1113 = vmatprep.subr.bf16.mxu0 %v1196_v7  ;;  %1156 = vmatprep.subr.bf16.mxu1 %v1196_v7 }
  0x22   : > { %1114 = vmatpush3.bf16.msra.mxu0 %v1196_v7  ;;  %1164 = vmatpush3.bf16.msra.mxu1 %v1196_v7 }
  0x23   : > { %1115 = vmatprep.subr.bf16.mxu0 %v1197_v8  ;;  %1157 = vmatprep.subr.bf16.mxu1 %v1197_v8 }
  0x26   : > { %1116 = vmatpush3.bf16.msra.mxu0 %v1197_v8  ;;  %1165 = vmatpush3.bf16.msra.mxu1 %v1197_v8 }
  0x27   : > { %1117 = vmatprep.subr.bf16.mxu0 %v1198_v9  ;;  %1158 = vmatprep.subr.bf16.mxu1 %v1198_v9 }
  0x2a   : > { %1118 = vmatpush3.bf16.msra.mxu0 %v1198_v9  ;;  %1166 = vmatpush3.bf16.msra.mxu1 %v1198_v9 }
  0x2d   : > { %1120 = vmatmul.mubr.bf16.vlgmr.msra.gmra.mxu0 %v1201_v10  ;;  %1136 = vmatmul.mubr.bf16.vlgmr.msra.gmra.mxu1 %v1202_v11 }
  0x2e   : > { %1123 = vmatprep.mubr.bf16.mxu0 %v1203_v12  ;;  %1139 = vmatprep.mubr.bf16.mxu1 %v1204_v13 }
  0x35   : > { %1124 = vmatmul.mubr.bf16.gmra.mxu0 %v1205_v14  ;;  %1140 = vmatmul.mubr.bf16.gmra.mxu1 %v1206_v15 }
  0x36   : > { %1127 = vmatprep.mubr.bf16.mxu0 %v1207_v16  ;;  %1143 = vmatprep.mubr.bf16.mxu1 %v1208_v17 }
  0x3d   : > { %1128 = vmatmul.mubr.bf16.gmra.mxu0 %v1209_v18  ;;  %1144 = vmatmul.mubr.bf16.gmra.mxu1 %v1210_v19 }
  0x3e   : > { %1131 = vmatprep.mubr.bf16.mxu0 %v1211_v20  ;;  %1147 = vmatprep.mubr.bf16.mxu1 %v1212_v21 }
  0x45   : > { %1132 = vmatmul.mubr.bf16.gmra.mxu0 %v1213_v22  ;;  %1148 = vmatmul.mubr.bf16.gmra.mxu1 %v1214_v23 }
  0xed   : > { %v1121_v24 = vpop.f32.mrf.mxu0  ;;  %v1137_v25 = vpop.f32.mrf.mxu1 }
  0xee   : > { %vm540_vm0 = vcmp.gt.f32.partialorder %v1121_v24, 0.0  ;;  %v572_v26 = vmul.f32 0.2, %v1121_v24  ;;  %v588_v27 = vmul.f32 0.2, %v1137_v25  ;;  %vm556_vm1 = vcmp.gt.f32.partialorder %v1137_v25, 0.0 }
  0xef   : > { %v411_v28 = vpop.f32.mrf.mxu0  ;;  %v475_v29 = vpop.f32.mrf.mxu1 }
  0xf0   : > { %v604_v30 = vsel %vm540_vm0, %v1121_v24, %v572_v26  ;;  %v570_v31 = vmul.f32 0.2, %v411_v28  ;;  %vm538_vm2 = vcmp.gt.f32.partialorder %v411_v28, 0.0  ;;  %v620_v35 = vsel %vm556_vm1, %v1137_v25, %v588_v27 }
  0xf1   : > { %v1122_v32 = vpop.f32.mrf.mxu0  ;;  %v1138_v33 = vpop.f32.mrf.mxu1  ;;  %vm554_vm5 = vcmp.gt.f32.partialorder %v475_v29, 0.0  ;;  %v586_v36 = vmul.f32 0.2, %v475_v29 }
  0xf2   : > { %vm541_vm3 = vcmp.gt.f32.partialorder %v1122_v32, 0.0  ;;  %v573_v34 = vmul.f32 0.2, %v1122_v32  ;;  %vm557_vm4 = vcmp.gt.f32.partialorder %v1138_v33, 0.0  ;;  %v589_v37 = vmul.f32 0.2, %v1138_v33 }
  0xf3   : > { %v414_v38 = vpop.f32.mrf.mxu0  ;;  %v478_v39 = vpop.f32.mrf.mxu1  ;;  %v602_v42 = vsel %vm538_vm2, %v411_v28, %v570_v31  ;;  %v618_v51 = vsel %vm554_vm5, %v475_v29, %v586_v36 }
  0xf4   : > { %v605_v40 = vsel %vm541_vm3, %v1122_v32, %v573_v34  ;;  %vm539_vm6 = vcmp.gt.f32.partialorder %v414_v38, 0.0  ;;  %v571_v41 = vmul.f32 0.2, %v414_v38  ;;  %vm555_vm7 = vcmp.gt.f32.partialorder %v478_v39, 0.0 }
  0xf5   : > { %v992_v43 = vpack.c.bf16 %v605_v40, %v604_v30  ;;  %v621_v44 = vsel %vm557_vm4, %v1138_v33, %v589_v37  ;;  %v587_v45 = vmul.f32 0.2, %v478_v39  ;;  %v1125_v46 = vpop.f32.mrf.mxu0  ;;  %v1141_v47 = vpop.f32.mrf.mxu1 }
  0xf6   : > { %v1032_v48 = vpack.c.bf16 %v621_v44, %v620_v35  ;;  %v603_v49 = vsel %vm539_vm6, %v414_v38, %v571_v41  ;;  %vm544_vm8 = vcmp.gt.f32.partialorder %v1125_v46, 0.0  ;;  %v576_v50 = vmul.f32 0.2, %v1125_v46 }
  0xf7   : > { %1064 = vst [vmem:[%s1327_s8 + $0x8] sm:$0xff] %v992_v43   ;;  %v987_v52 = vpack.c.bf16 %v603_v49, %v602_v42  ;;  %v619_v53 = vsel %vm555_vm7, %v478_v39, %v587_v45  ;;  %v592_v54 = vmul.f32 0.2, %v1141_v47  ;;  %v427_v55 = vpop.f32.mrf.mxu0  ;;  %v491_v56 = vpop.f32.mrf.mxu1  ;;  %vm560_vm9 = vcmp.gt.f32.partialorder %v1141_v47, 0.0 }
  0xf8   : > { %1072 = vst [vmem:[%s1327_s8 + $0x48] sm:$0xff] %v1032_v48   ;;  %v1027_v57 = vpack.c.bf16 %v619_v53, %v618_v51  ;;  %v608_v58 = vsel %vm544_vm8, %v1125_v46, %v576_v50  ;;  %v574_v59 = vmul.f32 0.2, %v427_v55  ;;  %vm542_vm10 = vcmp.gt.f32.partialorder %v427_v55, 0.0 }
  0xf9   : > { %988 = vst [vmem:[%s1327_s8] sm:$0xff] %v987_v52   ;;  %v1126_v60 = vpop.f32.mrf.mxu0  ;;  %v1142_v61 = vpop.f32.mrf.mxu1  ;;  %v624_v63 = vsel %vm560_vm9, %v1141_v47, %v592_v54  ;;  %vm558_vm13 = vcmp.gt.f32.partialorder %v491_v56, 0.0  ;;  %v590_v0 = vmul.f32 0.2, %v491_v56 }
  0xfa   : > { %1071 = vst [vmem:[%s1327_s8 + $0x40] sm:$0xff] %v1027_v57   ;;  %vm545_vm11 = vcmp.gt.f32.partialorder %v1126_v60, 0.0  ;;  %v577_v62 = vmul.f32 0.2, %v1126_v60  ;;  %vm561_vm12 = vcmp.gt.f32.partialorder %v1142_v61, 0.0  ;;  %v606_v6 = vsel %vm542_vm10, %v427_v55, %v574_v59 }
  0xfb   : > { %v593_v1 = vmul.f32 0.2, %v1142_v61  ;;  %v430_v2 = vpop.f32.mrf.mxu0  ;;  %v494_v3 = vpop.f32.mrf.mxu1  ;;  %v622_v15 = vsel %vm558_vm13, %v491_v56, %v590_v0 }
  0xfc   : > { %v609_v4 = vsel %vm545_vm11, %v1126_v60, %v577_v62  ;;  %vm543_vm14 = vcmp.gt.f32.partialorder %v430_v2, 0.0  ;;  %v575_v5 = vmul.f32 0.2, %v430_v2  ;;  %vm559_vm15 = vcmp.gt.f32.partialorder %v494_v3, 0.0 }
  0xfd   : > { %v1002_v7 = vpack.c.bf16 %v609_v4, %v608_v58  ;;  %v625_v8 = vsel %vm561_vm12, %v1142_v61, %v593_v1  ;;  %v591_v9 = vmul.f32 0.2, %v494_v3  ;;  %v1129_v10 = vpop.f32.mrf.mxu0  ;;  %v1145_v11 = vpop.f32.mrf.mxu1 }
  0xfe   : > { %v1042_v12 = vpack.c.bf16 %v625_v8, %v624_v63  ;;  %v607_v13 = vsel %vm543_vm14, %v430_v2, %v575_v5  ;;  %vm548_vm0 = vcmp.gt.f32.partialorder %v1129_v10, 0.0  ;;  %v580_v14 = vmul.f32 0.2, %v1129_v10 }
  0xff   : > { %1066 = vst [vmem:[%s1327_s8 + $0x18] sm:$0xff] %v1002_v7   ;;  %v997_v16 = vpack.c.bf16 %v607_v13, %v606_v6  ;;  %v623_v17 = vsel %vm559_vm15, %v494_v3, %v591_v9  ;;  %v596_v18 = vmul.f32 0.2, %v1145_v11  ;;  %v443_v19 = vpop.f32.mrf.mxu0  ;;  %v507_v20 = vpop.f32.mrf.mxu1  ;;  %vm564_vm1 = vcmp.gt.f32.partialorder %v1145_v11, 0.0 }
 0x100   : > { %1074 = vst [vmem:[%s1327_s8 + $0x58] sm:$0xff] %v1042_v12   ;;  %v1037_v21 = vpack.c.bf16 %v623_v17, %v622_v15  ;;  %v612_v22 = vsel %vm548_vm0, %v1129_v10, %v580_v14  ;;  %v578_v23 = vmul.f32 0.2, %v443_v19  ;;  %vm546_vm2 = vcmp.gt.f32.partialorder %v443_v19, 0.0 }
 0x101   : > { %1065 = vst [vmem:[%s1327_s8 + $0x10] sm:$0xff] %v997_v16   ;;  %v1130_v24 = vpop.f32.mrf.mxu0  ;;  %v1146_v25 = vpop.f32.mrf.mxu1  ;;  %v628_v27 = vsel %vm564_vm1, %v1145_v11, %v596_v18  ;;  %vm562_vm5 = vcmp.gt.f32.partialorder %v507_v20, 0.0  ;;  %v594_v28 = vmul.f32 0.2, %v507_v20 }
 0x102   : > { %1073 = vst [vmem:[%s1327_s8 + $0x50] sm:$0xff] %v1037_v21   ;;  %vm549_vm3 = vcmp.gt.f32.partialorder %v1130_v24, 0.0  ;;  %v581_v26 = vmul.f32 0.2, %v1130_v24  ;;  %vm565_vm4 = vcmp.gt.f32.partialorder %v1146_v25, 0.0  ;;  %v610_v34 = vsel %vm546_vm2, %v443_v19, %v578_v23 }
 0x103   : > { %v597_v29 = vmul.f32 0.2, %v1146_v25  ;;  %v446_v30 = vpop.f32.mrf.mxu0  ;;  %v510_v31 = vpop.f32.mrf.mxu1  ;;  %v626_v43 = vsel %vm562_vm5, %v507_v20, %v594_v28 }
 0x104   : > { %v613_v32 = vsel %vm549_vm3, %v1130_v24, %v581_v26  ;;  %vm547_vm6 = vcmp.gt.f32.partialorder %v446_v30, 0.0  ;;  %v579_v33 = vmul.f32 0.2, %v446_v30  ;;  %vm563_vm7 = vcmp.gt.f32.partialorder %v510_v31, 0.0 }
 0x105   : > { %v1012_v35 = vpack.c.bf16 %v613_v32, %v612_v22  ;;  %v629_v36 = vsel %vm565_vm4, %v1146_v25, %v597_v29  ;;  %v595_v37 = vmul.f32 0.2, %v510_v31  ;;  %v1133_v38 = vpop.f32.mrf.mxu0  ;;  %v1149_v39 = vpop.f32.mrf.mxu1 }
 0x106   : > { %v1052_v40 = vpack.c.bf16 %v629_v36, %v628_v27  ;;  %v611_v41 = vsel %vm547_vm6, %v446_v30, %v579_v33  ;;  %vm552_vm8 = vcmp.gt.f32.partialorder %v1133_v38, 0.0  ;;  %v584_v42 = vmul.f32 0.2, %v1133_v38 }
 0x107   : > { %1068 = vst [vmem:[%s1327_s8 + $0x28] sm:$0xff] %v1012_v35   ;;  %v1007_v44 = vpack.c.bf16 %v611_v41, %v610_v34  ;;  %v627_v45 = vsel %vm563_vm7, %v510_v31, %v595_v37  ;;  %v459_v46 = vpop.f32.mrf.mxu0  ;;  %v523_v47 = vpop.f32.mrf.mxu1  ;;  %vm568_vm9 = vcmp.gt.f32.partialorder %v1149_v39, 0.0  ;;  %v600_v50 = vmul.f32 0.2, %v1149_v39 }
 0x108   : > { %1076 = vst [vmem:[%s1327_s8 + $0x68] sm:$0xff] %v1052_v40   ;;  %v1047_v48 = vpack.c.bf16 %v627_v45, %v626_v43  ;;  %v616_v49 = vsel %vm552_vm8, %v1133_v38, %v584_v42  ;;  %v582_v53 = vmul.f32 0.2, %v459_v46  ;;  %vm550_vm12 = vcmp.gt.f32.partialorder %v459_v46, 0.0 }
 0x109   : > { %1067 = vst [vmem:[%s1327_s8 + $0x20] sm:$0xff] %v1007_v44   ;;  %v1134_v51 = vpop.f32.mrf.mxu0  ;;  %v1150_v52 = vpop.f32.mrf.mxu1  ;;  %vm566_vm13 = vcmp.gt.f32.partialorder %v523_v47, 0.0  ;;  %v598_v55 = vmul.f32 0.2, %v523_v47  ;;  %v632_v61 = vsel %vm568_vm9, %v1149_v39, %v600_v50 }
 0x10a   : > { %1075 = vst [vmem:[%s1327_s8 + $0x60] sm:$0xff] %v1047_v48   ;;  %vm553_vm10 = vcmp.gt.f32.partialorder %v1134_v51, 0.0  ;;  %v585_v54 = vmul.f32 0.2, %v1134_v51  ;;  %vm569_vm11 = vcmp.gt.f32.partialorder %v1150_v52, 0.0  ;;  %v614_v1 = vsel %vm550_vm12, %v459_v46, %v582_v53 }
 0x10b   : > { %v601_v56 = vmul.f32 0.2, %v1150_v52  ;;  %v462_v57 = vpop.f32.mrf.mxu0  ;;  %v526_v58 = vpop.f32.mrf.mxu1  ;;  %v630_v4 = vsel %vm566_vm13, %v523_v47, %v598_v55 }
 0x10c   : > { %v617_v59 = vsel %vm553_vm10, %v1134_v51, %v585_v54  ;;  %vm551_vm14 = vcmp.gt.f32.partialorder %v462_v57, 0.0  ;;  %v583_v60 = vmul.f32 0.2, %v462_v57  ;;  %vm567_vm15 = vcmp.gt.f32.partialorder %v526_v58, 0.0 }
 0x10d   : > { %v1022_v62 = vpack.c.bf16 %v617_v59, %v616_v49  ;;  %v633_v63 = vsel %vm569_vm11, %v1150_v52, %v601_v56  ;;  %v599_v0 = vmul.f32 0.2, %v526_v58 }
 0x10e   : > { %v1062_v2 = vpack.c.bf16 %v633_v63, %v632_v61  ;;  %v615_v3 = vsel %vm551_vm14, %v462_v57, %v583_v60 }
 0x10f   : > { %1070 = vst [vmem:[%s1327_s8 + $0x38] sm:$0xff] %v1022_v62   ;;  %v1017_v5 = vpack.c.bf16 %v615_v3, %v614_v1  ;;  %v631_v6 = vsel %vm567_vm15, %v526_v58, %v599_v0 }
 0x110   : > { %1078 = vst [vmem:[%s1327_s8 + $0x78] sm:$0xff] %v1062_v2   ;;  %v1057_v7 = vpack.c.bf16 %v631_v6, %v630_v4 }
 0x111   : > { %1069 = vst [vmem:[%s1327_s8 + $0x30] sm:$0xff] %v1017_v5  }
 0x112   : > { %1077 = vst [vmem:[%s1327_s8 + $0x70] sm:$0xff] %v1057_v7  }
 0x113 PF: > { %s12_s11 = sadd.s32 1, %s1237_s11   ;;  %s1362_s9 = smov %s1233_s10 }
 0x114   : > { %p9_p5 = scmp.ge.s32.totalorder %s12_s11, 4   ;;  %s1363_s10 = smov %s1365_s12 }
 0x116   :  { %11 = sbr.rel (!%p9_p5) target bundleno = 2 (0x2), region = 61 }

// kernel: d2_forward.14
= control target key start
LH: loop header
LB: loop body
LE: loop exit
PB: predicated region body
PF: predicated region fallthrough
CT: control target
= control target key end

     0   :  { %s455_s0 = inlined_call_operand.vmem [shape: bf16[128,128], index: 0, kind: input, shape index: {}]   ;;  %s456_s1 = inlined_call_operand.vmem [shape: f32[1,128], index: 1, kind: input, shape index: {}]   ;;  %s457_s2 = inlined_call_operand.vmem [shape: f32[1,128], index: 2, kind: input, shape index: {}]   ;;  %s458_s3 = inlined_call_operand.vmem [shape: bf16[128,128], index: 3, kind: output, shape index: {}]  }
   0x1   :  { %v259_v0 = vld [vmem:[%s455_s0] sm:$0xff]   ;;  %v330_v4 = vld [vmem:[%s455_s0 + $0x8] sm:$0xff]   ;;  %v331_v5 = vld [vmem:[%s455_s0 + $0x10] sm:$0xff]  }
   0x2   :  { %v370_v1 = vld [vmem:[%s456_s1] ss:$0 sm:$0xff]  ;;  %v260_v2 = vunpack.c.l.bf16 %v259_v0  ;;  %v261_v3 = vunpack.c.h.bf16 %v259_v0  ;;  %v332_v6 = vld [vmem:[%s455_s0 + $0x18] sm:$0xff]   ;;  %v264_v8 = vunpack.c.l.bf16 %v330_v4  ;;  %v265_v9 = vunpack.c.h.bf16 %v330_v4  ;;  %v334_v35 = vld [vmem:[%s455_s0 + $0x28] sm:$0xff]  }
   0x3   :  { %v384_v7 = vld [vmem:[%s457_s2] ss:$0 sm:$0xff]  ;;  %v268_v10 = vunpack.c.l.bf16 %v331_v5  ;;  %v269_v11 = vunpack.c.h.bf16 %v331_v5  ;;  %v272_v14 = vunpack.c.l.bf16 %v332_v6  ;;  %v273_v15 = vunpack.c.h.bf16 %v332_v6  ;;  %v335_v48 = vld [vmem:[%s455_s0 + $0x30] sm:$0xff]   ;;  %v336_v4 = vld [vmem:[%s455_s0 + $0x38] sm:$0xff]  }
   0x4   :  { %v53_v12 = vmul.f32 %v260_v2, %v370_v1  ;;  %v54_v13 = vmul.f32 %v261_v3, %v370_v1  ;;  %v55_v16 = vmul.f32 %v264_v8, %v370_v1  ;;  %v56_v17 = vmul.f32 %v265_v9, %v370_v1  ;;  %v333_v34 = vld [vmem:[%s455_s0 + $0x20] sm:$0xff]  }
   0x5   :  { %v57_v18 = vmul.f32 %v268_v10, %v370_v1  ;;  %v58_v19 = vmul.f32 %v269_v11, %v370_v1  ;;  %v59_v22 = vmul.f32 %v272_v14, %v370_v1  ;;  %v60_v23 = vmul.f32 %v273_v15, %v370_v1 }
   0x6   :  { %v76_v20 = vadd.f32 %v384_v7, %v53_v12  ;;  %v77_v21 = vadd.f32 %v384_v7, %v54_v13  ;;  %v78_v24 = vadd.f32 %v384_v7, %v55_v16  ;;  %v79_v25 = vadd.f32 %v384_v7, %v56_v17 }
   0x7   :  { %v80_v26 = vadd.f32 %v384_v7, %v57_v18  ;;  %v81_v27 = vadd.f32 %v384_v7, %v58_v19  ;;  %v82_v42 = vadd.f32 %v384_v7, %v59_v22  ;;  %v83_v43 = vadd.f32 %v384_v7, %v60_v23 }
   0x8   :  { %vm92_vm0 = vcmp.gt.f32.partialorder %v76_v20, 0.0  ;;  %vm93_vm1 = vcmp.gt.f32.partialorder %v77_v21, 0.0  ;;  %v108_v28 = vmul.f32 0.2, %v76_v20  ;;  %v109_v29 = vmul.f32 0.2, %v77_v21 }
   0x9   :  { %vm94_vm2 = vcmp.gt.f32.partialorder %v78_v24, 0.0  ;;  %vm95_vm3 = vcmp.gt.f32.partialorder %v79_v25, 0.0  ;;  %v110_v30 = vmul.f32 0.2, %v78_v24  ;;  %v111_v31 = vmul.f32 0.2, %v79_v25 }
   0xa   :  { %v124_v32 = vsel %vm92_vm0, %v76_v20, %v108_v28  ;;  %v125_v33 = vsel %vm93_vm1, %v77_v21, %v109_v29  ;;  %vm96_vm4 = vcmp.gt.f32.partialorder %v80_v26, 0.0  ;;  %vm97_vm5 = vcmp.gt.f32.partialorder %v81_v27, 0.0 }
   0xb   :  { %v293_v36 = vpack.c.bf16 %v125_v33, %v124_v32  ;;  %v126_v37 = vsel %vm94_vm2, %v78_v24, %v110_v30  ;;  %v127_v38 = vsel %vm95_vm3, %v79_v25, %v111_v31  ;;  %v112_v39 = vmul.f32 0.2, %v80_v26 }
   0xc   :  { %v298_v40 = vpack.c.bf16 %v127_v38, %v126_v37  ;;  %v113_v41 = vmul.f32 0.2, %v81_v27  ;;  %v276_v45 = vunpack.c.l.bf16 %v333_v34  ;;  %v277_v46 = vunpack.c.h.bf16 %v333_v34 }
   0xd   :  { %294 = vst [vmem:[%s458_s3] sm:$0xff] %v293_v36   ;;  %v128_v44 = vsel %vm96_vm4, %v80_v26, %v112_v39  ;;  %v280_v47 = vunpack.c.l.bf16 %v334_v35  ;;  %vm98_vm6 = vcmp.gt.f32.partialorder %v82_v42, 0.0  ;;  %vm99_vm7 = vcmp.gt.f32.partialorder %v83_v43, 0.0 }
   0xe   :  { %337 = vst [vmem:[%s458_s3 + $0x8] sm:$0xff] %v298_v40   ;;  %v129_v49 = vsel %vm97_vm5, %v81_v27, %v113_v41  ;;  %v114_v50 = vmul.f32 0.2, %v82_v42  ;;  %v115_v52 = vmul.f32 0.2, %v83_v43  ;;  %v61_v53 = vmul.f32 %v276_v45, %v370_v1 }
   0xf   :  { %v303_v51 = vpack.c.bf16 %v129_v49, %v128_v44  ;;  %v62_v54 = vmul.f32 %v277_v46, %v370_v1  ;;  %v281_v56 = vunpack.c.h.bf16 %v334_v35  ;;  %v63_v57 = vmul.f32 %v280_v47, %v370_v1 }
  0x10   :  { %v130_v55 = vsel %vm98_vm6, %v82_v42, %v114_v50  ;;  %v284_v58 = vunpack.c.l.bf16 %v335_v48  ;;  %v131_v59 = vsel %vm99_vm7, %v83_v43, %v115_v52  ;;  %v84_v60 = vadd.f32 %v384_v7, %v61_v53 }
  0x11   :  { %338 = vst [vmem:[%s458_s3 + $0x10] sm:$0xff] %v303_v51   ;;  %v85_v61 = vadd.f32 %v384_v7, %v62_v54  ;;  %v285_v62 = vunpack.c.h.bf16 %v335_v48  ;;  %v308_v63 = vpack.c.bf16 %v131_v59, %v130_v55  ;;  %v64_v0 = vmul.f32 %v281_v56, %v370_v1 }
  0x12   :  { %v86_v2 = vadd.f32 %v384_v7, %v63_v57  ;;  %v65_v3 = vmul.f32 %v284_v58, %v370_v1  ;;  %vm100_vm8 = vcmp.gt.f32.partialorder %v84_v60, 0.0  ;;  %v116_v5 = vmul.f32 0.2, %v84_v60 }
  0x13   :  { %vm101_vm9 = vcmp.gt.f32.partialorder %v85_v61, 0.0  ;;  %v117_v6 = vmul.f32 0.2, %v85_v61  ;;  %339 = vst [vmem:[%s458_s3 + $0x18] sm:$0xff] %v308_v63   ;;  %v87_v8 = vadd.f32 %v384_v7, %v64_v0  ;;  %v66_v10 = vmul.f32 %v285_v62, %v370_v1 }
  0x14   :  { %vm102_vm10 = vcmp.gt.f32.partialorder %v86_v2, 0.0  ;;  %v118_v9 = vmul.f32 0.2, %v86_v2  ;;  %v132_v11 = vsel %vm100_vm8, %v84_v60, %v116_v5  ;;  %v88_v13 = vadd.f32 %v384_v7, %v65_v3 }
  0x15   :  { %v133_v12 = vsel %vm101_vm9, %v85_v61, %v117_v6  ;;  %v288_v14 = vunpack.c.l.bf16 %v336_v4  ;;  %vm103_vm11 = vcmp.gt.f32.partialorder %v87_v8, 0.0  ;;  %v119_v16 = vmul.f32 0.2, %v87_v8 }
  0x16   :  { %v313_v15 = vpack.c.bf16 %v133_v12, %v132_v11  ;;  %v134_v17 = vsel %vm102_vm10, %v86_v2, %v118_v9  ;;  %v89_v18 = vadd.f32 %v384_v7, %v66_v10  ;;  %vm104_vm12 = vcmp.gt.f32.partialorder %v88_v13, 0.0 }
  0x17   :  { %v120_v19 = vmul.f32 0.2, %v88_v13  ;;  %v289_v20 = vunpack.c.h.bf16 %v336_v4  ;;  %v135_v21 = vsel %vm103_vm11, %v87_v8, %v119_v16  ;;  %v67_v22 = vmul.f32 %v288_v14, %v370_v1 }
  0x18   :  { %340 = vst [vmem:[%s458_s3 + $0x20] sm:$0xff] %v313_v15   ;;  %v318_v23 = vpack.c.bf16 %v135_v21, %v134_v17  ;;  %vm105_vm13 = vcmp.gt.f32.partialorder %v89_v18, 0.0  ;;  %v121_v24 = vmul.f32 0.2, %v89_v18 }
  0x19   :  { %v136_v25 = vsel %vm104_vm12, %v88_v13, %v120_v19  ;;  %v68_v26 = vmul.f32 %v289_v20, %v370_v1  ;;  %v90_v27 = vadd.f32 %v384_v7, %v67_v22 }
  0x1a   :  { %341 = vst [vmem:[%s458_s3 + $0x28] sm:$0xff] %v318_v23   ;;  %v137_v28 = vsel %vm105_vm13, %v89_v18, %v121_v24 }
  0x1b   :  { %v323_v29 = vpack.c.bf16 %v137_v28, %v136_v25  ;;  %v91_v30 = vadd.f32 %v384_v7, %v68_v26  ;;  %vm106_vm14 = vcmp.gt.f32.partialorder %v90_v27, 0.0  ;;  %v122_v31 = vmul.f32 0.2, %v90_v27 }
  0x1d   :  { %342 = vst [vmem:[%s458_s3 + $0x30] sm:$0xff] %v323_v29   ;;  %vm107_vm15 = vcmp.gt.f32.partialorder %v91_v30, 0.0  ;;  %v123_v32 = vmul.f32 0.2, %v91_v30  ;;  %v138_v33 = vsel %vm106_vm14, %v90_v27, %v122_v31 }
  0x1f   :  { %v139_v1 = vsel %vm107_vm15, %v91_v30, %v123_v32 }
  0x20   :  { %v328_v34 = vpack.c.bf16 %v139_v1, %v138_v33 }
  0x22   :  { %343 = vst [vmem:[%s458_s3 + $0x38] sm:$0xff] %v328_v34  }

// kernel: d2_forward.12
= control target key start
LH: loop header
LB: loop body
LE: loop exit
PB: predicated region body
PF: predicated region fallthrough
CT: control target
= control target key end

     0   :  { %s1718_s9 = smov 0   ;;  %s1720_s10 = smov 0   ;;  %s2017_s0 = inlined_call_operand.vmem [shape: bf16[128,1024], index: 0, kind: input, shape index: {}]   ;;  %s2018_s1 = inlined_call_operand.vmem [shape: bf16[1024,128], index: 1, kind: input, shape index: {}]   ;;  %s2019_s2 = inlined_call_operand.vmem [shape: bf16[128,128], index: 2, kind: output, shape index: {}]  }
   0x1   :  { %s1722_s11 = smov 0  }
   0x2 LB: > { %s24_s12 = sadd.s32 1, %s1697_s10  ;;  %p1287_p0 = scmp.ge.s32.totalorder %s1701_s11, 1  ;;  %s1701_s11 = sphi %s1722_s11, %s12_s11   ;;  %s1697_s10 = sphi %s1720_s10, %s2021_s10   ;;  %s1693_s9 = sphi %s1718_s9, %s2020_s9  }
   0x3   : > { %p26_p1 = scmp.ge.s32.totalorder %s24_s12, 2  ;;  %p137_p2 = scmp.lt.s32.totalorder %s1701_s11, 3 }
   0x5   : > { %s2023_s12 = smov (%p26_p1, %s24_s12), 0  ;;  %p138_p3 = pnand %p1287_p0, %p137_p2 }
   0x6   : > { %s1288_s21 = sshll.u32 (!%p138_p3), %s1693_s9, 3 }
   0x7   : > { %141 = sbr.rel (%p138_p3) target bundleno = 310 (0x136), region = 28  ;;  %p168_p4 = scmp.lt.s32.totalorder (!%p138_p3), %s1288_s21, 15 }
   0xc   : > { %v1615_v0 = vld [vmem:[%s2018_s1 + $0x78] sm:$0xff]   ;;  %v1619_v4 = vld [vmem:[%s2018_s1 + $0x70] sm:$0xff]   ;;  %v1623_v8 = vld [vmem:[%s2018_s1 + $0x68] sm:$0xff]   ;;  %s2025_s21 = smov (!%p168_p4, %s1288_s21), 15 }
   0xd   : > { %v1616_v1 = vld [vmem:[%s2018_s1 + $0xf8] sm:$0xff]   ;;  %1431 = vmatprep.subr.bf16.mxu0 %v1615_v0  ;;  %v1620_v5 = vld [vmem:[%s2018_s1 + $0xf0] sm:$0xff]   ;;  %v1624_v9 = vld [vmem:[%s2018_s1 + $0xe8] sm:$0xff]   ;;  %s1399_s19 = sshll.u32 %s2025_s21, 5 }
   0xe   : > { %v1617_v2 = vld [vmem:[%s2018_s1 + $0x38] sm:$0xff]   ;;  %1471 = vmatprep.subr.bf16.mxu1 %v1616_v1  ;;  %v1621_v6 = vld [vmem:[%s2018_s1 + $0x30] sm:$0xff]   ;;  %v1625_v10 = vld [vmem:[%s2018_s1 + $0x28] sm:$0xff]   ;;  %s1835_s29 = scalar_lea.vmem %s2017_s0, %s1399_s19 }
   0xf   : > { %v1618_v3 = vld [vmem:[%s2018_s1 + $0xb8] sm:$0xff]   ;;  %1432 = vmatpush3.bf16.msra.mxu0 %v1617_v2  ;;  %v1622_v7 = vld [vmem:[%s2018_s1 + $0xb0] sm:$0xff]   ;;  %v1626_v11 = vld [vmem:[%s2018_s1 + $0xa8] sm:$0xff]  }
  0x10   : > { %1472 = vmatpush3.bf16.msra.mxu1 %v1618_v3  ;;  %1433 = vmatprep.subr.bf16.mxu0 %v1619_v4  ;;  %v1627_v12 = vld [vmem:[%s2018_s1 + $0x60] sm:$0xff]   ;;  %v1631_v16 = vld [vmem:[%s2018_s1 + $0x58] sm:$0xff]   ;;  %v1635_v20 = vld [vmem:[%s2018_s1 + $0x50] sm:$0xff]  }
  0x11   : > { %1473 = vmatprep.subr.bf16.mxu1 %v1620_v5  ;;  %v1628_v13 = vld [vmem:[%s2018_s1 + $0xe0] sm:$0xff]   ;;  %v1632_v17 = vld [vmem:[%s2018_s1 + $0xd8] sm:$0xff]   ;;  %v1636_v21 = vld [vmem:[%s2018_s1 + $0xd0] sm:$0xff]  }
  0x12   : > { %v1629_v14 = vld [vmem:[%s2018_s1 + $0x20] sm:$0xff]   ;;  %v1633_v18 = vld [vmem:[%s2018_s1 + $0x18] sm:$0xff]   ;;  %v1637_v22 = vld [vmem:[%s2018_s1 + $0x10] sm:$0xff]  }
  0x13   : > { %1434 = vmatpush3.bf16.msra.mxu0 %v1621_v6  ;;  %v1630_v15 = vld [vmem:[%s2018_s1 + $0xa0] sm:$0xff]   ;;  %v1634_v19 = vld [vmem:[%s2018_s1 + $0x98] sm:$0xff]   ;;  %v1638_v23 = vld [vmem:[%s2018_s1 + $0x90] sm:$0xff]  }
  0x14   : > { %1474 = vmatpush3.bf16.msra.mxu1 %v1622_v7  ;;  %1435 = vmatprep.subr.bf16.mxu0 %v1623_v8  ;;  %v1639_v24 = vld [vmem:[%s2018_s1 + $0x48] sm:$0xff]   ;;  %v1643_v28 = vld [vmem:[%s2018_s1 + $0x40] sm:$0xff]   ;;  %v1647_v40 = vld [vmem:[%s2018_s1 + $0x178] sm:$0xff]  }
  0x15   : > { %1475 = vmatprep.subr.bf16.mxu1 %v1624_v9  ;;  %v1640_v25 = vld [vmem:[%s2018_s1 + $0xc8] sm:$0xff]   ;;  %v1644_v29 = vld [vmem:[%s2018_s1 + $0xc0] sm:$0xff]   ;;  %v1648_v41 = vld [vmem:[%s2018_s1 + $0x1f8] sm:$0xff]  }
  0x16   : > { %v1641_v26 = vld [vmem:[%s2018_s1 + $0x8] sm:$0xff]   ;;  %v1645_v30 = vld [vmem:[%s2018_s1] sm:$0xff]   ;;  %v1649_v42 = vld [vmem:[%s2018_s1 + $0x138] sm:$0xff]  }
  0x17   : > { %1436 = vmatpush3.bf16.msra.mxu0 %v1625_v10  ;;  %v1642_v27 = vld [vmem:[%s2018_s1 + $0x88] sm:$0xff]   ;;  %v1646_v31 = vld [vmem:[%s2018_s1 + $0x80] sm:$0xff]   ;;  %v1650_v43 = vld [vmem:[%s2018_s1 + $0x1b8] sm:$0xff]  }
  0x18   : > { %1476 = vmatpush3.bf16.msra.mxu1 %v1626_v11  ;;  %1437 = vmatprep.subr.bf16.mxu0 %v1627_v12  ;;  %v188_v32 = vld [vmem:[%s1835_s29] sm:$0xff]  ;;  %v189_v34 = vld [vmem:[%s1835_s29 + $0x8] sm:$0xff]  ;;  %v1651_v44 = vld [vmem:[%s2018_s1 + $0x170] sm:$0xff]  }
  0x19   : > { %1477 = vmatprep.subr.bf16.mxu1 %v1628_v13  ;;  %v192_v33 = vld [vmem:[%s1835_s29 + $0x20] sm:$0xff]  ;;  %v193_v37 = vld [vmem:[%s1835_s29 + $0x28] sm:$0xff]  ;;  %v1652_v45 = vld [vmem:[%s2018_s1 + $0x1f0] sm:$0xff]  }
  0x1a   : > { %v1293_v35 = vcombine.low %v188_v32, %v192_v33  ;;  %v1294_v36 = vcombine.high %v188_v32, %v192_v33  ;;  %v1295_v38 = vcombine.low %v189_v34, %v193_v37  ;;  %v1296_v39 = vcombine.high %v189_v34, %v193_v37  ;;  %v1653_v46 = vld [vmem:[%s2018_s1 + $0x130] sm:$0xff]   ;;  %v196_v48 = vld [vmem:[%s1835_s29 + $0x40] sm:$0xff]  ;;  %v197_v51 = vld [vmem:[%s1835_s29 + $0x48] sm:$0xff] }
  0x1b   : > { %1438 = vmatpush3.bf16.msra.mxu0 %v1629_v14  ;;  %v1654_v47 = vld [vmem:[%s2018_s1 + $0x1b0] sm:$0xff]   ;;  %v200_v49 = vld [vmem:[%s1835_s29 + $0x60] sm:$0xff]  ;;  %v201_v52 = vld [vmem:[%s1835_s29 + $0x68] sm:$0xff] }
  0x1c   : > { %1478 = vmatpush3.bf16.msra.mxu1 %v1630_v15  ;;  %1439 = vmatprep.subr.bf16.mxu0 %v1631_v16  ;;  %v1302_v50 = vcombine.high %v196_v48, %v200_v49  ;;  %v1301_v53 = vcombine.low %v196_v48, %v200_v49  ;;  %v1304_v54 = vcombine.high %v197_v51, %v201_v52  ;;  %v1655_v56 = vld [vmem:[%s2018_s1 + $0x168] sm:$0xff]   ;;  %v1659_v60 = vld [vmem:[%s2018_s1 + $0x160] sm:$0xff]   ;;  %v1663_v8 = vld [vmem:[%s2018_s1 + $0x158] sm:$0xff]  }
  0x1d   : > { %1479 = vmatprep.subr.bf16.mxu1 %v1632_v17  ;;  %924 = vmatprep.mubr.bf16.mxu0 %v1294_v36  ;;  %v1303_v55 = vcombine.low %v197_v51, %v201_v52  ;;  %v1656_v57 = vld [vmem:[%s2018_s1 + $0x1e8] sm:$0xff]   ;;  %v1660_v61 = vld [vmem:[%s2018_s1 + $0x1e0] sm:$0xff]   ;;  %v1664_v9 = vld [vmem:[%s2018_s1 + $0x1d8] sm:$0xff]  }
  0x1e   : > { %989 = vmatprep.mubr.bf16.mxu1 %v1296_v39  ;;  %v1657_v58 = vld [vmem:[%s2018_s1 + $0x128] sm:$0xff]   ;;  %v1661_v62 = vld [vmem:[%s2018_s1 + $0x120] sm:$0xff]   ;;  %v1665_v10 = vld [vmem:[%s2018_s1 + $0x118] sm:$0xff]  }
  0x1f   : > { %1440 = vmatpush3.bf16.msra.mxu0 %v1633_v18  ;;  %v1658_v59 = vld [vmem:[%s2018_s1 + $0x1a8] sm:$0xff]   ;;  %v1662_v63 = vld [vmem:[%s2018_s1 + $0x1a0] sm:$0xff]   ;;  %v1666_v11 = vld [vmem:[%s2018_s1 + $0x198] sm:$0xff]  }
  0x20   : > { %1480 = vmatpush3.bf16.msra.mxu1 %v1634_v19  ;;  %1441 = vmatprep.subr.bf16.mxu0 %v1635_v20  ;;  %v204_v0 = vld [vmem:[%s1835_s29 + $0x80] sm:$0xff]  ;;  %v205_v2 = vld [vmem:[%s1835_s29 + $0x88] sm:$0xff]  ;;  %v1667_v12 = vld [vmem:[%s2018_s1 + $0x150] sm:$0xff]  }
  0x21   : > { %1481 = vmatprep.subr.bf16.mxu1 %v1636_v21  ;;  %v208_v1 = vld [vmem:[%s1835_s29 + $0xa0] sm:$0xff]  ;;  %v209_v3 = vld [vmem:[%s1835_s29 + $0xa8] sm:$0xff]  ;;  %v1668_v13 = vld [vmem:[%s2018_s1 + $0x1d0] sm:$0xff]  }
  0x22   : > { %v1310_v4 = vcombine.high %v204_v0, %v208_v1  ;;  %v1312_v5 = vcombine.high %v205_v2, %v209_v3  ;;  %v1309_v6 = vcombine.low %v204_v0, %v208_v1  ;;  %v1311_v7 = vcombine.low %v205_v2, %v209_v3  ;;  %v1669_v14 = vld [vmem:[%s2018_s1 + $0x110] sm:$0xff]   ;;  %v212_v16 = vld [vmem:[%s1835_s29 + $0xc0] sm:$0xff]  ;;  %v213_v18 = vld [vmem:[%s1835_s29 + $0xc8] sm:$0xff] }
  0x23   : > { %1442 = vmatpush3.bf16.msra.mxu0 %v1637_v22  ;;  %v1670_v15 = vld [vmem:[%s2018_s1 + $0x190] sm:$0xff]   ;;  %v216_v17 = vld [vmem:[%s1835_s29 + $0xe0] sm:$0xff]  ;;  %v217_v20 = vld [vmem:[%s1835_s29 + $0xe8] sm:$0xff] }
  0x24   : > { %1482 = vmatpush3.bf16.msra.mxu1 %v1638_v23  ;;  %1443 = vmatprep.subr.bf16.mxu0 %v1639_v24  ;;  %v1318_v19 = vcombine.high %v212_v16, %v216_v17  ;;  %v1317_v21 = vcombine.low %v212_v16, %v216_v17  ;;  %v1320_v22 = vcombine.high %v213_v18, %v217_v20  ;;  %v1671_v24 = vld [vmem:[%s2018_s1 + $0x148] sm:$0xff]   ;;  %v190_v32 = vld [vmem:[%s1835_s29 + $0x10] sm:$0xff]  ;;  %v191_v36 = vld [vmem:[%s1835_s29 + $0x18] sm:$0xff] }
  0x25   : > { %1483 = vmatprep.subr.bf16.mxu1 %v1640_v25  ;;  %v1319_v23 = vcombine.low %v213_v18, %v217_v20  ;;  %v1672_v25 = vld [vmem:[%s2018_s1 + $0x1c8] sm:$0xff]   ;;  %v194_v33 = vld [vmem:[%s1835_s29 + $0x30] sm:$0xff]  ;;  %v195_v37 = vld [vmem:[%s1835_s29 + $0x38] sm:$0xff] }
  0x26   : > { %v1297_v34 = vcombine.low %v190_v32, %v194_v33  ;;  %v1299_v39 = vcombine.low %v191_v36, %v195_v37  ;;  %v207_v48 = vld [vmem:[%s1835_s29 + $0x98] sm:$0xff] }
  0x27   : > { %1444 = vmatpush3.bf16.msra.mxu0 %v1641_v26  ;;  %v1673_v26 = vld [vmem:[%s2018_s1 + $0x108] sm:$0xff]   ;;  %v211_v49 = vld [vmem:[%s1835_s29 + $0xb8] sm:$0xff] }
  0x28   : > { %1484 = vmatpush3.bf16.msra.mxu1 %v1642_v27  ;;  %1445 = vmatprep.subr.bf16.mxu0 %v1643_v28  ;;  %v1674_v27 = vld [vmem:[%s2018_s1 + $0x188] sm:$0xff]   ;;  %v1675_v28 = vld [vmem:[%s2018_s1 + $0x140] sm:$0xff]  }
  0x29   : > { %1485 = vmatprep.subr.bf16.mxu1 %v1644_v29  ;;  %v1676_v29 = vld [vmem:[%s2018_s1 + $0x1c0] sm:$0xff]  }
  0x2b   : > { %1446 = vmatpush3.bf16.msra.mxu0 %v1645_v30  ;;  %v1677_v30 = vld [vmem:[%s2018_s1 + $0x100] sm:$0xff]  }
  0x2c   : > { %1486 = vmatpush3.bf16.msra.mxu1 %v1646_v31  ;;  %1511 = vmatprep.subr.bf16.mxu0 %v1647_v40  ;;  %v1678_v31 = vld [vmem:[%s2018_s1 + $0x180] sm:$0xff]   ;;  %v1300_v40 = vcombine.high %v191_v36, %v195_v37 }
  0x2d   : > { %1551 = vmatprep.subr.bf16.mxu1 %v1648_v41  ;;  %v202_v41 = vld [vmem:[%s1835_s29 + $0x70] sm:$0xff] }
  0x2e   : > { %925 = vmatmul.mubr.bf16.vlgmr.msra.gmra.mxu0 %v1293_v35  ;;  %v1298_v35 = vcombine.high %v190_v32, %v194_v33 }
  0x2f   : > { %990 = vmatmul.mubr.bf16.vlgmr.msra.gmra.mxu1 %v1295_v38  ;;  %1512 = vmatpush3.bf16.msra.mxu0 %v1649_v42  ;;  %v198_v38 = vld [vmem:[%s1835_s29 + $0x50] sm:$0xff]  ;;  %v199_v42 = vld [vmem:[%s1835_s29 + $0x58] sm:$0xff] }
  0x30   : > { %1552 = vmatpush3.bf16.msra.mxu1 %v1650_v43  ;;  %1513 = vmatprep.subr.bf16.mxu0 %v1651_v44  ;;  %v203_v43 = vld [vmem:[%s1835_s29 + $0x78] sm:$0xff]  ;;  %v1306_v44 = vcombine.high %v198_v38, %v202_v41 }
  0x31   : > { %1553 = vmatprep.subr.bf16.mxu1 %v1652_v45  ;;  %932 = vmatprep.mubr.bf16.mxu0 %v1302_v50  ;;  %v1308_v45 = vcombine.high %v199_v42, %v203_v43  ;;  %v1305_v50 = vcombine.low %v198_v38, %v202_v41  ;;  %v1307_v51 = vcombine.low %v199_v42, %v203_v43 }
  0x32   : > { %997 = vmatprep.mubr.bf16.mxu1 %v1304_v54  ;;  %v214_v54 = vld [vmem:[%s1835_s29 + $0xd0] sm:$0xff] }
  0x33   : > { %1514 = vmatpush3.bf16.msra.mxu0 %v1653_v46  ;;  %v206_v46 = vld [vmem:[%s1835_s29 + $0x90] sm:$0xff] }
  0x34   : > { %1554 = vmatpush3.bf16.msra.mxu1 %v1654_v47  ;;  %1515 = vmatprep.subr.bf16.mxu0 %v1655_v56  ;;  %v210_v47 = vld [vmem:[%s1835_s29 + $0xb0] sm:$0xff]  ;;  %v215_v56 = vld [vmem:[%s1835_s29 + $0xd8] sm:$0xff] }
  0x35   : > { %1555 = vmatprep.subr.bf16.mxu1 %v1656_v57  ;;  %v1314_v52 = vcombine.high %v206_v46, %v210_v47  ;;  %v219_v57 = vld [vmem:[%s1835_s29 + $0xf8] sm:$0xff] }
  0x36   : > { %933 = vmatmul.mubr.bf16.gmra.mxu0 %v1301_v53  ;;  %v1316_v53 = vcombine.high %v207_v48, %v211_v49 }
  0x37   : > { %998 = vmatmul.mubr.bf16.gmra.mxu1 %v1303_v55  ;;  %1516 = vmatpush3.bf16.msra.mxu0 %v1657_v58  ;;  %v218_v55 = vld [vmem:[%s1835_s29 + $0xf0] sm:$0xff]  ;;  %v1313_v58 = vcombine.low %v206_v46, %v210_v47  ;;  %s1292_s29 = sshll.u32 %s2025_s21, 2 }
  0x38   : > { %1556 = vmatpush3.bf16.msra.mxu1 %v1658_v59  ;;  %1517 = vmatprep.subr.bf16.mxu0 %v1659_v60  ;;  %v1315_v59 = vcombine.low %v207_v48, %v211_v49  ;;  %v1322_v60 = vcombine.high %v214_v54, %v218_v55  ;;  %s1993_s30 = scalar_lea.vmem %s2019_s2, %s1292_s29 }
  0x39   : > { %1557 = vmatprep.subr.bf16.mxu1 %v1660_v61  ;;  %940 = vmatprep.mubr.bf16.mxu0 %v1310_v4  ;;  %v1324_v61 = vcombine.high %v215_v56, %v219_v57 }
  0x3a   : > { %1005 = vmatprep.mubr.bf16.mxu1 %v1312_v5 }
  0x3b   : > { %1518 = vmatpush3.bf16.msra.mxu0 %v1661_v62  ;;  %v1321_v62 = vcombine.low %v214_v54, %v218_v55 }
  0x3c   : > { %1558 = vmatpush3.bf16.msra.mxu1 %v1662_v63  ;;  %1519 = vmatprep.subr.bf16.mxu0 %v1663_v8  ;;  %v1323_v63 = vcombine.low %v215_v56, %v219_v57 }
  0x3d   : > { %1559 = vmatprep.subr.bf16.mxu1 %v1664_v9 }
  0x3e   : > { %941 = vmatmul.mubr.bf16.gmra.mxu0 %v1309_v6 }
  0x3f   : > { %1006 = vmatmul.mubr.bf16.gmra.mxu1 %v1311_v7  ;;  %1520 = vmatpush3.bf16.msra.mxu0 %v1665_v10 }
  0x40   : > { %1560 = vmatpush3.bf16.msra.mxu1 %v1666_v11  ;;  %1521 = vmatprep.subr.bf16.mxu0 %v1667_v12 }
  0x41   : > { %1561 = vmatprep.subr.bf16.mxu1 %v1668_v13  ;;  %948 = vmatprep.mubr.bf16.mxu0 %v1318_v19 }
  0x42   : > { %1013 = vmatprep.mubr.bf16.mxu1 %v1320_v22 }
  0x43   : > { %1522 = vmatpush3.bf16.msra.mxu0 %v1669_v14 }
  0x44   : > { %1562 = vmatpush3.bf16.msra.mxu1 %v1670_v15  ;;  %1523 = vmatprep.subr.bf16.mxu0 %v1671_v24 }
  0x45   : > { %1563 = vmatprep.subr.bf16.mxu1 %v1672_v25 }
  0x46   : > { %949 = vmatmul.mubr.bf16.gmra.mxu0 %v1317_v21 }
  0x47   : > { %1014 = vmatmul.mubr.bf16.gmra.mxu1 %v1319_v23  ;;  %1524 = vmatpush3.bf16.msra.mxu0 %v1673_v26 }
  0x48   : > { %1564 = vmatpush3.bf16.msra.mxu1 %v1674_v27  ;;  %1525 = vmatprep.subr.bf16.mxu0 %v1675_v28 }
  0x49   : > { %1565 = vmatprep.subr.bf16.mxu1 %v1676_v29  ;;  %1054 = vmatprep.mubr.bf16.mxu0 %v1298_v35 }
  0x4a   : > { %1119 = vmatprep.mubr.bf16.mxu1 %v1300_v40 }
  0x4b   : > { %1526 = vmatpush3.bf16.msra.mxu0 %v1677_v30 }
  0x4c   : > { %1566 = vmatpush3.bf16.msra.mxu1 %v1678_v31 }
  0x4e   : > { %1055 = vmatmul.mubr.bf16.vlgmr.msra.gmra.mxu0 %v1297_v34 }
  0x4f   : > { %1120 = vmatmul.mubr.bf16.vlgmr.msra.gmra.mxu1 %v1299_v39  ;;  %1062 = vmatprep.mubr.bf16.mxu0 %v1306_v44 }
  0x50   : > { %1127 = vmatprep.mubr.bf16.mxu1 %v1308_v45 }
  0x56   : > { %1063 = vmatmul.mubr.bf16.gmra.mxu0 %v1305_v50 }
  0x57   : > { %1128 = vmatmul.mubr.bf16.gmra.mxu1 %v1307_v51  ;;  %1070 = vmatprep.mubr.bf16.mxu0 %v1314_v52 }
  0x58   : > { %1135 = vmatprep.mubr.bf16.mxu1 %v1316_v53 }
  0x5e   : > { %1071 = vmatmul.mubr.bf16.gmra.mxu0 %v1313_v58 }
  0x5f   : > { %1136 = vmatmul.mubr.bf16.gmra.mxu1 %v1315_v59  ;;  %1078 = vmatprep.mubr.bf16.mxu0 %v1322_v60 }
  0x60   : > { %1143 = vmatprep.mubr.bf16.mxu1 %v1324_v61 }
  0x66   : > { %1079 = vmatmul.mubr.bf16.gmra.mxu0 %v1321_v62 }
  0x67   : > { %1144 = vmatmul.mubr.bf16.gmra.mxu1 %v1323_v63 }
  0xee   : > { %v1447_v0 = vpop.f32.mrf.mxu0 }
  0xef   : > { %v1487_v1 = vpop.f32.mrf.mxu1 }
  0xf0   : > { %v1448_v2 = vpop.f32.mrf.mxu0 }
  0xf1   : > { %v1488_v3 = vpop.f32.mrf.mxu1  ;;  %v1449_v33 = vadd.f32 %v1448_v2, %v1447_v0 }
  0xf2   : > { %v1450_v4 = vpop.f32.mrf.mxu0  ;;  %v1489_v34 = vadd.f32 %v1488_v3, %v1487_v1 }
  0xf3   : > { %v1490_v5 = vpop.f32.mrf.mxu1 }
  0xf4   : > { %v1451_v6 = vpop.f32.mrf.mxu0  ;;  %v992_v42 = vadd.f32 %v1489_v34, %v1449_v33 }
  0xf5   : > { %v1491_v7 = vpop.f32.mrf.mxu1  ;;  %v1452_v37 = vadd.f32 %v1451_v6, %v1450_v4 }
  0xf6   : > { %v1453_v8 = vpop.f32.mrf.mxu0  ;;  %v1492_v38 = vadd.f32 %v1491_v7, %v1490_v5 }
  0xf7   : > { %v1493_v9 = vpop.f32.mrf.mxu1 }
  0xf8   : > { %v1454_v10 = vpop.f32.mrf.mxu0  ;;  %v995_v45 = vadd.f32 %v1492_v38, %v1452_v37 }
  0xf9   : > { %v1494_v11 = vpop.f32.mrf.mxu1  ;;  %v1455_v49 = vadd.f32 %v1454_v10, %v1453_v8 }
  0xfa   : > { %v1456_v12 = vpop.f32.mrf.mxu0  ;;  %v1495_v51 = vadd.f32 %v1494_v11, %v1493_v9 }
  0xfb   : > { %v1496_v13 = vpop.f32.mrf.mxu1 }
  0xfc   : > { %v1457_v14 = vpop.f32.mrf.mxu0  ;;  %v1000_v0 = vadd.f32 %v1495_v51, %v1455_v49 }
  0xfd   : > { %v1497_v15 = vpop.f32.mrf.mxu1  ;;  %v1458_v56 = vadd.f32 %v1457_v14, %v1456_v12 }
  0xfe   : > { %v1459_v16 = vpop.f32.mrf.mxu0  ;;  %v1498_v58 = vadd.f32 %v1497_v15, %v1496_v13 }
  0xff   : > { %v1499_v17 = vpop.f32.mrf.mxu1 }
 0x100   : > { %v1460_v18 = vpop.f32.mrf.mxu0  ;;  %v1003_v4 = vadd.f32 %v1498_v58, %v1458_v56 }
 0x101   : > { %v1500_v19 = vpop.f32.mrf.mxu1  ;;  %v1461_v8 = vadd.f32 %v1460_v18, %v1459_v16 }
 0x102   : > { %v1462_v20 = vpop.f32.mrf.mxu0  ;;  %v1501_v10 = vadd.f32 %v1500_v19, %v1499_v17 }
 0x103   : > { %v1971_v21 = vpop.f32.mrf.mxu1 }
 0x104   : > { %v1463_v22 = vpop.f32.mrf.mxu0 }
 0x105   : > { %v1503_v23 = vpop.f32.mrf.mxu1  ;;  %v1464_v15 = vadd.f32 %v1463_v22, %v1462_v20 }
 0x106   : > { %v1973_v24 = vpop.f32.mrf.mxu0  ;;  %v1504_v33 = vadd.f32 %v1503_v23, %v1971_v21 }
 0x107   : > { %v1975_v25 = vpop.f32.mrf.mxu1 }
 0x108   : > { %v1977_v26 = vpop.f32.mrf.mxu0  ;;  %v1011_v18 = vadd.f32 %v1504_v33, %v1464_v15 }
 0x109   : > { %v1979_v27 = vpop.f32.mrf.mxu1  ;;  %v1467_v20 = vadd.f32 %v1977_v26, %v1973_v24 }
 0x10a   : > { %v1981_v28 = vpop.f32.mrf.mxu0  ;;  %v1507_v21 = vadd.f32 %v1979_v27, %v1975_v25 }
 0x10b   : > { %v1983_v29 = vpop.f32.mrf.mxu1 }
 0x10c   : > { %v1985_v30 = vpop.f32.mrf.mxu0 }
 0x10d   : > { %v1987_v31 = vpop.f32.mrf.mxu1 }
 0x10e   : > { %v1527_v32 = vpop.f32.mrf.mxu0 }
 0x10f   : > { %v1567_v35 = vpop.f32.mrf.mxu1 }
 0x110   : > { %v1528_v36 = vpop.f32.mrf.mxu0 }
 0x111   : > { %v1529_v39 = vadd.f32 %v1528_v36, %v1527_v32  ;;  %v1568_v40 = vpop.f32.mrf.mxu1 }
 0x112   : > { %v1530_v41 = vpop.f32.mrf.mxu0  ;;  %v1569_v52 = vadd.f32 %v1568_v40, %v1567_v35 }
 0x113   : > { %v1570_v43 = vpop.f32.mrf.mxu1  ;;  %v1057_v46 = vadd.f32 %v1529_v39, %v992_v42  ;;  %v1008_v39 = vadd.f32 %v1501_v10, %v1461_v8 }
 0x114   : > { %v1531_v44 = vpop.f32.mrf.mxu0 }
 0x115   : > { %v1532_v47 = vadd.f32 %v1531_v44, %v1530_v41  ;;  %v1571_v48 = vpop.f32.mrf.mxu1  ;;  %v1122_v59 = vadd.f32 %v1569_v52, %v1057_v46  ;;  %v1470_v46 = vadd.f32 %v1985_v30, %v1981_v28  ;;  %v1016_v52 = vadd.f32 %v1507_v21, %v1467_v20 }
 0x116   : > { %v1533_v50 = vpop.f32.mrf.mxu0  ;;  %v1572_v54 = vadd.f32 %v1571_v48, %v1570_v43  ;;  %v1510_v48 = vadd.f32 %v1987_v31, %v1983_v29 }
 0x117   : > { %v1060_v53 = vadd.f32 %v1532_v47, %v995_v45  ;;  %v1573_v55 = vpop.f32.mrf.mxu1 }
 0x118   : > { %v1534_v57 = vpop.f32.mrf.mxu0 }
 0x119   : > { %v1125_v60 = vadd.f32 %v1572_v54, %v1060_v53  ;;  %v1535_v61 = vadd.f32 %v1534_v57, %v1533_v50  ;;  %v1574_v62 = vpop.f32.mrf.mxu1  ;;  %v1019_v54 = vadd.f32 %v1510_v48, %v1470_v46 }
 0x11a   : > { %v1536_v63 = vpop.f32.mrf.mxu0  ;;  %v1575_v11 = vadd.f32 %v1574_v62, %v1573_v55 }
 0x11b   : > { %v1411_v1 = vpack.c.bf16 %v1125_v60, %v1122_v59  ;;  %v1576_v2 = vpop.f32.mrf.mxu1  ;;  %v1065_v5 = vadd.f32 %v1535_v61, %v1000_v0 }
 0x11c   : > { %v1537_v3 = vpop.f32.mrf.mxu0 }
 0x11d   : > { %1412 = vst [vmem:[%s1993_s30] sm:$0xff] %v1411_v1   ;;  %v1538_v6 = vadd.f32 %v1537_v3, %v1536_v63  ;;  %v1577_v7 = vpop.f32.mrf.mxu1  ;;  %v1130_v34 = vadd.f32 %v1575_v11, %v1065_v5 }
 0x11e   : > { %v1539_v9 = vpop.f32.mrf.mxu0  ;;  %v1578_v13 = vadd.f32 %v1577_v7, %v1576_v2 }
 0x11f   : > { %v1068_v12 = vadd.f32 %v1538_v6, %v1003_v4  ;;  %v1579_v14 = vpop.f32.mrf.mxu1 }
 0x120   : > { %v1540_v32 = vpop.f32.mrf.mxu0 }
 0x121   : > { %v1133_v35 = vadd.f32 %v1578_v13, %v1068_v12  ;;  %v1541_v36 = vadd.f32 %v1540_v32, %v1539_v9  ;;  %v1580_v37 = vpop.f32.mrf.mxu1 }
 0x122   : > { %v1542_v38 = vpop.f32.mrf.mxu0  ;;  %v1581_v23 = vadd.f32 %v1580_v37, %v1579_v14 }
 0x123   : > { %v1416_v40 = vpack.c.bf16 %v1133_v35, %v1130_v34  ;;  %v1582_v41 = vpop.f32.mrf.mxu1  ;;  %v1073_v17 = vadd.f32 %v1541_v36, %v1008_v39 }
 0x124   : > { %v1543_v16 = vpop.f32.mrf.mxu0 }
 0x125   : > { %1428 = vst [vmem:[%s1993_s30 + $0x8] sm:$0xff] %v1416_v40   ;;  %v1544_v19 = vadd.f32 %v1543_v16, %v1542_v38  ;;  %v1583_v42 = vpop.f32.mrf.mxu1  ;;  %v1138_v49 = vadd.f32 %v1581_v23, %v1073_v17 }
 0x126   : > { %v1545_v22 = vpop.f32.mrf.mxu0  ;;  %v1584_v44 = vadd.f32 %v1583_v42, %v1582_v41 }
 0x127   : > { %v1076_v43 = vadd.f32 %v1544_v19, %v1011_v18  ;;  %v1585_v45 = vpop.f32.mrf.mxu1 }
 0x128   : > { %v1546_v47 = vpop.f32.mrf.mxu0 }
 0x129   : > { %v1141_v50 = vadd.f32 %v1584_v44, %v1076_v43  ;;  %v1547_v51 = vadd.f32 %v1546_v47, %v1545_v22  ;;  %v1586_v24 = vpop.f32.mrf.mxu1 }
 0x12a   : > { %v1548_v26 = vpop.f32.mrf.mxu0  ;;  %v1587_v28 = vadd.f32 %v1586_v24, %v1585_v45 }
 0x12b   : > { %v1421_v25 = vpack.c.bf16 %v1141_v50, %v1138_v49  ;;  %v1588_v27 = vpop.f32.mrf.mxu1  ;;  %v1081_v55 = vadd.f32 %v1547_v51, %v1016_v52 }
 0x12c   : > { %v1549_v53 = vpop.f32.mrf.mxu0 }
 0x12d   : > { %1429 = vst [vmem:[%s1993_s30 + $0x10] sm:$0xff] %v1421_v25   ;;  %v1550_v56 = vadd.f32 %v1549_v53, %v1548_v26  ;;  %v1589_v57 = vpop.f32.mrf.mxu1  ;;  %v1146_v59 = vadd.f32 %v1587_v28, %v1081_v55 }
 0x12e   : > { %v1590_v58 = vadd.f32 %v1589_v57, %v1588_v27 }
 0x12f   : > { %v1084_v30 = vadd.f32 %v1550_v56, %v1019_v54 }
 0x131   : > { %v1149_v29 = vadd.f32 %v1590_v58, %v1084_v30 }
 0x133   : > { %v1426_v31 = vpack.c.bf16 %v1149_v29, %v1146_v59 }
 0x135   : > { %1430 = vst [vmem:[%s1993_s30 + $0x18] sm:$0xff] %v1426_v31  }
 0x136 PF: > { %s12_s11 = sadd.s32 1, %s1701_s11   ;;  %s2020_s9 = smov %s1697_s10 }
 0x137   : > { %p9_p5 = scmp.ge.s32.totalorder %s12_s11, 4   ;;  %s2021_s10 = smov %s2023_s12 }
 0x139   :  { %11 = sbr.rel (!%p9_p5) target bundleno = 2 (0x2), region = 61 }

// kernel: d2_forward.13
= control target key start
LH: loop header
LB: loop body
LE: loop exit
PB: predicated region body
PF: predicated region fallthrough
CT: control target
= control target key end

     0   :  { %v160_v0 = vmov 0.0   ;;  %s218_s1 = inlined_call_operand.vmem [shape: f32[1,128], index: 1, kind: output, shape index: {0}]   ;;  %s219_s2 = inlined_call_operand.vmem [shape: f32[1,128], index: 2, kind: output, shape index: {1}]   ;;  %s220_s0 = inlined_call_operand.vmem [shape: bf16[128,128], index: 0, kind: input, shape index: {}]  }
   0x1   :  { %14 = vst [vmem:[%s218_s1] sm:$0x1] %v160_v0  ;;  %15 = vst [vmem:[%s219_s2] sm:$0x1] %v160_v0  ;;  %v121_v1 = vld [vmem:[%s220_s0] sm:$0xff]   ;;  %v152_v2 = vld [vmem:[%s220_s0 + $0x8] sm:$0xff]  }
   0x2   :  { %v122_v3 = vunpack.c.l.bf16 %v121_v1  ;;  %v123_v4 = vunpack.c.h.bf16 %v121_v1  ;;  %v126_v5 = vunpack.c.l.bf16 %v152_v2  ;;  %v153_v6 = vld [vmem:[%s220_s0 + $0x10] sm:$0xff]   ;;  %v127_v7 = vunpack.c.h.bf16 %v152_v2  ;;  %v154_v14 = vld [vmem:[%s220_s0 + $0x18] sm:$0xff]   ;;  %v155_v23 = vld [vmem:[%s220_s0 + $0x20] sm:$0xff]  }
   0x3   :  { %v130_v11 = vunpack.c.l.bf16 %v153_v6  ;;  %v131_v15 = vunpack.c.h.bf16 %v153_v6  ;;  %v134_v19 = vunpack.c.l.bf16 %v154_v14  ;;  %v135_v24 = vunpack.c.h.bf16 %v154_v14  ;;  %v156_v32 = vld [vmem:[%s220_s0 + $0x28] sm:$0xff]   ;;  %v157_v41 = vld [vmem:[%s220_s0 + $0x30] sm:$0xff]   ;;  %v158_v50 = vld [vmem:[%s220_s0 + $0x38] sm:$0xff]  }
   0x4   :  { %v49_v8 = vadd.f32 %v123_v4, %v122_v3  ;;  %v73_v9 = vmul.f32 %v122_v3, %v122_v3  ;;  %v74_v10 = vmul.f32 %v123_v4, %v123_v4  ;;  %v75_v13 = vmul.f32 %v126_v5, %v126_v5 }
   0x5   :  { %v76_v17 = vmul.f32 %v127_v7, %v127_v7  ;;  %v77_v21 = vmul.f32 %v130_v11, %v130_v11  ;;  %v78_v26 = vmul.f32 %v131_v15, %v131_v15  ;;  %v138_v28 = vunpack.c.l.bf16 %v155_v23 }
   0x6   :  { %v50_v12 = vadd.f32 %v126_v5, %v49_v8  ;;  %v89_v18 = vadd.f32 %v74_v10, %v73_v9  ;;  %v79_v30 = vmul.f32 %v134_v19, %v134_v19  ;;  %v139_v33 = vunpack.c.h.bf16 %v155_v23 }
   0x7   :  { %v80_v35 = vmul.f32 %v135_v24, %v135_v24  ;;  %v142_v37 = vunpack.c.l.bf16 %v156_v32  ;;  %v81_v39 = vmul.f32 %v138_v28, %v138_v28  ;;  %v143_v42 = vunpack.c.h.bf16 %v156_v32 }
   0x8   :  { %v51_v16 = vadd.f32 %v127_v7, %v50_v12  ;;  %v90_v22 = vadd.f32 %v89_v18, %v75_v13  ;;  %v82_v44 = vmul.f32 %v139_v33, %v139_v33  ;;  %v146_v46 = vunpack.c.l.bf16 %v157_v41 }
   0x9   :  { %v83_v48 = vmul.f32 %v142_v37, %v142_v37  ;;  %v147_v51 = vunpack.c.h.bf16 %v157_v41  ;;  %v84_v53 = vmul.f32 %v143_v42, %v143_v42  ;;  %v150_v55 = vunpack.c.l.bf16 %v158_v50 }
   0xa   :  { %v52_v20 = vadd.f32 %v130_v11, %v51_v16  ;;  %v91_v27 = vadd.f32 %v90_v22, %v76_v17  ;;  %v85_v57 = vmul.f32 %v146_v46, %v146_v46  ;;  %v151_v59 = vunpack.c.h.bf16 %v158_v50 }
   0xb   :  { %v86_v61 = vmul.f32 %v147_v51, %v147_v51  ;;  %v87_v0 = vmul.f32 %v150_v55, %v150_v55 }
   0xc   :  { %v53_v25 = vadd.f32 %v131_v15, %v52_v20  ;;  %v92_v31 = vadd.f32 %v91_v27, %v77_v21  ;;  %v88_v3 = vmul.f32 %v151_v59, %v151_v59  ;;  %v48_v15 = vld [vmem:[%s218_s1] sm:$0x1] }
   0xd   :  { %v72_v20 = vld [vmem:[%s219_s2] sm:$0x1] }
   0xe   :  { %v54_v29 = vadd.f32 %v134_v19, %v53_v25  ;;  %v93_v36 = vadd.f32 %v92_v31, %v78_v26 }
  0x10   :  { %v55_v34 = vadd.f32 %v135_v24, %v54_v29  ;;  %v94_v40 = vadd.f32 %v93_v36, %v79_v30 }
  0x12   :  { %v56_v38 = vadd.f32 %v138_v28, %v55_v34  ;;  %v95_v45 = vadd.f32 %v94_v40, %v80_v35 }
  0x14   :  { %v57_v43 = vadd.f32 %v139_v33, %v56_v38  ;;  %v96_v49 = vadd.f32 %v95_v45, %v81_v39 }
  0x16   :  { %v58_v47 = vadd.f32 %v142_v37, %v57_v43  ;;  %v97_v54 = vadd.f32 %v96_v49, %v82_v44 }
  0x18   :  { %v59_v52 = vadd.f32 %v143_v42, %v58_v47  ;;  %v98_v58 = vadd.f32 %v97_v54, %v83_v48 }
  0x1a   :  { %v60_v56 = vadd.f32 %v146_v46, %v59_v52  ;;  %v99_v62 = vadd.f32 %v98_v58, %v84_v53 }
  0x1c   :  { %v61_v60 = vadd.f32 %v147_v51, %v60_v56  ;;  %v100_v1 = vadd.f32 %v99_v62, %v85_v57 }
  0x1e   :  { %v62_v63 = vadd.f32 %v150_v55, %v61_v60  ;;  %v101_v4 = vadd.f32 %v100_v1, %v86_v61 }
  0x20   :  { %v63_v2 = vadd.f32 %v151_v59, %v62_v63  ;;  %v102_v6 = vadd.f32 %v101_v4, %v87_v0 }
  0x22   :  { %v64_v5 = vrot.slane %v63_v2, 4  ;;  %v103_v8 = vadd.f32 %v102_v6, %v88_v3 }
  0x24   :  { %v65_v7 = vadd.f32 %v64_v5, %v63_v2  ;;  %v104_v10 = vrot.slane %v103_v8, 4 }
  0x26   :  { %v66_v9 = vrot.slane %v65_v7, 2  ;;  %v105_v12 = vadd.f32 %v104_v10, %v103_v8 }
  0x28   :  { %v67_v11 = vadd.f32 %v66_v9, %v65_v7  ;;  %v106_v14 = vrot.slane %v105_v12, 2 }
  0x2a   :  { %v68_v13 = vrot.slane %v67_v11, 1  ;;  %v107_v17 = vadd.f32 %v106_v14, %v105_v12 }
  0x2c   :  { %v69_v16 = vadd.f32 %v68_v13, %v67_v11  ;;  %v108_v19 = vrot.slane %v107_v17, 1 }
  0x2e   :  { %v70_v18 = vadd.f32 %v69_v16, %v48_v15  ;;  %v109_v21 = vadd.f32 %v108_v19, %v107_v17 }
  0x30   :  { %71 = vst [vmem:[%s218_s1] sm:$0x1] %v70_v18  ;;  %v110_v22 = vadd.f32 %v109_v21, %v72_v20 }
  0x32   :  { %111 = vst [vmem:[%s219_s2] sm:$0x1] %v110_v22 }

// kernel: d2_forward.16
= control target key start
LH: loop header
LB: loop body
LE: loop exit
PB: predicated region body
PF: predicated region fallthrough
CT: control target
= control target key end

     0   :  { %s468_s9 = smov 0   ;;  %s470_s10 = smov 0   ;;  %s547_s0 = inlined_call_operand.vmem [shape: bf16[32,256], index: 0, kind: input, shape index: {}]   ;;  %s548_s1 = inlined_call_operand.vmem [shape: f32[1,256], index: 1, kind: output, shape index: {0}]   ;;  %s549_s2 = inlined_call_operand.vmem [shape: f32[1,256], index: 2, kind: output, shape index: {1}]  }
   0x1   :  { %s472_s11 = smov 0   ;;  %s474_s12 = smov 0  }
   0x2   :  { %s476_s13 = smov 0  }
   0x3 LB: > { %s25_s14 = sadd.s32 1, %s446_s12  ;;  %p41_p1 = scmp.ne.s32.totalorder %s438_s10, %s434_s9  ;;  %s450_s13 = sphi %s476_s13, %s13_s13   ;;  %s446_s12 = sphi %s474_s12, %s553_s12   ;;  %s442_s11 = sphi %s472_s11, %s552_s11   ;;  %s438_s10 = sphi %s470_s10, %s551_s10   ;;  %s434_s9 = sphi %s468_s9, %s550_s9  }
   0x4   : > { %p27_p0 = scmp.ge.s32.totalorder %s25_s14, 2  ;;  %p42_p2 = scmp.eq.s32.totalorder %s450_s13, 0 }
   0x5   : > { %s34_s16 = sadd.s32 1, %s438_s10  ;;  %p355_p5 = scmp.ge.s32.totalorder %s450_s13, 2 }
   0x6   : > { %s555_s14 = smov (%p27_p0, %s25_s14), 0  ;;  %p43_p3 = por %p42_p2, %p41_p1 }
   0x7   : > { %s30_s15 = ssub.s32 %s446_s12, %s555_s14  ;;  %119 = sbr.rel (%p355_p5) target bundleno = 18 (0x12), region = 16 }
   0x8   : > { %p32_p4 = scmp.eq.s32.totalorder %s30_s15, 0 }
   0xa   : > { %s503_s17 = scalar_select %p32_p4, %s438_s10, %s34_s16  }
   0xc   : > { %122 = sbr.rel (!%p43_p3) target bundleno = 18 (0x12), region = 20  ;;  %s124_s18 = sand.u32 (%p43_p3), 1, %s438_s10  }
   0xd   : > { %s357_s19 = sshll.u32 (%p43_p3), %s446_s12, 2  ;;  %s356_s20 = sshll.u32 (%p43_p3), %s124_s18, 4 }
   0xe   : > { %s131_s23 = scalar_lea.vmem (%p43_p3), %s547_s0, %s357_s19  ;;  %s126_s24 = scalar_lea.vmem (%p43_p3), [#allocation2], %s356_s20 }
   0xf   : > { %v148_v0 = vld [vmem:[%s131_s23] sm:$0xf] (%p43_p3)  ;;  %v150_v1 = vld [vmem:[%s131_s23 + $0x8] sm:$0xf] (%p43_p3)  ;;  %v152_v2 = vld [vmem:[%s131_s23 + $0x10] sm:$0xf] (%p43_p3) }
  0x10   : > { %149 = vst [vmem:[%s126_s24] sm:$0xf] (%p43_p3), %v148_v0  ;;  %151 = vst [vmem:[%s126_s24 + $0x4] sm:$0xf] (%p43_p3), %v150_v1  ;;  %v154_v3 = vld [vmem:[%s131_s23 + $0x18] sm:$0xf] (%p43_p3) }
  0x11   : > { %153 = vst [vmem:[%s126_s24 + $0x8] sm:$0xf] %v152_v2  ;;  %155 = vst [vmem:[%s126_s24 + $0xc] sm:$0xf] %v154_v3 }
  0x12 PF: > { %p358_p6 = scmp.ge.s32.totalorder %s450_s13, 1  ;;  %p186_p7 = scmp.lt.s32.totalorder %s450_s13, 3 }
  0x14   : > { %p187_p8 = pnand %p358_p6, %p186_p7 }
  0x15   : > { %p216_p9 = scmp.lt.s32.totalorder (!%p187_p8), %s442_s11, 1  ;;  %s193_s25 = sand.u32 (!%p187_p8), 1, %s434_s9  }
  0x16   : > { %190 = sbr.rel (%p187_p8) target bundleno = 53 (0x35), region = 61  ;;  %s359_s26 = sshll.u32 (!%p187_p8), %s193_s25, 4 }
  0x17   : > { %s195_s5 = scalar_lea.vmem (!%p187_p8), [#allocation2], %s359_s26 }
  0x1b   : > { %s557_s11 = smov (!%p216_p9, %s442_s11), 1  ;;  %v363_v4 = vld [vmem:[%s195_s5] sm:$0xff]   ;;  %v370_v5 = vld [vmem:[%s195_s5 + $0x8] sm:$0xff]   ;;  %v452_v6 = vmov 0.0  }
  0x1c   : > { %s519_s29 = scalar_lea.vmem %s548_s1, %s557_s11  ;;  %s524_s4 = scalar_lea.vmem %s549_s2, %s557_s11  ;;  %v364_v7 = vunpack.c.l.bf16 %v363_v4  ;;  %v365_v8 = vunpack.c.h.bf16 %v363_v4  ;;  %v368_v9 = vunpack.c.l.bf16 %v370_v5  ;;  %v369_v10 = vunpack.c.h.bf16 %v370_v5 }
  0x1d   : > { %226 = vst [vmem:[%s519_s29] sm:$0x1] %v452_v6  ;;  %227 = vst [vmem:[%s524_s4] sm:$0x1] %v452_v6 }
  0x1e   : > { %v237_v11 = vadd.f32 %v365_v8, %v364_v7  ;;  %v249_v12 = vmul.f32 %v364_v7, %v364_v7  ;;  %v250_v13 = vmul.f32 %v365_v8, %v365_v8  ;;  %v251_v14 = vmul.f32 %v368_v9, %v368_v9 }
  0x1f   : > { %v252_v16 = vmul.f32 %v369_v10, %v369_v10 }
  0x20   : > { %v238_v15 = vadd.f32 %v368_v9, %v237_v11  ;;  %v253_v17 = vadd.f32 %v250_v13, %v249_v12 }
  0x22   : > { %v239_v18 = vadd.f32 %v369_v10, %v238_v15  ;;  %v254_v19 = vadd.f32 %v253_v17, %v251_v14 }
  0x24   : > { %v240_v20 = vrot.slane %v239_v18, 4  ;;  %v255_v21 = vadd.f32 %v254_v19, %v252_v16  ;;  %v236_v30 = vld [vmem:[%s519_s29] sm:$0x1] }
  0x25   : > { %v248_v33 = vld [vmem:[%s524_s4] sm:$0x1] }
  0x26   : > { %v241_v22 = vadd.f32 %v240_v20, %v239_v18  ;;  %v256_v23 = vrot.slane %v255_v21, 4 }
  0x28   : > { %v242_v24 = vrot.slane %v241_v22, 2  ;;  %v257_v25 = vadd.f32 %v256_v23, %v255_v21 }
  0x2a   : > { %v243_v26 = vadd.f32 %v242_v24, %v241_v22  ;;  %v258_v27 = vrot.slane %v257_v25, 2 }
  0x2c   : > { %v244_v28 = vrot.slane %v243_v26, 1  ;;  %v259_v29 = vadd.f32 %v258_v27, %v257_v25 }
  0x2e   : > { %v245_v31 = vadd.f32 %v244_v28, %v243_v26  ;;  %v260_v32 = vrot.slane %v259_v29, 1 }
  0x30   : > { %v246_v34 = vadd.f32 %v245_v31, %v236_v30  ;;  %v261_v35 = vadd.f32 %v260_v32, %v259_v29 }
  0x32   : > { %247 = vst [vmem:[%s519_s29] sm:$0x1] %v246_v34  ;;  %v262_v36 = vadd.f32 %v261_v35, %v248_v33 }
  0x34   : > { %263 = vst [vmem:[%s524_s4] sm:$0x1] %v262_v36 }
  0x35 PF: > { %s13_s13 = sadd.s32 1, %s450_s13   ;;  %s550_s9 = smov %s438_s10 }
  0x36   : > { %p10_p10 = scmp.ge.s32.totalorder %s13_s13, 4   ;;  %s551_s10 = smov %s503_s17 }
  0x37   : > { %s552_s11 = smov %s446_s12  ;;  %s553_s12 = smov %s555_s14 }
  0x38   :  { %12 = sbr.rel (!%p10_p10) target bundleno = 3 (0x3), region = 116 }

// kernel: d2_forward.15
= control target key start
LH: loop header
LB: loop body
LE: loop exit
PB: predicated region body
PF: predicated region fallthrough
CT: control target
= control target key end

     0   :  { %s3657_s9 = smov 0   ;;  %s3659_s10 = smov 0   ;;  %s4491_s0 = inlined_call_operand.vmem [shape: bf16[32,2048], index: 0, kind: input, shape index: {}]   ;;  %s4492_s1 = inlined_call_operand.vmem [shape: bf16[2048,256], index: 1, kind: input, shape index: {}]   ;;  %s4493_s2 = inlined_call_operand.vmem [shape: bf16[32,256], index: 2, kind: output, shape index: {}]  }
   0x1   :  { %s3661_s11 = smov 0   ;;  %s3663_s12 = smov 0  }
   0x2   :  { %s3665_s13 = smov 0  }
   0x3 LB: > { %s21_s14 = sadd.s32 1, %s3636_s12  ;;  %s3017_s15 = sadd.s32 4294967295, %s3640_s13   ;;  %s3640_s13 = sphi %s3665_s13, %s12_s13   ;;  %s3636_s12 = sphi %s3663_s12, %s4498_s12   ;;  %s3632_s11 = sphi %s3661_s11, %s4497_s11   ;;  %s3628_s10 = sphi %s3659_s10, %s4496_s10   ;;  %s3624_s9 = sphi %s3657_s9, %s4495_s9  }
   0x4   : > { %p22_p0 = scmp.ge.s32.totalorder %s21_s14, 2  ;;  %p64_p1 = scmp.ne.s32.totalorder %s3628_s10, %s3624_s9 }
   0x5   : > { %p65_p2 = scmp.eq.s32.totalorder %s3640_s13, 0  ;;  %p96_p4 = scmp.eq.s32.totalorder %s3017_s15, 1 }
   0x6   : > { %s4500_s14 = smov (%p22_p0, %s21_s14), 0  ;;  %s57_s17 = sadd.s32 1, %s3628_s10 }
   0x7   : > { %p66_p3 = por %p65_p2, %p64_p1  ;;  %s54_s16 = ssub.s32 %s3636_s12, %s4500_s14 }
   0x8   : > { %p55_p5 = scmp.eq.s32.totalorder %s54_s16, 0  ;;  %p3692_p6 = por %p96_p4, %p64_p1 }
   0x9   : > { %p3021_p7 = scmp.ge.s32.totalorder %s3640_s13, 2 }
   0xa   : > { %s3697_s19 = scalar_select %p55_p5, %s3628_s10, %s57_s17  }
   0xb   : > { %128 = sbr.rel (%p3021_p7) target bundleno = 190 (0xbe), region = 20 }
  0x10   : > { %131 = sbr.rel (!%p66_p3) target bundleno = 190 (0xbe), region = 24  ;;  %s133_s20 = sand.u32 (%p66_p3), 1, %s3628_s10  }
  0x11   : > { %s3023_s21 = sshll.u32 (%p66_p3), %s3636_s12, 2  ;;  %s3022_s22 = sshll.u32 (%p66_p3), %s133_s20, 10 }
  0x12   : > { %s3705_s25 = scalar_lea.vmem (%p66_p3), %s4492_s1, %s3023_s21  ;;  %s3709_s26 = scalar_lea.vmem (%p66_p3), [#allocation2], %s3022_s22 }
  0x13   : > { %v154_v0 = vld [vmem:[%s3705_s25] sm:$0xf] (%p66_p3)  ;;  %v156_v1 = vld [vmem:[%s3705_s25 + $0x8] sm:$0xf] (%p66_p3)  ;;  %v158_v2 = vld [vmem:[%s3705_s25 + $0x10] sm:$0xf] (%p66_p3) }
  0x14   : > { %155 = vst [vmem:[%s3709_s26] sm:$0xf] (%p66_p3), %v154_v0  ;;  %157 = vst [vmem:[%s3709_s26 + $0x4] sm:$0xf] (%p66_p3), %v156_v1  ;;  %v160_v3 = vld [vmem:[%s3705_s25 + $0x18] sm:$0xf] (%p66_p3) }
  0x15   : > { %v162_v4 = vld [vmem:[%s3705_s25 + $0x20] sm:$0xf]  ;;  %159 = vst [vmem:[%s3709_s26 + $0x8] sm:$0xf] %v158_v2  ;;  %161 = vst [vmem:[%s3709_s26 + $0xc] sm:$0xf] %v160_v3 }
  0x16   : > { %163 = vst [vmem:[%s3709_s26 + $0x10] sm:$0xf] %v162_v4  ;;  %v164_v5 = vld [vmem:[%s3705_s25 + $0x28] sm:$0xf]  ;;  %v166_v6 = vld [vmem:[%s3705_s25 + $0x30] sm:$0xf] }
  0x17   : > { %v168_v7 = vld [vmem:[%s3705_s25 + $0x38] sm:$0xf]  ;;  %165 = vst [vmem:[%s3709_s26 + $0x14] sm:$0xf] %v164_v5  ;;  %167 = vst [vmem:[%s3709_s26 + $0x18] sm:$0xf] %v166_v6 }
  0x18   : > { %169 = vst [vmem:[%s3709_s26 + $0x1c] sm:$0xf] %v168_v7  ;;  %v170_v8 = vld [vmem:[%s3705_s25 + $0x40] sm:$0xf]  ;;  %v172_v9 = vld [vmem:[%s3705_s25 + $0x48] sm:$0xf] }
  0x19   : > { %v174_v10 = vld [vmem:[%s3705_s25 + $0x50] sm:$0xf]  ;;  %171 = vst [vmem:[%s3709_s26 + $0x20] sm:$0xf] %v170_v8  ;;  %173 = vst [vmem:[%s3709_s26 + $0x24] sm:$0xf] %v172_v9 }
  0x1a   : > { %175 = vst [vmem:[%s3709_s26 + $0x28] sm:$0xf] %v174_v10  ;;  %v176_v11 = vld [vmem:[%s3705_s25 + $0x58] sm:$0xf]  ;;  %v178_v12 = vld [vmem:[%s3705_s25 + $0x60] sm:$0xf] }
  0x1b   : > { %v180_v13 = vld [vmem:[%s3705_s25 + $0x68] sm:$0xf]  ;;  %177 = vst [vmem:[%s3709_s26 + $0x2c] sm:$0xf] %v176_v11  ;;  %179 = vst [vmem:[%s3709_s26 + $0x30] sm:$0xf] %v178_v12 }
  0x1c   : > { %181 = vst [vmem:[%s3709_s26 + $0x34] sm:$0xf] %v180_v13  ;;  %v182_v14 = vld [vmem:[%s3705_s25 + $0x70] sm:$0xf]  ;;  %v184_v15 = vld [vmem:[%s3705_s25 + $0x78] sm:$0xf] }
  0x1d   : > { %v186_v16 = vld [vmem:[%s3705_s25 + $0x80] sm:$0xf]  ;;  %183 = vst [vmem:[%s3709_s26 + $0x38] sm:$0xf] %v182_v14  ;;  %185 = vst [vmem:[%s3709_s26 + $0x3c] sm:$0xf] %v184_v15 }
  0x1e   : > { %187 = vst [vmem:[%s3709_s26 + $0x40] sm:$0xf] %v186_v16  ;;  %v188_v17 = vld [vmem:[%s3705_s25 + $0x88] sm:$0xf]  ;;  %v190_v18 = vld [vmem:[%s3705_s25 + $0x90] sm:$0xf] }
  0x1f   : > { %v192_v19 = vld [vmem:[%s3705_s25 + $0x98] sm:$0xf]  ;;  %189 = vst [vmem:[%s3709_s26 + $0x44] sm:$0xf] %v188_v17  ;;  %191 = vst [vmem:[%s3709_s26 + $0x48] sm:$0xf] %v190_v18 }
  0x20   : > { %193 = vst [vmem:[%s3709_s26 + $0x4c] sm:$0xf] %v192_v19  ;;  %v194_v20 = vld [vmem:[%s3705_s25 + $0xa0] sm:$0xf]  ;;  %v196_v21 = vld [vmem:[%s3705_s25 + $0xa8] sm:$0xf] }
  0x21   : > { %v198_v22 = vld [vmem:[%s3705_s25 + $0xb0] sm:$0xf]  ;;  %195 = vst [vmem:[%s3709_s26 + $0x50] sm:$0xf] %v194_v20  ;;  %197 = vst [vmem:[%s3709_s26 + $0x54] sm:$0xf] %v196_v21 }
  0x22   : > { %199 = vst [vmem:[%s3709_s26 + $0x58] sm:$0xf] %v198_v22  ;;  %v200_v23 = vld [vmem:[%s3705_s25 + $0xb8] sm:$0xf]  ;;  %v202_v24 = vld [vmem:[%s3705_s25 + $0xc0] sm:$0xf] }
  0x23   : > { %v204_v25 = vld [vmem:[%s3705_s25 + $0xc8] sm:$0xf]  ;;  %201 = vst [vmem:[%s3709_s26 + $0x5c] sm:$0xf] %v200_v23  ;;  %203 = vst [vmem:[%s3709_s26 + $0x60] sm:$0xf] %v202_v24 }
  0x24   : > { %205 = vst [vmem:[%s3709_s26 + $0x64] sm:$0xf] %v204_v25  ;;  %v206_v26 = vld [vmem:[%s3705_s25 + $0xd0] sm:$0xf]  ;;  %v208_v27 = vld [vmem:[%s3705_s25 + $0xd8] sm:$0xf] }
  0x25   : > { %v210_v28 = vld [vmem:[%s3705_s25 + $0xe0] sm:$0xf]  ;;  %207 = vst [vmem:[%s3709_s26 + $0x68] sm:$0xf] %v206_v26  ;;  %209 = vst [vmem:[%s3709_s26 + $0x6c] sm:$0xf] %v208_v27 }
  0x26   : > { %211 = vst [vmem:[%s3709_s26 + $0x70] sm:$0xf] %v210_v28  ;;  %v212_v29 = vld [vmem:[%s3705_s25 + $0xe8] sm:$0xf]  ;;  %v214_v30 = vld [vmem:[%s3705_s25 + $0xf0] sm:$0xf] }
  0x27   : > { %v216_v31 = vld [vmem:[%s3705_s25 + $0xf8] sm:$0xf]  ;;  %213 = vst [vmem:[%s3709_s26 + $0x74] sm:$0xf] %v212_v29  ;;  %215 = vst [vmem:[%s3709_s26 + $0x78] sm:$0xf] %v214_v30 }
  0x28   : > { %217 = vst [vmem:[%s3709_s26 + $0x7c] sm:$0xf] %v216_v31  ;;  %v218_v32 = vld [vmem:[%s3705_s25 + $0x100] sm:$0xf]  ;;  %v220_v33 = vld [vmem:[%s3705_s25 + $0x108] sm:$0xf] }
  0x29   : > { %v222_v34 = vld [vmem:[%s3705_s25 + $0x110] sm:$0xf]  ;;  %219 = vst [vmem:[%s3709_s26 + $0x80] sm:$0xf] %v218_v32  ;;  %221 = vst [vmem:[%s3709_s26 + $0x84] sm:$0xf] %v220_v33 }
  0x2a   : > { %223 = vst [vmem:[%s3709_s26 + $0x88] sm:$0xf] %v222_v34  ;;  %v224_v35 = vld [vmem:[%s3705_s25 + $0x118] sm:$0xf]  ;;  %v226_v36 = vld [vmem:[%s3705_s25 + $0x120] sm:$0xf] }
  0x2b   : > { %v228_v37 = vld [vmem:[%s3705_s25 + $0x128] sm:$0xf]  ;;  %225 = vst [vmem:[%s3709_s26 + $0x8c] sm:$0xf] %v224_v35  ;;  %227 = vst [vmem:[%s3709_s26 + $0x90] sm:$0xf] %v226_v36 }
  0x2c   : > { %229 = vst [vmem:[%s3709_s26 + $0x94] sm:$0xf] %v228_v37  ;;  %v230_v38 = vld [vmem:[%s3705_s25 + $0x130] sm:$0xf]  ;;  %v232_v39 = vld [vmem:[%s3705_s25 + $0x138] sm:$0xf] }
  0x2d   : > { %v234_v40 = vld [vmem:[%s3705_s25 + $0x140] sm:$0xf]  ;;  %231 = vst [vmem:[%s3709_s26 + $0x98] sm:$0xf] %v230_v38  ;;  %233 = vst [vmem:[%s3709_s26 + $0x9c] sm:$0xf] %v232_v39 }
  0x2e   : > { %235 = vst [vmem:[%s3709_s26 + $0xa0] sm:$0xf] %v234_v40  ;;  %v236_v41 = vld [vmem:[%s3705_s25 + $0x148] sm:$0xf]  ;;  %v238_v42 = vld [vmem:[%s3705_s25 + $0x150] sm:$0xf] }
  0x2f   : > { %v240_v43 = vld [vmem:[%s3705_s25 + $0x158] sm:$0xf]  ;;  %237 = vst [vmem:[%s3709_s26 + $0xa4] sm:$0xf] %v236_v41  ;;  %239 = vst [vmem:[%s3709_s26 + $0xa8] sm:$0xf] %v238_v42 }
  0x30   : > { %241 = vst [vmem:[%s3709_s26 + $0xac] sm:$0xf] %v240_v43  ;;  %v242_v44 = vld [vmem:[%s3705_s25 + $0x160] sm:$0xf]  ;;  %v244_v45 = vld [vmem:[%s3705_s25 + $0x168] sm:$0xf] }
  0x31   : > { %v246_v46 = vld [vmem:[%s3705_s25 + $0x170] sm:$0xf]  ;;  %243 = vst [vmem:[%s3709_s26 + $0xb0] sm:$0xf] %v242_v44  ;;  %245 = vst [vmem:[%s3709_s26 + $0xb4] sm:$0xf] %v244_v45 }
  0x32   : > { %247 = vst [vmem:[%s3709_s26 + $0xb8] sm:$0xf] %v246_v46  ;;  %v248_v47 = vld [vmem:[%s3705_s25 + $0x178] sm:$0xf]  ;;  %v250_v48 = vld [vmem:[%s3705_s25 + $0x180] sm:$0xf] }
  0x33   : > { %v252_v49 = vld [vmem:[%s3705_s25 + $0x188] sm:$0xf]  ;;  %249 = vst [vmem:[%s3709_s26 + $0xbc] sm:$0xf] %v248_v47  ;;  %251 = vst [vmem:[%s3709_s26 + $0xc0] sm:$0xf] %v250_v48 }
  0x34   : > { %253 = vst [vmem:[%s3709_s26 + $0xc4] sm:$0xf] %v252_v49  ;;  %v254_v50 = vld [vmem:[%s3705_s25 + $0x190] sm:$0xf]  ;;  %v256_v51 = vld [vmem:[%s3705_s25 + $0x198] sm:$0xf] }
  0x35   : > { %v258_v52 = vld [vmem:[%s3705_s25 + $0x1a0] sm:$0xf]  ;;  %255 = vst [vmem:[%s3709_s26 + $0xc8] sm:$0xf] %v254_v50  ;;  %257 = vst [vmem:[%s3709_s26 + $0xcc] sm:$0xf] %v256_v51 }
  0x36   : > { %259 = vst [vmem:[%s3709_s26 + $0xd0] sm:$0xf] %v258_v52  ;;  %v260_v53 = vld [vmem:[%s3705_s25 + $0x1a8] sm:$0xf]  ;;  %v262_v54 = vld [vmem:[%s3705_s25 + $0x1b0] sm:$0xf] }
  0x37   : > { %v264_v55 = vld [vmem:[%s3705_s25 + $0x1b8] sm:$0xf]  ;;  %261 = vst [vmem:[%s3709_s26 + $0xd4] sm:$0xf] %v260_v53  ;;  %263 = vst [vmem:[%s3709_s26 + $0xd8] sm:$0xf] %v262_v54 }
  0x38   : > { %265 = vst [vmem:[%s3709_s26 + $0xdc] sm:$0xf] %v264_v55  ;;  %v266_v56 = vld [vmem:[%s3705_s25 + $0x1c0] sm:$0xf]  ;;  %v268_v57 = vld [vmem:[%s3705_s25 + $0x1c8] sm:$0xf] }
  0x39   : > { %v270_v58 = vld [vmem:[%s3705_s25 + $0x1d0] sm:$0xf]  ;;  %267 = vst [vmem:[%s3709_s26 + $0xe0] sm:$0xf] %v266_v56  ;;  %269 = vst [vmem:[%s3709_s26 + $0xe4] sm:$0xf] %v268_v57 }
  0x3a   : > { %271 = vst [vmem:[%s3709_s26 + $0xe8] sm:$0xf] %v270_v58  ;;  %v272_v59 = vld [vmem:[%s3705_s25 + $0x1d8] sm:$0xf]  ;;  %v274_v60 = vld [vmem:[%s3705_s25 + $0x1e0] sm:$0xf] }
  0x3b   : > { %v276_v61 = vld [vmem:[%s3705_s25 + $0x1e8] sm:$0xf]  ;;  %273 = vst [vmem:[%s3709_s26 + $0xec] sm:$0xf] %v272_v59  ;;  %275 = vst [vmem:[%s3709_s26 + $0xf0] sm:$0xf] %v274_v60 }
  0x3c   : > { %277 = vst [vmem:[%s3709_s26 + $0xf4] sm:$0xf] %v276_v61  ;;  %v278_v62 = vld [vmem:[%s3705_s25 + $0x1f0] sm:$0xf]  ;;  %v280_v63 = vld [vmem:[%s3705_s25 + $0x1f8] sm:$0xf] }
  0x3d   : > { %v282_v0 = vld [vmem:[%s3705_s25 + $0x200] sm:$0xf]  ;;  %279 = vst [vmem:[%s3709_s26 + $0xf8] sm:$0xf] %v278_v62  ;;  %281 = vst [vmem:[%s3709_s26 + $0xfc] sm:$0xf] %v280_v63 }
  0x3e   : > { %283 = vst [vmem:[%s3709_s26 + $0x100] sm:$0xf] %v282_v0  ;;  %v284_v1 = vld [vmem:[%s3705_s25 + $0x208] sm:$0xf]  ;;  %v286_v2 = vld [vmem:[%s3705_s25 + $0x210] sm:$0xf] }
  0x3f   : > { %v288_v3 = vld [vmem:[%s3705_s25 + $0x218] sm:$0xf]  ;;  %285 = vst [vmem:[%s3709_s26 + $0x104] sm:$0xf] %v284_v1  ;;  %287 = vst [vmem:[%s3709_s26 + $0x108] sm:$0xf] %v286_v2 }
  0x40   : > { %289 = vst [vmem:[%s3709_s26 + $0x10c] sm:$0xf] %v288_v3  ;;  %v290_v4 = vld [vmem:[%s3705_s25 + $0x220] sm:$0xf]  ;;  %v292_v5 = vld [vmem:[%s3705_s25 + $0x228] sm:$0xf] }
  0x41   : > { %v294_v6 = vld [vmem:[%s3705_s25 + $0x230] sm:$0xf]  ;;  %291 = vst [vmem:[%s3709_s26 + $0x110] sm:$0xf] %v290_v4  ;;  %293 = vst [vmem:[%s3709_s26 + $0x114] sm:$0xf] %v292_v5 }
  0x42   : > { %295 = vst [vmem:[%s3709_s26 + $0x118] sm:$0xf] %v294_v6  ;;  %v296_v7 = vld [vmem:[%s3705_s25 + $0x238] sm:$0xf]  ;;  %v298_v8 = vld [vmem:[%s3705_s25 + $0x240] sm:$0xf] }
  0x43   : > { %v300_v9 = vld [vmem:[%s3705_s25 + $0x248] sm:$0xf]  ;;  %297 = vst [vmem:[%s3709_s26 + $0x11c] sm:$0xf] %v296_v7  ;;  %299 = vst [vmem:[%s3709_s26 + $0x120] sm:$0xf] %v298_v8 }
  0x44   : > { %301 = vst [vmem:[%s3709_s26 + $0x124] sm:$0xf] %v300_v9  ;;  %v302_v10 = vld [vmem:[%s3705_s25 + $0x250] sm:$0xf]  ;;  %v304_v11 = vld [vmem:[%s3705_s25 + $0x258] sm:$0xf] }
  0x45   : > { %v306_v12 = vld [vmem:[%s3705_s25 + $0x260] sm:$0xf]  ;;  %303 = vst [vmem:[%s3709_s26 + $0x128] sm:$0xf] %v302_v10  ;;  %305 = vst [vmem:[%s3709_s26 + $0x12c] sm:$0xf] %v304_v11 }
  0x46   : > { %307 = vst [vmem:[%s3709_s26 + $0x130] sm:$0xf] %v306_v12  ;;  %v308_v13 = vld [vmem:[%s3705_s25 + $0x268] sm:$0xf]  ;;  %v310_v14 = vld [vmem:[%s3705_s25 + $0x270] sm:$0xf] }
  0x47   : > { %v312_v15 = vld [vmem:[%s3705_s25 + $0x278] sm:$0xf]  ;;  %309 = vst [vmem:[%s3709_s26 + $0x134] sm:$0xf] %v308_v13  ;;  %311 = vst [vmem:[%s3709_s26 + $0x138] sm:$0xf] %v310_v14 }
  0x48   : > { %313 = vst [vmem:[%s3709_s26 + $0x13c] sm:$0xf] %v312_v15  ;;  %v314_v16 = vld [vmem:[%s3705_s25 + $0x280] sm:$0xf]  ;;  %v316_v17 = vld [vmem:[%s3705_s25 + $0x288] sm:$0xf] }
  0x49   : > { %v318_v18 = vld [vmem:[%s3705_s25 + $0x290] sm:$0xf]  ;;  %315 = vst [vmem:[%s3709_s26 + $0x140] sm:$0xf] %v314_v16  ;;  %317 = vst [vmem:[%s3709_s26 + $0x144] sm:$0xf] %v316_v17 }
  0x4a   : > { %319 = vst [vmem:[%s3709_s26 + $0x148] sm:$0xf] %v318_v18  ;;  %v320_v19 = vld [vmem:[%s3705_s25 + $0x298] sm:$0xf]  ;;  %v322_v20 = vld [vmem:[%s3705_s25 + $0x2a0] sm:$0xf] }
  0x4b   : > { %v324_v21 = vld [vmem:[%s3705_s25 + $0x2a8] sm:$0xf]  ;;  %321 = vst [vmem:[%s3709_s26 + $0x14c] sm:$0xf] %v320_v19  ;;  %323 = vst [vmem:[%s3709_s26 + $0x150] sm:$0xf] %v322_v20 }
  0x4c   : > { %325 = vst [vmem:[%s3709_s26 + $0x154] sm:$0xf] %v324_v21  ;;  %v326_v22 = vld [vmem:[%s3705_s25 + $0x2b0] sm:$0xf]  ;;  %v328_v23 = vld [vmem:[%s3705_s25 + $0x2b8] sm:$0xf] }
  0x4d   : > { %v330_v24 = vld [vmem:[%s3705_s25 + $0x2c0] sm:$0xf]  ;;  %327 = vst [vmem:[%s3709_s26 + $0x158] sm:$0xf] %v326_v22  ;;  %329 = vst [vmem:[%s3709_s26 + $0x15c] sm:$0xf] %v328_v23 }
  0x4e   : > { %331 = vst [vmem:[%s3709_s26 + $0x160] sm:$0xf] %v330_v24  ;;  %v332_v25 = vld [vmem:[%s3705_s25 + $0x2c8] sm:$0xf]  ;;  %v334_v26 = vld [vmem:[%s3705_s25 + $0x2d0] sm:$0xf] }
  0x4f   : > { %v336_v27 = vld [vmem:[%s3705_s25 + $0x2d8] sm:$0xf]  ;;  %333 = vst [vmem:[%s3709_s26 + $0x164] sm:$0xf] %v332_v25  ;;  %335 = vst [vmem:[%s3709_s26 + $0x168] sm:$0xf] %v334_v26 }
  0x50   : > { %337 = vst [vmem:[%s3709_s26 + $0x16c] sm:$0xf] %v336_v27  ;;  %v338_v28 = vld [vmem:[%s3705_s25 + $0x2e0] sm:$0xf]  ;;  %v340_v29 = vld [vmem:[%s3705_s25 + $0x2e8] sm:$0xf] }
  0x51   : > { %v342_v30 = vld [vmem:[%s3705_s25 + $0x2f0] sm:$0xf]  ;;  %339 = vst [vmem:[%s3709_s26 + $0x170] sm:$0xf] %v338_v28  ;;  %341 = vst [vmem:[%s3709_s26 + $0x174] sm:$0xf] %v340_v29 }
  0x52   : > { %343 = vst [vmem:[%s3709_s26 + $0x178] sm:$0xf] %v342_v30  ;;  %v344_v31 = vld [vmem:[%s3705_s25 + $0x2f8] sm:$0xf]  ;;  %v346_v32 = vld [vmem:[%s3705_s25 + $0x300] sm:$0xf] }
  0x53   : > { %v348_v33 = vld [vmem:[%s3705_s25 + $0x308] sm:$0xf]  ;;  %345 = vst [vmem:[%s3709_s26 + $0x17c] sm:$0xf] %v344_v31  ;;  %347 = vst [vmem:[%s3709_s26 + $0x180] sm:$0xf] %v346_v32 }
  0x54   : > { %349 = vst [vmem:[%s3709_s26 + $0x184] sm:$0xf] %v348_v33  ;;  %v350_v34 = vld [vmem:[%s3705_s25 + $0x310] sm:$0xf]  ;;  %v352_v35 = vld [vmem:[%s3705_s25 + $0x318] sm:$0xf] }
  0x55   : > { %v354_v36 = vld [vmem:[%s3705_s25 + $0x320] sm:$0xf]  ;;  %351 = vst [vmem:[%s3709_s26 + $0x188] sm:$0xf] %v350_v34  ;;  %353 = vst [vmem:[%s3709_s26 + $0x18c] sm:$0xf] %v352_v35 }
  0x56   : > { %355 = vst [vmem:[%s3709_s26 + $0x190] sm:$0xf] %v354_v36  ;;  %v356_v37 = vld [vmem:[%s3705_s25 + $0x328] sm:$0xf]  ;;  %v358_v38 = vld [vmem:[%s3705_s25 + $0x330] sm:$0xf] }
  0x57   : > { %v360_v39 = vld [vmem:[%s3705_s25 + $0x338] sm:$0xf]  ;;  %357 = vst [vmem:[%s3709_s26 + $0x194] sm:$0xf] %v356_v37  ;;  %359 = vst [vmem:[%s3709_s26 + $0x198] sm:$0xf] %v358_v38 }
  0x58   : > { %361 = vst [vmem:[%s3709_s26 + $0x19c] sm:$0xf] %v360_v39  ;;  %v362_v40 = vld [vmem:[%s3705_s25 + $0x340] sm:$0xf]  ;;  %v364_v41 = vld [vmem:[%s3705_s25 + $0x348] sm:$0xf] }
  0x59   : > { %v366_v42 = vld [vmem:[%s3705_s25 + $0x350] sm:$0xf]  ;;  %363 = vst [vmem:[%s3709_s26 + $0x1a0] sm:$0xf] %v362_v40  ;;  %365 = vst [vmem:[%s3709_s26 + $0x1a4] sm:$0xf] %v364_v41 }
  0x5a   : > { %367 = vst [vmem:[%s3709_s26 + $0x1a8] sm:$0xf] %v366_v42  ;;  %v368_v43 = vld [vmem:[%s3705_s25 + $0x358] sm:$0xf]  ;;  %v370_v44 = vld [vmem:[%s3705_s25 + $0x360] sm:$0xf] }
  0x5b   : > { %v372_v45 = vld [vmem:[%s3705_s25 + $0x368] sm:$0xf]  ;;  %369 = vst [vmem:[%s3709_s26 + $0x1ac] sm:$0xf] %v368_v43  ;;  %371 = vst [vmem:[%s3709_s26 + $0x1b0] sm:$0xf] %v370_v44 }
  0x5c   : > { %373 = vst [vmem:[%s3709_s26 + $0x1b4] sm:$0xf] %v372_v45  ;;  %v374_v46 = vld [vmem:[%s3705_s25 + $0x370] sm:$0xf]  ;;  %v376_v47 = vld [vmem:[%s3705_s25 + $0x378] sm:$0xf] }
  0x5d   : > { %v378_v48 = vld [vmem:[%s3705_s25 + $0x380] sm:$0xf]  ;;  %375 = vst [vmem:[%s3709_s26 + $0x1b8] sm:$0xf] %v374_v46  ;;  %377 = vst [vmem:[%s3709_s26 + $0x1bc] sm:$0xf] %v376_v47 }
  0x5e   : > { %379 = vst [vmem:[%s3709_s26 + $0x1c0] sm:$0xf] %v378_v48  ;;  %v380_v49 = vld [vmem:[%s3705_s25 + $0x388] sm:$0xf]  ;;  %v382_v50 = vld [vmem:[%s3705_s25 + $0x390] sm:$0xf] }
  0x5f   : > { %v384_v51 = vld [vmem:[%s3705_s25 + $0x398] sm:$0xf]  ;;  %381 = vst [vmem:[%s3709_s26 + $0x1c4] sm:$0xf] %v380_v49  ;;  %383 = vst [vmem:[%s3709_s26 + $0x1c8] sm:$0xf] %v382_v50 }
  0x60   : > { %385 = vst [vmem:[%s3709_s26 + $0x1cc] sm:$0xf] %v384_v51  ;;  %v386_v52 = vld [vmem:[%s3705_s25 + $0x3a0] sm:$0xf]  ;;  %v388_v53 = vld [vmem:[%s3705_s25 + $0x3a8] sm:$0xf] }
  0x61   : > { %v390_v54 = vld [vmem:[%s3705_s25 + $0x3b0] sm:$0xf]  ;;  %387 = vst [vmem:[%s3709_s26 + $0x1d0] sm:$0xf] %v386_v52  ;;  %389 = vst [vmem:[%s3709_s26 + $0x1d4] sm:$0xf] %v388_v53 }
  0x62   : > { %391 = vst [vmem:[%s3709_s26 + $0x1d8] sm:$0xf] %v390_v54  ;;  %v392_v55 = vld [vmem:[%s3705_s25 + $0x3b8] sm:$0xf]  ;;  %v394_v56 = vld [vmem:[%s3705_s25 + $0x3c0] sm:$0xf] }
  0x63   : > { %v396_v57 = vld [vmem:[%s3705_s25 + $0x3c8] sm:$0xf]  ;;  %393 = vst [vmem:[%s3709_s26 + $0x1dc] sm:$0xf] %v392_v55  ;;  %395 = vst [vmem:[%s3709_s26 + $0x1e0] sm:$0xf] %v394_v56 }
  0x64   : > { %397 = vst [vmem:[%s3709_s26 + $0x1e4] sm:$0xf] %v396_v57  ;;  %v398_v58 = vld [vmem:[%s3705_s25 + $0x3d0] sm:$0xf]  ;;  %v400_v59 = vld [vmem:[%s3705_s25 + $0x3d8] sm:$0xf] }
  0x65   : > { %v402_v60 = vld [vmem:[%s3705_s25 + $0x3e0] sm:$0xf]  ;;  %399 = vst [vmem:[%s3709_s26 + $0x1e8] sm:$0xf] %v398_v58  ;;  %401 = vst [vmem:[%s3709_s26 + $0x1ec] sm:$0xf] %v400_v59 }
  0x66   : > { %403 = vst [vmem:[%s3709_s26 + $0x1f0] sm:$0xf] %v402_v60  ;;  %v404_v61 = vld [vmem:[%s3705_s25 + $0x3e8] sm:$0xf]  ;;  %v406_v62 = vld [vmem:[%s3705_s25 + $0x3f0] sm:$0xf] }
  0x67   : > { %v408_v63 = vld [vmem:[%s3705_s25 + $0x3f8] sm:$0xf]  ;;  %405 = vst [vmem:[%s3709_s26 + $0x1f4] sm:$0xf] %v404_v61  ;;  %407 = vst [vmem:[%s3709_s26 + $0x1f8] sm:$0xf] %v406_v62 }
  0x68   : > { %409 = vst [vmem:[%s3709_s26 + $0x1fc] sm:$0xf] %v408_v63  ;;  %v410_v0 = vld [vmem:[%s3705_s25 + $0x400] sm:$0xf]  ;;  %v412_v1 = vld [vmem:[%s3705_s25 + $0x408] sm:$0xf] }
  0x69   : > { %v414_v2 = vld [vmem:[%s3705_s25 + $0x410] sm:$0xf]  ;;  %411 = vst [vmem:[%s3709_s26 + $0x200] sm:$0xf] %v410_v0  ;;  %413 = vst [vmem:[%s3709_s26 + $0x204] sm:$0xf] %v412_v1 }
  0x6a   : > { %415 = vst [vmem:[%s3709_s26 + $0x208] sm:$0xf] %v414_v2  ;;  %v416_v3 = vld [vmem:[%s3705_s25 + $0x418] sm:$0xf]  ;;  %v418_v4 = vld [vmem:[%s3705_s25 + $0x420] sm:$0xf] }
  0x6b   : > { %v420_v5 = vld [vmem:[%s3705_s25 + $0x428] sm:$0xf]  ;;  %417 = vst [vmem:[%s3709_s26 + $0x20c] sm:$0xf] %v416_v3  ;;  %419 = vst [vmem:[%s3709_s26 + $0x210] sm:$0xf] %v418_v4 }
  0x6c   : > { %421 = vst [vmem:[%s3709_s26 + $0x214] sm:$0xf] %v420_v5  ;;  %v422_v6 = vld [vmem:[%s3705_s25 + $0x430] sm:$0xf]  ;;  %v424_v7 = vld [vmem:[%s3705_s25 + $0x438] sm:$0xf] }
  0x6d   : > { %v426_v8 = vld [vmem:[%s3705_s25 + $0x440] sm:$0xf]  ;;  %423 = vst [vmem:[%s3709_s26 + $0x218] sm:$0xf] %v422_v6  ;;  %425 = vst [vmem:[%s3709_s26 + $0x21c] sm:$0xf] %v424_v7 }
  0x6e   : > { %427 = vst [vmem:[%s3709_s26 + $0x220] sm:$0xf] %v426_v8  ;;  %v428_v9 = vld [vmem:[%s3705_s25 + $0x448] sm:$0xf]  ;;  %v430_v10 = vld [vmem:[%s3705_s25 + $0x450] sm:$0xf] }
  0x6f   : > { %v432_v11 = vld [vmem:[%s3705_s25 + $0x458] sm:$0xf]  ;;  %429 = vst [vmem:[%s3709_s26 + $0x224] sm:$0xf] %v428_v9  ;;  %431 = vst [vmem:[%s3709_s26 + $0x228] sm:$0xf] %v430_v10 }
  0x70   : > { %433 = vst [vmem:[%s3709_s26 + $0x22c] sm:$0xf] %v432_v11  ;;  %v434_v12 = vld [vmem:[%s3705_s25 + $0x460] sm:$0xf]  ;;  %v436_v13 = vld [vmem:[%s3705_s25 + $0x468] sm:$0xf] }
  0x71   : > { %v438_v14 = vld [vmem:[%s3705_s25 + $0x470] sm:$0xf]  ;;  %435 = vst [vmem:[%s3709_s26 + $0x230] sm:$0xf] %v434_v12  ;;  %437 = vst [vmem:[%s3709_s26 + $0x234] sm:$0xf] %v436_v13 }
  0x72   : > { %439 = vst [vmem:[%s3709_s26 + $0x238] sm:$0xf] %v438_v14  ;;  %v440_v15 = vld [vmem:[%s3705_s25 + $0x478] sm:$0xf]  ;;  %v442_v16 = vld [vmem:[%s3705_s25 + $0x480] sm:$0xf] }
  0x73   : > { %v444_v17 = vld [vmem:[%s3705_s25 + $0x488] sm:$0xf]  ;;  %441 = vst [vmem:[%s3709_s26 + $0x23c] sm:$0xf] %v440_v15  ;;  %443 = vst [vmem:[%s3709_s26 + $0x240] sm:$0xf] %v442_v16 }
  0x74   : > { %445 = vst [vmem:[%s3709_s26 + $0x244] sm:$0xf] %v444_v17  ;;  %v446_v18 = vld [vmem:[%s3705_s25 + $0x490] sm:$0xf]  ;;  %v448_v19 = vld [vmem:[%s3705_s25 + $0x498] sm:$0xf] }
  0x75   : > { %v450_v20 = vld [vmem:[%s3705_s25 + $0x4a0] sm:$0xf]  ;;  %447 = vst [vmem:[%s3709_s26 + $0x248] sm:$0xf] %v446_v18  ;;  %449 = vst [vmem:[%s3709_s26 + $0x24c] sm:$0xf] %v448_v19 }
  0x76   : > { %451 = vst [vmem:[%s3709_s26 + $0x250] sm:$0xf] %v450_v20  ;;  %v452_v21 = vld [vmem:[%s3705_s25 + $0x4a8] sm:$0xf]  ;;  %v454_v22 = vld [vmem:[%s3705_s25 + $0x4b0] sm:$0xf] }
  0x77   : > { %v456_v23 = vld [vmem:[%s3705_s25 + $0x4b8] sm:$0xf]  ;;  %453 = vst [vmem:[%s3709_s26 + $0x254] sm:$0xf] %v452_v21  ;;  %455 = vst [vmem:[%s3709_s26 + $0x258] sm:$0xf] %v454_v22 }
  0x78   : > { %457 = vst [vmem:[%s3709_s26 + $0x25c] sm:$0xf] %v456_v23  ;;  %v458_v24 = vld [vmem:[%s3705_s25 + $0x4c0] sm:$0xf]  ;;  %v460_v25 = vld [vmem:[%s3705_s25 + $0x4c8] sm:$0xf] }
  0x79   : > { %v462_v26 = vld [vmem:[%s3705_s25 + $0x4d0] sm:$0xf]  ;;  %459 = vst [vmem:[%s3709_s26 + $0x260] sm:$0xf] %v458_v24  ;;  %461 = vst [vmem:[%s3709_s26 + $0x264] sm:$0xf] %v460_v25 }
  0x7a   : > { %463 = vst [vmem:[%s3709_s26 + $0x268] sm:$0xf] %v462_v26  ;;  %v464_v27 = vld [vmem:[%s3705_s25 + $0x4d8] sm:$0xf]  ;;  %v466_v28 = vld [vmem:[%s3705_s25 + $0x4e0] sm:$0xf] }
  0x7b   : > { %v468_v29 = vld [vmem:[%s3705_s25 + $0x4e8] sm:$0xf]  ;;  %465 = vst [vmem:[%s3709_s26 + $0x26c] sm:$0xf] %v464_v27  ;;  %467 = vst [vmem:[%s3709_s26 + $0x270] sm:$0xf] %v466_v28 }
  0x7c   : > { %469 = vst [vmem:[%s3709_s26 + $0x274] sm:$0xf] %v468_v29  ;;  %v470_v30 = vld [vmem:[%s3705_s25 + $0x4f0] sm:$0xf]  ;;  %v472_v31 = vld [vmem:[%s3705_s25 + $0x4f8] sm:$0xf] }
  0x7d   : > { %v474_v32 = vld [vmem:[%s3705_s25 + $0x500] sm:$0xf]  ;;  %471 = vst [vmem:[%s3709_s26 + $0x278] sm:$0xf] %v470_v30  ;;  %473 = vst [vmem:[%s3709_s26 + $0x27c] sm:$0xf] %v472_v31 }
  0x7e   : > { %475 = vst [vmem:[%s3709_s26 + $0x280] sm:$0xf] %v474_v32  ;;  %v476_v33 = vld [vmem:[%s3705_s25 + $0x508] sm:$0xf]  ;;  %v478_v34 = vld [vmem:[%s3705_s25 + $0x510] sm:$0xf] }
  0x7f   : > { %v480_v35 = vld [vmem:[%s3705_s25 + $0x518] sm:$0xf]  ;;  %477 = vst [vmem:[%s3709_s26 + $0x284] sm:$0xf] %v476_v33  ;;  %479 = vst [vmem:[%s3709_s26 + $0x288] sm:$0xf] %v478_v34 }
  0x80   : > { %481 = vst [vmem:[%s3709_s26 + $0x28c] sm:$0xf] %v480_v35  ;;  %v482_v36 = vld [vmem:[%s3705_s25 + $0x520] sm:$0xf]  ;;  %v484_v37 = vld [vmem:[%s3705_s25 + $0x528] sm:$0xf] }
  0x81   : > { %v486_v38 = vld [vmem:[%s3705_s25 + $0x530] sm:$0xf]  ;;  %483 = vst [vmem:[%s3709_s26 + $0x290] sm:$0xf] %v482_v36  ;;  %485 = vst [vmem:[%s3709_s26 + $0x294] sm:$0xf] %v484_v37 }
  0x82   : > { %487 = vst [vmem:[%s3709_s26 + $0x298] sm:$0xf] %v486_v38  ;;  %v488_v39 = vld [vmem:[%s3705_s25 + $0x538] sm:$0xf]  ;;  %v490_v40 = vld [vmem:[%s3705_s25 + $0x540] sm:$0xf] }
  0x83   : > { %v492_v41 = vld [vmem:[%s3705_s25 + $0x548] sm:$0xf]  ;;  %489 = vst [vmem:[%s3709_s26 + $0x29c] sm:$0xf] %v488_v39  ;;  %491 = vst [vmem:[%s3709_s26 + $0x2a0] sm:$0xf] %v490_v40 }
  0x84   : > { %493 = vst [vmem:[%s3709_s26 + $0x2a4] sm:$0xf] %v492_v41  ;;  %v494_v42 = vld [vmem:[%s3705_s25 + $0x550] sm:$0xf]  ;;  %v496_v43 = vld [vmem:[%s3705_s25 + $0x558] sm:$0xf] }
  0x85   : > { %v498_v44 = vld [vmem:[%s3705_s25 + $0x560] sm:$0xf]  ;;  %495 = vst [vmem:[%s3709_s26 + $0x2a8] sm:$0xf] %v494_v42  ;;  %497 = vst [vmem:[%s3709_s26 + $0x2ac] sm:$0xf] %v496_v43 }
  0x86   : > { %499 = vst [vmem:[%s3709_s26 + $0x2b0] sm:$0xf] %v498_v44  ;;  %v500_v45 = vld [vmem:[%s3705_s25 + $0x568] sm:$0xf]  ;;  %v502_v46 = vld [vmem:[%s3705_s25 + $0x570] sm:$0xf] }
  0x87   : > { %v504_v47 = vld [vmem:[%s3705_s25 + $0x578] sm:$0xf]  ;;  %501 = vst [vmem:[%s3709_s26 + $0x2b4] sm:$0xf] %v500_v45  ;;  %503 = vst [vmem:[%s3709_s26 + $0x2b8] sm:$0xf] %v502_v46 }
  0x88   : > { %505 = vst [vmem:[%s3709_s26 + $0x2bc] sm:$0xf] %v504_v47  ;;  %v506_v48 = vld [vmem:[%s3705_s25 + $0x580] sm:$0xf]  ;;  %v508_v49 = vld [vmem:[%s3705_s25 + $0x588] sm:$0xf] }
  0x89   : > { %v510_v50 = vld [vmem:[%s3705_s25 + $0x590] sm:$0xf]  ;;  %507 = vst [vmem:[%s3709_s26 + $0x2c0] sm:$0xf] %v506_v48  ;;  %509 = vst [vmem:[%s3709_s26 + $0x2c4] sm:$0xf] %v508_v49 }
  0x8a   : > { %511 = vst [vmem:[%s3709_s26 + $0x2c8] sm:$0xf] %v510_v50  ;;  %v512_v51 = vld [vmem:[%s3705_s25 + $0x598] sm:$0xf]  ;;  %v514_v52 = vld [vmem:[%s3705_s25 + $0x5a0] sm:$0xf] }
  0x8b   : > { %v516_v53 = vld [vmem:[%s3705_s25 + $0x5a8] sm:$0xf]  ;;  %513 = vst [vmem:[%s3709_s26 + $0x2cc] sm:$0xf] %v512_v51  ;;  %515 = vst [vmem:[%s3709_s26 + $0x2d0] sm:$0xf] %v514_v52 }
  0x8c   : > { %517 = vst [vmem:[%s3709_s26 + $0x2d4] sm:$0xf] %v516_v53  ;;  %v518_v54 = vld [vmem:[%s3705_s25 + $0x5b0] sm:$0xf]  ;;  %v520_v55 = vld [vmem:[%s3705_s25 + $0x5b8] sm:$0xf] }
  0x8d   : > { %v522_v56 = vld [vmem:[%s3705_s25 + $0x5c0] sm:$0xf]  ;;  %519 = vst [vmem:[%s3709_s26 + $0x2d8] sm:$0xf] %v518_v54  ;;  %521 = vst [vmem:[%s3709_s26 + $0x2dc] sm:$0xf] %v520_v55 }
  0x8e   : > { %523 = vst [vmem:[%s3709_s26 + $0x2e0] sm:$0xf] %v522_v56  ;;  %v524_v57 = vld [vmem:[%s3705_s25 + $0x5c8] sm:$0xf]  ;;  %v526_v58 = vld [vmem:[%s3705_s25 + $0x5d0] sm:$0xf] }
  0x8f   : > { %v528_v59 = vld [vmem:[%s3705_s25 + $0x5d8] sm:$0xf]  ;;  %525 = vst [vmem:[%s3709_s26 + $0x2e4] sm:$0xf] %v524_v57  ;;  %527 = vst [vmem:[%s3709_s26 + $0x2e8] sm:$0xf] %v526_v58 }
  0x90   : > { %529 = vst [vmem:[%s3709_s26 + $0x2ec] sm:$0xf] %v528_v59  ;;  %v530_v60 = vld [vmem:[%s3705_s25 + $0x5e0] sm:$0xf]  ;;  %v532_v61 = vld [vmem:[%s3705_s25 + $0x5e8] sm:$0xf] }
  0x91   : > { %v534_v62 = vld [vmem:[%s3705_s25 + $0x5f0] sm:$0xf]  ;;  %531 = vst [vmem:[%s3709_s26 + $0x2f0] sm:$0xf] %v530_v60  ;;  %533 = vst [vmem:[%s3709_s26 + $0x2f4] sm:$0xf] %v532_v61 }
  0x92   : > { %535 = vst [vmem:[%s3709_s26 + $0x2f8] sm:$0xf] %v534_v62  ;;  %v536_v63 = vld [vmem:[%s3705_s25 + $0x5f8] sm:$0xf]  ;;  %v538_v0 = vld [vmem:[%s3705_s25 + $0x600] sm:$0xf] }
  0x93   : > { %v540_v1 = vld [vmem:[%s3705_s25 + $0x608] sm:$0xf]  ;;  %537 = vst [vmem:[%s3709_s26 + $0x2fc] sm:$0xf] %v536_v63  ;;  %539 = vst [vmem:[%s3709_s26 + $0x300] sm:$0xf] %v538_v0 }
  0x94   : > { %541 = vst [vmem:[%s3709_s26 + $0x304] sm:$0xf] %v540_v1  ;;  %v542_v2 = vld [vmem:[%s3705_s25 + $0x610] sm:$0xf]  ;;  %v544_v3 = vld [vmem:[%s3705_s25 + $0x618] sm:$0xf] }
  0x95   : > { %v546_v4 = vld [vmem:[%s3705_s25 + $0x620] sm:$0xf]  ;;  %543 = vst [vmem:[%s3709_s26 + $0x308] sm:$0xf] %v542_v2  ;;  %545 = vst [vmem:[%s3709_s26 + $0x30c] sm:$0xf] %v544_v3 }
  0x96   : > { %547 = vst [vmem:[%s3709_s26 + $0x310] sm:$0xf] %v546_v4  ;;  %v548_v5 = vld [vmem:[%s3705_s25 + $0x628] sm:$0xf]  ;;  %v550_v6 = vld [vmem:[%s3705_s25 + $0x630] sm:$0xf] }
  0x97   : > { %v552_v7 = vld [vmem:[%s3705_s25 + $0x638] sm:$0xf]  ;;  %549 = vst [vmem:[%s3709_s26 + $0x314] sm:$0xf] %v548_v5  ;;  %551 = vst [vmem:[%s3709_s26 + $0x318] sm:$0xf] %v550_v6 }
  0x98   : > { %553 = vst [vmem:[%s3709_s26 + $0x31c] sm:$0xf] %v552_v7  ;;  %v554_v8 = vld [vmem:[%s3705_s25 + $0x640] sm:$0xf]  ;;  %v556_v9 = vld [vmem:[%s3705_s25 + $0x648] sm:$0xf] }
  0x99   : > { %v558_v10 = vld [vmem:[%s3705_s25 + $0x650] sm:$0xf]  ;;  %555 = vst [vmem:[%s3709_s26 + $0x320] sm:$0xf] %v554_v8  ;;  %557 = vst [vmem:[%s3709_s26 + $0x324] sm:$0xf] %v556_v9 }
  0x9a   : > { %559 = vst [vmem:[%s3709_s26 + $0x328] sm:$0xf] %v558_v10  ;;  %v560_v11 = vld [vmem:[%s3705_s25 + $0x658] sm:$0xf]  ;;  %v562_v12 = vld [vmem:[%s3705_s25 + $0x660] sm:$0xf] }
  0x9b   : > { %v564_v13 = vld [vmem:[%s3705_s25 + $0x668] sm:$0xf]  ;;  %561 = vst [vmem:[%s3709_s26 + $0x32c] sm:$0xf] %v560_v11  ;;  %563 = vst [vmem:[%s3709_s26 + $0x330] sm:$0xf] %v562_v12 }
  0x9c   : > { %565 = vst [vmem:[%s3709_s26 + $0x334] sm:$0xf] %v564_v13  ;;  %v566_v14 = vld [vmem:[%s3705_s25 + $0x670] sm:$0xf]  ;;  %v568_v15 = vld [vmem:[%s3705_s25 + $0x678] sm:$0xf] }
  0x9d   : > { %v570_v16 = vld [vmem:[%s3705_s25 + $0x680] sm:$0xf]  ;;  %567 = vst [vmem:[%s3709_s26 + $0x338] sm:$0xf] %v566_v14  ;;  %569 = vst [vmem:[%s3709_s26 + $0x33c] sm:$0xf] %v568_v15 }
  0x9e   : > { %571 = vst [vmem:[%s3709_s26 + $0x340] sm:$0xf] %v570_v16  ;;  %v572_v17 = vld [vmem:[%s3705_s25 + $0x688] sm:$0xf]  ;;  %v574_v18 = vld [vmem:[%s3705_s25 + $0x690] sm:$0xf] }
  0x9f   : > { %v576_v19 = vld [vmem:[%s3705_s25 + $0x698] sm:$0xf]  ;;  %573 = vst [vmem:[%s3709_s26 + $0x344] sm:$0xf] %v572_v17  ;;  %575 = vst [vmem:[%s3709_s26 + $0x348] sm:$0xf] %v574_v18 }
  0xa0   : > { %577 = vst [vmem:[%s3709_s26 + $0x34c] sm:$0xf] %v576_v19  ;;  %v578_v20 = vld [vmem:[%s3705_s25 + $0x6a0] sm:$0xf]  ;;  %v580_v21 = vld [vmem:[%s3705_s25 + $0x6a8] sm:$0xf] }
  0xa1   : > { %v582_v22 = vld [vmem:[%s3705_s25 + $0x6b0] sm:$0xf]  ;;  %579 = vst [vmem:[%s3709_s26 + $0x350] sm:$0xf] %v578_v20  ;;  %581 = vst [vmem:[%s3709_s26 + $0x354] sm:$0xf] %v580_v21 }
  0xa2   : > { %583 = vst [vmem:[%s3709_s26 + $0x358] sm:$0xf] %v582_v22  ;;  %v584_v23 = vld [vmem:[%s3705_s25 + $0x6b8] sm:$0xf]  ;;  %v586_v24 = vld [vmem:[%s3705_s25 + $0x6c0] sm:$0xf] }
  0xa3   : > { %v588_v25 = vld [vmem:[%s3705_s25 + $0x6c8] sm:$0xf]  ;;  %585 = vst [vmem:[%s3709_s26 + $0x35c] sm:$0xf] %v584_v23  ;;  %587 = vst [vmem:[%s3709_s26 + $0x360] sm:$0xf] %v586_v24 }
  0xa4   : > { %589 = vst [vmem:[%s3709_s26 + $0x364] sm:$0xf] %v588_v25  ;;  %v590_v26 = vld [vmem:[%s3705_s25 + $0x6d0] sm:$0xf]  ;;  %v592_v27 = vld [vmem:[%s3705_s25 + $0x6d8] sm:$0xf] }
  0xa5   : > { %v594_v28 = vld [vmem:[%s3705_s25 + $0x6e0] sm:$0xf]  ;;  %591 = vst [vmem:[%s3709_s26 + $0x368] sm:$0xf] %v590_v26  ;;  %593 = vst [vmem:[%s3709_s26 + $0x36c] sm:$0xf] %v592_v27 }
  0xa6   : > { %595 = vst [vmem:[%s3709_s26 + $0x370] sm:$0xf] %v594_v28  ;;  %v596_v29 = vld [vmem:[%s3705_s25 + $0x6e8] sm:$0xf]  ;;  %v598_v30 = vld [vmem:[%s3705_s25 + $0x6f0] sm:$0xf] }
  0xa7   : > { %v600_v31 = vld [vmem:[%s3705_s25 + $0x6f8] sm:$0xf]  ;;  %597 = vst [vmem:[%s3709_s26 + $0x374] sm:$0xf] %v596_v29  ;;  %599 = vst [vmem:[%s3709_s26 + $0x378] sm:$0xf] %v598_v30 }
  0xa8   : > { %601 = vst [vmem:[%s3709_s26 + $0x37c] sm:$0xf] %v600_v31  ;;  %v602_v32 = vld [vmem:[%s3705_s25 + $0x700] sm:$0xf]  ;;  %v604_v33 = vld [vmem:[%s3705_s25 + $0x708] sm:$0xf] }
  0xa9   : > { %v606_v34 = vld [vmem:[%s3705_s25 + $0x710] sm:$0xf]  ;;  %603 = vst [vmem:[%s3709_s26 + $0x380] sm:$0xf] %v602_v32  ;;  %605 = vst [vmem:[%s3709_s26 + $0x384] sm:$0xf] %v604_v33 }
  0xaa   : > { %607 = vst [vmem:[%s3709_s26 + $0x388] sm:$0xf] %v606_v34  ;;  %v608_v35 = vld [vmem:[%s3705_s25 + $0x718] sm:$0xf]  ;;  %v610_v36 = vld [vmem:[%s3705_s25 + $0x720] sm:$0xf] }
  0xab   : > { %v612_v37 = vld [vmem:[%s3705_s25 + $0x728] sm:$0xf]  ;;  %609 = vst [vmem:[%s3709_s26 + $0x38c] sm:$0xf] %v608_v35  ;;  %611 = vst [vmem:[%s3709_s26 + $0x390] sm:$0xf] %v610_v36 }
  0xac   : > { %613 = vst [vmem:[%s3709_s26 + $0x394] sm:$0xf] %v612_v37  ;;  %v614_v38 = vld [vmem:[%s3705_s25 + $0x730] sm:$0xf]  ;;  %v616_v39 = vld [vmem:[%s3705_s25 + $0x738] sm:$0xf] }
  0xad   : > { %v618_v40 = vld [vmem:[%s3705_s25 + $0x740] sm:$0xf]  ;;  %615 = vst [vmem:[%s3709_s26 + $0x398] sm:$0xf] %v614_v38  ;;  %617 = vst [vmem:[%s3709_s26 + $0x39c] sm:$0xf] %v616_v39 }
  0xae   : > { %619 = vst [vmem:[%s3709_s26 + $0x3a0] sm:$0xf] %v618_v40  ;;  %v620_v41 = vld [vmem:[%s3705_s25 + $0x748] sm:$0xf]  ;;  %v622_v42 = vld [vmem:[%s3705_s25 + $0x750] sm:$0xf] }
  0xaf   : > { %v624_v43 = vld [vmem:[%s3705_s25 + $0x758] sm:$0xf]  ;;  %621 = vst [vmem:[%s3709_s26 + $0x3a4] sm:$0xf] %v620_v41  ;;  %623 = vst [vmem:[%s3709_s26 + $0x3a8] sm:$0xf] %v622_v42 }
  0xb0   : > { %625 = vst [vmem:[%s3709_s26 + $0x3ac] sm:$0xf] %v624_v43  ;;  %v626_v44 = vld [vmem:[%s3705_s25 + $0x760] sm:$0xf]  ;;  %v628_v45 = vld [vmem:[%s3705_s25 + $0x768] sm:$0xf] }
  0xb1   : > { %v630_v46 = vld [vmem:[%s3705_s25 + $0x770] sm:$0xf]  ;;  %627 = vst [vmem:[%s3709_s26 + $0x3b0] sm:$0xf] %v626_v44  ;;  %629 = vst [vmem:[%s3709_s26 + $0x3b4] sm:$0xf] %v628_v45 }
  0xb2   : > { %631 = vst [vmem:[%s3709_s26 + $0x3b8] sm:$0xf] %v630_v46  ;;  %v632_v47 = vld [vmem:[%s3705_s25 + $0x778] sm:$0xf]  ;;  %v634_v48 = vld [vmem:[%s3705_s25 + $0x780] sm:$0xf] }
  0xb3   : > { %v636_v49 = vld [vmem:[%s3705_s25 + $0x788] sm:$0xf]  ;;  %633 = vst [vmem:[%s3709_s26 + $0x3bc] sm:$0xf] %v632_v47  ;;  %635 = vst [vmem:[%s3709_s26 + $0x3c0] sm:$0xf] %v634_v48 }
  0xb4   : > { %637 = vst [vmem:[%s3709_s26 + $0x3c4] sm:$0xf] %v636_v49  ;;  %v638_v50 = vld [vmem:[%s3705_s25 + $0x790] sm:$0xf]  ;;  %v640_v51 = vld [vmem:[%s3705_s25 + $0x798] sm:$0xf] }
  0xb5   : > { %v642_v52 = vld [vmem:[%s3705_s25 + $0x7a0] sm:$0xf]  ;;  %639 = vst [vmem:[%s3709_s26 + $0x3c8] sm:$0xf] %v638_v50  ;;  %641 = vst [vmem:[%s3709_s26 + $0x3cc] sm:$0xf] %v640_v51 }
  0xb6   : > { %643 = vst [vmem:[%s3709_s26 + $0x3d0] sm:$0xf] %v642_v52  ;;  %v644_v53 = vld [vmem:[%s3705_s25 + $0x7a8] sm:$0xf]  ;;  %v646_v54 = vld [vmem:[%s3705_s25 + $0x7b0] sm:$0xf] }
  0xb7   : > { %v648_v55 = vld [vmem:[%s3705_s25 + $0x7b8] sm:$0xf]  ;;  %645 = vst [vmem:[%s3709_s26 + $0x3d4] sm:$0xf] %v644_v53  ;;  %647 = vst [vmem:[%s3709_s26 + $0x3d8] sm:$0xf] %v646_v54 }
  0xb8   : > { %649 = vst [vmem:[%s3709_s26 + $0x3dc] sm:$0xf] %v648_v55  ;;  %v650_v56 = vld [vmem:[%s3705_s25 + $0x7c0] sm:$0xf]  ;;  %v652_v57 = vld [vmem:[%s3705_s25 + $0x7c8] sm:$0xf] }
  0xb9   : > { %v654_v58 = vld [vmem:[%s3705_s25 + $0x7d0] sm:$0xf]  ;;  %651 = vst [vmem:[%s3709_s26 + $0x3e0] sm:$0xf] %v650_v56  ;;  %653 = vst [vmem:[%s3709_s26 + $0x3e4] sm:$0xf] %v652_v57 }
  0xba   : > { %655 = vst [vmem:[%s3709_s26 + $0x3e8] sm:$0xf] %v654_v58  ;;  %v656_v59 = vld [vmem:[%s3705_s25 + $0x7d8] sm:$0xf]  ;;  %v658_v60 = vld [vmem:[%s3705_s25 + $0x7e0] sm:$0xf] }
  0xbb   : > { %v660_v61 = vld [vmem:[%s3705_s25 + $0x7e8] sm:$0xf]  ;;  %657 = vst [vmem:[%s3709_s26 + $0x3ec] sm:$0xf] %v656_v59  ;;  %659 = vst [vmem:[%s3709_s26 + $0x3f0] sm:$0xf] %v658_v60 }
  0xbc   : > { %661 = vst [vmem:[%s3709_s26 + $0x3f4] sm:$0xf] %v660_v61  ;;  %v662_v62 = vld [vmem:[%s3705_s25 + $0x7f0] sm:$0xf]  ;;  %v664_v63 = vld [vmem:[%s3705_s25 + $0x7f8] sm:$0xf] }
  0xbd   : > { %663 = vst [vmem:[%s3709_s26 + $0x3f8] sm:$0xf] %v662_v62  ;;  %665 = vst [vmem:[%s3709_s26 + $0x3fc] sm:$0xf] %v664_v63 }
  0xbe PF: > { %p3024_p8 = scmp.ge.s32.totalorder %s3640_s13, 1  ;;  %p1200_p9 = scmp.lt.s32.totalorder %s3640_s13, 3 }
  0xc0   : > { %p1201_p10 = pnand %p3024_p8, %p1200_p9 }
  0xc1   : > { %s1207_s27 = sand.u32 (!%p1201_p10), 1, %s3624_s9  }
  0xc2   : > { %1204 = sbr.rel (%p1201_p10) target bundleno = 553 (0x229), region = 65  ;;  %s3025_s6 = sshll.u32 (!%p1201_p10), %s1207_s27, 10 }
  0xc3   : > { %s4250_s15 = scalar_lea.vmem (!%p1201_p10), [#allocation2], %s3025_s6  ;;  %s3026_s17 = sshll.u32 (!%p1201_p10), %s1207_s27, 4 }
  0xc4   : > { %s1232_s20 = scalar_lea.vmem (!%p1201_p10), [#allocation3], %s3026_s17 }
  0xc7   : > { %v4227_v0 = vld [vmem:[%s4491_s0] sm:$0xff]  ;;  %v4237_v2 = vld [vmem:[%s4491_s0 + $0x8] sm:$0xff]  ;;  %v3474_v6 = vld [vmem:[%s4250_s15 + $0x78] sm:$0xff]   ;;  %s3192_s9 = sshll.u32 (%p3692_p6), %s3632_s11, 2 }
  0xc8   : > { %v4232_v1 = vld [vmem:[%s4491_s0 + $0x40] sm:$0xff]  ;;  %v4246_v4 = vld [vmem:[%s4491_s0 + $0x48] sm:$0xff]  ;;  %v3475_v7 = vld [vmem:[%s4250_s15 + $0xf8] sm:$0xff]   ;;  %3210 = vmatprep.subr.bf16.mxu0 %v3474_v6  ;;  %s2881_s22 = scalar_lea.vmem (%p3692_p6), %s4493_s2, %s3192_s9 }
  0xc9   : > { %v3028_v3 = vcombine.high %v4227_v0, %v4232_v1  ;;  %v3030_v5 = vcombine.high %v4237_v2, %v4246_v4  ;;  %v3476_v8 = vld [vmem:[%s4250_s15 + $0x38] sm:$0xff]   ;;  %3238 = vmatprep.subr.bf16.mxu1 %v3475_v7  ;;  %v3478_v10 = vld [vmem:[%s4250_s15 + $0x70] sm:$0xff]   ;;  %v3482_v14 = vld [vmem:[%s4250_s15 + $0x68] sm:$0xff]   ;;  %v3027_v42 = vcombine.low %v4227_v0, %v4232_v1  ;;  %v3029_v43 = vcombine.low %v4237_v2, %v4246_v4 }
  0xca   : > { %v3477_v9 = vld [vmem:[%s4250_s15 + $0xb8] sm:$0xff]   ;;  %3211 = vmatpush3.bf16.msra.mxu0 %v3476_v8  ;;  %v3479_v11 = vld [vmem:[%s4250_s15 + $0xf0] sm:$0xff]   ;;  %v3483_v15 = vld [vmem:[%s4250_s15 + $0xe8] sm:$0xff]  }
  0xcb   : > { %2490 = vmatprep.mubr.bf16.mxu0 %v3028_v3  ;;  %2539 = vmatprep.mubr.bf16.mxu1 %v3030_v5  ;;  %v3480_v12 = vld [vmem:[%s4250_s15 + $0x30] sm:$0xff]   ;;  %v3484_v16 = vld [vmem:[%s4250_s15 + $0x28] sm:$0xff]   ;;  %v3486_v18 = vld [vmem:[%s4250_s15 + $0x60] sm:$0xff]  }
  0xcc   : > { %3239 = vmatpush3.bf16.msra.mxu1 %v3477_v9  ;;  %3212 = vmatprep.subr.bf16.mxu0 %v3478_v10  ;;  %v3481_v13 = vld [vmem:[%s4250_s15 + $0xb0] sm:$0xff]   ;;  %v3485_v17 = vld [vmem:[%s4250_s15 + $0xa8] sm:$0xff]   ;;  %v3487_v19 = vld [vmem:[%s4250_s15 + $0xe0] sm:$0xff]  }
  0xcd   : > { %3240 = vmatprep.subr.bf16.mxu1 %v3479_v11  ;;  %v3488_v20 = vld [vmem:[%s4250_s15 + $0x20] sm:$0xff]   ;;  %v3490_v22 = vld [vmem:[%s4250_s15 + $0x58] sm:$0xff]   ;;  %v3494_v26 = vld [vmem:[%s4250_s15 + $0x50] sm:$0xff]  }
  0xce   : > { %3213 = vmatpush3.bf16.msra.mxu0 %v3480_v12  ;;  %v3489_v21 = vld [vmem:[%s4250_s15 + $0xa0] sm:$0xff]   ;;  %v3491_v23 = vld [vmem:[%s4250_s15 + $0xd8] sm:$0xff]   ;;  %v3495_v27 = vld [vmem:[%s4250_s15 + $0xd0] sm:$0xff]  }
  0xcf   : > { %3214 = vmatprep.subr.bf16.mxu0 %v3482_v14  ;;  %v3492_v24 = vld [vmem:[%s4250_s15 + $0x18] sm:$0xff]   ;;  %v3496_v28 = vld [vmem:[%s4250_s15 + $0x10] sm:$0xff]   ;;  %v3498_v30 = vld [vmem:[%s4250_s15 + $0x48] sm:$0xff]  }
  0xd0   : > { %3241 = vmatpush3.bf16.msra.mxu1 %v3481_v13  ;;  %v3493_v25 = vld [vmem:[%s4250_s15 + $0x98] sm:$0xff]   ;;  %v3497_v29 = vld [vmem:[%s4250_s15 + $0x90] sm:$0xff]   ;;  %v3499_v31 = vld [vmem:[%s4250_s15 + $0xc8] sm:$0xff]  }
  0xd1   : > { %3242 = vmatprep.subr.bf16.mxu1 %v3483_v15  ;;  %v3500_v32 = vld [vmem:[%s4250_s15 + $0x8] sm:$0xff]   ;;  %v3502_v34 = vld [vmem:[%s4250_s15 + $0x40] sm:$0xff]   ;;  %v3506_v44 = vld [vmem:[%s4250_s15 + $0x178] sm:$0xff]  }
  0xd2   : > { %3215 = vmatpush3.bf16.msra.mxu0 %v3484_v16  ;;  %v3501_v33 = vld [vmem:[%s4250_s15 + $0x88] sm:$0xff]   ;;  %v1258_v35 = vld [vmem:[%s4491_s0 + $0x80] sm:$0xff]  ;;  %v3507_v45 = vld [vmem:[%s4250_s15 + $0x1f8] sm:$0xff]  }
  0xd3   : > { %3216 = vmatprep.subr.bf16.mxu0 %v3486_v18  ;;  %v1266_v36 = vld [vmem:[%s4491_s0 + $0xc0] sm:$0xff]  ;;  %v1259_v38 = vld [vmem:[%s4491_s0 + $0x88] sm:$0xff]  ;;  %v3508_v47 = vld [vmem:[%s4250_s15 + $0x138] sm:$0xff]  }
  0xd4   : > { %3243 = vmatpush3.bf16.msra.mxu1 %v3485_v17  ;;  %v3503_v37 = vld [vmem:[%s4250_s15 + $0xc0] sm:$0xff]   ;;  %v1267_v39 = vld [vmem:[%s4491_s0 + $0xc8] sm:$0xff]  ;;  %v3044_v46 = vcombine.high %v1258_v35, %v1266_v36  ;;  %v3509_v49 = vld [vmem:[%s4250_s15 + $0x1b8] sm:$0xff]   ;;  %v3043_v54 = vcombine.low %v1258_v35, %v1266_v36 }
  0xd5   : > { %3244 = vmatprep.subr.bf16.mxu1 %v3487_v19  ;;  %v3504_v40 = vld [vmem:[%s4250_s15] sm:$0xff]   ;;  %v3046_v48 = vcombine.high %v1259_v38, %v1267_v39  ;;  %v3510_v50 = vld [vmem:[%s4250_s15 + $0x170] sm:$0xff]   ;;  %v3514_v55 = vld [vmem:[%s4250_s15 + $0x168] sm:$0xff]   ;;  %v3045_v56 = vcombine.low %v1259_v38, %v1267_v39 }
  0xd6   : > { %3217 = vmatpush3.bf16.msra.mxu0 %v3488_v20  ;;  %v3505_v41 = vld [vmem:[%s4250_s15 + $0x80] sm:$0xff]   ;;  %v3511_v51 = vld [vmem:[%s4250_s15 + $0x1f0] sm:$0xff]   ;;  %v3515_v57 = vld [vmem:[%s4250_s15 + $0x1e8] sm:$0xff]  }
  0xd7   : > { %3218 = vmatprep.subr.bf16.mxu0 %v3490_v22  ;;  %v3512_v52 = vld [vmem:[%s4250_s15 + $0x130] sm:$0xff]   ;;  %v3516_v58 = vld [vmem:[%s4250_s15 + $0x128] sm:$0xff]   ;;  %v3518_v60 = vld [vmem:[%s4250_s15 + $0x160] sm:$0xff]  }
  0xd8   : > { %3245 = vmatpush3.bf16.msra.mxu1 %v3489_v21  ;;  %v3513_v53 = vld [vmem:[%s4250_s15 + $0x1b0] sm:$0xff]   ;;  %v3517_v59 = vld [vmem:[%s4250_s15 + $0x1a8] sm:$0xff]   ;;  %v3519_v61 = vld [vmem:[%s4250_s15 + $0x1e0] sm:$0xff]  }
  0xd9   : > { %3246 = vmatprep.subr.bf16.mxu1 %v3491_v23  ;;  %v3520_v62 = vld [vmem:[%s4250_s15 + $0x120] sm:$0xff]   ;;  %v3522_v0 = vld [vmem:[%s4250_s15 + $0x158] sm:$0xff]   ;;  %v3526_v4 = vld [vmem:[%s4250_s15 + $0x150] sm:$0xff]  }
  0xda   : > { %3219 = vmatpush3.bf16.msra.mxu0 %v3492_v24  ;;  %v3521_v63 = vld [vmem:[%s4250_s15 + $0x1a0] sm:$0xff]   ;;  %v3523_v1 = vld [vmem:[%s4250_s15 + $0x1d8] sm:$0xff]   ;;  %v3527_v5 = vld [vmem:[%s4250_s15 + $0x1d0] sm:$0xff]  }
  0xdb   : > { %3220 = vmatprep.subr.bf16.mxu0 %v3494_v26  ;;  %v3524_v2 = vld [vmem:[%s4250_s15 + $0x118] sm:$0xff]   ;;  %v3528_v6 = vld [vmem:[%s4250_s15 + $0x110] sm:$0xff]   ;;  %v3530_v8 = vld [vmem:[%s4250_s15 + $0x148] sm:$0xff]  }
  0xdc   : > { %3247 = vmatpush3.bf16.msra.mxu1 %v3493_v25  ;;  %v3525_v3 = vld [vmem:[%s4250_s15 + $0x198] sm:$0xff]   ;;  %v3529_v7 = vld [vmem:[%s4250_s15 + $0x190] sm:$0xff]   ;;  %v3531_v9 = vld [vmem:[%s4250_s15 + $0x1c8] sm:$0xff]  }
  0xdd   : > { %3248 = vmatprep.subr.bf16.mxu1 %v3495_v27  ;;  %v3532_v10 = vld [vmem:[%s4250_s15 + $0x108] sm:$0xff]   ;;  %v3534_v12 = vld [vmem:[%s4250_s15 + $0x140] sm:$0xff]   ;;  %v1244_v13 = vld [vmem:[%s4491_s0 + $0x10] sm:$0xff] }
  0xde   : > { %3221 = vmatpush3.bf16.msra.mxu0 %v3496_v28  ;;  %v3533_v11 = vld [vmem:[%s4250_s15 + $0x188] sm:$0xff]   ;;  %v3535_v14 = vld [vmem:[%s4250_s15 + $0x1c0] sm:$0xff]   ;;  %v1252_v17 = vld [vmem:[%s4491_s0 + $0x50] sm:$0xff] }
  0xdf   : > { %3222 = vmatprep.subr.bf16.mxu0 %v3498_v30  ;;  %v3536_v15 = vld [vmem:[%s4250_s15 + $0x100] sm:$0xff]   ;;  %v1245_v18 = vld [vmem:[%s4491_s0 + $0x18] sm:$0xff]  ;;  %v3031_v20 = vcombine.low %v1244_v13, %v1252_v17  ;;  %v3032_v21 = vcombine.high %v1244_v13, %v1252_v17  ;;  %v3542_v28 = vld [vmem:[%s4250_s15 + $0x270] sm:$0xff]  }
  0xe0   : > { %3249 = vmatpush3.bf16.msra.mxu1 %v3497_v29  ;;  %v3537_v16 = vld [vmem:[%s4250_s15 + $0x180] sm:$0xff]   ;;  %v1253_v19 = vld [vmem:[%s4491_s0 + $0x58] sm:$0xff]  ;;  %v3543_v29 = vld [vmem:[%s4250_s15 + $0x2f0] sm:$0xff]  }
  0xe1   : > { %3250 = vmatprep.subr.bf16.mxu1 %v3499_v31  ;;  %v3033_v22 = vcombine.low %v1245_v18, %v1253_v19  ;;  %v3034_v23 = vcombine.high %v1245_v18, %v1253_v19  ;;  %v3538_v24 = vld [vmem:[%s4250_s15 + $0x278] sm:$0xff]   ;;  %v3544_v30 = vld [vmem:[%s4250_s15 + $0x230] sm:$0xff]   ;;  %v3546_v36 = vld [vmem:[%s4250_s15 + $0x268] sm:$0xff]  }
  0xe2   : > { %3223 = vmatpush3.bf16.msra.mxu0 %v3500_v32  ;;  %v3539_v25 = vld [vmem:[%s4250_s15 + $0x2f8] sm:$0xff]   ;;  %v3545_v31 = vld [vmem:[%s4250_s15 + $0x2b0] sm:$0xff]   ;;  %v1270_v17 = vld [vmem:[%s4491_s0 + $0xe0] sm:$0xff] }
  0xe3   : > { %3224 = vmatprep.subr.bf16.mxu0 %v3502_v34  ;;  %v3540_v26 = vld [vmem:[%s4250_s15 + $0x238] sm:$0xff]   ;;  %v1260_v32 = vld [vmem:[%s4491_s0 + $0x90] sm:$0xff] }
  0xe4   : > { %3251 = vmatpush3.bf16.msra.mxu1 %v3501_v33  ;;  %v3541_v27 = vld [vmem:[%s4250_s15 + $0x2b8] sm:$0xff]   ;;  %v1268_v33 = vld [vmem:[%s4491_s0 + $0xd0] sm:$0xff] }
  0xe5   : > { %3252 = vmatprep.subr.bf16.mxu1 %v3503_v37  ;;  %v3048_v34 = vcombine.high %v1260_v32, %v1268_v33  ;;  %v3047_v35 = vcombine.low %v1260_v32, %v1268_v33  ;;  %v3547_v37 = vld [vmem:[%s4250_s15 + $0x2e8] sm:$0xff]   ;;  %v1261_v38 = vld [vmem:[%s4491_s0 + $0x98] sm:$0xff]  ;;  %v3575_v13 = vld [vmem:[%s4250_s15 + $0x3f0] sm:$0xff]  }
  0xe6   : > { %3225 = vmatpush3.bf16.msra.mxu0 %v3504_v40  ;;  %v1269_v39 = vld [vmem:[%s4491_s0 + $0xd8] sm:$0xff] }
  0xe7   : > { %3266 = vmatprep.subr.bf16.mxu0 %v3506_v44  ;;  %v3050_v40 = vcombine.high %v1261_v38, %v1269_v39  ;;  %v3550_v44 = vld [vmem:[%s4250_s15 + $0x260] sm:$0xff]   ;;  %v3586_v32 = vld [vmem:[%s4250_s15 + $0x358] sm:$0xff]  }
  0xe8   : > { %3253 = vmatpush3.bf16.msra.mxu1 %v3505_v41  ;;  %v3548_v41 = vld [vmem:[%s4250_s15 + $0x228] sm:$0xff]   ;;  %v3587_v33 = vld [vmem:[%s4250_s15 + $0x3d8] sm:$0xff]  }
  0xe9   : > { %2491 = vmatmul.mubr.bf16.vlgmr.msra.gmra.mxu0 %v3027_v42  ;;  %3294 = vmatprep.subr.bf16.mxu1 %v3507_v45  ;;  %v3049_v42 = vcombine.low %v1261_v38, %v1269_v39  ;;  %v3551_v45 = vld [vmem:[%s4250_s15 + $0x2e0] sm:$0xff]   ;;  %v3592_v38 = vld [vmem:[%s4250_s15 + $0x310] sm:$0xff]  }
  0xea   : > { %3267 = vmatpush3.bf16.msra.mxu0 %v3508_v47  ;;  %2498 = vmatprep.mubr.bf16.mxu0 %v3044_v46  ;;  %v3552_v46 = vld [vmem:[%s4250_s15 + $0x220] sm:$0xff]   ;;  %v3593_v39 = vld [vmem:[%s4250_s15 + $0x390] sm:$0xff]  }
  0xeb   : > { %2540 = vmatmul.mubr.bf16.vlgmr.msra.gmra.mxu1 %v3029_v43  ;;  %3268 = vmatprep.subr.bf16.mxu0 %v3510_v50  ;;  %v3549_v43 = vld [vmem:[%s4250_s15 + $0x2a8] sm:$0xff]   ;;  %v3553_v47 = vld [vmem:[%s4250_s15 + $0x2a0] sm:$0xff]   ;;  %v3556_v50 = vld [vmem:[%s4250_s15 + $0x218] sm:$0xff]  }
  0xec   : > { %3295 = vmatpush3.bf16.msra.mxu1 %v3509_v49  ;;  %2547 = vmatprep.mubr.bf16.mxu1 %v3046_v48  ;;  %v3554_v48 = vld [vmem:[%s4250_s15 + $0x258] sm:$0xff]  }
  0xed   : > { %3296 = vmatprep.subr.bf16.mxu1 %v3511_v51  ;;  %v3555_v49 = vld [vmem:[%s4250_s15 + $0x2d8] sm:$0xff]  }
  0xee   : > { %3269 = vmatpush3.bf16.msra.mxu0 %v3512_v52  ;;  %v3557_v51 = vld [vmem:[%s4250_s15 + $0x298] sm:$0xff]   ;;  %v3558_v52 = vld [vmem:[%s4250_s15 + $0x250] sm:$0xff]  }
  0xef   : > { %3270 = vmatprep.subr.bf16.mxu0 %v3514_v55  ;;  %v3561_v55 = vld [vmem:[%s4250_s15 + $0x290] sm:$0xff]  }
  0xf0   : > { %3297 = vmatpush3.bf16.msra.mxu1 %v3513_v53  ;;  %v3559_v53 = vld [vmem:[%s4250_s15 + $0x2d0] sm:$0xff]  }
  0xf1   : > { %3298 = vmatprep.subr.bf16.mxu1 %v3515_v57  ;;  %2499 = vmatmul.mubr.bf16.gmra.mxu0 %v3043_v54  ;;  %v3560_v54 = vld [vmem:[%s4250_s15 + $0x210] sm:$0xff]   ;;  %v3563_v57 = vld [vmem:[%s4250_s15 + $0x2c8] sm:$0xff]  }
  0xf2   : > { %3271 = vmatpush3.bf16.msra.mxu0 %v3516_v58  ;;  %2588 = vmatprep.mubr.bf16.mxu0 %v3032_v21  ;;  %v3564_v58 = vld [vmem:[%s4250_s15 + $0x208] sm:$0xff]  }
  0xf3   : > { %2548 = vmatmul.mubr.bf16.gmra.mxu1 %v3045_v56  ;;  %3272 = vmatprep.subr.bf16.mxu0 %v3518_v60  ;;  %v3562_v56 = vld [vmem:[%s4250_s15 + $0x248] sm:$0xff]   ;;  %v3566_v60 = vld [vmem:[%s4250_s15 + $0x240] sm:$0xff]  }
  0xf4   : > { %3299 = vmatpush3.bf16.msra.mxu1 %v3517_v59  ;;  %2637 = vmatprep.mubr.bf16.mxu1 %v3034_v23  ;;  %v3565_v59 = vld [vmem:[%s4250_s15 + $0x288] sm:$0xff]  }
  0xf5   : > { %3300 = vmatprep.subr.bf16.mxu1 %v3519_v61  ;;  %v3567_v61 = vld [vmem:[%s4250_s15 + $0x2c0] sm:$0xff]   ;;  %v3579_v21 = vld [vmem:[%s4250_s15 + $0x3e8] sm:$0xff]  }
  0xf6   : > { %3273 = vmatpush3.bf16.msra.mxu0 %v3520_v62  ;;  %v3568_v62 = vld [vmem:[%s4250_s15 + $0x200] sm:$0xff]   ;;  %v1271_v23 = vld [vmem:[%s4491_s0 + $0xe8] sm:$0xff] }
  0xf7   : > { %3274 = vmatprep.subr.bf16.mxu0 %v3522_v0  ;;  %v1246_v0 = vld [vmem:[%s4491_s0 + $0x20] sm:$0xff] }
  0xf8   : > { %3301 = vmatpush3.bf16.msra.mxu1 %v3521_v63  ;;  %v3569_v63 = vld [vmem:[%s4250_s15 + $0x280] sm:$0xff]  }
  0xf9   : > { %3302 = vmatprep.subr.bf16.mxu1 %v3523_v1  ;;  %v1254_v1 = vld [vmem:[%s4491_s0 + $0x60] sm:$0xff] }
  0xfa   : > { %3275 = vmatpush3.bf16.msra.mxu0 %v3524_v2  ;;  %v3035_v2 = vcombine.low %v1246_v0, %v1254_v1 }
  0xfb   : > { %3276 = vmatprep.subr.bf16.mxu0 %v3526_v4  ;;  %v1247_v4 = vld [vmem:[%s4491_s0 + $0x28] sm:$0xff] }
  0xfc   : > { %3303 = vmatpush3.bf16.msra.mxu1 %v3525_v3  ;;  %v3036_v3 = vcombine.high %v1246_v0, %v1254_v1 }
  0xfd   : > { %3304 = vmatprep.subr.bf16.mxu1 %v3527_v5  ;;  %v1255_v5 = vld [vmem:[%s4491_s0 + $0x68] sm:$0xff] }
  0xfe   : > { %3277 = vmatpush3.bf16.msra.mxu0 %v3528_v6  ;;  %v3037_v6 = vcombine.low %v1247_v4, %v1255_v5 }
  0xff   : > { %3278 = vmatprep.subr.bf16.mxu0 %v3530_v8  ;;  %v3570_v8 = vld [vmem:[%s4250_s15 + $0x378] sm:$0xff]  }
 0x100   : > { %3305 = vmatpush3.bf16.msra.mxu1 %v3529_v7  ;;  %v3038_v7 = vcombine.high %v1247_v4, %v1255_v5 }
 0x101   : > { %3306 = vmatprep.subr.bf16.mxu1 %v3531_v9  ;;  %v3571_v9 = vld [vmem:[%s4250_s15 + $0x3f8] sm:$0xff]  }
 0x102   : > { %3279 = vmatpush3.bf16.msra.mxu0 %v3532_v10  ;;  %v3572_v10 = vld [vmem:[%s4250_s15 + $0x338] sm:$0xff]  }
 0x103   : > { %3280 = vmatprep.subr.bf16.mxu0 %v3534_v12  ;;  %v3574_v12 = vld [vmem:[%s4250_s15 + $0x370] sm:$0xff]  }
 0x104   : > { %3307 = vmatpush3.bf16.msra.mxu1 %v3533_v11  ;;  %v3573_v11 = vld [vmem:[%s4250_s15 + $0x3b8] sm:$0xff]  }
 0x105   : > { %3308 = vmatprep.subr.bf16.mxu1 %v3535_v14  ;;  %v3576_v14 = vld [vmem:[%s4250_s15 + $0x330] sm:$0xff]  }
 0x106   : > { %3281 = vmatpush3.bf16.msra.mxu0 %v3536_v15  ;;  %v3577_v15 = vld [vmem:[%s4250_s15 + $0x3b0] sm:$0xff]  }
 0x107   : > { %3322 = vmatprep.subr.bf16.mxu0 %v3538_v24 }
 0x108   : > { %3309 = vmatpush3.bf16.msra.mxu1 %v3537_v16  ;;  %v1262_v16 = vld [vmem:[%s4491_s0 + $0xa0] sm:$0xff] }
 0x109   : > { %2589 = vmatmul.mubr.bf16.vlgmr.msra.gmra.mxu0 %v3031_v20  ;;  %3350 = vmatprep.subr.bf16.mxu1 %v3539_v25  ;;  %v3052_v18 = vcombine.high %v1262_v16, %v1270_v17  ;;  %v3051_v19 = vcombine.low %v1262_v16, %v1270_v17  ;;  %v3578_v20 = vld [vmem:[%s4250_s15 + $0x368] sm:$0xff]  }
 0x10a   : > { %3323 = vmatpush3.bf16.msra.mxu0 %v3540_v26  ;;  %2596 = vmatprep.mubr.bf16.mxu0 %v3048_v34  ;;  %v3580_v25 = vld [vmem:[%s4250_s15 + $0x328] sm:$0xff]   ;;  %v3588_v34 = vld [vmem:[%s4250_s15 + $0x318] sm:$0xff]  }
 0x10b   : > { %2638 = vmatmul.mubr.bf16.vlgmr.msra.gmra.mxu1 %v3033_v22  ;;  %3324 = vmatprep.subr.bf16.mxu0 %v3542_v28  ;;  %v1263_v22 = vld [vmem:[%s4491_s0 + $0xa8] sm:$0xff]  ;;  %v3582_v28 = vld [vmem:[%s4250_s15 + $0x360] sm:$0xff]  }
 0x10c   : > { %3351 = vmatpush3.bf16.msra.mxu1 %v3541_v27  ;;  %2645 = vmatprep.mubr.bf16.mxu1 %v3050_v40  ;;  %v3054_v24 = vcombine.high %v1263_v22, %v1271_v23  ;;  %v3053_v26 = vcombine.low %v1263_v22, %v1271_v23  ;;  %v3581_v27 = vld [vmem:[%s4250_s15 + $0x3a8] sm:$0xff]  }
 0x10d   : > { %3352 = vmatprep.subr.bf16.mxu1 %v3543_v29  ;;  %v3583_v29 = vld [vmem:[%s4250_s15 + $0x3e0] sm:$0xff]   ;;  %v3594_v40 = vld [vmem:[%s4250_s15 + $0x348] sm:$0xff]  }
 0x10e   : > { %3325 = vmatpush3.bf16.msra.mxu0 %v3544_v30  ;;  %v3584_v30 = vld [vmem:[%s4250_s15 + $0x320] sm:$0xff]  }
 0x10f   : > { %3326 = vmatprep.subr.bf16.mxu0 %v3546_v36  ;;  %v3590_v36 = vld [vmem:[%s4250_s15 + $0x350] sm:$0xff]  }
 0x110   : > { %3353 = vmatpush3.bf16.msra.mxu1 %v3545_v31  ;;  %v3585_v31 = vld [vmem:[%s4250_s15 + $0x3a0] sm:$0xff]  }
 0x111   : > { %2597 = vmatmul.mubr.bf16.gmra.mxu0 %v3047_v35  ;;  %3354 = vmatprep.subr.bf16.mxu1 %v3547_v37  ;;  %v3589_v35 = vld [vmem:[%s4250_s15 + $0x398] sm:$0xff]   ;;  %v3591_v37 = vld [vmem:[%s4250_s15 + $0x3d0] sm:$0xff]  }
 0x112   : > { %3327 = vmatpush3.bf16.msra.mxu0 %v3548_v41  ;;  %2686 = vmatprep.mubr.bf16.mxu0 %v3036_v3  ;;  %v3595_v41 = vld [vmem:[%s4250_s15 + $0x3c8] sm:$0xff]  }
 0x113   : > { %2646 = vmatmul.mubr.bf16.gmra.mxu1 %v3049_v42  ;;  %3328 = vmatprep.subr.bf16.mxu0 %v3550_v44  ;;  %v3596_v42 = vld [vmem:[%s4250_s15 + $0x308] sm:$0xff]   ;;  %v3598_v44 = vld [vmem:[%s4250_s15 + $0x340] sm:$0xff]  }
 0x114   : > { %3355 = vmatpush3.bf16.msra.mxu1 %v3549_v43  ;;  %2735 = vmatprep.mubr.bf16.mxu1 %v3038_v7  ;;  %v3597_v43 = vld [vmem:[%s4250_s15 + $0x388] sm:$0xff]  }
 0x115   : > { %3356 = vmatprep.subr.bf16.mxu1 %v3551_v45  ;;  %v3599_v45 = vld [vmem:[%s4250_s15 + $0x3c0] sm:$0xff]  }
 0x116   : > { %3329 = vmatpush3.bf16.msra.mxu0 %v3552_v46  ;;  %v3600_v46 = vld [vmem:[%s4250_s15 + $0x300] sm:$0xff]  }
 0x117   : > { %3330 = vmatprep.subr.bf16.mxu0 %v3554_v48  ;;  %v1248_v48 = vld [vmem:[%s4491_s0 + $0x30] sm:$0xff] }
 0x118   : > { %3357 = vmatpush3.bf16.msra.mxu1 %v3553_v47  ;;  %v3601_v47 = vld [vmem:[%s4250_s15 + $0x380] sm:$0xff]  }
 0x119   : > { %3358 = vmatprep.subr.bf16.mxu1 %v3555_v49  ;;  %v1256_v49 = vld [vmem:[%s4491_s0 + $0x70] sm:$0xff] }
 0x11a   : > { %3331 = vmatpush3.bf16.msra.mxu0 %v3556_v50  ;;  %v1249_v50 = vld [vmem:[%s4491_s0 + $0x38] sm:$0xff] }
 0x11b   : > { %3332 = vmatprep.subr.bf16.mxu0 %v3558_v52  ;;  %v3040_v52 = vcombine.high %v1248_v48, %v1256_v49 }
 0x11c   : > { %3359 = vmatpush3.bf16.msra.mxu1 %v3557_v51  ;;  %v3039_v51 = vcombine.low %v1248_v48, %v1256_v49 }
 0x11d   : > { %3360 = vmatprep.subr.bf16.mxu1 %v3559_v53  ;;  %v1257_v53 = vld [vmem:[%s4491_s0 + $0x78] sm:$0xff] }
 0x11e   : > { %3333 = vmatpush3.bf16.msra.mxu0 %v3560_v54  ;;  %v1264_v54 = vld [vmem:[%s4491_s0 + $0xb0] sm:$0xff] }
 0x11f   : > { %3334 = vmatprep.subr.bf16.mxu0 %v3562_v56  ;;  %v3041_v56 = vcombine.low %v1249_v50, %v1257_v53 }
 0x120   : > { %3361 = vmatpush3.bf16.msra.mxu1 %v3561_v55  ;;  %v1272_v55 = vld [vmem:[%s4491_s0 + $0xf0] sm:$0xff] }
 0x121   : > { %3362 = vmatprep.subr.bf16.mxu1 %v3563_v57  ;;  %v3042_v57 = vcombine.high %v1249_v50, %v1257_v53 }
 0x122   : > { %3335 = vmatpush3.bf16.msra.mxu0 %v3564_v58  ;;  %v3056_v58 = vcombine.high %v1264_v54, %v1272_v55 }
 0x123   : > { %3336 = vmatprep.subr.bf16.mxu0 %v3566_v60  ;;  %v1273_v60 = vld [vmem:[%s4491_s0 + $0xf8] sm:$0xff] }
 0x124   : > { %3363 = vmatpush3.bf16.msra.mxu1 %v3565_v59  ;;  %v1265_v59 = vld [vmem:[%s4491_s0 + $0xb8] sm:$0xff] }
 0x125   : > { %3364 = vmatprep.subr.bf16.mxu1 %v3567_v61  ;;  %v3058_v61 = vcombine.high %v1265_v59, %v1273_v60 }
 0x126   : > { %3337 = vmatpush3.bf16.msra.mxu0 %v3568_v62  ;;  %v3055_v62 = vcombine.low %v1264_v54, %v1272_v55 }
 0x127   : > { %3378 = vmatprep.subr.bf16.mxu0 %v3570_v8 }
 0x128   : > { %3365 = vmatpush3.bf16.msra.mxu1 %v3569_v63  ;;  %v3057_v63 = vcombine.low %v1265_v59, %v1273_v60 }
 0x129   : > { %2687 = vmatmul.mubr.bf16.vlgmr.msra.gmra.mxu0 %v3035_v2  ;;  %3406 = vmatprep.subr.bf16.mxu1 %v3571_v9 }
 0x12a   : > { %3379 = vmatpush3.bf16.msra.mxu0 %v3572_v10  ;;  %2694 = vmatprep.mubr.bf16.mxu0 %v3052_v18 }
 0x12b   : > { %2736 = vmatmul.mubr.bf16.vlgmr.msra.gmra.mxu1 %v3037_v6  ;;  %3380 = vmatprep.subr.bf16.mxu0 %v3574_v12 }
 0x12c   : > { %3407 = vmatpush3.bf16.msra.mxu1 %v3573_v11  ;;  %2743 = vmatprep.mubr.bf16.mxu1 %v3054_v24 }
 0x12d   : > { %3408 = vmatprep.subr.bf16.mxu1 %v3575_v13 }
 0x12e   : > { %3381 = vmatpush3.bf16.msra.mxu0 %v3576_v14 }
 0x12f   : > { %3382 = vmatprep.subr.bf16.mxu0 %v3578_v20 }
 0x130   : > { %3409 = vmatpush3.bf16.msra.mxu1 %v3577_v15 }
 0x131   : > { %2695 = vmatmul.mubr.bf16.gmra.mxu0 %v3051_v19  ;;  %3410 = vmatprep.subr.bf16.mxu1 %v3579_v21 }
 0x132   : > { %3383 = vmatpush3.bf16.msra.mxu0 %v3580_v25  ;;  %2784 = vmatprep.mubr.bf16.mxu0 %v3040_v52 }
 0x133   : > { %2744 = vmatmul.mubr.bf16.gmra.mxu1 %v3053_v26  ;;  %3384 = vmatprep.subr.bf16.mxu0 %v3582_v28 }
 0x134   : > { %3411 = vmatpush3.bf16.msra.mxu1 %v3581_v27  ;;  %2833 = vmatprep.mubr.bf16.mxu1 %v3042_v57 }
 0x135   : > { %3412 = vmatprep.subr.bf16.mxu1 %v3583_v29 }
 0x136   : > { %3385 = vmatpush3.bf16.msra.mxu0 %v3584_v30 }
 0x137   : > { %3386 = vmatprep.subr.bf16.mxu0 %v3586_v32 }
 0x138   : > { %3413 = vmatpush3.bf16.msra.mxu1 %v3585_v31 }
 0x139   : > { %3414 = vmatprep.subr.bf16.mxu1 %v3587_v33 }
 0x13a   : > { %3387 = vmatpush3.bf16.msra.mxu0 %v3588_v34 }
 0x13b   : > { %3388 = vmatprep.subr.bf16.mxu0 %v3590_v36 }
 0x13c   : > { %3415 = vmatpush3.bf16.msra.mxu1 %v3589_v35 }
 0x13d   : > { %3416 = vmatprep.subr.bf16.mxu1 %v3591_v37 }
 0x13e   : > { %3389 = vmatpush3.bf16.msra.mxu0 %v3592_v38 }
 0x13f   : > { %3390 = vmatprep.subr.bf16.mxu0 %v3594_v40 }
 0x140   : > { %3417 = vmatpush3.bf16.msra.mxu1 %v3593_v39 }
 0x141   : > { %3418 = vmatprep.subr.bf16.mxu1 %v3595_v41 }
 0x142   : > { %3391 = vmatpush3.bf16.msra.mxu0 %v3596_v42 }
 0x143   : > { %3392 = vmatprep.subr.bf16.mxu0 %v3598_v44 }
 0x144   : > { %3419 = vmatpush3.bf16.msra.mxu1 %v3597_v43 }
 0x145   : > { %3420 = vmatprep.subr.bf16.mxu1 %v3599_v45 }
 0x146   : > { %3393 = vmatpush3.bf16.msra.mxu0 %v3600_v46 }
 0x148   : > { %3421 = vmatpush3.bf16.msra.mxu1 %v3601_v47 }
 0x149   : > { %2785 = vmatmul.mubr.bf16.vlgmr.msra.gmra.mxu0 %v3039_v51 }
 0x14a   : > { %2792 = vmatprep.mubr.bf16.mxu0 %v3056_v58 }
 0x14b   : > { %2834 = vmatmul.mubr.bf16.vlgmr.msra.gmra.mxu1 %v3041_v56 }
 0x14c   : > { %2841 = vmatprep.mubr.bf16.mxu1 %v3058_v61 }
 0x151   : > { %2793 = vmatmul.mubr.bf16.gmra.mxu0 %v3055_v62 }
 0x153   : > { %2842 = vmatmul.mubr.bf16.gmra.mxu1 %v3057_v63 }
 0x1a9   : > { %v3226_v0 = vpop.f32.mrf.mxu0 }
 0x1ab   : > { %v3227_v1 = vpop.f32.mrf.mxu0  ;;  %v3254_v2 = vpop.f32.mrf.mxu1 }
 0x1ac   : > { %v3228_v42 = vadd.f32 %v3227_v1, %v3226_v0 }
 0x1ad   : > { %v3229_v3 = vpop.f32.mrf.mxu0  ;;  %v3255_v4 = vpop.f32.mrf.mxu1 }
 0x1ae   : > { %v3256_v43 = vadd.f32 %v3255_v4, %v3254_v2 }
 0x1af   : > { %v3230_v5 = vpop.f32.mrf.mxu0  ;;  %v3257_v6 = vpop.f32.mrf.mxu1 }
 0x1b0   : > { %v3231_v45 = vadd.f32 %v3230_v5, %v3229_v3  ;;  %v2542_v49 = vadd.f32 %v3256_v43, %v3228_v42 }
 0x1b1   : > { %v3232_v7 = vpop.f32.mrf.mxu0  ;;  %v3258_v8 = vpop.f32.mrf.mxu1 }
 0x1b2   : > { %v3259_v46 = vadd.f32 %v3258_v8, %v3257_v6 }
 0x1b3   : > { %v3233_v9 = vpop.f32.mrf.mxu0  ;;  %v3260_v10 = vpop.f32.mrf.mxu1 }
 0x1b4   : > { %v2545_v52 = vadd.f32 %v3259_v46, %v3231_v45  ;;  %v3234_v56 = vadd.f32 %v3233_v9, %v3232_v7 }
 0x1b5   : > { %v3235_v11 = vpop.f32.mrf.mxu0  ;;  %v3261_v12 = vpop.f32.mrf.mxu1 }
 0x1b6   : > { %v3262_v57 = vadd.f32 %v3261_v12, %v3260_v10 }
 0x1b7   : > { %v3236_v13 = vpop.f32.mrf.mxu0  ;;  %v3263_v14 = vpop.f32.mrf.mxu1 }
 0x1b8   : > { %v3237_v60 = vadd.f32 %v3236_v13, %v3235_v11  ;;  %v2550_v4 = vadd.f32 %v3262_v57, %v3234_v56 }
 0x1b9   : > { %v3264_v16 = vpop.f32.mrf.mxu1 }
 0x1ba   : > { %v3265_v61 = vadd.f32 %v3264_v16, %v3263_v14 }
 0x1c9   : > { %v3282_v15 = vpop.f32.mrf.mxu0 }
 0x1cb   : > { %v3283_v17 = vpop.f32.mrf.mxu0  ;;  %v3310_v18 = vpop.f32.mrf.mxu1 }
 0x1cc   : > { %v3284_v47 = vadd.f32 %v3283_v17, %v3282_v15 }
 0x1cd   : > { %v3285_v19 = vpop.f32.mrf.mxu0  ;;  %v3311_v20 = vpop.f32.mrf.mxu1 }
 0x1ce   : > { %v2591_v53 = vadd.f32 %v3284_v47, %v2542_v49  ;;  %v3312_v54 = vadd.f32 %v3311_v20, %v3310_v18 }
 0x1cf   : > { %v3286_v21 = vpop.f32.mrf.mxu0  ;;  %v3313_v22 = vpop.f32.mrf.mxu1 }
 0x1d0   : > { %v3287_v50 = vadd.f32 %v3286_v21, %v3285_v19  ;;  %v2640_v0 = vadd.f32 %v3312_v54, %v2591_v53  ;;  %v2553_v19 = vadd.f32 %v3265_v61, %v3237_v60 }
 0x1d1   : > { %v3288_v23 = vpop.f32.mrf.mxu0  ;;  %v3314_v24 = vpop.f32.mrf.mxu1 }
 0x1d2   : > { %v2594_v58 = vadd.f32 %v3287_v50, %v2545_v52  ;;  %v3315_v1 = vadd.f32 %v3314_v24, %v3313_v22 }
 0x1d3   : > { %v3316_v25 = vpop.f32.mrf.mxu1  ;;  %v3289_v26 = vpop.f32.mrf.mxu0 }
 0x1d4   : > { %v3290_v62 = vadd.f32 %v3289_v26, %v3288_v23  ;;  %v2643_v8 = vadd.f32 %v3315_v1, %v2594_v58 }
 0x1d5   : > { %v3317_v27 = vpop.f32.mrf.mxu1  ;;  %v3291_v28 = vpop.f32.mrf.mxu0 }
 0x1d6   : > { %v2599_v7 = vadd.f32 %v3290_v62, %v2550_v4  ;;  %v3318_v9 = vadd.f32 %v3317_v27, %v3316_v25 }
 0x1d7   : > { %v3319_v29 = vpop.f32.mrf.mxu1  ;;  %v3292_v30 = vpop.f32.mrf.mxu0 }
 0x1d8   : > { %v3293_v5 = vadd.f32 %v3292_v30, %v3291_v28  ;;  %v2648_v26 = vadd.f32 %v3318_v9, %v2599_v7 }
 0x1d9   : > { %v3320_v32 = vpop.f32.mrf.mxu1 }
 0x1da   : > { %v2602_v14 = vadd.f32 %v3293_v5, %v2553_v19  ;;  %v3321_v16 = vadd.f32 %v3320_v32, %v3319_v29 }
 0x1dc   : > { %v2651_v25 = vadd.f32 %v3321_v16, %v2602_v14 }
 0x1e9   : > { %v3338_v31 = vpop.f32.mrf.mxu0 }
 0x1eb   : > { %v3366_v33 = vpop.f32.mrf.mxu1  ;;  %v3339_v34 = vpop.f32.mrf.mxu0 }
 0x1ec   : > { %v3340_v59 = vadd.f32 %v3339_v34, %v3338_v31 }
 0x1ed   : > { %v3367_v35 = vpop.f32.mrf.mxu1  ;;  %v3341_v36 = vpop.f32.mrf.mxu0 }
 0x1ee   : > { %v2689_v15 = vadd.f32 %v3340_v59, %v2640_v0  ;;  %v3368_v17 = vadd.f32 %v3367_v35, %v3366_v33 }
 0x1ef   : > { %v3369_v37 = vpop.f32.mrf.mxu1  ;;  %v3342_v38 = vpop.f32.mrf.mxu0 }
 0x1f0   : > { %v3343_v2 = vadd.f32 %v3342_v38, %v3341_v36  ;;  %v2738_v22 = vadd.f32 %v3368_v17, %v2689_v15 }
 0x1f1   : > { %v3370_v39 = vpop.f32.mrf.mxu1  ;;  %v3344_v40 = vpop.f32.mrf.mxu0 }
 0x1f2   : > { %v2692_v12 = vadd.f32 %v3343_v2, %v2643_v8  ;;  %v3371_v23 = vadd.f32 %v3370_v39, %v3369_v37 }
 0x1f3   : > { %v3372_v41 = vpop.f32.mrf.mxu1  ;;  %v3345_v44 = vpop.f32.mrf.mxu0 }
 0x1f4   : > { %v3346_v20 = vadd.f32 %v3345_v44, %v3344_v40  ;;  %v2741_v31 = vadd.f32 %v3371_v23, %v2692_v12 }
 0x1f5   : > { %v3373_v48 = vpop.f32.mrf.mxu1  ;;  %v3347_v51 = vpop.f32.mrf.mxu0 }
 0x1f6   : > { %v2697_v27 = vadd.f32 %v3346_v20, %v2648_v26  ;;  %v3374_v38 = vadd.f32 %v3373_v48, %v3372_v41 }
 0x1f7   : > { %v3375_v55 = vpop.f32.mrf.mxu1  ;;  %v3348_v63 = vpop.f32.mrf.mxu0 }
 0x1f8   : > { %v3349_v28 = vadd.f32 %v3348_v63, %v3347_v51  ;;  %v2746_v50 = vadd.f32 %v3374_v38, %v2697_v27 }
 0x1f9   : > { %v3376_v3 = vpop.f32.mrf.mxu1 }
 0x1fa   : > { %v2700_v40 = vadd.f32 %v3349_v28, %v2651_v25  ;;  %v3377_v39 = vadd.f32 %v3376_v3, %v3375_v55 }
 0x1fc   : > { %v2749_v54 = vadd.f32 %v3377_v39, %v2700_v40 }
 0x209   : > { %v3394_v6 = vpop.f32.mrf.mxu0 }
 0x20b   : > { %v3422_v18 = vpop.f32.mrf.mxu1  ;;  %v3395_v10 = vpop.f32.mrf.mxu0 }
 0x20c   : > { %v3396_v11 = vadd.f32 %v3395_v10, %v3394_v6 }
 0x20d   : > { %v3423_v13 = vpop.f32.mrf.mxu1  ;;  %v3397_v21 = vpop.f32.mrf.mxu0 }
 0x20e   : > { %v2787_v33 = vadd.f32 %v3396_v11, %v2738_v22  ;;  %v3424_v42 = vadd.f32 %v3423_v13, %v3422_v18 }
 0x20f   : > { %v3425_v24 = vpop.f32.mrf.mxu1  ;;  %v3398_v30 = vpop.f32.mrf.mxu0 }
 0x210   : > { %v3399_v34 = vadd.f32 %v3398_v30, %v3397_v21  ;;  %v2836_v44 = vadd.f32 %v3424_v42, %v2787_v33 }
 0x211   : > { %v3426_v35 = vpop.f32.mrf.mxu1  ;;  %v3400_v36 = vpop.f32.mrf.mxu0 }
 0x212   : > { %v2790_v43 = vadd.f32 %v3399_v34, %v2741_v31  ;;  %v3427_v29 = vadd.f32 %v3426_v35, %v3425_v24 }
 0x213   : > { %v3428_v32 = vpop.f32.mrf.mxu1  ;;  %v3401_v37 = vpop.f32.mrf.mxu0 }
 0x214   : > { %v2839_v45 = vadd.f32 %v3427_v29, %v2790_v43  ;;  %v3402_v46 = vadd.f32 %v3401_v37, %v3400_v36 }
 0x215   : > { %v3429_v47 = vpop.f32.mrf.mxu1  ;;  %v3403_v49 = vpop.f32.mrf.mxu0 }
 0x216   : > { %v3202_v51 = vpack.c.bf16 %v2839_v45, %v2836_v44  ;;  %v2795_v41 = vadd.f32 %v3402_v46, %v2746_v50  ;;  %v3430_v57 = vadd.f32 %v3429_v47, %v3428_v32 }
 0x217   : > { %v3431_v52 = vpop.f32.mrf.mxu1  ;;  %v3404_v53 = vpop.f32.mrf.mxu0 }
 0x218   : > { %3203 = vst [vmem:[%s1232_s20] sm:$0xff] %v3202_v51   ;;  %v3405_v48 = vadd.f32 %v3404_v53, %v3403_v49  ;;  %v2844_v60 = vadd.f32 %v3430_v57, %v2795_v41 }
 0x219   : > { %v3432_v56 = vpop.f32.mrf.mxu1 }
 0x21a   : > { %v2798_v58 = vadd.f32 %v3405_v48, %v2749_v54  ;;  %v3433_v59 = vadd.f32 %v3432_v56, %v3431_v52 }
 0x21c   : > { %v2847_v55 = vadd.f32 %v3433_v59, %v2798_v58  ;;  %2876 = sbr.rel (!%p3692_p6) target bundleno = 553 (0x229), region = 73 }
 0x21e   : > { %v3207_v61 = vpack.c.bf16 %v2847_v55, %v2844_v60 }
 0x21f   : > { %v2898_v62 = vld [vmem:[%s1232_s20] sm:$0xf] (%p3692_p6)  ;;  %v2900_v63 = vld [vmem:[%s1232_s20 + $0x4] sm:$0xf] (%p3692_p6) }
 0x220   : > { %3209 = vst [vmem:[%s1232_s20 + $0x8] sm:$0xff] %v3207_v61   ;;  %2899 = vst [vmem:[%s2881_s22] sm:$0xf] (%p3692_p6), %v2898_v62 }
 0x221   : > { %2901 = vst [vmem:[%s2881_s22 + $0x8] sm:$0xf] %v2900_v63 }
 0x227   : > { %v2902_v0 = vld [vmem:[%s1232_s20 + $0x8] sm:$0xf]  ;;  %v2904_v1 = vld [vmem:[%s1232_s20 + $0xc] sm:$0xf] }
 0x228   : > { %2903 = vst [vmem:[%s2881_s22 + $0x10] sm:$0xf] %v2902_v0  ;;  %2905 = vst [vmem:[%s2881_s22 + $0x18] sm:$0xf] %v2904_v1 }
 0x229 PF: > { %s12_s13 = sadd.s32 1, %s3640_s13   ;;  %s4495_s9 = smov %s3628_s10 }
 0x22a   : > { %p9_p11 = scmp.ge.s32.totalorder %s12_s13, 4   ;;  %s4496_s10 = smov %s3697_s19 }
 0x22b   : > { %s4497_s11 = smov %s3636_s12  ;;  %s4498_s12 = smov %s4500_s14 }
 0x22c   :  { %11 = sbr.rel (!%p9_p11) target bundleno = 3 (0x3), region = 148 }

// kernel: d2_forward.17
= control target key start
LH: loop header
LB: loop body
LE: loop exit
PB: predicated region body
PF: predicated region fallthrough
CT: control target
= control target key end

     0   :  { %s626_s12 = smov 0   ;;  %s628_s13 = smov 0   ;;  %s710_s0 = inlined_call_operand.vmem [shape: bf16[32,256], index: 0, kind: input, shape index: {}]   ;;  %s711_s1 = inlined_call_operand.vmem [shape: f32[1,256], index: 1, kind: input, shape index: {}]   ;;  %s712_s2 = inlined_call_operand.vmem [shape: f32[1,256], index: 2, kind: input, shape index: {}]   ;;  %s713_s3 = inlined_call_operand.vmem [shape: bf16[32,256], index: 3, kind: output, shape index: {}]  }
   0x1   :  { %s630_s14 = smov 0   ;;  %s632_s15 = smov 0  }
   0x2   :  { %s634_s16 = smov 0  }
   0x3 LB: > { %s22_s17 = sadd.s32 1, %s600_s15  ;;  %s483_s18 = sadd.s32 4294967295, %s604_s16   ;;  %s604_s16 = sphi %s634_s16, %s13_s16   ;;  %s600_s15 = sphi %s632_s15, %s718_s15   ;;  %s596_s14 = sphi %s630_s14, %s717_s14   ;;  %s592_s13 = sphi %s628_s13, %s716_s13   ;;  %s588_s12 = sphi %s626_s12, %s715_s12  }
   0x4   : > { %p23_p0 = scmp.ge.s32.totalorder %s22_s17, 2  ;;  %p41_p1 = scmp.ne.s32.totalorder %s592_s13, %s588_s12 }
   0x5   : > { %p42_p2 = scmp.eq.s32.totalorder %s604_s16, 0  ;;  %p125_p4 = scmp.eq.s32.totalorder %s483_s18, 1 }
   0x6   : > { %s720_s17 = smov (%p23_p0, %s22_s17), 0  ;;  %s34_s20 = sadd.s32 1, %s592_s13 }
   0x7   : > { %p43_p3 = por %p42_p2, %p41_p1  ;;  %s30_s19 = ssub.s32 %s600_s15, %s720_s17 }
   0x8   : > { %p32_p5 = scmp.eq.s32.totalorder %s30_s19, 0  ;;  %p661_p6 = por %p125_p4, %p41_p1 }
   0x9   : > { %p486_p7 = scmp.ge.s32.totalorder %s604_s16, 2 }
   0xa   : > { %s666_s22 = scalar_select %p32_p5, %s592_s13, %s34_s20  }
   0xb   : > { %147 = sbr.rel (%p486_p7) target bundleno = 22 (0x16), region = 16 }
  0x10   : > { %150 = sbr.rel (!%p43_p3) target bundleno = 22 (0x16), region = 20  ;;  %s152_s23 = sand.u32 (%p43_p3), 1, %s592_s13  }
  0x11   : > { %s488_s24 = sshll.u32 (%p43_p3), %s600_s15, 2  ;;  %s487_s25 = sshll.u32 (%p43_p3), %s152_s23, 4 }
  0x12   : > { %s159_s28 = scalar_lea.vmem (%p43_p3), %s710_s0, %s488_s24  ;;  %s154_s29 = scalar_lea.vmem (%p43_p3), [#allocation2], %s487_s25 }
  0x13   : > { %v176_v0 = vld [vmem:[%s159_s28] sm:$0xf] (%p43_p3)  ;;  %v178_v1 = vld [vmem:[%s159_s28 + $0x8] sm:$0xf] (%p43_p3)  ;;  %v180_v2 = vld [vmem:[%s159_s28 + $0x10] sm:$0xf] (%p43_p3) }
  0x14   : > { %177 = vst [vmem:[%s154_s29] sm:$0xf] (%p43_p3), %v176_v0  ;;  %179 = vst [vmem:[%s154_s29 + $0x4] sm:$0xf] (%p43_p3), %v178_v1  ;;  %v182_v3 = vld [vmem:[%s159_s28 + $0x18] sm:$0xf] (%p43_p3) }
  0x15   : > { %181 = vst [vmem:[%s154_s29 + $0x8] sm:$0xf] %v180_v2  ;;  %183 = vst [vmem:[%s154_s29 + $0xc] sm:$0xf] %v182_v3 }
  0x16 PF: > { %p489_p8 = scmp.ge.s32.totalorder %s604_s16, 1  ;;  %p226_p9 = scmp.lt.s32.totalorder %s604_s16, 3 }
  0x18   : > { %p227_p10 = pnand %p489_p8, %p226_p9 }
  0x19   : > { %s233_s30 = sand.u32 (!%p227_p10), 1, %s588_s12   ;;  %p262_p11 = scmp.lt.s32.totalorder (!%p227_p10), %s596_s14, 1 }
  0x1a   : > { %230 = sbr.rel (%p227_p10) target bundleno = 55 (0x37), region = 69  ;;  %s678_s4 = sshll.u32 (!%p227_p10), %s233_s30, 4 }
  0x1b   : > { %s235_s6 = scalar_lea.vmem (!%p227_p10), [#allocation2], %s678_s4  ;;  %s260_s18 = scalar_lea.vmem (!%p227_p10), [#allocation3], %s678_s4 }
  0x1f   : > { %s263_s5 = scalar_select %p262_p11, %s596_s14, 1  ;;  %v507_v4 = vld [vmem:[%s235_s6] sm:$0xff]   ;;  %v524_v5 = vld [vmem:[%s235_s6 + $0x8] sm:$0xff]  }
  0x20   : > { %v508_v6 = vunpack.c.l.bf16 %v507_v4  ;;  %v509_v7 = vunpack.c.h.bf16 %v507_v4  ;;  %v512_v8 = vunpack.c.l.bf16 %v524_v5  ;;  %v513_v9 = vunpack.c.h.bf16 %v524_v5  ;;  %s499_s19 = sshll.u32 (%p661_p6), %s596_s14, 2 }
  0x21   : > { %s264_s9 = scalar_lea.vmem %s711_s1, %s263_s5  ;;  %s267_s12 = scalar_lea.vmem %s712_s2, %s263_s5 }
  0x22   : > { %v492_v10 = vld [vmem:[%s264_s9] ss:$0 sm:$0xff]  ;;  %s342_s24 = scalar_lea.vmem (%p661_p6), %s713_s3, %s499_s19 }
  0x23   : > { %v493_v11 = vld [vmem:[%s267_s12] ss:$0 sm:$0xff]  ;;  %v284_v12 = vmul.f32 %v508_v6, %v492_v10  ;;  %v285_v13 = vmul.f32 %v509_v7, %v492_v10  ;;  %v286_v14 = vmul.f32 %v512_v8, %v492_v10  ;;  %v287_v15 = vmul.f32 %v513_v9, %v492_v10 }
  0x25   : > { %v295_v16 = vadd.f32 %v493_v11, %v284_v12  ;;  %v296_v17 = vadd.f32 %v493_v11, %v285_v13  ;;  %v297_v18 = vadd.f32 %v493_v11, %v286_v14  ;;  %v298_v19 = vadd.f32 %v493_v11, %v287_v15 }
  0x27   : > { %vm299_vm0 = vcmp.gt.f32.partialorder %v295_v16, 0.0  ;;  %vm300_vm1 = vcmp.gt.f32.partialorder %v296_v17, 0.0  ;;  %v303_v20 = vmul.f32 0.2, %v295_v16  ;;  %v304_v21 = vmul.f32 0.2, %v296_v17 }
  0x28   : > { %vm301_vm2 = vcmp.gt.f32.partialorder %v297_v18, 0.0  ;;  %vm302_vm3 = vcmp.gt.f32.partialorder %v298_v19, 0.0  ;;  %v305_v22 = vmul.f32 0.2, %v297_v18  ;;  %v306_v23 = vmul.f32 0.2, %v298_v19 }
  0x29   : > { %v307_v24 = vsel %vm299_vm0, %v295_v16, %v303_v20  ;;  %v308_v25 = vsel %vm300_vm1, %v296_v17, %v304_v21  ;;  %337 = sbr.rel (!%p661_p6) target bundleno = 55 (0x37), region = 77 }
  0x2a   : > { %v517_v26 = vpack.c.bf16 %v308_v25, %v307_v24  ;;  %v309_v27 = vsel %vm301_vm2, %v297_v18, %v305_v22  ;;  %v310_v28 = vsel %vm302_vm3, %v298_v19, %v306_v23 }
  0x2b   : > { %v522_v29 = vpack.c.bf16 %v310_v28, %v309_v27 }
  0x2c   : > { %518 = vst [vmem:[%s260_s18] sm:$0xff] %v517_v26  }
  0x2d   : > { %525 = vst [vmem:[%s260_s18 + $0x8] sm:$0xff] %v522_v29  }
  0x33   : > { %v359_v30 = vld [vmem:[%s260_s18] sm:$0xf]  ;;  %v361_v31 = vld [vmem:[%s260_s18 + $0x4] sm:$0xf] }
  0x34   : > { %v363_v32 = vld [vmem:[%s260_s18 + $0x8] sm:$0xf]  ;;  %v365_v33 = vld [vmem:[%s260_s18 + $0xc] sm:$0xf]  ;;  %360 = vst [vmem:[%s342_s24] sm:$0xf] %v359_v30 }
  0x35   : > { %362 = vst [vmem:[%s342_s24 + $0x8] sm:$0xf] %v361_v31  ;;  %364 = vst [vmem:[%s342_s24 + $0x10] sm:$0xf] %v363_v32 }
  0x36   : > { %366 = vst [vmem:[%s342_s24 + $0x18] sm:$0xf] %v365_v33 }
  0x37 PF: > { %s13_s16 = sadd.s32 1, %s604_s16   ;;  %s715_s12 = smov %s592_s13 }
  0x38   : > { %p10_p12 = scmp.ge.s32.totalorder %s13_s16, 4   ;;  %s716_s13 = smov %s666_s22 }
  0x39   : > { %s717_s14 = smov %s600_s15  ;;  %s718_s15 = smov %s720_s17 }
  0x3a   :  { %12 = sbr.rel (!%p10_p12) target bundleno = 3 (0x3), region = 155 }

// kernel: d2_forward.19
= control target key start
LH: loop header
LB: loop body
LE: loop exit
PB: predicated region body
PF: predicated region fallthrough
CT: control target
= control target key end

     0   :  { %s468_s9 = smov 0   ;;  %s470_s10 = smov 0   ;;  %s547_s0 = inlined_call_operand.vmem [shape: bf16[32,512], index: 0, kind: input, shape index: {}]   ;;  %s548_s1 = inlined_call_operand.vmem [shape: f32[1,512], index: 1, kind: output, shape index: {0}]   ;;  %s549_s2 = inlined_call_operand.vmem [shape: f32[1,512], index: 2, kind: output, shape index: {1}]  }
   0x1   :  { %s472_s11 = smov 0   ;;  %s474_s12 = smov 0  }
   0x2   :  { %s476_s13 = smov 0  }
   0x3 LB: > { %s25_s14 = sadd.s32 1, %s446_s12  ;;  %p41_p1 = scmp.ne.s32.totalorder %s438_s10, %s434_s9  ;;  %s450_s13 = sphi %s476_s13, %s13_s13   ;;  %s446_s12 = sphi %s474_s12, %s553_s12   ;;  %s442_s11 = sphi %s472_s11, %s552_s11   ;;  %s438_s10 = sphi %s470_s10, %s551_s10   ;;  %s434_s9 = sphi %s468_s9, %s550_s9  }
   0x4   : > { %p27_p0 = scmp.ge.s32.totalorder %s25_s14, 4  ;;  %p42_p2 = scmp.eq.s32.totalorder %s450_s13, 0 }
   0x5   : > { %s34_s16 = sadd.s32 1, %s438_s10  ;;  %p355_p5 = scmp.ge.s32.totalorder %s450_s13, 4 }
   0x6   : > { %s555_s14 = smov (%p27_p0, %s25_s14), 0  ;;  %p43_p3 = por %p42_p2, %p41_p1 }
   0x7   : > { %s30_s15 = ssub.s32 %s446_s12, %s555_s14  ;;  %119 = sbr.rel (%p355_p5) target bundleno = 19 (0x13), region = 16 }
   0x8   : > { %p32_p4 = scmp.eq.s32.totalorder %s30_s15, 0 }
   0xa   : > { %s503_s17 = scalar_select %p32_p4, %s438_s10, %s34_s16  }
   0xc   : > { %122 = sbr.rel (!%p43_p3) target bundleno = 19 (0x13), region = 20  ;;  %s124_s18 = sand.u32 (%p43_p3), 1, %s438_s10  }
   0xd   : > { %s357_s19 = sshll.u32 (%p43_p3), %s446_s12, 2  ;;  %s356_s20 = sshll.u32 (%p43_p3), %s124_s18, 4 }
   0xe   : > { %s131_s23 = scalar_lea.vmem (%p43_p3), %s547_s0, %s357_s19  ;;  %s126_s24 = scalar_lea.vmem (%p43_p3), [#allocation2], %s356_s20 }
   0xf   : > { %v148_v0 = vld [vmem:[%s131_s23] sm:$0xf] (%p43_p3)  ;;  %v150_v1 = vld [vmem:[%s131_s23 + $0x10] sm:$0xf] (%p43_p3) }
  0x10   : > { %149 = vst [vmem:[%s126_s24] sm:$0xf] (%p43_p3), %v148_v0  ;;  %151 = vst [vmem:[%s126_s24 + $0x4] sm:$0xf] (%p43_p3), %v150_v1  ;;  %v152_v2 = vld [vmem:[%s131_s23 + $0x20] sm:$0xf] (%p43_p3) }
  0x11   : > { %v154_v3 = vld [vmem:[%s131_s23 + $0x30] sm:$0xf]  ;;  %153 = vst [vmem:[%s126_s24 + $0x8] sm:$0xf] %v152_v2 }
  0x12   : > { %155 = vst [vmem:[%s126_s24 + $0xc] sm:$0xf] %v154_v3 }
  0x13 PF: > { %p358_p6 = scmp.ge.s32.totalorder %s450_s13, 1  ;;  %p186_p7 = scmp.lt.s32.totalorder %s450_s13, 5 }
  0x15   : > { %p187_p8 = pnand %p358_p6, %p186_p7 }
  0x16   : > { %p216_p9 = scmp.lt.s32.totalorder (!%p187_p8), %s442_s11, 3  ;;  %s193_s25 = sand.u32 (!%p187_p8), 1, %s434_s9  }
  0x17   : > { %190 = sbr.rel (%p187_p8) target bundleno = 54 (0x36), region = 61  ;;  %s359_s26 = sshll.u32 (!%p187_p8), %s193_s25, 4 }
  0x18   : > { %s195_s5 = scalar_lea.vmem (!%p187_p8), [#allocation2], %s359_s26 }
  0x1c   : > { %s557_s11 = smov (!%p216_p9, %s442_s11), 3  ;;  %v363_v4 = vld [vmem:[%s195_s5] sm:$0xff]   ;;  %v370_v5 = vld [vmem:[%s195_s5 + $0x8] sm:$0xff]   ;;  %v452_v6 = vmov 0.0  }
  0x1d   : > { %s519_s29 = scalar_lea.vmem %s548_s1, %s557_s11  ;;  %s524_s4 = scalar_lea.vmem %s549_s2, %s557_s11  ;;  %v364_v7 = vunpack.c.l.bf16 %v363_v4  ;;  %v365_v8 = vunpack.c.h.bf16 %v363_v4  ;;  %v368_v9 = vunpack.c.l.bf16 %v370_v5  ;;  %v369_v10 = vunpack.c.h.bf16 %v370_v5 }
  0x1e   : > { %226 = vst [vmem:[%s519_s29] sm:$0x1] %v452_v6  ;;  %227 = vst [vmem:[%s524_s4] sm:$0x1] %v452_v6 }
  0x1f   : > { %v237_v11 = vadd.f32 %v365_v8, %v364_v7  ;;  %v249_v12 = vmul.f32 %v364_v7, %v364_v7  ;;  %v250_v13 = vmul.f32 %v365_v8, %v365_v8  ;;  %v251_v14 = vmul.f32 %v368_v9, %v368_v9 }
  0x20   : > { %v252_v16 = vmul.f32 %v369_v10, %v369_v10 }
  0x21   : > { %v238_v15 = vadd.f32 %v368_v9, %v237_v11  ;;  %v253_v17 = vadd.f32 %v250_v13, %v249_v12 }
  0x23   : > { %v239_v18 = vadd.f32 %v369_v10, %v238_v15  ;;  %v254_v19 = vadd.f32 %v253_v17, %v251_v14 }
  0x25   : > { %v240_v20 = vrot.slane %v239_v18, 4  ;;  %v255_v21 = vadd.f32 %v254_v19, %v252_v16  ;;  %v236_v30 = vld [vmem:[%s519_s29] sm:$0x1] }
  0x26   : > { %v248_v33 = vld [vmem:[%s524_s4] sm:$0x1] }
  0x27   : > { %v241_v22 = vadd.f32 %v240_v20, %v239_v18  ;;  %v256_v23 = vrot.slane %v255_v21, 4 }
  0x29   : > { %v242_v24 = vrot.slane %v241_v22, 2  ;;  %v257_v25 = vadd.f32 %v256_v23, %v255_v21 }
  0x2b   : > { %v243_v26 = vadd.f32 %v242_v24, %v241_v22  ;;  %v258_v27 = vrot.slane %v257_v25, 2 }
  0x2d   : > { %v244_v28 = vrot.slane %v243_v26, 1  ;;  %v259_v29 = vadd.f32 %v258_v27, %v257_v25 }
  0x2f   : > { %v245_v31 = vadd.f32 %v244_v28, %v243_v26  ;;  %v260_v32 = vrot.slane %v259_v29, 1 }
  0x31   : > { %v246_v34 = vadd.f32 %v245_v31, %v236_v30  ;;  %v261_v35 = vadd.f32 %v260_v32, %v259_v29 }
  0x33   : > { %247 = vst [vmem:[%s519_s29] sm:$0x1] %v246_v34  ;;  %v262_v36 = vadd.f32 %v261_v35, %v248_v33 }
  0x35   : > { %263 = vst [vmem:[%s524_s4] sm:$0x1] %v262_v36 }
  0x36 PF: > { %s13_s13 = sadd.s32 1, %s450_s13   ;;  %s550_s9 = smov %s438_s10 }
  0x37   : > { %p10_p10 = scmp.ge.s32.totalorder %s13_s13, 6   ;;  %s551_s10 = smov %s503_s17 }
  0x38   : > { %s552_s11 = smov %s446_s12  ;;  %s553_s12 = smov %s555_s14 }
  0x39   :  { %12 = sbr.rel (!%p10_p10) target bundleno = 3 (0x3), region = 116 }

// kernel: d2_forward.20
= control target key start
LH: loop header
LB: loop body
LE: loop exit
PB: predicated region body
PF: predicated region fallthrough
CT: control target
= control target key end

     0   :  { %s626_s12 = smov 0   ;;  %s628_s13 = smov 0   ;;  %s710_s0 = inlined_call_operand.vmem [shape: bf16[32,512], index: 0, kind: input, shape index: {}]   ;;  %s711_s1 = inlined_call_operand.vmem [shape: f32[1,512], index: 1, kind: input, shape index: {}]   ;;  %s712_s2 = inlined_call_operand.vmem [shape: f32[1,512], index: 2, kind: input, shape index: {}]   ;;  %s713_s3 = inlined_call_operand.vmem [shape: bf16[32,512], index: 3, kind: output, shape index: {}]  }
   0x1   :  { %s630_s14 = smov 0   ;;  %s632_s15 = smov 0  }
   0x2   :  { %s634_s16 = smov 0  }
   0x3 LB: > { %s22_s17 = sadd.s32 1, %s600_s15  ;;  %s483_s18 = sadd.s32 4294967295, %s604_s16   ;;  %s604_s16 = sphi %s634_s16, %s13_s16   ;;  %s600_s15 = sphi %s632_s15, %s718_s15   ;;  %s596_s14 = sphi %s630_s14, %s717_s14   ;;  %s592_s13 = sphi %s628_s13, %s716_s13   ;;  %s588_s12 = sphi %s626_s12, %s715_s12  }
   0x4   : > { %p23_p0 = scmp.ge.s32.totalorder %s22_s17, 4  ;;  %p41_p1 = scmp.ne.s32.totalorder %s592_s13, %s588_s12 }
   0x5   : > { %p42_p2 = scmp.eq.s32.totalorder %s604_s16, 0  ;;  %p125_p4 = scmp.eq.s32.totalorder %s483_s18, 3 }
   0x6   : > { %s720_s17 = smov (%p23_p0, %s22_s17), 0  ;;  %s34_s20 = sadd.s32 1, %s592_s13 }
   0x7   : > { %p43_p3 = por %p42_p2, %p41_p1  ;;  %s30_s19 = ssub.s32 %s600_s15, %s720_s17 }
   0x8   : > { %p32_p5 = scmp.eq.s32.totalorder %s30_s19, 0  ;;  %p661_p6 = por %p125_p4, %p41_p1 }
   0x9   : > { %p486_p7 = scmp.ge.s32.totalorder %s604_s16, 4 }
   0xa   : > { %s666_s22 = scalar_select %p32_p5, %s592_s13, %s34_s20  }
   0xb   : > { %147 = sbr.rel (%p486_p7) target bundleno = 23 (0x17), region = 16 }
  0x10   : > { %150 = sbr.rel (!%p43_p3) target bundleno = 23 (0x17), region = 20  ;;  %s152_s23 = sand.u32 (%p43_p3), 1, %s592_s13  }
  0x11   : > { %s488_s24 = sshll.u32 (%p43_p3), %s600_s15, 2  ;;  %s487_s25 = sshll.u32 (%p43_p3), %s152_s23, 4 }
  0x12   : > { %s159_s28 = scalar_lea.vmem (%p43_p3), %s710_s0, %s488_s24  ;;  %s154_s29 = scalar_lea.vmem (%p43_p3), [#allocation2], %s487_s25 }
  0x13   : > { %v176_v0 = vld [vmem:[%s159_s28] sm:$0xf] (%p43_p3)  ;;  %v178_v1 = vld [vmem:[%s159_s28 + $0x10] sm:$0xf] (%p43_p3) }
  0x14   : > { %177 = vst [vmem:[%s154_s29] sm:$0xf] (%p43_p3), %v176_v0  ;;  %179 = vst [vmem:[%s154_s29 + $0x4] sm:$0xf] (%p43_p3), %v178_v1  ;;  %v180_v2 = vld [vmem:[%s159_s28 + $0x20] sm:$0xf] (%p43_p3) }
  0x15   : > { %v182_v3 = vld [vmem:[%s159_s28 + $0x30] sm:$0xf]  ;;  %181 = vst [vmem:[%s154_s29 + $0x8] sm:$0xf] %v180_v2 }
  0x16   : > { %183 = vst [vmem:[%s154_s29 + $0xc] sm:$0xf] %v182_v3 }
  0x17 PF: > { %p489_p8 = scmp.ge.s32.totalorder %s604_s16, 1  ;;  %p226_p9 = scmp.lt.s32.totalorder %s604_s16, 5 }
  0x19   : > { %p227_p10 = pnand %p489_p8, %p226_p9 }
  0x1a   : > { %s233_s30 = sand.u32 (!%p227_p10), 1, %s588_s12   ;;  %p262_p11 = scmp.lt.s32.totalorder (!%p227_p10), %s596_s14, 3 }
  0x1b   : > { %230 = sbr.rel (%p227_p10) target bundleno = 56 (0x38), region = 69  ;;  %s678_s4 = sshll.u32 (!%p227_p10), %s233_s30, 4 }
  0x1c   : > { %s235_s6 = scalar_lea.vmem (!%p227_p10), [#allocation2], %s678_s4  ;;  %s260_s18 = scalar_lea.vmem (!%p227_p10), [#allocation3], %s678_s4 }
  0x20   : > { %s263_s5 = scalar_select %p262_p11, %s596_s14, 3  ;;  %v507_v4 = vld [vmem:[%s235_s6] sm:$0xff]   ;;  %v524_v5 = vld [vmem:[%s235_s6 + $0x8] sm:$0xff]  }
  0x21   : > { %v508_v6 = vunpack.c.l.bf16 %v507_v4  ;;  %v509_v7 = vunpack.c.h.bf16 %v507_v4  ;;  %v512_v8 = vunpack.c.l.bf16 %v524_v5  ;;  %v513_v9 = vunpack.c.h.bf16 %v524_v5  ;;  %s499_s19 = sshll.u32 (%p661_p6), %s596_s14, 2 }
  0x22   : > { %s264_s9 = scalar_lea.vmem %s711_s1, %s263_s5  ;;  %s267_s12 = scalar_lea.vmem %s712_s2, %s263_s5 }
  0x23   : > { %v492_v10 = vld [vmem:[%s264_s9] ss:$0 sm:$0xff]  ;;  %s342_s24 = scalar_lea.vmem (%p661_p6), %s713_s3, %s499_s19 }
  0x24   : > { %v493_v11 = vld [vmem:[%s267_s12] ss:$0 sm:$0xff]  ;;  %v284_v12 = vmul.f32 %v508_v6, %v492_v10  ;;  %v285_v13 = vmul.f32 %v509_v7, %v492_v10  ;;  %v286_v14 = vmul.f32 %v512_v8, %v492_v10  ;;  %v287_v15 = vmul.f32 %v513_v9, %v492_v10 }
  0x26   : > { %v295_v16 = vadd.f32 %v493_v11, %v284_v12  ;;  %v296_v17 = vadd.f32 %v493_v11, %v285_v13  ;;  %v297_v18 = vadd.f32 %v493_v11, %v286_v14  ;;  %v298_v19 = vadd.f32 %v493_v11, %v287_v15 }
  0x28   : > { %vm299_vm0 = vcmp.gt.f32.partialorder %v295_v16, 0.0  ;;  %vm300_vm1 = vcmp.gt.f32.partialorder %v296_v17, 0.0  ;;  %v303_v20 = vmul.f32 0.2, %v295_v16  ;;  %v304_v21 = vmul.f32 0.2, %v296_v17 }
  0x29   : > { %vm301_vm2 = vcmp.gt.f32.partialorder %v297_v18, 0.0  ;;  %vm302_vm3 = vcmp.gt.f32.partialorder %v298_v19, 0.0  ;;  %v305_v22 = vmul.f32 0.2, %v297_v18  ;;  %v306_v23 = vmul.f32 0.2, %v298_v19 }
  0x2a   : > { %v307_v24 = vsel %vm299_vm0, %v295_v16, %v303_v20  ;;  %v308_v25 = vsel %vm300_vm1, %v296_v17, %v304_v21  ;;  %337 = sbr.rel (!%p661_p6) target bundleno = 56 (0x38), region = 77 }
  0x2b   : > { %v517_v26 = vpack.c.bf16 %v308_v25, %v307_v24  ;;  %v309_v27 = vsel %vm301_vm2, %v297_v18, %v305_v22  ;;  %v310_v28 = vsel %vm302_vm3, %v298_v19, %v306_v23 }
  0x2c   : > { %v522_v29 = vpack.c.bf16 %v310_v28, %v309_v27 }
  0x2d   : > { %518 = vst [vmem:[%s260_s18] sm:$0xff] %v517_v26  }
  0x2e   : > { %525 = vst [vmem:[%s260_s18 + $0x8] sm:$0xff] %v522_v29  }
  0x34   : > { %v359_v30 = vld [vmem:[%s260_s18] sm:$0xf]  ;;  %v361_v31 = vld [vmem:[%s260_s18 + $0x4] sm:$0xf] }
  0x35   : > { %v363_v32 = vld [vmem:[%s260_s18 + $0x8] sm:$0xf]  ;;  %v365_v33 = vld [vmem:[%s260_s18 + $0xc] sm:$0xf]  ;;  %360 = vst [vmem:[%s342_s24] sm:$0xf] %v359_v30 }
  0x36   : > { %362 = vst [vmem:[%s342_s24 + $0x10] sm:$0xf] %v361_v31  ;;  %364 = vst [vmem:[%s342_s24 + $0x20] sm:$0xf] %v363_v32 }
  0x37   : > { %366 = vst [vmem:[%s342_s24 + $0x30] sm:$0xf] %v365_v33 }
  0x38 PF: > { %s13_s16 = sadd.s32 1, %s604_s16   ;;  %s715_s12 = smov %s592_s13 }
  0x39   : > { %p10_p12 = scmp.ge.s32.totalorder %s13_s16, 6   ;;  %s716_s13 = smov %s666_s22 }
  0x3a   : > { %s717_s14 = smov %s600_s15  ;;  %s718_s15 = smov %s720_s17 }
  0x3b   :  { %12 = sbr.rel (!%p10_p12) target bundleno = 3 (0x3), region = 155 }

// kernel: d2_forward.18
= control target key start
LH: loop header
LB: loop body
LE: loop exit
PB: predicated region body
PF: predicated region fallthrough
CT: control target
= control target key end

     0   :  { %s10295_s9 = smov 0   ;;  %s10297_s10 = smov 0   ;;  %s12498_s0 = inlined_call_operand.vmem [shape: bf16[32,4096], index: 0, kind: input, shape index: {}]   ;;  %s12499_s1 = inlined_call_operand.vmem [shape: bf16[4096,512], index: 1, kind: input, shape index: {}]   ;;  %s12500_s2 = inlined_call_operand.vmem [shape: bf16[32,512], index: 2, kind: output, shape index: {}]  }
   0x1   :  { %s10299_s11 = smov 0   ;;  %s10301_s12 = smov 0  }
   0x2   :  { %s10303_s13 = smov 0  }
   0x3 LB: > { %s21_s14 = sadd.s32 1, %s10274_s12  ;;  %s8830_s15 = sadd.s32 4294967295, %s10278_s13   ;;  %s10278_s13 = sphi %s10303_s13, %s12_s13   ;;  %s10274_s12 = sphi %s10301_s12, %s12543_s12   ;;  %s10270_s11 = sphi %s10299_s11, %s12542_s11   ;;  %s10266_s10 = sphi %s10297_s10, %s12541_s10   ;;  %s10262_s9 = sphi %s10295_s9, %s12540_s9  }
   0x4   : > { %p22_p0 = scmp.ge.s32.totalorder %s21_s14, 2  ;;  %p64_p1 = scmp.ne.s32.totalorder %s10266_s10, %s10262_s9 }
   0x5   : > { %p65_p2 = scmp.eq.s32.totalorder %s10278_s13, 0  ;;  %p96_p4 = scmp.eq.s32.totalorder %s8830_s15, 1 }
   0x6   : > { %s12545_s14 = smov (%p22_p0, %s21_s14), 0  ;;  %s57_s17 = sadd.s32 1, %s10266_s10 }
   0x7   : > { %p66_p3 = por %p65_p2, %p64_p1  ;;  %s54_s16 = ssub.s32 %s10274_s12, %s12545_s14 }
   0x8   : > { %p55_p5 = scmp.eq.s32.totalorder %s54_s16, 0  ;;  %p10330_p6 = por %p96_p4, %p64_p1 }
   0x9   : > { %p8834_p7 = scmp.ge.s32.totalorder %s10278_s13, 2 }
   0xa   : > { %s10335_s19 = scalar_select %p55_p5, %s10266_s10, %s57_s17  }
   0xb   : > { %128 = sbr.rel (%p8834_p7) target bundleno = 276 (0x114), region = 20 }
  0x10   : > { %131 = sbr.rel (!%p66_p3) target bundleno = 276 (0x114), region = 24  ;;  %s133_s20 = sand.u32 (%p66_p3), 1, %s10266_s10  }
  0x11   : > { %s9426_s21 = sshll.u32 (%p66_p3), %s10274_s12, 3  ;;  %s8835_s22 = sshll.u32 (%p66_p3), %s133_s20, 12 }
  0x12   : > { %s10343_s25 = scalar_lea.vmem (%p66_p3), %s12499_s1, %s9426_s21  ;;  %s10348_s26 = scalar_lea.vmem (%p66_p3), [#allocation2], %s8835_s22 }
  0x13   : > { %v1192_v0 = vld [vmem:[%s10343_s25] sm:$0xff] (%p66_p3)  ;;  %v1194_v1 = vld [vmem:[%s10343_s25 + $0x10] sm:$0xff] (%p66_p3) }
  0x14   : > { %v1196_v2 = vld [vmem:[%s10343_s25 + $0x20] sm:$0xff] (%p66_p3)  ;;  %1193 = vst [vmem:[%s10348_s26] sm:$0xff] (%p66_p3), %v1192_v0  ;;  %1195 = vst [vmem:[%s10348_s26 + $0x8] sm:$0xff] (%p66_p3), %v1194_v1  ;;  %v1198_v3 = vld [vmem:[%s10343_s25 + $0x30] sm:$0xff] (%p66_p3) }
  0x15   : > { %1197 = vst [vmem:[%s10348_s26 + $0x10] sm:$0xff] %v1196_v2  ;;  %v1200_v4 = vld [vmem:[%s10343_s25 + $0x40] sm:$0xff]  ;;  %v1202_v5 = vld [vmem:[%s10343_s25 + $0x50] sm:$0xff]  ;;  %1199 = vst [vmem:[%s10348_s26 + $0x18] sm:$0xff] %v1198_v3 }
  0x16   : > { %1201 = vst [vmem:[%s10348_s26 + $0x20] sm:$0xff] %v1200_v4  ;;  %1203 = vst [vmem:[%s10348_s26 + $0x28] sm:$0xff] %v1202_v5  ;;  %v1204_v6 = vld [vmem:[%s10343_s25 + $0x60] sm:$0xff]  ;;  %v1206_v7 = vld [vmem:[%s10343_s25 + $0x70] sm:$0xff] }
  0x17   : > { %v1208_v8 = vld [vmem:[%s10343_s25 + $0x80] sm:$0xff]  ;;  %1205 = vst [vmem:[%s10348_s26 + $0x30] sm:$0xff] %v1204_v6  ;;  %1207 = vst [vmem:[%s10348_s26 + $0x38] sm:$0xff] %v1206_v7  ;;  %v1210_v9 = vld [vmem:[%s10343_s25 + $0x90] sm:$0xff] }
  0x18   : > { %1209 = vst [vmem:[%s10348_s26 + $0x40] sm:$0xff] %v1208_v8  ;;  %v1212_v10 = vld [vmem:[%s10343_s25 + $0xa0] sm:$0xff]  ;;  %v1214_v11 = vld [vmem:[%s10343_s25 + $0xb0] sm:$0xff]  ;;  %1211 = vst [vmem:[%s10348_s26 + $0x48] sm:$0xff] %v1210_v9 }
  0x19   : > { %1213 = vst [vmem:[%s10348_s26 + $0x50] sm:$0xff] %v1212_v10  ;;  %1215 = vst [vmem:[%s10348_s26 + $0x58] sm:$0xff] %v1214_v11  ;;  %v1216_v12 = vld [vmem:[%s10343_s25 + $0xc0] sm:$0xff]  ;;  %v1218_v13 = vld [vmem:[%s10343_s25 + $0xd0] sm:$0xff] }
  0x1a   : > { %v1220_v14 = vld [vmem:[%s10343_s25 + $0xe0] sm:$0xff]  ;;  %1217 = vst [vmem:[%s10348_s26 + $0x60] sm:$0xff] %v1216_v12  ;;  %1219 = vst [vmem:[%s10348_s26 + $0x68] sm:$0xff] %v1218_v13  ;;  %v1222_v15 = vld [vmem:[%s10343_s25 + $0xf0] sm:$0xff] }
  0x1b   : > { %1221 = vst [vmem:[%s10348_s26 + $0x70] sm:$0xff] %v1220_v14  ;;  %v1224_v16 = vld [vmem:[%s10343_s25 + $0x100] sm:$0xff]  ;;  %v1226_v17 = vld [vmem:[%s10343_s25 + $0x110] sm:$0xff]  ;;  %1223 = vst [vmem:[%s10348_s26 + $0x78] sm:$0xff] %v1222_v15 }
  0x1c   : > { %1225 = vst [vmem:[%s10348_s26 + $0x80] sm:$0xff] %v1224_v16  ;;  %1227 = vst [vmem:[%s10348_s26 + $0x88] sm:$0xff] %v1226_v17  ;;  %v1228_v18 = vld [vmem:[%s10343_s25 + $0x120] sm:$0xff]  ;;  %v1230_v19 = vld [vmem:[%s10343_s25 + $0x130] sm:$0xff] }
  0x1d   : > { %v1232_v20 = vld [vmem:[%s10343_s25 + $0x140] sm:$0xff]  ;;  %1229 = vst [vmem:[%s10348_s26 + $0x90] sm:$0xff] %v1228_v18  ;;  %1231 = vst [vmem:[%s10348_s26 + $0x98] sm:$0xff] %v1230_v19  ;;  %v1234_v21 = vld [vmem:[%s10343_s25 + $0x150] sm:$0xff] }
  0x1e   : > { %1233 = vst [vmem:[%s10348_s26 + $0xa0] sm:$0xff] %v1232_v20  ;;  %v1236_v22 = vld [vmem:[%s10343_s25 + $0x160] sm:$0xff]  ;;  %v1238_v23 = vld [vmem:[%s10343_s25 + $0x170] sm:$0xff]  ;;  %1235 = vst [vmem:[%s10348_s26 + $0xa8] sm:$0xff] %v1234_v21 }
  0x1f   : > { %1237 = vst [vmem:[%s10348_s26 + $0xb0] sm:$0xff] %v1236_v22  ;;  %1239 = vst [vmem:[%s10348_s26 + $0xb8] sm:$0xff] %v1238_v23  ;;  %v1240_v24 = vld [vmem:[%s10343_s25 + $0x180] sm:$0xff]  ;;  %v1242_v25 = vld [vmem:[%s10343_s25 + $0x190] sm:$0xff] }
  0x20   : > { %v1244_v26 = vld [vmem:[%s10343_s25 + $0x1a0] sm:$0xff]  ;;  %1241 = vst [vmem:[%s10348_s26 + $0xc0] sm:$0xff] %v1240_v24  ;;  %1243 = vst [vmem:[%s10348_s26 + $0xc8] sm:$0xff] %v1242_v25  ;;  %v1246_v27 = vld [vmem:[%s10343_s25 + $0x1b0] sm:$0xff] }
  0x21   : > { %1245 = vst [vmem:[%s10348_s26 + $0xd0] sm:$0xff] %v1244_v26  ;;  %v1248_v28 = vld [vmem:[%s10343_s25 + $0x1c0] sm:$0xff]  ;;  %v1250_v29 = vld [vmem:[%s10343_s25 + $0x1d0] sm:$0xff]  ;;  %1247 = vst [vmem:[%s10348_s26 + $0xd8] sm:$0xff] %v1246_v27 }
  0x22   : > { %1249 = vst [vmem:[%s10348_s26 + $0xe0] sm:$0xff] %v1248_v28  ;;  %1251 = vst [vmem:[%s10348_s26 + $0xe8] sm:$0xff] %v1250_v29  ;;  %v1252_v30 = vld [vmem:[%s10343_s25 + $0x1e0] sm:$0xff]  ;;  %v1254_v31 = vld [vmem:[%s10343_s25 + $0x1f0] sm:$0xff] }
  0x23   : > { %v1256_v32 = vld [vmem:[%s10343_s25 + $0x200] sm:$0xff]  ;;  %1253 = vst [vmem:[%s10348_s26 + $0xf0] sm:$0xff] %v1252_v30  ;;  %1255 = vst [vmem:[%s10348_s26 + $0xf8] sm:$0xff] %v1254_v31  ;;  %v1258_v33 = vld [vmem:[%s10343_s25 + $0x210] sm:$0xff] }
  0x24   : > { %1257 = vst [vmem:[%s10348_s26 + $0x100] sm:$0xff] %v1256_v32  ;;  %v1260_v34 = vld [vmem:[%s10343_s25 + $0x220] sm:$0xff]  ;;  %v1262_v35 = vld [vmem:[%s10343_s25 + $0x230] sm:$0xff]  ;;  %1259 = vst [vmem:[%s10348_s26 + $0x108] sm:$0xff] %v1258_v33 }
  0x25   : > { %1261 = vst [vmem:[%s10348_s26 + $0x110] sm:$0xff] %v1260_v34  ;;  %1263 = vst [vmem:[%s10348_s26 + $0x118] sm:$0xff] %v1262_v35  ;;  %v1264_v36 = vld [vmem:[%s10343_s25 + $0x240] sm:$0xff]  ;;  %v1266_v37 = vld [vmem:[%s10343_s25 + $0x250] sm:$0xff] }
  0x26   : > { %v1268_v38 = vld [vmem:[%s10343_s25 + $0x260] sm:$0xff]  ;;  %1265 = vst [vmem:[%s10348_s26 + $0x120] sm:$0xff] %v1264_v36  ;;  %1267 = vst [vmem:[%s10348_s26 + $0x128] sm:$0xff] %v1266_v37  ;;  %v1270_v39 = vld [vmem:[%s10343_s25 + $0x270] sm:$0xff] }
  0x27   : > { %1269 = vst [vmem:[%s10348_s26 + $0x130] sm:$0xff] %v1268_v38  ;;  %v1272_v40 = vld [vmem:[%s10343_s25 + $0x280] sm:$0xff]  ;;  %v1274_v41 = vld [vmem:[%s10343_s25 + $0x290] sm:$0xff]  ;;  %1271 = vst [vmem:[%s10348_s26 + $0x138] sm:$0xff] %v1270_v39 }
  0x28   : > { %1273 = vst [vmem:[%s10348_s26 + $0x140] sm:$0xff] %v1272_v40  ;;  %1275 = vst [vmem:[%s10348_s26 + $0x148] sm:$0xff] %v1274_v41  ;;  %v1276_v42 = vld [vmem:[%s10343_s25 + $0x2a0] sm:$0xff]  ;;  %v1278_v43 = vld [vmem:[%s10343_s25 + $0x2b0] sm:$0xff] }
  0x29   : > { %v1280_v44 = vld [vmem:[%s10343_s25 + $0x2c0] sm:$0xff]  ;;  %1277 = vst [vmem:[%s10348_s26 + $0x150] sm:$0xff] %v1276_v42  ;;  %1279 = vst [vmem:[%s10348_s26 + $0x158] sm:$0xff] %v1278_v43  ;;  %v1282_v45 = vld [vmem:[%s10343_s25 + $0x2d0] sm:$0xff] }
  0x2a   : > { %1281 = vst [vmem:[%s10348_s26 + $0x160] sm:$0xff] %v1280_v44  ;;  %v1284_v46 = vld [vmem:[%s10343_s25 + $0x2e0] sm:$0xff]  ;;  %v1286_v47 = vld [vmem:[%s10343_s25 + $0x2f0] sm:$0xff]  ;;  %1283 = vst [vmem:[%s10348_s26 + $0x168] sm:$0xff] %v1282_v45 }
  0x2b   : > { %1285 = vst [vmem:[%s10348_s26 + $0x170] sm:$0xff] %v1284_v46  ;;  %1287 = vst [vmem:[%s10348_s26 + $0x178] sm:$0xff] %v1286_v47  ;;  %v1288_v48 = vld [vmem:[%s10343_s25 + $0x300] sm:$0xff]  ;;  %v1290_v49 = vld [vmem:[%s10343_s25 + $0x310] sm:$0xff] }
  0x2c   : > { %v1292_v50 = vld [vmem:[%s10343_s25 + $0x320] sm:$0xff]  ;;  %1289 = vst [vmem:[%s10348_s26 + $0x180] sm:$0xff] %v1288_v48  ;;  %1291 = vst [vmem:[%s10348_s26 + $0x188] sm:$0xff] %v1290_v49  ;;  %v1294_v51 = vld [vmem:[%s10343_s25 + $0x330] sm:$0xff] }
  0x2d   : > { %1293 = vst [vmem:[%s10348_s26 + $0x190] sm:$0xff] %v1292_v50  ;;  %v1296_v52 = vld [vmem:[%s10343_s25 + $0x340] sm:$0xff]  ;;  %v1298_v53 = vld [vmem:[%s10343_s25 + $0x350] sm:$0xff]  ;;  %1295 = vst [vmem:[%s10348_s26 + $0x198] sm:$0xff] %v1294_v51 }
  0x2e   : > { %1297 = vst [vmem:[%s10348_s26 + $0x1a0] sm:$0xff] %v1296_v52  ;;  %1299 = vst [vmem:[%s10348_s26 + $0x1a8] sm:$0xff] %v1298_v53  ;;  %v1300_v54 = vld [vmem:[%s10343_s25 + $0x360] sm:$0xff]  ;;  %v1302_v55 = vld [vmem:[%s10343_s25 + $0x370] sm:$0xff] }
  0x2f   : > { %v1304_v56 = vld [vmem:[%s10343_s25 + $0x380] sm:$0xff]  ;;  %1301 = vst [vmem:[%s10348_s26 + $0x1b0] sm:$0xff] %v1300_v54  ;;  %1303 = vst [vmem:[%s10348_s26 + $0x1b8] sm:$0xff] %v1302_v55  ;;  %v1306_v57 = vld [vmem:[%s10343_s25 + $0x390] sm:$0xff] }
  0x30   : > { %1305 = vst [vmem:[%s10348_s26 + $0x1c0] sm:$0xff] %v1304_v56  ;;  %v1308_v58 = vld [vmem:[%s10343_s25 + $0x3a0] sm:$0xff]  ;;  %v1310_v59 = vld [vmem:[%s10343_s25 + $0x3b0] sm:$0xff]  ;;  %1307 = vst [vmem:[%s10348_s26 + $0x1c8] sm:$0xff] %v1306_v57 }
  0x31   : > { %1309 = vst [vmem:[%s10348_s26 + $0x1d0] sm:$0xff] %v1308_v58  ;;  %1311 = vst [vmem:[%s10348_s26 + $0x1d8] sm:$0xff] %v1310_v59  ;;  %v1312_v60 = vld [vmem:[%s10343_s25 + $0x3c0] sm:$0xff]  ;;  %v1314_v61 = vld [vmem:[%s10343_s25 + $0x3d0] sm:$0xff] }
  0x32   : > { %v1316_v62 = vld [vmem:[%s10343_s25 + $0x3e0] sm:$0xff]  ;;  %1313 = vst [vmem:[%s10348_s26 + $0x1e0] sm:$0xff] %v1312_v60  ;;  %1315 = vst [vmem:[%s10348_s26 + $0x1e8] sm:$0xff] %v1314_v61  ;;  %v1318_v63 = vld [vmem:[%s10343_s25 + $0x3f0] sm:$0xff] }
  0x33   : > { %1317 = vst [vmem:[%s10348_s26 + $0x1f0] sm:$0xff] %v1316_v62  ;;  %v1320_v0 = vld [vmem:[%s10343_s25 + $0x400] sm:$0xff]  ;;  %v1322_v1 = vld [vmem:[%s10343_s25 + $0x410] sm:$0xff]  ;;  %1319 = vst [vmem:[%s10348_s26 + $0x1f8] sm:$0xff] %v1318_v63 }
  0x34   : > { %1321 = vst [vmem:[%s10348_s26 + $0x200] sm:$0xff] %v1320_v0  ;;  %1323 = vst [vmem:[%s10348_s26 + $0x208] sm:$0xff] %v1322_v1  ;;  %v1324_v2 = vld [vmem:[%s10343_s25 + $0x420] sm:$0xff]  ;;  %v1326_v3 = vld [vmem:[%s10343_s25 + $0x430] sm:$0xff] }
  0x35   : > { %v1328_v4 = vld [vmem:[%s10343_s25 + $0x440] sm:$0xff]  ;;  %1325 = vst [vmem:[%s10348_s26 + $0x210] sm:$0xff] %v1324_v2  ;;  %1327 = vst [vmem:[%s10348_s26 + $0x218] sm:$0xff] %v1326_v3  ;;  %v1330_v5 = vld [vmem:[%s10343_s25 + $0x450] sm:$0xff] }
  0x36   : > { %1329 = vst [vmem:[%s10348_s26 + $0x220] sm:$0xff] %v1328_v4  ;;  %v1332_v6 = vld [vmem:[%s10343_s25 + $0x460] sm:$0xff]  ;;  %v1334_v7 = vld [vmem:[%s10343_s25 + $0x470] sm:$0xff]  ;;  %1331 = vst [vmem:[%s10348_s26 + $0x228] sm:$0xff] %v1330_v5 }
  0x37   : > { %1333 = vst [vmem:[%s10348_s26 + $0x230] sm:$0xff] %v1332_v6  ;;  %1335 = vst [vmem:[%s10348_s26 + $0x238] sm:$0xff] %v1334_v7  ;;  %v1336_v8 = vld [vmem:[%s10343_s25 + $0x480] sm:$0xff]  ;;  %v1338_v9 = vld [vmem:[%s10343_s25 + $0x490] sm:$0xff] }
  0x38   : > { %v1340_v10 = vld [vmem:[%s10343_s25 + $0x4a0] sm:$0xff]  ;;  %1337 = vst [vmem:[%s10348_s26 + $0x240] sm:$0xff] %v1336_v8  ;;  %1339 = vst [vmem:[%s10348_s26 + $0x248] sm:$0xff] %v1338_v9  ;;  %v1342_v11 = vld [vmem:[%s10343_s25 + $0x4b0] sm:$0xff] }
  0x39   : > { %1341 = vst [vmem:[%s10348_s26 + $0x250] sm:$0xff] %v1340_v10  ;;  %v1344_v12 = vld [vmem:[%s10343_s25 + $0x4c0] sm:$0xff]  ;;  %v1346_v13 = vld [vmem:[%s10343_s25 + $0x4d0] sm:$0xff]  ;;  %1343 = vst [vmem:[%s10348_s26 + $0x258] sm:$0xff] %v1342_v11 }
  0x3a   : > { %1345 = vst [vmem:[%s10348_s26 + $0x260] sm:$0xff] %v1344_v12  ;;  %1347 = vst [vmem:[%s10348_s26 + $0x268] sm:$0xff] %v1346_v13  ;;  %v1348_v14 = vld [vmem:[%s10343_s25 + $0x4e0] sm:$0xff]  ;;  %v1350_v15 = vld [vmem:[%s10343_s25 + $0x4f0] sm:$0xff] }
  0x3b   : > { %v1352_v16 = vld [vmem:[%s10343_s25 + $0x500] sm:$0xff]  ;;  %1349 = vst [vmem:[%s10348_s26 + $0x270] sm:$0xff] %v1348_v14  ;;  %1351 = vst [vmem:[%s10348_s26 + $0x278] sm:$0xff] %v1350_v15  ;;  %v1354_v17 = vld [vmem:[%s10343_s25 + $0x510] sm:$0xff] }
  0x3c   : > { %1353 = vst [vmem:[%s10348_s26 + $0x280] sm:$0xff] %v1352_v16  ;;  %v1356_v18 = vld [vmem:[%s10343_s25 + $0x520] sm:$0xff]  ;;  %v1358_v19 = vld [vmem:[%s10343_s25 + $0x530] sm:$0xff]  ;;  %1355 = vst [vmem:[%s10348_s26 + $0x288] sm:$0xff] %v1354_v17 }
  0x3d   : > { %1357 = vst [vmem:[%s10348_s26 + $0x290] sm:$0xff] %v1356_v18  ;;  %1359 = vst [vmem:[%s10348_s26 + $0x298] sm:$0xff] %v1358_v19  ;;  %v1360_v20 = vld [vmem:[%s10343_s25 + $0x540] sm:$0xff]  ;;  %v1362_v21 = vld [vmem:[%s10343_s25 + $0x550] sm:$0xff] }
  0x3e   : > { %v1364_v22 = vld [vmem:[%s10343_s25 + $0x560] sm:$0xff]  ;;  %1361 = vst [vmem:[%s10348_s26 + $0x2a0] sm:$0xff] %v1360_v20  ;;  %1363 = vst [vmem:[%s10348_s26 + $0x2a8] sm:$0xff] %v1362_v21  ;;  %v1366_v23 = vld [vmem:[%s10343_s25 + $0x570] sm:$0xff] }
  0x3f   : > { %1365 = vst [vmem:[%s10348_s26 + $0x2b0] sm:$0xff] %v1364_v22  ;;  %v1368_v24 = vld [vmem:[%s10343_s25 + $0x580] sm:$0xff]  ;;  %v1370_v25 = vld [vmem:[%s10343_s25 + $0x590] sm:$0xff]  ;;  %1367 = vst [vmem:[%s10348_s26 + $0x2b8] sm:$0xff] %v1366_v23 }
  0x40   : > { %1369 = vst [vmem:[%s10348_s26 + $0x2c0] sm:$0xff] %v1368_v24  ;;  %1371 = vst [vmem:[%s10348_s26 + $0x2c8] sm:$0xff] %v1370_v25  ;;  %v1372_v26 = vld [vmem:[%s10343_s25 + $0x5a0] sm:$0xff]  ;;  %v1374_v27 = vld [vmem:[%s10343_s25 + $0x5b0] sm:$0xff] }
  0x41   : > { %v1376_v28 = vld [vmem:[%s10343_s25 + $0x5c0] sm:$0xff]  ;;  %1373 = vst [vmem:[%s10348_s26 + $0x2d0] sm:$0xff] %v1372_v26  ;;  %1375 = vst [vmem:[%s10348_s26 + $0x2d8] sm:$0xff] %v1374_v27  ;;  %v1378_v29 = vld [vmem:[%s10343_s25 + $0x5d0] sm:$0xff] }
  0x42   : > { %1377 = vst [vmem:[%s10348_s26 + $0x2e0] sm:$0xff] %v1376_v28  ;;  %v1380_v30 = vld [vmem:[%s10343_s25 + $0x5e0] sm:$0xff]  ;;  %v1382_v31 = vld [vmem:[%s10343_s25 + $0x5f0] sm:$0xff]  ;;  %1379 = vst [vmem:[%s10348_s26 + $0x2e8] sm:$0xff] %v1378_v29 }
  0x43   : > { %1381 = vst [vmem:[%s10348_s26 + $0x2f0] sm:$0xff] %v1380_v30  ;;  %1383 = vst [vmem:[%s10348_s26 + $0x2f8] sm:$0xff] %v1382_v31  ;;  %v1384_v32 = vld [vmem:[%s10343_s25 + $0x600] sm:$0xff]  ;;  %v1386_v33 = vld [vmem:[%s10343_s25 + $0x610] sm:$0xff] }
  0x44   : > { %v1388_v34 = vld [vmem:[%s10343_s25 + $0x620] sm:$0xff]  ;;  %1385 = vst [vmem:[%s10348_s26 + $0x300] sm:$0xff] %v1384_v32  ;;  %1387 = vst [vmem:[%s10348_s26 + $0x308] sm:$0xff] %v1386_v33  ;;  %v1390_v35 = vld [vmem:[%s10343_s25 + $0x630] sm:$0xff] }
  0x45   : > { %1389 = vst [vmem:[%s10348_s26 + $0x310] sm:$0xff] %v1388_v34  ;;  %v1392_v36 = vld [vmem:[%s10343_s25 + $0x640] sm:$0xff]  ;;  %v1394_v37 = vld [vmem:[%s10343_s25 + $0x650] sm:$0xff]  ;;  %1391 = vst [vmem:[%s10348_s26 + $0x318] sm:$0xff] %v1390_v35 }
  0x46   : > { %1393 = vst [vmem:[%s10348_s26 + $0x320] sm:$0xff] %v1392_v36  ;;  %1395 = vst [vmem:[%s10348_s26 + $0x328] sm:$0xff] %v1394_v37  ;;  %v1396_v38 = vld [vmem:[%s10343_s25 + $0x660] sm:$0xff]  ;;  %v1398_v39 = vld [vmem:[%s10343_s25 + $0x670] sm:$0xff] }
  0x47   : > { %v1400_v40 = vld [vmem:[%s10343_s25 + $0x680] sm:$0xff]  ;;  %1397 = vst [vmem:[%s10348_s26 + $0x330] sm:$0xff] %v1396_v38  ;;  %1399 = vst [vmem:[%s10348_s26 + $0x338] sm:$0xff] %v1398_v39  ;;  %v1402_v41 = vld [vmem:[%s10343_s25 + $0x690] sm:$0xff] }
  0x48   : > { %1401 = vst [vmem:[%s10348_s26 + $0x340] sm:$0xff] %v1400_v40  ;;  %v1404_v42 = vld [vmem:[%s10343_s25 + $0x6a0] sm:$0xff]  ;;  %v1406_v43 = vld [vmem:[%s10343_s25 + $0x6b0] sm:$0xff]  ;;  %1403 = vst [vmem:[%s10348_s26 + $0x348] sm:$0xff] %v1402_v41 }
  0x49   : > { %1405 = vst [vmem:[%s10348_s26 + $0x350] sm:$0xff] %v1404_v42  ;;  %1407 = vst [vmem:[%s10348_s26 + $0x358] sm:$0xff] %v1406_v43  ;;  %v1408_v44 = vld [vmem:[%s10343_s25 + $0x6c0] sm:$0xff]  ;;  %v1410_v45 = vld [vmem:[%s10343_s25 + $0x6d0] sm:$0xff] }
  0x4a   : > { %v1412_v46 = vld [vmem:[%s10343_s25 + $0x6e0] sm:$0xff]  ;;  %1409 = vst [vmem:[%s10348_s26 + $0x360] sm:$0xff] %v1408_v44  ;;  %1411 = vst [vmem:[%s10348_s26 + $0x368] sm:$0xff] %v1410_v45  ;;  %v1414_v47 = vld [vmem:[%s10343_s25 + $0x6f0] sm:$0xff] }
  0x4b   : > { %1413 = vst [vmem:[%s10348_s26 + $0x370] sm:$0xff] %v1412_v46  ;;  %v1416_v48 = vld [vmem:[%s10343_s25 + $0x700] sm:$0xff]  ;;  %v1418_v49 = vld [vmem:[%s10343_s25 + $0x710] sm:$0xff]  ;;  %1415 = vst [vmem:[%s10348_s26 + $0x378] sm:$0xff] %v1414_v47 }
  0x4c   : > { %1417 = vst [vmem:[%s10348_s26 + $0x380] sm:$0xff] %v1416_v48  ;;  %1419 = vst [vmem:[%s10348_s26 + $0x388] sm:$0xff] %v1418_v49  ;;  %v1420_v50 = vld [vmem:[%s10343_s25 + $0x720] sm:$0xff]  ;;  %v1422_v51 = vld [vmem:[%s10343_s25 + $0x730] sm:$0xff] }
  0x4d   : > { %v1424_v52 = vld [vmem:[%s10343_s25 + $0x740] sm:$0xff]  ;;  %1421 = vst [vmem:[%s10348_s26 + $0x390] sm:$0xff] %v1420_v50  ;;  %1423 = vst [vmem:[%s10348_s26 + $0x398] sm:$0xff] %v1422_v51  ;;  %v1426_v53 = vld [vmem:[%s10343_s25 + $0x750] sm:$0xff] }
  0x4e   : > { %1425 = vst [vmem:[%s10348_s26 + $0x3a0] sm:$0xff] %v1424_v52  ;;  %v1428_v54 = vld [vmem:[%s10343_s25 + $0x760] sm:$0xff]  ;;  %v1430_v55 = vld [vmem:[%s10343_s25 + $0x770] sm:$0xff]  ;;  %1427 = vst [vmem:[%s10348_s26 + $0x3a8] sm:$0xff] %v1426_v53 }
  0x4f   : > { %1429 = vst [vmem:[%s10348_s26 + $0x3b0] sm:$0xff] %v1428_v54  ;;  %1431 = vst [vmem:[%s10348_s26 + $0x3b8] sm:$0xff] %v1430_v55  ;;  %v1432_v56 = vld [vmem:[%s10343_s25 + $0x780] sm:$0xff]  ;;  %v1434_v57 = vld [vmem:[%s10343_s25 + $0x790] sm:$0xff] }
  0x50   : > { %v1436_v58 = vld [vmem:[%s10343_s25 + $0x7a0] sm:$0xff]  ;;  %1433 = vst [vmem:[%s10348_s26 + $0x3c0] sm:$0xff] %v1432_v56  ;;  %1435 = vst [vmem:[%s10348_s26 + $0x3c8] sm:$0xff] %v1434_v57  ;;  %v1438_v59 = vld [vmem:[%s10343_s25 + $0x7b0] sm:$0xff] }
  0x51   : > { %1437 = vst [vmem:[%s10348_s26 + $0x3d0] sm:$0xff] %v1436_v58  ;;  %v1440_v60 = vld [vmem:[%s10343_s25 + $0x7c0] sm:$0xff]  ;;  %v1442_v61 = vld [vmem:[%s10343_s25 + $0x7d0] sm:$0xff]  ;;  %1439 = vst [vmem:[%s10348_s26 + $0x3d8] sm:$0xff] %v1438_v59 }
  0x52   : > { %1441 = vst [vmem:[%s10348_s26 + $0x3e0] sm:$0xff] %v1440_v60  ;;  %1443 = vst [vmem:[%s10348_s26 + $0x3e8] sm:$0xff] %v1442_v61  ;;  %v1444_v62 = vld [vmem:[%s10343_s25 + $0x7e0] sm:$0xff]  ;;  %v1446_v63 = vld [vmem:[%s10343_s25 + $0x7f0] sm:$0xff] }
  0x53   : > { %v1448_v0 = vld [vmem:[%s10343_s25 + $0x800] sm:$0xff]  ;;  %1445 = vst [vmem:[%s10348_s26 + $0x3f0] sm:$0xff] %v1444_v62  ;;  %1447 = vst [vmem:[%s10348_s26 + $0x3f8] sm:$0xff] %v1446_v63  ;;  %v1450_v1 = vld [vmem:[%s10343_s25 + $0x810] sm:$0xff] }
  0x54   : > { %1449 = vst [vmem:[%s10348_s26 + $0x400] sm:$0xff] %v1448_v0  ;;  %v1452_v2 = vld [vmem:[%s10343_s25 + $0x820] sm:$0xff]  ;;  %v1454_v3 = vld [vmem:[%s10343_s25 + $0x830] sm:$0xff]  ;;  %1451 = vst [vmem:[%s10348_s26 + $0x408] sm:$0xff] %v1450_v1 }
  0x55   : > { %1453 = vst [vmem:[%s10348_s26 + $0x410] sm:$0xff] %v1452_v2  ;;  %1455 = vst [vmem:[%s10348_s26 + $0x418] sm:$0xff] %v1454_v3  ;;  %v1456_v4 = vld [vmem:[%s10343_s25 + $0x840] sm:$0xff]  ;;  %v1458_v5 = vld [vmem:[%s10343_s25 + $0x850] sm:$0xff] }
  0x56   : > { %v1460_v6 = vld [vmem:[%s10343_s25 + $0x860] sm:$0xff]  ;;  %1457 = vst [vmem:[%s10348_s26 + $0x420] sm:$0xff] %v1456_v4  ;;  %1459 = vst [vmem:[%s10348_s26 + $0x428] sm:$0xff] %v1458_v5  ;;  %v1462_v7 = vld [vmem:[%s10343_s25 + $0x870] sm:$0xff] }
  0x57   : > { %1461 = vst [vmem:[%s10348_s26 + $0x430] sm:$0xff] %v1460_v6  ;;  %v1464_v8 = vld [vmem:[%s10343_s25 + $0x880] sm:$0xff]  ;;  %v1466_v9 = vld [vmem:[%s10343_s25 + $0x890] sm:$0xff]  ;;  %1463 = vst [vmem:[%s10348_s26 + $0x438] sm:$0xff] %v1462_v7 }
  0x58   : > { %1465 = vst [vmem:[%s10348_s26 + $0x440] sm:$0xff] %v1464_v8  ;;  %1467 = vst [vmem:[%s10348_s26 + $0x448] sm:$0xff] %v1466_v9  ;;  %v1468_v10 = vld [vmem:[%s10343_s25 + $0x8a0] sm:$0xff]  ;;  %v1470_v11 = vld [vmem:[%s10343_s25 + $0x8b0] sm:$0xff] }
  0x59   : > { %v1472_v12 = vld [vmem:[%s10343_s25 + $0x8c0] sm:$0xff]  ;;  %1469 = vst [vmem:[%s10348_s26 + $0x450] sm:$0xff] %v1468_v10  ;;  %1471 = vst [vmem:[%s10348_s26 + $0x458] sm:$0xff] %v1470_v11  ;;  %v1474_v13 = vld [vmem:[%s10343_s25 + $0x8d0] sm:$0xff] }
  0x5a   : > { %1473 = vst [vmem:[%s10348_s26 + $0x460] sm:$0xff] %v1472_v12  ;;  %v1476_v14 = vld [vmem:[%s10343_s25 + $0x8e0] sm:$0xff]  ;;  %v1478_v15 = vld [vmem:[%s10343_s25 + $0x8f0] sm:$0xff]  ;;  %1475 = vst [vmem:[%s10348_s26 + $0x468] sm:$0xff] %v1474_v13 }
  0x5b   : > { %1477 = vst [vmem:[%s10348_s26 + $0x470] sm:$0xff] %v1476_v14  ;;  %1479 = vst [vmem:[%s10348_s26 + $0x478] sm:$0xff] %v1478_v15  ;;  %v1480_v16 = vld [vmem:[%s10343_s25 + $0x900] sm:$0xff]  ;;  %v1482_v17 = vld [vmem:[%s10343_s25 + $0x910] sm:$0xff] }
  0x5c   : > { %v1484_v18 = vld [vmem:[%s10343_s25 + $0x920] sm:$0xff]  ;;  %1481 = vst [vmem:[%s10348_s26 + $0x480] sm:$0xff] %v1480_v16  ;;  %1483 = vst [vmem:[%s10348_s26 + $0x488] sm:$0xff] %v1482_v17  ;;  %v1486_v19 = vld [vmem:[%s10343_s25 + $0x930] sm:$0xff] }
  0x5d   : > { %1485 = vst [vmem:[%s10348_s26 + $0x490] sm:$0xff] %v1484_v18  ;;  %v1488_v20 = vld [vmem:[%s10343_s25 + $0x940] sm:$0xff]  ;;  %v1490_v21 = vld [vmem:[%s10343_s25 + $0x950] sm:$0xff]  ;;  %1487 = vst [vmem:[%s10348_s26 + $0x498] sm:$0xff] %v1486_v19 }
  0x5e   : > { %1489 = vst [vmem:[%s10348_s26 + $0x4a0] sm:$0xff] %v1488_v20  ;;  %1491 = vst [vmem:[%s10348_s26 + $0x4a8] sm:$0xff] %v1490_v21  ;;  %v1492_v22 = vld [vmem:[%s10343_s25 + $0x960] sm:$0xff]  ;;  %v1494_v23 = vld [vmem:[%s10343_s25 + $0x970] sm:$0xff] }
  0x5f   : > { %v1496_v24 = vld [vmem:[%s10343_s25 + $0x980] sm:$0xff]  ;;  %1493 = vst [vmem:[%s10348_s26 + $0x4b0] sm:$0xff] %v1492_v22  ;;  %1495 = vst [vmem:[%s10348_s26 + $0x4b8] sm:$0xff] %v1494_v23  ;;  %v1498_v25 = vld [vmem:[%s10343_s25 + $0x990] sm:$0xff] }
  0x60   : > { %1497 = vst [vmem:[%s10348_s26 + $0x4c0] sm:$0xff] %v1496_v24  ;;  %v1500_v26 = vld [vmem:[%s10343_s25 + $0x9a0] sm:$0xff]  ;;  %v1502_v27 = vld [vmem:[%s10343_s25 + $0x9b0] sm:$0xff]  ;;  %1499 = vst [vmem:[%s10348_s26 + $0x4c8] sm:$0xff] %v1498_v25 }
  0x61   : > { %1501 = vst [vmem:[%s10348_s26 + $0x4d0] sm:$0xff] %v1500_v26  ;;  %1503 = vst [vmem:[%s10348_s26 + $0x4d8] sm:$0xff] %v1502_v27  ;;  %v1504_v28 = vld [vmem:[%s10343_s25 + $0x9c0] sm:$0xff]  ;;  %v1506_v29 = vld [vmem:[%s10343_s25 + $0x9d0] sm:$0xff] }
  0x62   : > { %v1508_v30 = vld [vmem:[%s10343_s25 + $0x9e0] sm:$0xff]  ;;  %1505 = vst [vmem:[%s10348_s26 + $0x4e0] sm:$0xff] %v1504_v28  ;;  %1507 = vst [vmem:[%s10348_s26 + $0x4e8] sm:$0xff] %v1506_v29  ;;  %v1510_v31 = vld [vmem:[%s10343_s25 + $0x9f0] sm:$0xff] }
  0x63   : > { %1509 = vst [vmem:[%s10348_s26 + $0x4f0] sm:$0xff] %v1508_v30  ;;  %v1512_v32 = vld [vmem:[%s10343_s25 + $0xa00] sm:$0xff]  ;;  %v1514_v33 = vld [vmem:[%s10343_s25 + $0xa10] sm:$0xff]  ;;  %1511 = vst [vmem:[%s10348_s26 + $0x4f8] sm:$0xff] %v1510_v31 }
  0x64   : > { %1513 = vst [vmem:[%s10348_s26 + $0x500] sm:$0xff] %v1512_v32  ;;  %1515 = vst [vmem:[%s10348_s26 + $0x508] sm:$0xff] %v1514_v33  ;;  %v1516_v34 = vld [vmem:[%s10343_s25 + $0xa20] sm:$0xff]  ;;  %v1518_v35 = vld [vmem:[%s10343_s25 + $0xa30] sm:$0xff] }
  0x65   : > { %v1520_v36 = vld [vmem:[%s10343_s25 + $0xa40] sm:$0xff]  ;;  %1517 = vst [vmem:[%s10348_s26 + $0x510] sm:$0xff] %v1516_v34  ;;  %1519 = vst [vmem:[%s10348_s26 + $0x518] sm:$0xff] %v1518_v35  ;;  %v1522_v37 = vld [vmem:[%s10343_s25 + $0xa50] sm:$0xff] }
  0x66   : > { %1521 = vst [vmem:[%s10348_s26 + $0x520] sm:$0xff] %v1520_v36  ;;  %v1524_v38 = vld [vmem:[%s10343_s25 + $0xa60] sm:$0xff]  ;;  %v1526_v39 = vld [vmem:[%s10343_s25 + $0xa70] sm:$0xff]  ;;  %1523 = vst [vmem:[%s10348_s26 + $0x528] sm:$0xff] %v1522_v37 }
  0x67   : > { %1525 = vst [vmem:[%s10348_s26 + $0x530] sm:$0xff] %v1524_v38  ;;  %1527 = vst [vmem:[%s10348_s26 + $0x538] sm:$0xff] %v1526_v39  ;;  %v1528_v40 = vld [vmem:[%s10343_s25 + $0xa80] sm:$0xff]  ;;  %v1530_v41 = vld [vmem:[%s10343_s25 + $0xa90] sm:$0xff] }
  0x68   : > { %v1532_v42 = vld [vmem:[%s10343_s25 + $0xaa0] sm:$0xff]  ;;  %1529 = vst [vmem:[%s10348_s26 + $0x540] sm:$0xff] %v1528_v40  ;;  %1531 = vst [vmem:[%s10348_s26 + $0x548] sm:$0xff] %v1530_v41  ;;  %v1534_v43 = vld [vmem:[%s10343_s25 + $0xab0] sm:$0xff] }
  0x69   : > { %1533 = vst [vmem:[%s10348_s26 + $0x550] sm:$0xff] %v1532_v42  ;;  %v1536_v44 = vld [vmem:[%s10343_s25 + $0xac0] sm:$0xff]  ;;  %v1538_v45 = vld [vmem:[%s10343_s25 + $0xad0] sm:$0xff]  ;;  %1535 = vst [vmem:[%s10348_s26 + $0x558] sm:$0xff] %v1534_v43 }
  0x6a   : > { %1537 = vst [vmem:[%s10348_s26 + $0x560] sm:$0xff] %v1536_v44  ;;  %1539 = vst [vmem:[%s10348_s26 + $0x568] sm:$0xff] %v1538_v45  ;;  %v1540_v46 = vld [vmem:[%s10343_s25 + $0xae0] sm:$0xff]  ;;  %v1542_v47 = vld [vmem:[%s10343_s25 + $0xaf0] sm:$0xff] }
  0x6b   : > { %v1544_v48 = vld [vmem:[%s10343_s25 + $0xb00] sm:$0xff]  ;;  %1541 = vst [vmem:[%s10348_s26 + $0x570] sm:$0xff] %v1540_v46  ;;  %1543 = vst [vmem:[%s10348_s26 + $0x578] sm:$0xff] %v1542_v47  ;;  %v1546_v49 = vld [vmem:[%s10343_s25 + $0xb10] sm:$0xff] }
  0x6c   : > { %1545 = vst [vmem:[%s10348_s26 + $0x580] sm:$0xff] %v1544_v48  ;;  %v1548_v50 = vld [vmem:[%s10343_s25 + $0xb20] sm:$0xff]  ;;  %v1550_v51 = vld [vmem:[%s10343_s25 + $0xb30] sm:$0xff]  ;;  %1547 = vst [vmem:[%s10348_s26 + $0x588] sm:$0xff] %v1546_v49 }
  0x6d   : > { %1549 = vst [vmem:[%s10348_s26 + $0x590] sm:$0xff] %v1548_v50  ;;  %1551 = vst [vmem:[%s10348_s26 + $0x598] sm:$0xff] %v1550_v51  ;;  %v1552_v52 = vld [vmem:[%s10343_s25 + $0xb40] sm:$0xff]  ;;  %v1554_v53 = vld [vmem:[%s10343_s25 + $0xb50] sm:$0xff] }
  0x6e   : > { %v1556_v54 = vld [vmem:[%s10343_s25 + $0xb60] sm:$0xff]  ;;  %1553 = vst [vmem:[%s10348_s26 + $0x5a0] sm:$0xff] %v1552_v52  ;;  %1555 = vst [vmem:[%s10348_s26 + $0x5a8] sm:$0xff] %v1554_v53  ;;  %v1558_v55 = vld [vmem:[%s10343_s25 + $0xb70] sm:$0xff] }
  0x6f   : > { %1557 = vst [vmem:[%s10348_s26 + $0x5b0] sm:$0xff] %v1556_v54  ;;  %v1560_v56 = vld [vmem:[%s10343_s25 + $0xb80] sm:$0xff]  ;;  %v1562_v57 = vld [vmem:[%s10343_s25 + $0xb90] sm:$0xff]  ;;  %1559 = vst [vmem:[%s10348_s26 + $0x5b8] sm:$0xff] %v1558_v55 }
  0x70   : > { %1561 = vst [vmem:[%s10348_s26 + $0x5c0] sm:$0xff] %v1560_v56  ;;  %1563 = vst [vmem:[%s10348_s26 + $0x5c8] sm:$0xff] %v1562_v57  ;;  %v1564_v58 = vld [vmem:[%s10343_s25 + $0xba0] sm:$0xff]  ;;  %v1566_v59 = vld [vmem:[%s10343_s25 + $0xbb0] sm:$0xff] }
  0x71   : > { %v1568_v60 = vld [vmem:[%s10343_s25 + $0xbc0] sm:$0xff]  ;;  %1565 = vst [vmem:[%s10348_s26 + $0x5d0] sm:$0xff] %v1564_v58  ;;  %1567 = vst [vmem:[%s10348_s26 + $0x5d8] sm:$0xff] %v1566_v59  ;;  %v1570_v61 = vld [vmem:[%s10343_s25 + $0xbd0] sm:$0xff] }
  0x72   : > { %1569 = vst [vmem:[%s10348_s26 + $0x5e0] sm:$0xff] %v1568_v60  ;;  %v1572_v62 = vld [vmem:[%s10343_s25 + $0xbe0] sm:$0xff]  ;;  %v1574_v63 = vld [vmem:[%s10343_s25 + $0xbf0] sm:$0xff]  ;;  %1571 = vst [vmem:[%s10348_s26 + $0x5e8] sm:$0xff] %v1570_v61 }
  0x73   : > { %1573 = vst [vmem:[%s10348_s26 + $0x5f0] sm:$0xff] %v1572_v62  ;;  %1575 = vst [vmem:[%s10348_s26 + $0x5f8] sm:$0xff] %v1574_v63  ;;  %v1576_v0 = vld [vmem:[%s10343_s25 + $0xc00] sm:$0xff]  ;;  %v1578_v1 = vld [vmem:[%s10343_s25 + $0xc10] sm:$0xff] }
  0x74   : > { %v1580_v2 = vld [vmem:[%s10343_s25 + $0xc20] sm:$0xff]  ;;  %1577 = vst [vmem:[%s10348_s26 + $0x600] sm:$0xff] %v1576_v0  ;;  %1579 = vst [vmem:[%s10348_s26 + $0x608] sm:$0xff] %v1578_v1  ;;  %v1582_v3 = vld [vmem:[%s10343_s25 + $0xc30] sm:$0xff] }
  0x75   : > { %1581 = vst [vmem:[%s10348_s26 + $0x610] sm:$0xff] %v1580_v2  ;;  %v1584_v4 = vld [vmem:[%s10343_s25 + $0xc40] sm:$0xff]  ;;  %v1586_v5 = vld [vmem:[%s10343_s25 + $0xc50] sm:$0xff]  ;;  %1583 = vst [vmem:[%s10348_s26 + $0x618] sm:$0xff] %v1582_v3 }
  0x76   : > { %1585 = vst [vmem:[%s10348_s26 + $0x620] sm:$0xff] %v1584_v4  ;;  %1587 = vst [vmem:[%s10348_s26 + $0x628] sm:$0xff] %v1586_v5  ;;  %v1588_v6 = vld [vmem:[%s10343_s25 + $0xc60] sm:$0xff]  ;;  %v1590_v7 = vld [vmem:[%s10343_s25 + $0xc70] sm:$0xff] }
  0x77   : > { %v1592_v8 = vld [vmem:[%s10343_s25 + $0xc80] sm:$0xff]  ;;  %1589 = vst [vmem:[%s10348_s26 + $0x630] sm:$0xff] %v1588_v6  ;;  %1591 = vst [vmem:[%s10348_s26 + $0x638] sm:$0xff] %v1590_v7  ;;  %v1594_v9 = vld [vmem:[%s10343_s25 + $0xc90] sm:$0xff] }
  0x78   : > { %1593 = vst [vmem:[%s10348_s26 + $0x640] sm:$0xff] %v1592_v8  ;;  %v1596_v10 = vld [vmem:[%s10343_s25 + $0xca0] sm:$0xff]  ;;  %v1598_v11 = vld [vmem:[%s10343_s25 + $0xcb0] sm:$0xff]  ;;  %1595 = vst [vmem:[%s10348_s26 + $0x648] sm:$0xff] %v1594_v9 }
  0x79   : > { %1597 = vst [vmem:[%s10348_s26 + $0x650] sm:$0xff] %v1596_v10  ;;  %1599 = vst [vmem:[%s10348_s26 + $0x658] sm:$0xff] %v1598_v11  ;;  %v1600_v12 = vld [vmem:[%s10343_s25 + $0xcc0] sm:$0xff]  ;;  %v1602_v13 = vld [vmem:[%s10343_s25 + $0xcd0] sm:$0xff] }
  0x7a   : > { %v1604_v14 = vld [vmem:[%s10343_s25 + $0xce0] sm:$0xff]  ;;  %1601 = vst [vmem:[%s10348_s26 + $0x660] sm:$0xff] %v1600_v12  ;;  %1603 = vst [vmem:[%s10348_s26 + $0x668] sm:$0xff] %v1602_v13  ;;  %v1606_v15 = vld [vmem:[%s10343_s25 + $0xcf0] sm:$0xff] }
  0x7b   : > { %1605 = vst [vmem:[%s10348_s26 + $0x670] sm:$0xff] %v1604_v14  ;;  %v1608_v16 = vld [vmem:[%s10343_s25 + $0xd00] sm:$0xff]  ;;  %v1610_v17 = vld [vmem:[%s10343_s25 + $0xd10] sm:$0xff]  ;;  %1607 = vst [vmem:[%s10348_s26 + $0x678] sm:$0xff] %v1606_v15 }
  0x7c   : > { %1609 = vst [vmem:[%s10348_s26 + $0x680] sm:$0xff] %v1608_v16  ;;  %1611 = vst [vmem:[%s10348_s26 + $0x688] sm:$0xff] %v1610_v17  ;;  %v1612_v18 = vld [vmem:[%s10343_s25 + $0xd20] sm:$0xff]  ;;  %v1614_v19 = vld [vmem:[%s10343_s25 + $0xd30] sm:$0xff] }
  0x7d   : > { %v1616_v20 = vld [vmem:[%s10343_s25 + $0xd40] sm:$0xff]  ;;  %1613 = vst [vmem:[%s10348_s26 + $0x690] sm:$0xff] %v1612_v18  ;;  %1615 = vst [vmem:[%s10348_s26 + $0x698] sm:$0xff] %v1614_v19  ;;  %v1618_v21 = vld [vmem:[%s10343_s25 + $0xd50] sm:$0xff] }
  0x7e   : > { %1617 = vst [vmem:[%s10348_s26 + $0x6a0] sm:$0xff] %v1616_v20  ;;  %v1620_v22 = vld [vmem:[%s10343_s25 + $0xd60] sm:$0xff]  ;;  %v1622_v23 = vld [vmem:[%s10343_s25 + $0xd70] sm:$0xff]  ;;  %1619 = vst [vmem:[%s10348_s26 + $0x6a8] sm:$0xff] %v1618_v21 }
  0x7f   : > { %1621 = vst [vmem:[%s10348_s26 + $0x6b0] sm:$0xff] %v1620_v22  ;;  %1623 = vst [vmem:[%s10348_s26 + $0x6b8] sm:$0xff] %v1622_v23  ;;  %v1624_v24 = vld [vmem:[%s10343_s25 + $0xd80] sm:$0xff]  ;;  %v1626_v25 = vld [vmem:[%s10343_s25 + $0xd90] sm:$0xff] }
  0x80   : > { %v1628_v26 = vld [vmem:[%s10343_s25 + $0xda0] sm:$0xff]  ;;  %1625 = vst [vmem:[%s10348_s26 + $0x6c0] sm:$0xff] %v1624_v24  ;;  %1627 = vst [vmem:[%s10348_s26 + $0x6c8] sm:$0xff] %v1626_v25  ;;  %v1630_v27 = vld [vmem:[%s10343_s25 + $0xdb0] sm:$0xff] }
  0x81   : > { %1629 = vst [vmem:[%s10348_s26 + $0x6d0] sm:$0xff] %v1628_v26  ;;  %v1632_v28 = vld [vmem:[%s10343_s25 + $0xdc0] sm:$0xff]  ;;  %v1634_v29 = vld [vmem:[%s10343_s25 + $0xdd0] sm:$0xff]  ;;  %1631 = vst [vmem:[%s10348_s26 + $0x6d8] sm:$0xff] %v1630_v27 }
  0x82   : > { %1633 = vst [vmem:[%s10348_s26 + $0x6e0] sm:$0xff] %v1632_v28  ;;  %1635 = vst [vmem:[%s10348_s26 + $0x6e8] sm:$0xff] %v1634_v29  ;;  %v1636_v30 = vld [vmem:[%s10343_s25 + $0xde0] sm:$0xff]  ;;  %v1638_v31 = vld [vmem:[%s10343_s25 + $0xdf0] sm:$0xff] }
  0x83   : > { %v1640_v32 = vld [vmem:[%s10343_s25 + $0xe00] sm:$0xff]  ;;  %1637 = vst [vmem:[%s10348_s26 + $0x6f0] sm:$0xff] %v1636_v30  ;;  %1639 = vst [vmem:[%s10348_s26 + $0x6f8] sm:$0xff] %v1638_v31  ;;  %v1642_v33 = vld [vmem:[%s10343_s25 + $0xe10] sm:$0xff] }
  0x84   : > { %1641 = vst [vmem:[%s10348_s26 + $0x700] sm:$0xff] %v1640_v32  ;;  %v1644_v34 = vld [vmem:[%s10343_s25 + $0xe20] sm:$0xff]  ;;  %v1646_v35 = vld [vmem:[%s10343_s25 + $0xe30] sm:$0xff]  ;;  %1643 = vst [vmem:[%s10348_s26 + $0x708] sm:$0xff] %v1642_v33 }
  0x85   : > { %1645 = vst [vmem:[%s10348_s26 + $0x710] sm:$0xff] %v1644_v34  ;;  %1647 = vst [vmem:[%s10348_s26 + $0x718] sm:$0xff] %v1646_v35  ;;  %v1648_v36 = vld [vmem:[%s10343_s25 + $0xe40] sm:$0xff]  ;;  %v1650_v37 = vld [vmem:[%s10343_s25 + $0xe50] sm:$0xff] }
  0x86   : > { %v1652_v38 = vld [vmem:[%s10343_s25 + $0xe60] sm:$0xff]  ;;  %1649 = vst [vmem:[%s10348_s26 + $0x720] sm:$0xff] %v1648_v36  ;;  %1651 = vst [vmem:[%s10348_s26 + $0x728] sm:$0xff] %v1650_v37  ;;  %v1654_v39 = vld [vmem:[%s10343_s25 + $0xe70] sm:$0xff] }
  0x87   : > { %1653 = vst [vmem:[%s10348_s26 + $0x730] sm:$0xff] %v1652_v38  ;;  %v1656_v40 = vld [vmem:[%s10343_s25 + $0xe80] sm:$0xff]  ;;  %v1658_v41 = vld [vmem:[%s10343_s25 + $0xe90] sm:$0xff]  ;;  %1655 = vst [vmem:[%s10348_s26 + $0x738] sm:$0xff] %v1654_v39 }
  0x88   : > { %1657 = vst [vmem:[%s10348_s26 + $0x740] sm:$0xff] %v1656_v40  ;;  %1659 = vst [vmem:[%s10348_s26 + $0x748] sm:$0xff] %v1658_v41  ;;  %v1660_v42 = vld [vmem:[%s10343_s25 + $0xea0] sm:$0xff]  ;;  %v1662_v43 = vld [vmem:[%s10343_s25 + $0xeb0] sm:$0xff] }
  0x89   : > { %v1664_v44 = vld [vmem:[%s10343_s25 + $0xec0] sm:$0xff]  ;;  %1661 = vst [vmem:[%s10348_s26 + $0x750] sm:$0xff] %v1660_v42  ;;  %1663 = vst [vmem:[%s10348_s26 + $0x758] sm:$0xff] %v1662_v43  ;;  %v1666_v45 = vld [vmem:[%s10343_s25 + $0xed0] sm:$0xff] }
  0x8a   : > { %1665 = vst [vmem:[%s10348_s26 + $0x760] sm:$0xff] %v1664_v44  ;;  %v1668_v46 = vld [vmem:[%s10343_s25 + $0xee0] sm:$0xff]  ;;  %v1670_v47 = vld [vmem:[%s10343_s25 + $0xef0] sm:$0xff]  ;;  %1667 = vst [vmem:[%s10348_s26 + $0x768] sm:$0xff] %v1666_v45 }
  0x8b   : > { %1669 = vst [vmem:[%s10348_s26 + $0x770] sm:$0xff] %v1668_v46  ;;  %1671 = vst [vmem:[%s10348_s26 + $0x778] sm:$0xff] %v1670_v47  ;;  %v1672_v48 = vld [vmem:[%s10343_s25 + $0xf00] sm:$0xff]  ;;  %v1674_v49 = vld [vmem:[%s10343_s25 + $0xf10] sm:$0xff] }
  0x8c   : > { %v1676_v50 = vld [vmem:[%s10343_s25 + $0xf20] sm:$0xff]  ;;  %1673 = vst [vmem:[%s10348_s26 + $0x780] sm:$0xff] %v1672_v48  ;;  %1675 = vst [vmem:[%s10348_s26 + $0x788] sm:$0xff] %v1674_v49  ;;  %v1678_v51 = vld [vmem:[%s10343_s25 + $0xf30] sm:$0xff] }
  0x8d   : > { %1677 = vst [vmem:[%s10348_s26 + $0x790] sm:$0xff] %v1676_v50  ;;  %v1680_v52 = vld [vmem:[%s10343_s25 + $0xf40] sm:$0xff]  ;;  %v1682_v53 = vld [vmem:[%s10343_s25 + $0xf50] sm:$0xff]  ;;  %1679 = vst [vmem:[%s10348_s26 + $0x798] sm:$0xff] %v1678_v51 }
  0x8e   : > { %1681 = vst [vmem:[%s10348_s26 + $0x7a0] sm:$0xff] %v1680_v52  ;;  %1683 = vst [vmem:[%s10348_s26 + $0x7a8] sm:$0xff] %v1682_v53  ;;  %v1684_v54 = vld [vmem:[%s10343_s25 + $0xf60] sm:$0xff]  ;;  %v1686_v55 = vld [vmem:[%s10343_s25 + $0xf70] sm:$0xff] }
  0x8f   : > { %v1688_v56 = vld [vmem:[%s10343_s25 + $0xf80] sm:$0xff]  ;;  %1685 = vst [vmem:[%s10348_s26 + $0x7b0] sm:$0xff] %v1684_v54  ;;  %1687 = vst [vmem:[%s10348_s26 + $0x7b8] sm:$0xff] %v1686_v55  ;;  %v1690_v57 = vld [vmem:[%s10343_s25 + $0xf90] sm:$0xff] }
  0x90   : > { %1689 = vst [vmem:[%s10348_s26 + $0x7c0] sm:$0xff] %v1688_v56  ;;  %v1692_v58 = vld [vmem:[%s10343_s25 + $0xfa0] sm:$0xff]  ;;  %v1694_v59 = vld [vmem:[%s10343_s25 + $0xfb0] sm:$0xff]  ;;  %1691 = vst [vmem:[%s10348_s26 + $0x7c8] sm:$0xff] %v1690_v57 }
  0x91   : > { %1693 = vst [vmem:[%s10348_s26 + $0x7d0] sm:$0xff] %v1692_v58  ;;  %1695 = vst [vmem:[%s10348_s26 + $0x7d8] sm:$0xff] %v1694_v59  ;;  %v1696_v60 = vld [vmem:[%s10343_s25 + $0xfc0] sm:$0xff]  ;;  %v1698_v61 = vld [vmem:[%s10343_s25 + $0xfd0] sm:$0xff] }
  0x92   : > { %v1700_v62 = vld [vmem:[%s10343_s25 + $0xfe0] sm:$0xff]  ;;  %1697 = vst [vmem:[%s10348_s26 + $0x7e0] sm:$0xff] %v1696_v60  ;;  %1699 = vst [vmem:[%s10348_s26 + $0x7e8] sm:$0xff] %v1698_v61  ;;  %v1702_v63 = vld [vmem:[%s10343_s25 + $0xff0] sm:$0xff] }
  0x93   : > { %1701 = vst [vmem:[%s10348_s26 + $0x7f0] sm:$0xff] %v1700_v62  ;;  %v1704_v0 = vld [vmem:[%s10343_s25 + $0x1000] sm:$0xff]  ;;  %v1706_v1 = vld [vmem:[%s10343_s25 + $0x1010] sm:$0xff]  ;;  %1703 = vst [vmem:[%s10348_s26 + $0x7f8] sm:$0xff] %v1702_v63 }
  0x94   : > { %1705 = vst [vmem:[%s10348_s26 + $0x800] sm:$0xff] %v1704_v0  ;;  %1707 = vst [vmem:[%s10348_s26 + $0x808] sm:$0xff] %v1706_v1  ;;  %v1708_v2 = vld [vmem:[%s10343_s25 + $0x1020] sm:$0xff]  ;;  %v1710_v3 = vld [vmem:[%s10343_s25 + $0x1030] sm:$0xff] }
  0x95   : > { %v1712_v4 = vld [vmem:[%s10343_s25 + $0x1040] sm:$0xff]  ;;  %1709 = vst [vmem:[%s10348_s26 + $0x810] sm:$0xff] %v1708_v2  ;;  %1711 = vst [vmem:[%s10348_s26 + $0x818] sm:$0xff] %v1710_v3  ;;  %v1714_v5 = vld [vmem:[%s10343_s25 + $0x1050] sm:$0xff] }
  0x96   : > { %1713 = vst [vmem:[%s10348_s26 + $0x820] sm:$0xff] %v1712_v4  ;;  %v1716_v6 = vld [vmem:[%s10343_s25 + $0x1060] sm:$0xff]  ;;  %v1718_v7 = vld [vmem:[%s10343_s25 + $0x1070] sm:$0xff]  ;;  %1715 = vst [vmem:[%s10348_s26 + $0x828] sm:$0xff] %v1714_v5 }
  0x97   : > { %1717 = vst [vmem:[%s10348_s26 + $0x830] sm:$0xff] %v1716_v6  ;;  %1719 = vst [vmem:[%s10348_s26 + $0x838] sm:$0xff] %v1718_v7  ;;  %v1720_v8 = vld [vmem:[%s10343_s25 + $0x1080] sm:$0xff]  ;;  %v1722_v9 = vld [vmem:[%s10343_s25 + $0x1090] sm:$0xff] }
  0x98   : > { %v1724_v10 = vld [vmem:[%s10343_s25 + $0x10a0] sm:$0xff]  ;;  %1721 = vst [vmem:[%s10348_s26 + $0x840] sm:$0xff] %v1720_v8  ;;  %1723 = vst [vmem:[%s10348_s26 + $0x848] sm:$0xff] %v1722_v9  ;;  %v1726_v11 = vld [vmem:[%s10343_s25 + $0x10b0] sm:$0xff] }
  0x99   : > { %1725 = vst [vmem:[%s10348_s26 + $0x850] sm:$0xff] %v1724_v10  ;;  %v1728_v12 = vld [vmem:[%s10343_s25 + $0x10c0] sm:$0xff]  ;;  %v1730_v13 = vld [vmem:[%s10343_s25 + $0x10d0] sm:$0xff]  ;;  %1727 = vst [vmem:[%s10348_s26 + $0x858] sm:$0xff] %v1726_v11 }
  0x9a   : > { %1729 = vst [vmem:[%s10348_s26 + $0x860] sm:$0xff] %v1728_v12  ;;  %1731 = vst [vmem:[%s10348_s26 + $0x868] sm:$0xff] %v1730_v13  ;;  %v1732_v14 = vld [vmem:[%s10343_s25 + $0x10e0] sm:$0xff]  ;;  %v1734_v15 = vld [vmem:[%s10343_s25 + $0x10f0] sm:$0xff] }
  0x9b   : > { %v1736_v16 = vld [vmem:[%s10343_s25 + $0x1100] sm:$0xff]  ;;  %1733 = vst [vmem:[%s10348_s26 + $0x870] sm:$0xff] %v1732_v14  ;;  %1735 = vst [vmem:[%s10348_s26 + $0x878] sm:$0xff] %v1734_v15  ;;  %v1738_v17 = vld [vmem:[%s10343_s25 + $0x1110] sm:$0xff] }
  0x9c   : > { %1737 = vst [vmem:[%s10348_s26 + $0x880] sm:$0xff] %v1736_v16  ;;  %v1740_v18 = vld [vmem:[%s10343_s25 + $0x1120] sm:$0xff]  ;;  %v1742_v19 = vld [vmem:[%s10343_s25 + $0x1130] sm:$0xff]  ;;  %1739 = vst [vmem:[%s10348_s26 + $0x888] sm:$0xff] %v1738_v17 }
  0x9d   : > { %1741 = vst [vmem:[%s10348_s26 + $0x890] sm:$0xff] %v1740_v18  ;;  %1743 = vst [vmem:[%s10348_s26 + $0x898] sm:$0xff] %v1742_v19  ;;  %v1744_v20 = vld [vmem:[%s10343_s25 + $0x1140] sm:$0xff]  ;;  %v1746_v21 = vld [vmem:[%s10343_s25 + $0x1150] sm:$0xff] }
  0x9e   : > { %v1748_v22 = vld [vmem:[%s10343_s25 + $0x1160] sm:$0xff]  ;;  %1745 = vst [vmem:[%s10348_s26 + $0x8a0] sm:$0xff] %v1744_v20  ;;  %1747 = vst [vmem:[%s10348_s26 + $0x8a8] sm:$0xff] %v1746_v21  ;;  %v1750_v23 = vld [vmem:[%s10343_s25 + $0x1170] sm:$0xff] }
  0x9f   : > { %1749 = vst [vmem:[%s10348_s26 + $0x8b0] sm:$0xff] %v1748_v22  ;;  %v1752_v24 = vld [vmem:[%s10343_s25 + $0x1180] sm:$0xff]  ;;  %v1754_v25 = vld [vmem:[%s10343_s25 + $0x1190] sm:$0xff]  ;;  %1751 = vst [vmem:[%s10348_s26 + $0x8b8] sm:$0xff] %v1750_v23 }
  0xa0   : > { %1753 = vst [vmem:[%s10348_s26 + $0x8c0] sm:$0xff] %v1752_v24  ;;  %1755 = vst [vmem:[%s10348_s26 + $0x8c8] sm:$0xff] %v1754_v25  ;;  %v1756_v26 = vld [vmem:[%s10343_s25 + $0x11a0] sm:$0xff]  ;;  %v1758_v27 = vld [vmem:[%s10343_s25 + $0x11b0] sm:$0xff] }
  0xa1   : > { %v1760_v28 = vld [vmem:[%s10343_s25 + $0x11c0] sm:$0xff]  ;;  %1757 = vst [vmem:[%s10348_s26 + $0x8d0] sm:$0xff] %v1756_v26  ;;  %1759 = vst [vmem:[%s10348_s26 + $0x8d8] sm:$0xff] %v1758_v27  ;;  %v1762_v29 = vld [vmem:[%s10343_s25 + $0x11d0] sm:$0xff] }
  0xa2   : > { %1761 = vst [vmem:[%s10348_s26 + $0x8e0] sm:$0xff] %v1760_v28  ;;  %v1764_v30 = vld [vmem:[%s10343_s25 + $0x11e0] sm:$0xff]  ;;  %v1766_v31 = vld [vmem:[%s10343_s25 + $0x11f0] sm:$0xff]  ;;  %1763 = vst [vmem:[%s10348_s26 + $0x8e8] sm:$0xff] %v1762_v29 }
  0xa3   : > { %1765 = vst [vmem:[%s10348_s26 + $0x8f0] sm:$0xff] %v1764_v30  ;;  %1767 = vst [vmem:[%s10348_s26 + $0x8f8] sm:$0xff] %v1766_v31  ;;  %v1768_v32 = vld [vmem:[%s10343_s25 + $0x1200] sm:$0xff]  ;;  %v1770_v33 = vld [vmem:[%s10343_s25 + $0x1210] sm:$0xff] }
  0xa4   : > { %v1772_v34 = vld [vmem:[%s10343_s25 + $0x1220] sm:$0xff]  ;;  %1769 = vst [vmem:[%s10348_s26 + $0x900] sm:$0xff] %v1768_v32  ;;  %1771 = vst [vmem:[%s10348_s26 + $0x908] sm:$0xff] %v1770_v33  ;;  %v1774_v35 = vld [vmem:[%s10343_s25 + $0x1230] sm:$0xff] }
  0xa5   : > { %1773 = vst [vmem:[%s10348_s26 + $0x910] sm:$0xff] %v1772_v34  ;;  %v1776_v36 = vld [vmem:[%s10343_s25 + $0x1240] sm:$0xff]  ;;  %v1778_v37 = vld [vmem:[%s10343_s25 + $0x1250] sm:$0xff]  ;;  %1775 = vst [vmem:[%s10348_s26 + $0x918] sm:$0xff] %v1774_v35 }
  0xa6   : > { %1777 = vst [vmem:[%s10348_s26 + $0x920] sm:$0xff] %v1776_v36  ;;  %1779 = vst [vmem:[%s10348_s26 + $0x928] sm:$0xff] %v1778_v37  ;;  %v1780_v38 = vld [vmem:[%s10343_s25 + $0x1260] sm:$0xff]  ;;  %v1782_v39 = vld [vmem:[%s10343_s25 + $0x1270] sm:$0xff] }
  0xa7   : > { %v1784_v40 = vld [vmem:[%s10343_s25 + $0x1280] sm:$0xff]  ;;  %1781 = vst [vmem:[%s10348_s26 + $0x930] sm:$0xff] %v1780_v38  ;;  %1783 = vst [vmem:[%s10348_s26 + $0x938] sm:$0xff] %v1782_v39  ;;  %v1786_v41 = vld [vmem:[%s10343_s25 + $0x1290] sm:$0xff] }
  0xa8   : > { %1785 = vst [vmem:[%s10348_s26 + $0x940] sm:$0xff] %v1784_v40  ;;  %v1788_v42 = vld [vmem:[%s10343_s25 + $0x12a0] sm:$0xff]  ;;  %v1790_v43 = vld [vmem:[%s10343_s25 + $0x12b0] sm:$0xff]  ;;  %1787 = vst [vmem:[%s10348_s26 + $0x948] sm:$0xff] %v1786_v41 }
  0xa9   : > { %1789 = vst [vmem:[%s10348_s26 + $0x950] sm:$0xff] %v1788_v42  ;;  %1791 = vst [vmem:[%s10348_s26 + $0x958] sm:$0xff] %v1790_v43  ;;  %v1792_v44 = vld [vmem:[%s10343_s25 + $0x12c0] sm:$0xff]  ;;  %v1794_v45 = vld [vmem:[%s10343_s25 + $0x12d0] sm:$0xff] }
  0xaa   : > { %v1796_v46 = vld [vmem:[%s10343_s25 + $0x12e0] sm:$0xff]  ;;  %1793 = vst [vmem:[%s10348_s26 + $0x960] sm:$0xff] %v1792_v44  ;;  %1795 = vst [vmem:[%s10348_s26 + $0x968] sm:$0xff] %v1794_v45  ;;  %v1798_v47 = vld [vmem:[%s10343_s25 + $0x12f0] sm:$0xff] }
  0xab   : > { %1797 = vst [vmem:[%s10348_s26 + $0x970] sm:$0xff] %v1796_v46  ;;  %v1800_v48 = vld [vmem:[%s10343_s25 + $0x1300] sm:$0xff]  ;;  %v1802_v49 = vld [vmem:[%s10343_s25 + $0x1310] sm:$0xff]  ;;  %1799 = vst [vmem:[%s10348_s26 + $0x978] sm:$0xff] %v1798_v47 }
  0xac   : > { %1801 = vst [vmem:[%s10348_s26 + $0x980] sm:$0xff] %v1800_v48  ;;  %1803 = vst [vmem:[%s10348_s26 + $0x988] sm:$0xff] %v1802_v49  ;;  %v1804_v50 = vld [vmem:[%s10343_s25 + $0x1320] sm:$0xff]  ;;  %v1806_v51 = vld [vmem:[%s10343_s25 + $0x1330] sm:$0xff] }
  0xad   : > { %v1808_v52 = vld [vmem:[%s10343_s25 + $0x1340] sm:$0xff]  ;;  %1805 = vst [vmem:[%s10348_s26 + $0x990] sm:$0xff] %v1804_v50  ;;  %1807 = vst [vmem:[%s10348_s26 + $0x998] sm:$0xff] %v1806_v51  ;;  %v1810_v53 = vld [vmem:[%s10343_s25 + $0x1350] sm:$0xff] }
  0xae   : > { %1809 = vst [vmem:[%s10348_s26 + $0x9a0] sm:$0xff] %v1808_v52  ;;  %v1812_v54 = vld [vmem:[%s10343_s25 + $0x1360] sm:$0xff]  ;;  %v1814_v55 = vld [vmem:[%s10343_s25 + $0x1370] sm:$0xff]  ;;  %1811 = vst [vmem:[%s10348_s26 + $0x9a8] sm:$0xff] %v1810_v53 }
  0xaf   : > { %1813 = vst [vmem:[%s10348_s26 + $0x9b0] sm:$0xff] %v1812_v54  ;;  %1815 = vst [vmem:[%s10348_s26 + $0x9b8] sm:$0xff] %v1814_v55  ;;  %v1816_v56 = vld [vmem:[%s10343_s25 + $0x1380] sm:$0xff]  ;;  %v1818_v57 = vld [vmem:[%s10343_s25 + $0x1390] sm:$0xff] }
  0xb0   : > { %v1820_v58 = vld [vmem:[%s10343_s25 + $0x13a0] sm:$0xff]  ;;  %1817 = vst [vmem:[%s10348_s26 + $0x9c0] sm:$0xff] %v1816_v56  ;;  %1819 = vst [vmem:[%s10348_s26 + $0x9c8] sm:$0xff] %v1818_v57  ;;  %v1822_v59 = vld [vmem:[%s10343_s25 + $0x13b0] sm:$0xff] }
  0xb1   : > { %1821 = vst [vmem:[%s10348_s26 + $0x9d0] sm:$0xff] %v1820_v58  ;;  %v1824_v60 = vld [vmem:[%s10343_s25 + $0x13c0] sm:$0xff]  ;;  %v1826_v61 = vld [vmem:[%s10343_s25 + $0x13d0] sm:$0xff]  ;;  %1823 = vst [vmem:[%s10348_s26 + $0x9d8] sm:$0xff] %v1822_v59 }
  0xb2   : > { %1825 = vst [vmem:[%s10348_s26 + $0x9e0] sm:$0xff] %v1824_v60  ;;  %1827 = vst [vmem:[%s10348_s26 + $0x9e8] sm:$0xff] %v1826_v61  ;;  %v1828_v62 = vld [vmem:[%s10343_s25 + $0x13e0] sm:$0xff]  ;;  %v1830_v63 = vld [vmem:[%s10343_s25 + $0x13f0] sm:$0xff] }
  0xb3   : > { %v1832_v0 = vld [vmem:[%s10343_s25 + $0x1400] sm:$0xff]  ;;  %1829 = vst [vmem:[%s10348_s26 + $0x9f0] sm:$0xff] %v1828_v62  ;;  %1831 = vst [vmem:[%s10348_s26 + $0x9f8] sm:$0xff] %v1830_v63  ;;  %v1834_v1 = vld [vmem:[%s10343_s25 + $0x1410] sm:$0xff] }
  0xb4   : > { %1833 = vst [vmem:[%s10348_s26 + $0xa00] sm:$0xff] %v1832_v0  ;;  %v1836_v2 = vld [vmem:[%s10343_s25 + $0x1420] sm:$0xff]  ;;  %v1838_v3 = vld [vmem:[%s10343_s25 + $0x1430] sm:$0xff]  ;;  %1835 = vst [vmem:[%s10348_s26 + $0xa08] sm:$0xff] %v1834_v1 }
  0xb5   : > { %1837 = vst [vmem:[%s10348_s26 + $0xa10] sm:$0xff] %v1836_v2  ;;  %1839 = vst [vmem:[%s10348_s26 + $0xa18] sm:$0xff] %v1838_v3  ;;  %v1840_v4 = vld [vmem:[%s10343_s25 + $0x1440] sm:$0xff]  ;;  %v1842_v5 = vld [vmem:[%s10343_s25 + $0x1450] sm:$0xff] }
  0xb6   : > { %v1844_v6 = vld [vmem:[%s10343_s25 + $0x1460] sm:$0xff]  ;;  %1841 = vst [vmem:[%s10348_s26 + $0xa20] sm:$0xff] %v1840_v4  ;;  %1843 = vst [vmem:[%s10348_s26 + $0xa28] sm:$0xff] %v1842_v5  ;;  %v1846_v7 = vld [vmem:[%s10343_s25 + $0x1470] sm:$0xff] }
  0xb7   : > { %1845 = vst [vmem:[%s10348_s26 + $0xa30] sm:$0xff] %v1844_v6  ;;  %v1848_v8 = vld [vmem:[%s10343_s25 + $0x1480] sm:$0xff]  ;;  %v1850_v9 = vld [vmem:[%s10343_s25 + $0x1490] sm:$0xff]  ;;  %1847 = vst [vmem:[%s10348_s26 + $0xa38] sm:$0xff] %v1846_v7 }
  0xb8   : > { %1849 = vst [vmem:[%s10348_s26 + $0xa40] sm:$0xff] %v1848_v8  ;;  %1851 = vst [vmem:[%s10348_s26 + $0xa48] sm:$0xff] %v1850_v9  ;;  %v1852_v10 = vld [vmem:[%s10343_s25 + $0x14a0] sm:$0xff]  ;;  %v1854_v11 = vld [vmem:[%s10343_s25 + $0x14b0] sm:$0xff] }
  0xb9   : > { %v1856_v12 = vld [vmem:[%s10343_s25 + $0x14c0] sm:$0xff]  ;;  %1853 = vst [vmem:[%s10348_s26 + $0xa50] sm:$0xff] %v1852_v10  ;;  %1855 = vst [vmem:[%s10348_s26 + $0xa58] sm:$0xff] %v1854_v11  ;;  %v1858_v13 = vld [vmem:[%s10343_s25 + $0x14d0] sm:$0xff] }
  0xba   : > { %1857 = vst [vmem:[%s10348_s26 + $0xa60] sm:$0xff] %v1856_v12  ;;  %v1860_v14 = vld [vmem:[%s10343_s25 + $0x14e0] sm:$0xff]  ;;  %v1862_v15 = vld [vmem:[%s10343_s25 + $0x14f0] sm:$0xff]  ;;  %1859 = vst [vmem:[%s10348_s26 + $0xa68] sm:$0xff] %v1858_v13 }
  0xbb   : > { %1861 = vst [vmem:[%s10348_s26 + $0xa70] sm:$0xff] %v1860_v14  ;;  %1863 = vst [vmem:[%s10348_s26 + $0xa78] sm:$0xff] %v1862_v15  ;;  %v1864_v16 = vld [vmem:[%s10343_s25 + $0x1500] sm:$0xff]  ;;  %v1866_v17 = vld [vmem:[%s10343_s25 + $0x1510] sm:$0xff] }
  0xbc   : > { %v1868_v18 = vld [vmem:[%s10343_s25 + $0x1520] sm:$0xff]  ;;  %1865 = vst [vmem:[%s10348_s26 + $0xa80] sm:$0xff] %v1864_v16  ;;  %1867 = vst [vmem:[%s10348_s26 + $0xa88] sm:$0xff] %v1866_v17  ;;  %v1870_v19 = vld [vmem:[%s10343_s25 + $0x1530] sm:$0xff] }
  0xbd   : > { %1869 = vst [vmem:[%s10348_s26 + $0xa90] sm:$0xff] %v1868_v18  ;;  %v1872_v20 = vld [vmem:[%s10343_s25 + $0x1540] sm:$0xff]  ;;  %v1874_v21 = vld [vmem:[%s10343_s25 + $0x1550] sm:$0xff]  ;;  %1871 = vst [vmem:[%s10348_s26 + $0xa98] sm:$0xff] %v1870_v19 }
  0xbe   : > { %1873 = vst [vmem:[%s10348_s26 + $0xaa0] sm:$0xff] %v1872_v20  ;;  %1875 = vst [vmem:[%s10348_s26 + $0xaa8] sm:$0xff] %v1874_v21  ;;  %v1876_v22 = vld [vmem:[%s10343_s25 + $0x1560] sm:$0xff]  ;;  %v1878_v23 = vld [vmem:[%s10343_s25 + $0x1570] sm:$0xff] }
  0xbf   : > { %v1880_v24 = vld [vmem:[%s10343_s25 + $0x1580] sm:$0xff]  ;;  %1877 = vst [vmem:[%s10348_s26 + $0xab0] sm:$0xff] %v1876_v22  ;;  %1879 = vst [vmem:[%s10348_s26 + $0xab8] sm:$0xff] %v1878_v23  ;;  %v1882_v25 = vld [vmem:[%s10343_s25 + $0x1590] sm:$0xff] }
  0xc0   : > { %1881 = vst [vmem:[%s10348_s26 + $0xac0] sm:$0xff] %v1880_v24  ;;  %v1884_v26 = vld [vmem:[%s10343_s25 + $0x15a0] sm:$0xff]  ;;  %v1886_v27 = vld [vmem:[%s10343_s25 + $0x15b0] sm:$0xff]  ;;  %1883 = vst [vmem:[%s10348_s26 + $0xac8] sm:$0xff] %v1882_v25 }
  0xc1   : > { %1885 = vst [vmem:[%s10348_s26 + $0xad0] sm:$0xff] %v1884_v26  ;;  %1887 = vst [vmem:[%s10348_s26 + $0xad8] sm:$0xff] %v1886_v27  ;;  %v1888_v28 = vld [vmem:[%s10343_s25 + $0x15c0] sm:$0xff]  ;;  %v1890_v29 = vld [vmem:[%s10343_s25 + $0x15d0] sm:$0xff] }
  0xc2   : > { %v1892_v30 = vld [vmem:[%s10343_s25 + $0x15e0] sm:$0xff]  ;;  %1889 = vst [vmem:[%s10348_s26 + $0xae0] sm:$0xff] %v1888_v28  ;;  %1891 = vst [vmem:[%s10348_s26 + $0xae8] sm:$0xff] %v1890_v29  ;;  %v1894_v31 = vld [vmem:[%s10343_s25 + $0x15f0] sm:$0xff] }
  0xc3   : > { %1893 = vst [vmem:[%s10348_s26 + $0xaf0] sm:$0xff] %v1892_v30  ;;  %v1896_v32 = vld [vmem:[%s10343_s25 + $0x1600] sm:$0xff]  ;;  %v1898_v33 = vld [vmem:[%s10343_s25 + $0x1610] sm:$0xff]  ;;  %1895 = vst [vmem:[%s10348_s26 + $0xaf8] sm:$0xff] %v1894_v31 }
  0xc4   : > { %1897 = vst [vmem:[%s10348_s26 + $0xb00] sm:$0xff] %v1896_v32  ;;  %1899 = vst [vmem:[%s10348_s26 + $0xb08] sm:$0xff] %v1898_v33  ;;  %v1900_v34 = vld [vmem:[%s10343_s25 + $0x1620] sm:$0xff]  ;;  %v1902_v35 = vld [vmem:[%s10343_s25 + $0x1630] sm:$0xff] }
  0xc5   : > { %v1904_v36 = vld [vmem:[%s10343_s25 + $0x1640] sm:$0xff]  ;;  %1901 = vst [vmem:[%s10348_s26 + $0xb10] sm:$0xff] %v1900_v34  ;;  %1903 = vst [vmem:[%s10348_s26 + $0xb18] sm:$0xff] %v1902_v35  ;;  %v1906_v37 = vld [vmem:[%s10343_s25 + $0x1650] sm:$0xff] }
  0xc6   : > { %1905 = vst [vmem:[%s10348_s26 + $0xb20] sm:$0xff] %v1904_v36  ;;  %v1908_v38 = vld [vmem:[%s10343_s25 + $0x1660] sm:$0xff]  ;;  %v1910_v39 = vld [vmem:[%s10343_s25 + $0x1670] sm:$0xff]  ;;  %1907 = vst [vmem:[%s10348_s26 + $0xb28] sm:$0xff] %v1906_v37 }
  0xc7   : > { %1909 = vst [vmem:[%s10348_s26 + $0xb30] sm:$0xff] %v1908_v38  ;;  %1911 = vst [vmem:[%s10348_s26 + $0xb38] sm:$0xff] %v1910_v39  ;;  %v1912_v40 = vld [vmem:[%s10343_s25 + $0x1680] sm:$0xff]  ;;  %v1914_v41 = vld [vmem:[%s10343_s25 + $0x1690] sm:$0xff] }
  0xc8   : > { %v1916_v42 = vld [vmem:[%s10343_s25 + $0x16a0] sm:$0xff]  ;;  %1913 = vst [vmem:[%s10348_s26 + $0xb40] sm:$0xff] %v1912_v40  ;;  %1915 = vst [vmem:[%s10348_s26 + $0xb48] sm:$0xff] %v1914_v41  ;;  %v1918_v43 = vld [vmem:[%s10343_s25 + $0x16b0] sm:$0xff] }
  0xc9   : > { %1917 = vst [vmem:[%s10348_s26 + $0xb50] sm:$0xff] %v1916_v42  ;;  %v1920_v44 = vld [vmem:[%s10343_s25 + $0x16c0] sm:$0xff]  ;;  %v1922_v45 = vld [vmem:[%s10343_s25 + $0x16d0] sm:$0xff]  ;;  %1919 = vst [vmem:[%s10348_s26 + $0xb58] sm:$0xff] %v1918_v43 }
  0xca   : > { %1921 = vst [vmem:[%s10348_s26 + $0xb60] sm:$0xff] %v1920_v44  ;;  %1923 = vst [vmem:[%s10348_s26 + $0xb68] sm:$0xff] %v1922_v45  ;;  %v1924_v46 = vld [vmem:[%s10343_s25 + $0x16e0] sm:$0xff]  ;;  %v1926_v47 = vld [vmem:[%s10343_s25 + $0x16f0] sm:$0xff] }
  0xcb   : > { %v1928_v48 = vld [vmem:[%s10343_s25 + $0x1700] sm:$0xff]  ;;  %1925 = vst [vmem:[%s10348_s26 + $0xb70] sm:$0xff] %v1924_v46  ;;  %1927 = vst [vmem:[%s10348_s26 + $0xb78] sm:$0xff] %v1926_v47  ;;  %v1930_v49 = vld [vmem:[%s10343_s25 + $0x1710] sm:$0xff] }
  0xcc   : > { %1929 = vst [vmem:[%s10348_s26 + $0xb80] sm:$0xff] %v1928_v48  ;;  %v1932_v50 = vld [vmem:[%s10343_s25 + $0x1720] sm:$0xff]  ;;  %v1934_v51 = vld [vmem:[%s10343_s25 + $0x1730] sm:$0xff]  ;;  %1931 = vst [vmem:[%s10348_s26 + $0xb88] sm:$0xff] %v1930_v49 }
  0xcd   : > { %1933 = vst [vmem:[%s10348_s26 + $0xb90] sm:$0xff] %v1932_v50  ;;  %1935 = vst [vmem:[%s10348_s26 + $0xb98] sm:$0xff] %v1934_v51  ;;  %v1936_v52 = vld [vmem:[%s10343_s25 + $0x1740] sm:$0xff]  ;;  %v1938_v53 = vld [vmem:[%s10343_s25 + $0x1750] sm:$0xff] }
  0xce   : > { %v1940_v54 = vld [vmem:[%s10343_s25 + $0x1760] sm:$0xff]  ;;  %1937 = vst [vmem:[%s10348_s26 + $0xba0] sm:$0xff] %v1936_v52  ;;  %1939 = vst [vmem:[%s10348_s26 + $0xba8] sm:$0xff] %v1938_v53  ;;  %v1942_v55 = vld [vmem:[%s10343_s25 + $0x1770] sm:$0xff] }
  0xcf   : > { %1941 = vst [vmem:[%s10348_s26 + $0xbb0] sm:$0xff] %v1940_v54  ;;  %v1944_v56 = vld [vmem:[%s10343_s25 + $0x1780] sm:$0xff]  ;;  %v1946_v57 = vld [vmem:[%s10343_s25 + $0x1790] sm:$0xff]  ;;  %1943 = vst [vmem:[%s10348_s26 + $0xbb8] sm:$0xff] %v1942_v55 }
  0xd0   : > { %1945 = vst [vmem:[%s10348_s26 + $0xbc0] sm:$0xff] %v1944_v56  ;;  %1947 = vst [vmem:[%s10348_s26 + $0xbc8] sm:$0xff] %v1946_v57  ;;  %v1948_v58 = vld [vmem:[%s10343_s25 + $0x17a0] sm:$0xff]  ;;  %v1950_v59 = vld [vmem:[%s10343_s25 + $0x17b0] sm:$0xff] }
  0xd1   : > { %v1952_v60 = vld [vmem:[%s10343_s25 + $0x17c0] sm:$0xff]  ;;  %1949 = vst [vmem:[%s10348_s26 + $0xbd0] sm:$0xff] %v1948_v58  ;;  %1951 = vst [vmem:[%s10348_s26 + $0xbd8] sm:$0xff] %v1950_v59  ;;  %v1954_v61 = vld [vmem:[%s10343_s25 + $0x17d0] sm:$0xff] }
  0xd2   : > { %1953 = vst [vmem:[%s10348_s26 + $0xbe0] sm:$0xff] %v1952_v60  ;;  %v1956_v62 = vld [vmem:[%s10343_s25 + $0x17e0] sm:$0xff]  ;;  %v1958_v63 = vld [vmem:[%s10343_s25 + $0x17f0] sm:$0xff]  ;;  %1955 = vst [vmem:[%s10348_s26 + $0xbe8] sm:$0xff] %v1954_v61 }
  0xd3   : > { %1957 = vst [vmem:[%s10348_s26 + $0xbf0] sm:$0xff] %v1956_v62  ;;  %1959 = vst [vmem:[%s10348_s26 + $0xbf8] sm:$0xff] %v1958_v63  ;;  %v1960_v0 = vld [vmem:[%s10343_s25 + $0x1800] sm:$0xff]  ;;  %v1962_v1 = vld [vmem:[%s10343_s25 + $0x1810] sm:$0xff] }
  0xd4   : > { %v1964_v2 = vld [vmem:[%s10343_s25 + $0x1820] sm:$0xff]  ;;  %1961 = vst [vmem:[%s10348_s26 + $0xc00] sm:$0xff] %v1960_v0  ;;  %1963 = vst [vmem:[%s10348_s26 + $0xc08] sm:$0xff] %v1962_v1  ;;  %v1966_v3 = vld [vmem:[%s10343_s25 + $0x1830] sm:$0xff] }
  0xd5   : > { %1965 = vst [vmem:[%s10348_s26 + $0xc10] sm:$0xff] %v1964_v2  ;;  %v1968_v4 = vld [vmem:[%s10343_s25 + $0x1840] sm:$0xff]  ;;  %v1970_v5 = vld [vmem:[%s10343_s25 + $0x1850] sm:$0xff]  ;;  %1967 = vst [vmem:[%s10348_s26 + $0xc18] sm:$0xff] %v1966_v3 }
  0xd6   : > { %1969 = vst [vmem:[%s10348_s26 + $0xc20] sm:$0xff] %v1968_v4  ;;  %1971 = vst [vmem:[%s10348_s26 + $0xc28] sm:$0xff] %v1970_v5  ;;  %v1972_v6 = vld [vmem:[%s10343_s25 + $0x1860] sm:$0xff]  ;;  %v1974_v7 = vld [vmem:[%s10343_s25 + $0x1870] sm:$0xff] }
  0xd7   : > { %v1976_v8 = vld [vmem:[%s10343_s25 + $0x1880] sm:$0xff]  ;;  %1973 = vst [vmem:[%s10348_s26 + $0xc30] sm:$0xff] %v1972_v6  ;;  %1975 = vst [vmem:[%s10348_s26 + $0xc38] sm:$0xff] %v1974_v7  ;;  %v1978_v9 = vld [vmem:[%s10343_s25 + $0x1890] sm:$0xff] }
  0xd8   : > { %1977 = vst [vmem:[%s10348_s26 + $0xc40] sm:$0xff] %v1976_v8  ;;  %v1980_v10 = vld [vmem:[%s10343_s25 + $0x18a0] sm:$0xff]  ;;  %v1982_v11 = vld [vmem:[%s10343_s25 + $0x18b0] sm:$0xff]  ;;  %1979 = vst [vmem:[%s10348_s26 + $0xc48] sm:$0xff] %v1978_v9 }
  0xd9   : > { %1981 = vst [vmem:[%s10348_s26 + $0xc50] sm:$0xff] %v1980_v10  ;;  %1983 = vst [vmem:[%s10348_s26 + $0xc58] sm:$0xff] %v1982_v11  ;;  %v1984_v12 = vld [vmem:[%s10343_s25 + $0x18c0] sm:$0xff]  ;;  %v1986_v13 = vld [vmem:[%s10343_s25 + $0x18d0] sm:$0xff] }
  0xda   : > { %v1988_v14 = vld [vmem:[%s10343_s25 + $0x18e0] sm:$0xff]  ;;  %1985 = vst [vmem:[%s10348_s26 + $0xc60] sm:$0xff] %v1984_v12  ;;  %1987 = vst [vmem:[%s10348_s26 + $0xc68] sm:$0xff] %v1986_v13  ;;  %v1990_v15 = vld [vmem:[%s10343_s25 + $0x18f0] sm:$0xff] }
  0xdb   : > { %1989 = vst [vmem:[%s10348_s26 + $0xc70] sm:$0xff] %v1988_v14  ;;  %v1992_v16 = vld [vmem:[%s10343_s25 + $0x1900] sm:$0xff]  ;;  %v1994_v17 = vld [vmem:[%s10343_s25 + $0x1910] sm:$0xff]  ;;  %1991 = vst [vmem:[%s10348_s26 + $0xc78] sm:$0xff] %v1990_v15 }
  0xdc   : > { %1993 = vst [vmem:[%s10348_s26 + $0xc80] sm:$0xff] %v1992_v16  ;;  %1995 = vst [vmem:[%s10348_s26 + $0xc88] sm:$0xff] %v1994_v17  ;;  %v1996_v18 = vld [vmem:[%s10343_s25 + $0x1920] sm:$0xff]  ;;  %v1998_v19 = vld [vmem:[%s10343_s25 + $0x1930] sm:$0xff] }
  0xdd   : > { %v2000_v20 = vld [vmem:[%s10343_s25 + $0x1940] sm:$0xff]  ;;  %1997 = vst [vmem:[%s10348_s26 + $0xc90] sm:$0xff] %v1996_v18  ;;  %1999 = vst [vmem:[%s10348_s26 + $0xc98] sm:$0xff] %v1998_v19  ;;  %v2002_v21 = vld [vmem:[%s10343_s25 + $0x1950] sm:$0xff] }
  0xde   : > { %2001 = vst [vmem:[%s10348_s26 + $0xca0] sm:$0xff] %v2000_v20  ;;  %v2004_v22 = vld [vmem:[%s10343_s25 + $0x1960] sm:$0xff]  ;;  %v2006_v23 = vld [vmem:[%s10343_s25 + $0x1970] sm:$0xff]  ;;  %2003 = vst [vmem:[%s10348_s26 + $0xca8] sm:$0xff] %v2002_v21 }
  0xdf   : > { %2005 = vst [vmem:[%s10348_s26 + $0xcb0] sm:$0xff] %v2004_v22  ;;  %2007 = vst [vmem:[%s10348_s26 + $0xcb8] sm:$0xff] %v2006_v23  ;;  %v2008_v24 = vld [vmem:[%s10343_s25 + $0x1980] sm:$0xff]  ;;  %v2010_v25 = vld [vmem:[%s10343_s25 + $0x1990] sm:$0xff] }
  0xe0   : > { %v2012_v26 = vld [vmem:[%s10343_s25 + $0x19a0] sm:$0xff]  ;;  %2009 = vst [vmem:[%s10348_s26 + $0xcc0] sm:$0xff] %v2008_v24  ;;  %2011 = vst [vmem:[%s10348_s26 + $0xcc8] sm:$0xff] %v2010_v25  ;;  %v2014_v27 = vld [vmem:[%s10343_s25 + $0x19b0] sm:$0xff] }
  0xe1   : > { %2013 = vst [vmem:[%s10348_s26 + $0xcd0] sm:$0xff] %v2012_v26  ;;  %v2016_v28 = vld [vmem:[%s10343_s25 + $0x19c0] sm:$0xff]  ;;  %v2018_v29 = vld [vmem:[%s10343_s25 + $0x19d0] sm:$0xff]  ;;  %2015 = vst [vmem:[%s10348_s26 + $0xcd8] sm:$0xff] %v2014_v27 }
  0xe2   : > { %2017 = vst [vmem:[%s10348_s26 + $0xce0] sm:$0xff] %v2016_v28  ;;  %2019 = vst [vmem:[%s10348_s26 + $0xce8] sm:$0xff] %v2018_v29  ;;  %v2020_v30 = vld [vmem:[%s10343_s25 + $0x19e0] sm:$0xff]  ;;  %v2022_v31 = vld [vmem:[%s10343_s25 + $0x19f0] sm:$0xff] }
  0xe3   : > { %v2024_v32 = vld [vmem:[%s10343_s25 + $0x1a00] sm:$0xff]  ;;  %2021 = vst [vmem:[%s10348_s26 + $0xcf0] sm:$0xff] %v2020_v30  ;;  %2023 = vst [vmem:[%s10348_s26 + $0xcf8] sm:$0xff] %v2022_v31  ;;  %v2026_v33 = vld [vmem:[%s10343_s25 + $0x1a10] sm:$0xff] }
  0xe4   : > { %2025 = vst [vmem:[%s10348_s26 + $0xd00] sm:$0xff] %v2024_v32  ;;  %v2028_v34 = vld [vmem:[%s10343_s25 + $0x1a20] sm:$0xff]  ;;  %v2030_v35 = vld [vmem:[%s10343_s25 + $0x1a30] sm:$0xff]  ;;  %2027 = vst [vmem:[%s10348_s26 + $0xd08] sm:$0xff] %v2026_v33 }
  0xe5   : > { %2029 = vst [vmem:[%s10348_s26 + $0xd10] sm:$0xff] %v2028_v34  ;;  %2031 = vst [vmem:[%s10348_s26 + $0xd18] sm:$0xff] %v2030_v35  ;;  %v2032_v36 = vld [vmem:[%s10343_s25 + $0x1a40] sm:$0xff]  ;;  %v2034_v37 = vld [vmem:[%s10343_s25 + $0x1a50] sm:$0xff] }
  0xe6   : > { %v2036_v38 = vld [vmem:[%s10343_s25 + $0x1a60] sm:$0xff]  ;;  %2033 = vst [vmem:[%s10348_s26 + $0xd20] sm:$0xff] %v2032_v36  ;;  %2035 = vst [vmem:[%s10348_s26 + $0xd28] sm:$0xff] %v2034_v37  ;;  %v2038_v39 = vld [vmem:[%s10343_s25 + $0x1a70] sm:$0xff] }
  0xe7   : > { %2037 = vst [vmem:[%s10348_s26 + $0xd30] sm:$0xff] %v2036_v38  ;;  %v2040_v40 = vld [vmem:[%s10343_s25 + $0x1a80] sm:$0xff]  ;;  %v2042_v41 = vld [vmem:[%s10343_s25 + $0x1a90] sm:$0xff]  ;;  %2039 = vst [vmem:[%s10348_s26 + $0xd38] sm:$0xff] %v2038_v39 }
  0xe8   : > { %2041 = vst [vmem:[%s10348_s26 + $0xd40] sm:$0xff] %v2040_v40  ;;  %2043 = vst [vmem:[%s10348_s26 + $0xd48] sm:$0xff] %v2042_v41  ;;  %v2044_v42 = vld [vmem:[%s10343_s25 + $0x1aa0] sm:$0xff]  ;;  %v2046_v43 = vld [vmem:[%s10343_s25 + $0x1ab0] sm:$0xff] }
  0xe9   : > { %v2048_v44 = vld [vmem:[%s10343_s25 + $0x1ac0] sm:$0xff]  ;;  %2045 = vst [vmem:[%s10348_s26 + $0xd50] sm:$0xff] %v2044_v42  ;;  %2047 = vst [vmem:[%s10348_s26 + $0xd58] sm:$0xff] %v2046_v43  ;;  %v2050_v45 = vld [vmem:[%s10343_s25 + $0x1ad0] sm:$0xff] }
  0xea   : > { %2049 = vst [vmem:[%s10348_s26 + $0xd60] sm:$0xff] %v2048_v44  ;;  %v2052_v46 = vld [vmem:[%s10343_s25 + $0x1ae0] sm:$0xff]  ;;  %v2054_v47 = vld [vmem:[%s10343_s25 + $0x1af0] sm:$0xff]  ;;  %2051 = vst [vmem:[%s10348_s26 + $0xd68] sm:$0xff] %v2050_v45 }
  0xeb   : > { %2053 = vst [vmem:[%s10348_s26 + $0xd70] sm:$0xff] %v2052_v46  ;;  %2055 = vst [vmem:[%s10348_s26 + $0xd78] sm:$0xff] %v2054_v47  ;;  %v2056_v48 = vld [vmem:[%s10343_s25 + $0x1b00] sm:$0xff]  ;;  %v2058_v49 = vld [vmem:[%s10343_s25 + $0x1b10] sm:$0xff] }
  0xec   : > { %v2060_v50 = vld [vmem:[%s10343_s25 + $0x1b20] sm:$0xff]  ;;  %2057 = vst [vmem:[%s10348_s26 + $0xd80] sm:$0xff] %v2056_v48  ;;  %2059 = vst [vmem:[%s10348_s26 + $0xd88] sm:$0xff] %v2058_v49  ;;  %v2062_v51 = vld [vmem:[%s10343_s25 + $0x1b30] sm:$0xff] }
  0xed   : > { %2061 = vst [vmem:[%s10348_s26 + $0xd90] sm:$0xff] %v2060_v50  ;;  %v2064_v52 = vld [vmem:[%s10343_s25 + $0x1b40] sm:$0xff]  ;;  %v2066_v53 = vld [vmem:[%s10343_s25 + $0x1b50] sm:$0xff]  ;;  %2063 = vst [vmem:[%s10348_s26 + $0xd98] sm:$0xff] %v2062_v51 }
  0xee   : > { %2065 = vst [vmem:[%s10348_s26 + $0xda0] sm:$0xff] %v2064_v52  ;;  %2067 = vst [vmem:[%s10348_s26 + $0xda8] sm:$0xff] %v2066_v53  ;;  %v2068_v54 = vld [vmem:[%s10343_s25 + $0x1b60] sm:$0xff]  ;;  %v2070_v55 = vld [vmem:[%s10343_s25 + $0x1b70] sm:$0xff] }
  0xef   : > { %v2072_v56 = vld [vmem:[%s10343_s25 + $0x1b80] sm:$0xff]  ;;  %2069 = vst [vmem:[%s10348_s26 + $0xdb0] sm:$0xff] %v2068_v54  ;;  %2071 = vst [vmem:[%s10348_s26 + $0xdb8] sm:$0xff] %v2070_v55  ;;  %v2074_v57 = vld [vmem:[%s10343_s25 + $0x1b90] sm:$0xff] }
  0xf0   : > { %2073 = vst [vmem:[%s10348_s26 + $0xdc0] sm:$0xff] %v2072_v56  ;;  %v2076_v58 = vld [vmem:[%s10343_s25 + $0x1ba0] sm:$0xff]  ;;  %v2078_v59 = vld [vmem:[%s10343_s25 + $0x1bb0] sm:$0xff]  ;;  %2075 = vst [vmem:[%s10348_s26 + $0xdc8] sm:$0xff] %v2074_v57 }
  0xf1   : > { %2077 = vst [vmem:[%s10348_s26 + $0xdd0] sm:$0xff] %v2076_v58  ;;  %2079 = vst [vmem:[%s10348_s26 + $0xdd8] sm:$0xff] %v2078_v59  ;;  %v2080_v60 = vld [vmem:[%s10343_s25 + $0x1bc0] sm:$0xff]  ;;  %v2082_v61 = vld [vmem:[%s10343_s25 + $0x1bd0] sm:$0xff] }
  0xf2   : > { %v2084_v62 = vld [vmem:[%s10343_s25 + $0x1be0] sm:$0xff]  ;;  %2081 = vst [vmem:[%s10348_s26 + $0xde0] sm:$0xff] %v2080_v60  ;;  %2083 = vst [vmem:[%s10348_s26 + $0xde8] sm:$0xff] %v2082_v61  ;;  %v2086_v63 = vld [vmem:[%s10343_s25 + $0x1bf0] sm:$0xff] }
  0xf3   : > { %2085 = vst [vmem:[%s10348_s26 + $0xdf0] sm:$0xff] %v2084_v62  ;;  %v2088_v0 = vld [vmem:[%s10343_s25 + $0x1c00] sm:$0xff]  ;;  %v2090_v1 = vld [vmem:[%s10343_s25 + $0x1c10] sm:$0xff]  ;;  %2087 = vst [vmem:[%s10348_s26 + $0xdf8] sm:$0xff] %v2086_v63 }
  0xf4   : > { %2089 = vst [vmem:[%s10348_s26 + $0xe00] sm:$0xff] %v2088_v0  ;;  %2091 = vst [vmem:[%s10348_s26 + $0xe08] sm:$0xff] %v2090_v1  ;;  %v2092_v2 = vld [vmem:[%s10343_s25 + $0x1c20] sm:$0xff]  ;;  %v2094_v3 = vld [vmem:[%s10343_s25 + $0x1c30] sm:$0xff] }
  0xf5   : > { %v2096_v4 = vld [vmem:[%s10343_s25 + $0x1c40] sm:$0xff]  ;;  %2093 = vst [vmem:[%s10348_s26 + $0xe10] sm:$0xff] %v2092_v2  ;;  %2095 = vst [vmem:[%s10348_s26 + $0xe18] sm:$0xff] %v2094_v3  ;;  %v2098_v5 = vld [vmem:[%s10343_s25 + $0x1c50] sm:$0xff] }
  0xf6   : > { %2097 = vst [vmem:[%s10348_s26 + $0xe20] sm:$0xff] %v2096_v4  ;;  %v2100_v6 = vld [vmem:[%s10343_s25 + $0x1c60] sm:$0xff]  ;;  %v2102_v7 = vld [vmem:[%s10343_s25 + $0x1c70] sm:$0xff]  ;;  %2099 = vst [vmem:[%s10348_s26 + $0xe28] sm:$0xff] %v2098_v5 }
  0xf7   : > { %2101 = vst [vmem:[%s10348_s26 + $0xe30] sm:$0xff] %v2100_v6  ;;  %2103 = vst [vmem:[%s10348_s26 + $0xe38] sm:$0xff] %v2102_v7  ;;  %v2104_v8 = vld [vmem:[%s10343_s25 + $0x1c80] sm:$0xff]  ;;  %v2106_v9 = vld [vmem:[%s10343_s25 + $0x1c90] sm:$0xff] }
  0xf8   : > { %v2108_v10 = vld [vmem:[%s10343_s25 + $0x1ca0] sm:$0xff]  ;;  %2105 = vst [vmem:[%s10348_s26 + $0xe40] sm:$0xff] %v2104_v8  ;;  %2107 = vst [vmem:[%s10348_s26 + $0xe48] sm:$0xff] %v2106_v9  ;;  %v2110_v11 = vld [vmem:[%s10343_s25 + $0x1cb0] sm:$0xff] }
  0xf9   : > { %2109 = vst [vmem:[%s10348_s26 + $0xe50] sm:$0xff] %v2108_v10  ;;  %v2112_v12 = vld [vmem:[%s10343_s25 + $0x1cc0] sm:$0xff]  ;;  %v2114_v13 = vld [vmem:[%s10343_s25 + $0x1cd0] sm:$0xff]  ;;  %2111 = vst [vmem:[%s10348_s26 + $0xe58] sm:$0xff] %v2110_v11 }
  0xfa   : > { %2113 = vst [vmem:[%s10348_s26 + $0xe60] sm:$0xff] %v2112_v12  ;;  %2115 = vst [vmem:[%s10348_s26 + $0xe68] sm:$0xff] %v2114_v13  ;;  %v2116_v14 = vld [vmem:[%s10343_s25 + $0x1ce0] sm:$0xff]  ;;  %v2118_v15 = vld [vmem:[%s10343_s25 + $0x1cf0] sm:$0xff] }
  0xfb   : > { %v2120_v16 = vld [vmem:[%s10343_s25 + $0x1d00] sm:$0xff]  ;;  %2117 = vst [vmem:[%s10348_s26 + $0xe70] sm:$0xff] %v2116_v14  ;;  %2119 = vst [vmem:[%s10348_s26 + $0xe78] sm:$0xff] %v2118_v15  ;;  %v2122_v17 = vld [vmem:[%s10343_s25 + $0x1d10] sm:$0xff] }
  0xfc   : > { %2121 = vst [vmem:[%s10348_s26 + $0xe80] sm:$0xff] %v2120_v16  ;;  %v2124_v18 = vld [vmem:[%s10343_s25 + $0x1d20] sm:$0xff]  ;;  %v2126_v19 = vld [vmem:[%s10343_s25 + $0x1d30] sm:$0xff]  ;;  %2123 = vst [vmem:[%s10348_s26 + $0xe88] sm:$0xff] %v2122_v17 }
  0xfd   : > { %2125 = vst [vmem:[%s10348_s26 + $0xe90] sm:$0xff] %v2124_v18  ;;  %2127 = vst [vmem:[%s10348_s26 + $0xe98] sm:$0xff] %v2126_v19  ;;  %v2128_v20 = vld [vmem:[%s10343_s25 + $0x1d40] sm:$0xff]  ;;  %v2130_v21 = vld [vmem:[%s10343_s25 + $0x1d50] sm:$0xff] }
  0xfe   : > { %v2132_v22 = vld [vmem:[%s10343_s25 + $0x1d60] sm:$0xff]  ;;  %2129 = vst [vmem:[%s10348_s26 + $0xea0] sm:$0xff] %v2128_v20  ;;  %2131 = vst [vmem:[%s10348_s26 + $0xea8] sm:$0xff] %v2130_v21  ;;  %v2134_v23 = vld [vmem:[%s10343_s25 + $0x1d70] sm:$0xff] }
  0xff   : > { %2133 = vst [vmem:[%s10348_s26 + $0xeb0] sm:$0xff] %v2132_v22  ;;  %v2136_v24 = vld [vmem:[%s10343_s25 + $0x1d80] sm:$0xff]  ;;  %v2138_v25 = vld [vmem:[%s10343_s25 + $0x1d90] sm:$0xff]  ;;  %2135 = vst [vmem:[%s10348_s26 + $0xeb8] sm:$0xff] %v2134_v23 }
 0x100   : > { %2137 = vst [vmem:[%s10348_s26 + $0xec0] sm:$0xff] %v2136_v24  ;;  %2139 = vst [vmem:[%s10348_s26 + $0xec8] sm:$0xff] %v2138_v25  ;;  %v2140_v26 = vld [vmem:[%s10343_s25 + $0x1da0] sm:$0xff]  ;;  %v2142_v27 = vld [vmem:[%s10343_s25 + $0x1db0] sm:$0xff] }
 0x101   : > { %v2144_v28 = vld [vmem:[%s10343_s25 + $0x1dc0] sm:$0xff]  ;;  %2141 = vst [vmem:[%s10348_s26 + $0xed0] sm:$0xff] %v2140_v26  ;;  %2143 = vst [vmem:[%s10348_s26 + $0xed8] sm:$0xff] %v2142_v27  ;;  %v2146_v29 = vld [vmem:[%s10343_s25 + $0x1dd0] sm:$0xff] }
 0x102   : > { %2145 = vst [vmem:[%s10348_s26 + $0xee0] sm:$0xff] %v2144_v28  ;;  %v2148_v30 = vld [vmem:[%s10343_s25 + $0x1de0] sm:$0xff]  ;;  %v2150_v31 = vld [vmem:[%s10343_s25 + $0x1df0] sm:$0xff]  ;;  %2147 = vst [vmem:[%s10348_s26 + $0xee8] sm:$0xff] %v2146_v29 }
 0x103   : > { %2149 = vst [vmem:[%s10348_s26 + $0xef0] sm:$0xff] %v2148_v30  ;;  %2151 = vst [vmem:[%s10348_s26 + $0xef8] sm:$0xff] %v2150_v31  ;;  %v2152_v32 = vld [vmem:[%s10343_s25 + $0x1e00] sm:$0xff]  ;;  %v2154_v33 = vld [vmem:[%s10343_s25 + $0x1e10] sm:$0xff] }
 0x104   : > { %v2156_v34 = vld [vmem:[%s10343_s25 + $0x1e20] sm:$0xff]  ;;  %2153 = vst [vmem:[%s10348_s26 + $0xf00] sm:$0xff] %v2152_v32  ;;  %2155 = vst [vmem:[%s10348_s26 + $0xf08] sm:$0xff] %v2154_v33  ;;  %v2158_v35 = vld [vmem:[%s10343_s25 + $0x1e30] sm:$0xff] }
 0x105   : > { %2157 = vst [vmem:[%s10348_s26 + $0xf10] sm:$0xff] %v2156_v34  ;;  %v2160_v36 = vld [vmem:[%s10343_s25 + $0x1e40] sm:$0xff]  ;;  %v2162_v37 = vld [vmem:[%s10343_s25 + $0x1e50] sm:$0xff]  ;;  %2159 = vst [vmem:[%s10348_s26 + $0xf18] sm:$0xff] %v2158_v35 }
 0x106   : > { %2161 = vst [vmem:[%s10348_s26 + $0xf20] sm:$0xff] %v2160_v36  ;;  %2163 = vst [vmem:[%s10348_s26 + $0xf28] sm:$0xff] %v2162_v37  ;;  %v2164_v38 = vld [vmem:[%s10343_s25 + $0x1e60] sm:$0xff]  ;;  %v2166_v39 = vld [vmem:[%s10343_s25 + $0x1e70] sm:$0xff] }
 0x107   : > { %v2168_v40 = vld [vmem:[%s10343_s25 + $0x1e80] sm:$0xff]  ;;  %2165 = vst [vmem:[%s10348_s26 + $0xf30] sm:$0xff] %v2164_v38  ;;  %2167 = vst [vmem:[%s10348_s26 + $0xf38] sm:$0xff] %v2166_v39  ;;  %v2170_v41 = vld [vmem:[%s10343_s25 + $0x1e90] sm:$0xff] }
 0x108   : > { %2169 = vst [vmem:[%s10348_s26 + $0xf40] sm:$0xff] %v2168_v40  ;;  %v2172_v42 = vld [vmem:[%s10343_s25 + $0x1ea0] sm:$0xff]  ;;  %v2174_v43 = vld [vmem:[%s10343_s25 + $0x1eb0] sm:$0xff]  ;;  %2171 = vst [vmem:[%s10348_s26 + $0xf48] sm:$0xff] %v2170_v41 }
 0x109   : > { %2173 = vst [vmem:[%s10348_s26 + $0xf50] sm:$0xff] %v2172_v42  ;;  %2175 = vst [vmem:[%s10348_s26 + $0xf58] sm:$0xff] %v2174_v43  ;;  %v2176_v44 = vld [vmem:[%s10343_s25 + $0x1ec0] sm:$0xff]  ;;  %v2178_v45 = vld [vmem:[%s10343_s25 + $0x1ed0] sm:$0xff] }
 0x10a   : > { %v2180_v46 = vld [vmem:[%s10343_s25 + $0x1ee0] sm:$0xff]  ;;  %2177 = vst [vmem:[%s10348_s26 + $0xf60] sm:$0xff] %v2176_v44  ;;  %2179 = vst [vmem:[%s10348_s26 + $0xf68] sm:$0xff] %v2178_v45  ;;  %v2182_v47 = vld [vmem:[%s10343_s25 + $0x1ef0] sm:$0xff] }
 0x10b   : > { %2181 = vst [vmem:[%s10348_s26 + $0xf70] sm:$0xff] %v2180_v46  ;;  %v2184_v48 = vld [vmem:[%s10343_s25 + $0x1f00] sm:$0xff]  ;;  %v2186_v49 = vld [vmem:[%s10343_s25 + $0x1f10] sm:$0xff]  ;;  %2183 = vst [vmem:[%s10348_s26 + $0xf78] sm:$0xff] %v2182_v47 }
 0x10c   : > { %2185 = vst [vmem:[%s10348_s26 + $0xf80] sm:$0xff] %v2184_v48  ;;  %2187 = vst [vmem:[%s10348_s26 + $0xf88] sm:$0xff] %v2186_v49  ;;  %v2188_v50 = vld [vmem:[%s10343_s25 + $0x1f20] sm:$0xff]  ;;  %v2190_v51 = vld [vmem:[%s10343_s25 + $0x1f30] sm:$0xff] }
 0x10d   : > { %v2192_v52 = vld [vmem:[%s10343_s25 + $0x1f40] sm:$0xff]  ;;  %2189 = vst [vmem:[%s10348_s26 + $0xf90] sm:$0xff] %v2188_v50  ;;  %2191 = vst [vmem:[%s10348_s26 + $0xf98] sm:$0xff] %v2190_v51  ;;  %v2194_v53 = vld [vmem:[%s10343_s25 + $0x1f50] sm:$0xff] }
 0x10e   : > { %2193 = vst [vmem:[%s10348_s26 + $0xfa0] sm:$0xff] %v2192_v52  ;;  %v2196_v54 = vld [vmem:[%s10343_s25 + $0x1f60] sm:$0xff]  ;;  %v2198_v55 = vld [vmem:[%s10343_s25 + $0x1f70] sm:$0xff]  ;;  %2195 = vst [vmem:[%s10348_s26 + $0xfa8] sm:$0xff] %v2194_v53 }
 0x10f   : > { %2197 = vst [vmem:[%s10348_s26 + $0xfb0] sm:$0xff] %v2196_v54  ;;  %2199 = vst [vmem:[%s10348_s26 + $0xfb8] sm:$0xff] %v2198_v55  ;;  %v2200_v56 = vld [vmem:[%s10343_s25 + $0x1f80] sm:$0xff]  ;;  %v2202_v57 = vld [vmem:[%s10343_s25 + $0x1f90] sm:$0xff] }
 0x110   : > { %v2204_v58 = vld [vmem:[%s10343_s25 + $0x1fa0] sm:$0xff]  ;;  %2201 = vst [vmem:[%s10348_s26 + $0xfc0] sm:$0xff] %v2200_v56  ;;  %2203 = vst [vmem:[%s10348_s26 + $0xfc8] sm:$0xff] %v2202_v57  ;;  %v2206_v59 = vld [vmem:[%s10343_s25 + $0x1fb0] sm:$0xff] }
 0x111   : > { %2205 = vst [vmem:[%s10348_s26 + $0xfd0] sm:$0xff] %v2204_v58  ;;  %v2208_v60 = vld [vmem:[%s10343_s25 + $0x1fc0] sm:$0xff]  ;;  %v2210_v61 = vld [vmem:[%s10343_s25 + $0x1fd0] sm:$0xff]  ;;  %2207 = vst [vmem:[%s10348_s26 + $0xfd8] sm:$0xff] %v2206_v59 }
 0x112   : > { %2209 = vst [vmem:[%s10348_s26 + $0xfe0] sm:$0xff] %v2208_v60  ;;  %2211 = vst [vmem:[%s10348_s26 + $0xfe8] sm:$0xff] %v2210_v61  ;;  %v2212_v62 = vld [vmem:[%s10343_s25 + $0x1fe0] sm:$0xff]  ;;  %v2214_v63 = vld [vmem:[%s10343_s25 + $0x1ff0] sm:$0xff] }
 0x113   : > { %2213 = vst [vmem:[%s10348_s26 + $0xff0] sm:$0xff] %v2212_v62  ;;  %2215 = vst [vmem:[%s10348_s26 + $0xff8] sm:$0xff] %v2214_v63 }
 0x114 PF: > { %p8838_p8 = scmp.ge.s32.totalorder %s10278_s13, 1  ;;  %p4305_p9 = scmp.lt.s32.totalorder %s10278_s13, 3 }
 0x116   : > { %p4306_p10 = pnand %p8838_p8, %p4305_p9 }
 0x118   : > { %4309 = sbr.rel (%p4306_p10) target bundleno = 1024 (0x400), region = 76 }
 0x11d   : > { %s4312_s27 = sand.u32 1, %s10262_s9   ;;  %v11377_v0 = vld [vmem:[%s12498_s0] sm:$0xff]  ;;  %v11387_v2 = vld [vmem:[%s12498_s0 + $0x8] sm:$0xff] }
 0x11e   : > { %v11382_v1 = vld [vmem:[%s12498_s0 + $0x80] sm:$0xff]  ;;  %s8839_s6 = sshll.u32 %s4312_s27, 12  ;;  %v11398_v5 = vld [vmem:[%s12498_s0 + $0x88] sm:$0xff] }
 0x11f   : > { %v8841_v3 = vcombine.low %v11377_v0, %v11382_v1  ;;  %v8842_v4 = vcombine.high %v11377_v0, %v11382_v1  ;;  %v8843_v6 = vcombine.low %v11387_v2, %v11398_v5  ;;  %v8844_v7 = vcombine.high %v11387_v2, %v11398_v5  ;;  %s11404_s15 = scalar_lea.vmem [#allocation2], %s8839_s6 }
 0x120   : > { %v9472_v8 = vld [vmem:[%s11404_s15 + $0x74] ss:$8 sps:$4 sm:$0xff]   ;;  %v9476_v10 = vld [vmem:[%s11404_s15 + $0x70] ss:$8 sps:$4 sm:$0xff]   ;;  %v9478_v12 = vld [vmem:[%s11404_s15 + $0x64] ss:$8 sps:$4 sm:$0xff]  }
 0x121   : > { %7836 = vmatprep.mubr.bf16.mxu0 %v8842_v4  ;;  %v9474_v9 = vld [vmem:[%s11404_s15 + $0x174] ss:$8 sps:$4 sm:$0xff]   ;;  %7889 = vmatprep.mubr.bf16.mxu1 %v8844_v7  ;;  %v9477_v11 = vld [vmem:[%s11404_s15 + $0x170] ss:$8 sps:$4 sm:$0xff]   ;;  %v9480_v13 = vld [vmem:[%s11404_s15 + $0x164] ss:$8 sps:$4 sm:$0xff]  }
 0x122   : > { %7804 = vmatprep.subr.bf16.mxu0 %v9472_v8  ;;  %7857 = vmatprep.subr.bf16.mxu1 %v9474_v9  ;;  %v9482_v14 = vld [vmem:[%s11404_s15 + $0x60] ss:$8 sps:$4 sm:$0xff]   ;;  %v9484_v16 = vld [vmem:[%s11404_s15 + $0x54] ss:$8 sps:$4 sm:$0xff]   ;;  %v9488_v18 = vld [vmem:[%s11404_s15 + $0x50] ss:$8 sps:$4 sm:$0xff]  }
 0x123   : > { %7805 = vmatpush1.bf16.msra.mxu0 %v9476_v10  ;;  %7858 = vmatpush1.bf16.msra.mxu1 %v9477_v11  ;;  %v9483_v15 = vld [vmem:[%s11404_s15 + $0x160] ss:$8 sps:$4 sm:$0xff]   ;;  %v9486_v17 = vld [vmem:[%s11404_s15 + $0x154] ss:$8 sps:$4 sm:$0xff]   ;;  %v9489_v19 = vld [vmem:[%s11404_s15 + $0x150] ss:$8 sps:$4 sm:$0xff]  }
 0x124   : > { %7806 = vmatprep.subr.bf16.mxu0 %v9478_v12  ;;  %7859 = vmatprep.subr.bf16.mxu1 %v9480_v13  ;;  %v9490_v20 = vld [vmem:[%s11404_s15 + $0x44] ss:$8 sps:$4 sm:$0xff]   ;;  %v9494_v22 = vld [vmem:[%s11404_s15 + $0x40] ss:$8 sps:$4 sm:$0xff]   ;;  %v9496_v24 = vld [vmem:[%s11404_s15 + $0x34] ss:$8 sps:$4 sm:$0xff]  }
 0x125   : > { %v9492_v21 = vld [vmem:[%s11404_s15 + $0x144] ss:$8 sps:$4 sm:$0xff]   ;;  %v9495_v23 = vld [vmem:[%s11404_s15 + $0x140] ss:$8 sps:$4 sm:$0xff]   ;;  %v9498_v25 = vld [vmem:[%s11404_s15 + $0x134] ss:$8 sps:$4 sm:$0xff]  }
 0x126   : > { %v9500_v26 = vld [vmem:[%s11404_s15 + $0x30] ss:$8 sps:$4 sm:$0xff]   ;;  %v9502_v28 = vld [vmem:[%s11404_s15 + $0x24] ss:$8 sps:$4 sm:$0xff]   ;;  %v9506_v30 = vld [vmem:[%s11404_s15 + $0x20] ss:$8 sps:$4 sm:$0xff]  }
 0x127   : > { %7807 = vmatpush1.bf16.msra.mxu0 %v9482_v14  ;;  %7860 = vmatpush1.bf16.msra.mxu1 %v9483_v15  ;;  %v9501_v27 = vld [vmem:[%s11404_s15 + $0x130] ss:$8 sps:$4 sm:$0xff]   ;;  %v9504_v29 = vld [vmem:[%s11404_s15 + $0x124] ss:$8 sps:$4 sm:$0xff]   ;;  %v9507_v31 = vld [vmem:[%s11404_s15 + $0x120] ss:$8 sps:$4 sm:$0xff]  }
 0x128   : > { %7808 = vmatprep.subr.bf16.mxu0 %v9484_v16  ;;  %7861 = vmatprep.subr.bf16.mxu1 %v9486_v17  ;;  %v9508_v32 = vld [vmem:[%s11404_s15 + $0x14] ss:$8 sps:$4 sm:$0xff]   ;;  %v9512_v34 = vld [vmem:[%s11404_s15 + $0x10] ss:$8 sps:$4 sm:$0xff]   ;;  %v9514_v36 = vld [vmem:[%s11404_s15 + $0x4] ss:$8 sps:$4 sm:$0xff]  }
 0x129   : > { %v9510_v33 = vld [vmem:[%s11404_s15 + $0x114] ss:$8 sps:$4 sm:$0xff]   ;;  %v9513_v35 = vld [vmem:[%s11404_s15 + $0x110] ss:$8 sps:$4 sm:$0xff]   ;;  %v9516_v37 = vld [vmem:[%s11404_s15 + $0x104] ss:$8 sps:$4 sm:$0xff]  }
 0x12a   : > { %v9518_v38 = vld [vmem:[%s11404_s15] ss:$8 sps:$4 sm:$0xff]   ;;  %v9520_v40 = vld [vmem:[%s11404_s15 + $0xf4] ss:$8 sps:$4 sm:$0xff]   ;;  %v9524_v42 = vld [vmem:[%s11404_s15 + $0xf0] ss:$8 sps:$4 sm:$0xff]  }
 0x12b   : > { %7809 = vmatpush1.bf16.msra.mxu0 %v9488_v18  ;;  %7862 = vmatpush1.bf16.msra.mxu1 %v9489_v19  ;;  %v9519_v39 = vld [vmem:[%s11404_s15 + $0x100] ss:$8 sps:$4 sm:$0xff]   ;;  %v9522_v41 = vld [vmem:[%s11404_s15 + $0x1f4] ss:$8 sps:$4 sm:$0xff]   ;;  %v9525_v43 = vld [vmem:[%s11404_s15 + $0x1f0] ss:$8 sps:$4 sm:$0xff]  }
 0x12c   : > { %7810 = vmatprep.subr.bf16.mxu0 %v9490_v20  ;;  %7863 = vmatprep.subr.bf16.mxu1 %v9492_v21  ;;  %v9526_v44 = vld [vmem:[%s11404_s15 + $0xe4] ss:$8 sps:$4 sm:$0xff]   ;;  %v9530_v46 = vld [vmem:[%s11404_s15 + $0xe0] ss:$8 sps:$4 sm:$0xff]   ;;  %v9532_v48 = vld [vmem:[%s11404_s15 + $0xd4] ss:$8 sps:$4 sm:$0xff]  }
 0x12d   : > { %v9528_v45 = vld [vmem:[%s11404_s15 + $0x1e4] ss:$8 sps:$4 sm:$0xff]   ;;  %v9531_v47 = vld [vmem:[%s11404_s15 + $0x1e0] ss:$8 sps:$4 sm:$0xff]   ;;  %v9534_v49 = vld [vmem:[%s11404_s15 + $0x1d4] ss:$8 sps:$4 sm:$0xff]  }
 0x12e   : > { %v9536_v50 = vld [vmem:[%s11404_s15 + $0xd0] ss:$8 sps:$4 sm:$0xff]   ;;  %v9538_v52 = vld [vmem:[%s11404_s15 + $0xc4] ss:$8 sps:$4 sm:$0xff]   ;;  %v9542_v54 = vld [vmem:[%s11404_s15 + $0xc0] ss:$8 sps:$4 sm:$0xff]  }
 0x12f   : > { %7811 = vmatpush1.bf16.msra.mxu0 %v9494_v22  ;;  %7864 = vmatpush1.bf16.msra.mxu1 %v9495_v23  ;;  %v9537_v51 = vld [vmem:[%s11404_s15 + $0x1d0] ss:$8 sps:$4 sm:$0xff]   ;;  %v9540_v53 = vld [vmem:[%s11404_s15 + $0x1c4] ss:$8 sps:$4 sm:$0xff]   ;;  %v9543_v55 = vld [vmem:[%s11404_s15 + $0x1c0] ss:$8 sps:$4 sm:$0xff]  }
 0x130   : > { %7812 = vmatprep.subr.bf16.mxu0 %v9496_v24  ;;  %7865 = vmatprep.subr.bf16.mxu1 %v9498_v25  ;;  %v9544_v56 = vld [vmem:[%s11404_s15 + $0xb4] ss:$8 sps:$4 sm:$0xff]   ;;  %v9548_v58 = vld [vmem:[%s11404_s15 + $0xb0] ss:$8 sps:$4 sm:$0xff]   ;;  %v9550_v60 = vld [vmem:[%s11404_s15 + $0xa4] ss:$8 sps:$4 sm:$0xff]  }
 0x131   : > { %v9546_v57 = vld [vmem:[%s11404_s15 + $0x1b4] ss:$8 sps:$4 sm:$0xff]   ;;  %v9549_v59 = vld [vmem:[%s11404_s15 + $0x1b0] ss:$8 sps:$4 sm:$0xff]   ;;  %v9552_v61 = vld [vmem:[%s11404_s15 + $0x1a4] ss:$8 sps:$4 sm:$0xff]  }
 0x132   : > { %v9554_v62 = vld [vmem:[%s11404_s15 + $0xa0] ss:$8 sps:$4 sm:$0xff]   ;;  %v9556_v4 = vld [vmem:[%s11404_s15 + $0x94] ss:$8 sps:$4 sm:$0xff]   ;;  %v9560_v8 = vld [vmem:[%s11404_s15 + $0x90] ss:$8 sps:$4 sm:$0xff]  }
 0x133   : > { %7813 = vmatpush1.bf16.msra.mxu0 %v9500_v26  ;;  %7866 = vmatpush1.bf16.msra.mxu1 %v9501_v27  ;;  %v9555_v63 = vld [vmem:[%s11404_s15 + $0x1a0] ss:$8 sps:$4 sm:$0xff]   ;;  %v9558_v7 = vld [vmem:[%s11404_s15 + $0x194] ss:$8 sps:$4 sm:$0xff]   ;;  %v9561_v9 = vld [vmem:[%s11404_s15 + $0x190] ss:$8 sps:$4 sm:$0xff]  }
 0x134   : > { %7814 = vmatprep.subr.bf16.mxu0 %v9502_v28  ;;  %7867 = vmatprep.subr.bf16.mxu1 %v9504_v29  ;;  %v9562_v10 = vld [vmem:[%s11404_s15 + $0x84] ss:$8 sps:$4 sm:$0xff]   ;;  %v9566_v12 = vld [vmem:[%s11404_s15 + $0x80] ss:$8 sps:$4 sm:$0xff]   ;;  %v9570_v14 = vld [vmem:[%s11404_s15 + $0x274] ss:$8 sps:$4 sm:$0xff]  }
 0x135   : > { %v9564_v11 = vld [vmem:[%s11404_s15 + $0x184] ss:$8 sps:$4 sm:$0xff]   ;;  %v9567_v13 = vld [vmem:[%s11404_s15 + $0x180] ss:$8 sps:$4 sm:$0xff]   ;;  %v9573_v15 = vld [vmem:[%s11404_s15 + $0x374] ss:$8 sps:$4 sm:$0xff]  }
 0x136   : > { %v4380_v16 = vld [vmem:[%s12498_s0 + $0x100] sm:$0xff]  ;;  %v4381_v18 = vld [vmem:[%s12498_s0 + $0x108] sm:$0xff]  ;;  %v9568_v20 = vld [vmem:[%s11404_s15 + $0x270] ss:$8 sps:$4 sm:$0xff]  }
 0x137   : > { %7815 = vmatpush1.bf16.msra.mxu0 %v9506_v30  ;;  %7868 = vmatpush1.bf16.msra.mxu1 %v9507_v31  ;;  %v4396_v17 = vld [vmem:[%s12498_s0 + $0x180] sm:$0xff]  ;;  %v4397_v19 = vld [vmem:[%s12498_s0 + $0x188] sm:$0xff]  ;;  %v9571_v21 = vld [vmem:[%s11404_s15 + $0x370] ss:$8 sps:$4 sm:$0xff]  }
 0x138   : > { %7816 = vmatprep.subr.bf16.mxu0 %v9508_v32  ;;  %7869 = vmatprep.subr.bf16.mxu1 %v9510_v33  ;;  %v9576_v22 = vld [vmem:[%s11404_s15 + $0x264] ss:$8 sps:$4 sm:$0xff]   ;;  %v8874_v24 = vcombine.high %v4380_v16, %v4396_v17  ;;  %v8876_v25 = vcombine.high %v4381_v18, %v4397_v19  ;;  %v9574_v26 = vld [vmem:[%s11404_s15 + $0x260] ss:$8 sps:$4 sm:$0xff]   ;;  %v9582_v28 = vld [vmem:[%s11404_s15 + $0x254] ss:$8 sps:$4 sm:$0xff]   ;;  %v8875_v2 = vcombine.low %v4381_v18, %v4397_v19 }
 0x139   : > { %v9579_v23 = vld [vmem:[%s11404_s15 + $0x364] ss:$8 sps:$4 sm:$0xff]   ;;  %v9577_v27 = vld [vmem:[%s11404_s15 + $0x360] ss:$8 sps:$4 sm:$0xff]   ;;  %v9585_v29 = vld [vmem:[%s11404_s15 + $0x354] ss:$8 sps:$4 sm:$0xff]  }
 0x13a   : > { %v9580_v0 = vld [vmem:[%s11404_s15 + $0x250] ss:$8 sps:$4 sm:$0xff]   ;;  %v9588_v5 = vld [vmem:[%s11404_s15 + $0x244] ss:$8 sps:$4 sm:$0xff]   ;;  %v9586_v30 = vld [vmem:[%s11404_s15 + $0x240] ss:$8 sps:$4 sm:$0xff]  }
 0x13b   : > { %7817 = vmatpush1.bf16.msra.mxu0 %v9512_v34  ;;  %7870 = vmatpush1.bf16.msra.mxu1 %v9513_v35  ;;  %v9583_v1 = vld [vmem:[%s11404_s15 + $0x350] ss:$8 sps:$4 sm:$0xff]   ;;  %v9589_v31 = vld [vmem:[%s11404_s15 + $0x340] ss:$8 sps:$4 sm:$0xff]   ;;  %v9594_v32 = vld [vmem:[%s11404_s15 + $0x234] ss:$8 sps:$4 sm:$0xff]  }
 0x13c   : > { %7818 = vmatprep.subr.bf16.mxu0 %v9514_v36  ;;  %7871 = vmatprep.subr.bf16.mxu1 %v9516_v37  ;;  %v9597_v33 = vld [vmem:[%s11404_s15 + $0x334] ss:$8 sps:$4 sm:$0xff]   ;;  %v9592_v34 = vld [vmem:[%s11404_s15 + $0x230] ss:$8 sps:$4 sm:$0xff]   ;;  %v9600_v36 = vld [vmem:[%s11404_s15 + $0x224] ss:$8 sps:$4 sm:$0xff]  }
 0x13d   : > { %v9595_v35 = vld [vmem:[%s11404_s15 + $0x330] ss:$8 sps:$4 sm:$0xff]   ;;  %v9603_v37 = vld [vmem:[%s11404_s15 + $0x324] ss:$8 sps:$4 sm:$0xff]   ;;  %v9646_v18 = vld [vmem:[%s11404_s15 + $0x2a0] ss:$8 sps:$4 sm:$0xff]  }
 0x13e   : > { %v9649_v19 = vld [vmem:[%s11404_s15 + $0x3a0] ss:$8 sps:$4 sm:$0xff]  }
 0x13f   : > { %7819 = vmatpush1.bf16.msra.mxu0 %v9518_v38  ;;  %7872 = vmatpush1.bf16.msra.mxu1 %v9519_v39  ;;  %v11513_v38 = vld [vmem:[%s12498_s0 + $0x10] sm:$0xff]  ;;  %v9598_v39 = vld [vmem:[%s11404_s15 + $0x220] ss:$8 sps:$4 sm:$0xff]  }
 0x140   : > { %7820 = vmatprep.subr.bf16.mxu0 %v9520_v40  ;;  %7873 = vmatprep.subr.bf16.mxu1 %v9522_v41  ;;  %v9601_v40 = vld [vmem:[%s11404_s15 + $0x320] ss:$8 sps:$4 sm:$0xff]   ;;  %v9606_v41 = vld [vmem:[%s11404_s15 + $0x214] ss:$8 sps:$4 sm:$0xff]  }
 0x143   : > { %7821 = vmatpush2.bf16.msra.mxu0 %v9524_v42  ;;  %7874 = vmatpush2.bf16.msra.mxu1 %v9525_v43  ;;  %v9609_v42 = vld [vmem:[%s11404_s15 + $0x314] ss:$8 sps:$4 sm:$0xff]  }
 0x144   : > { %7822 = vmatprep.subr.bf16.mxu0 %v9526_v44  ;;  %7875 = vmatprep.subr.bf16.mxu1 %v9528_v45  ;;  %v11522_v43 = vld [vmem:[%s12498_s0 + $0x90] sm:$0xff]  ;;  %v11527_v44 = vld [vmem:[%s12498_s0 + $0x18] sm:$0xff] }
 0x145   : > { %v8846_v45 = vcombine.high %v11513_v38, %v11522_v43 }
 0x147   : > { %7823 = vmatpush2.bf16.msra.mxu0 %v9530_v46  ;;  %7876 = vmatpush2.bf16.msra.mxu1 %v9531_v47  ;;  %v11534_v46 = vld [vmem:[%s12498_s0 + $0x98] sm:$0xff] }
 0x148   : > { %7824 = vmatprep.subr.bf16.mxu0 %v9532_v48  ;;  %7877 = vmatprep.subr.bf16.mxu1 %v9534_v49  ;;  %v9604_v47 = vld [vmem:[%s11404_s15 + $0x210] ss:$8 sps:$4 sm:$0xff]   ;;  %v8848_v48 = vcombine.high %v11527_v44, %v11534_v46 }
 0x149   : > { %v9607_v49 = vld [vmem:[%s11404_s15 + $0x310] ss:$8 sps:$4 sm:$0xff]  }
 0x14b   : > { %7825 = vmatpush2.bf16.msra.mxu0 %v9536_v50  ;;  %7878 = vmatpush2.bf16.msra.mxu1 %v9537_v51  ;;  %v9612_v50 = vld [vmem:[%s11404_s15 + $0x204] ss:$8 sps:$4 sm:$0xff]  }
 0x14c   : > { %7826 = vmatprep.subr.bf16.mxu0 %v9538_v52  ;;  %7879 = vmatprep.subr.bf16.mxu1 %v9540_v53  ;;  %v9615_v51 = vld [vmem:[%s11404_s15 + $0x304] ss:$8 sps:$4 sm:$0xff]   ;;  %v9610_v52 = vld [vmem:[%s11404_s15 + $0x200] ss:$8 sps:$4 sm:$0xff]  }
 0x14d   : > { %v9613_v53 = vld [vmem:[%s11404_s15 + $0x300] ss:$8 sps:$4 sm:$0xff]  }
 0x14f   : > { %7827 = vmatpush2.bf16.msra.mxu0 %v9542_v54  ;;  %7880 = vmatpush2.bf16.msra.mxu1 %v9543_v55  ;;  %v9618_v54 = vld [vmem:[%s11404_s15 + $0x2f4] ss:$8 sps:$4 sm:$0xff]  }
 0x150   : > { %7828 = vmatprep.subr.bf16.mxu0 %v9544_v56  ;;  %7881 = vmatprep.subr.bf16.mxu1 %v9546_v57  ;;  %v9621_v55 = vld [vmem:[%s11404_s15 + $0x3f4] ss:$8 sps:$4 sm:$0xff]   ;;  %v9616_v56 = vld [vmem:[%s11404_s15 + $0x2f0] ss:$8 sps:$4 sm:$0xff]  }
 0x151   : > { %v9619_v57 = vld [vmem:[%s11404_s15 + $0x3f0] ss:$8 sps:$4 sm:$0xff]  }
 0x153   : > { %7829 = vmatpush2.bf16.msra.mxu0 %v9548_v58  ;;  %7882 = vmatpush2.bf16.msra.mxu1 %v9549_v59  ;;  %v9624_v58 = vld [vmem:[%s11404_s15 + $0x2e4] ss:$8 sps:$4 sm:$0xff]  }
 0x154   : > { %7830 = vmatprep.subr.bf16.mxu0 %v9550_v60  ;;  %7883 = vmatprep.subr.bf16.mxu1 %v9552_v61  ;;  %v9627_v59 = vld [vmem:[%s11404_s15 + $0x3e4] ss:$8 sps:$4 sm:$0xff]   ;;  %v9622_v60 = vld [vmem:[%s11404_s15 + $0x2e0] ss:$8 sps:$4 sm:$0xff]  }
 0x155   : > { %v9625_v61 = vld [vmem:[%s11404_s15 + $0x3e0] ss:$8 sps:$4 sm:$0xff]  }
 0x157   : > { %7831 = vmatpush2.bf16.msra.mxu0 %v9554_v62  ;;  %7884 = vmatpush2.bf16.msra.mxu1 %v9555_v63  ;;  %v9630_v62 = vld [vmem:[%s11404_s15 + $0x2d4] ss:$8 sps:$4 sm:$0xff]  }
 0x158   : > { %7832 = vmatprep.subr.bf16.mxu0 %v9556_v4  ;;  %7885 = vmatprep.subr.bf16.mxu1 %v9558_v7  ;;  %v9633_v63 = vld [vmem:[%s11404_s15 + $0x3d4] ss:$8 sps:$4 sm:$0xff]   ;;  %v9628_v4 = vld [vmem:[%s11404_s15 + $0x2d0] ss:$8 sps:$4 sm:$0xff]  }
 0x159   : > { %v9631_v7 = vld [vmem:[%s11404_s15 + $0x3d0] ss:$8 sps:$4 sm:$0xff]  }
 0x15b   : > { %7833 = vmatpush2.bf16.msra.mxu0 %v9560_v8  ;;  %7886 = vmatpush2.bf16.msra.mxu1 %v9561_v9  ;;  %v9636_v8 = vld [vmem:[%s11404_s15 + $0x2c4] ss:$8 sps:$4 sm:$0xff]  }
 0x15c   : > { %7834 = vmatprep.subr.bf16.mxu0 %v9562_v10  ;;  %7887 = vmatprep.subr.bf16.mxu1 %v9564_v11  ;;  %v9639_v9 = vld [vmem:[%s11404_s15 + $0x3c4] ss:$8 sps:$4 sm:$0xff]   ;;  %v9634_v10 = vld [vmem:[%s11404_s15 + $0x2c0] ss:$8 sps:$4 sm:$0xff]  }
 0x15d   : > { %v9637_v11 = vld [vmem:[%s11404_s15 + $0x3c0] ss:$8 sps:$4 sm:$0xff]  }
 0x15f   : > { %7835 = vmatpush2.bf16.msra.mxu0 %v9566_v12  ;;  %7888 = vmatpush2.bf16.msra.mxu1 %v9567_v13  ;;  %v9642_v12 = vld [vmem:[%s11404_s15 + $0x2b4] ss:$8 sps:$4 sm:$0xff]  }
 0x160   : > { %7910 = vmatprep.subr.bf16.mxu0 %v9570_v14  ;;  %7963 = vmatprep.subr.bf16.mxu1 %v9573_v15  ;;  %v9645_v13 = vld [vmem:[%s11404_s15 + $0x3b4] ss:$8 sps:$4 sm:$0xff]   ;;  %v9640_v14 = vld [vmem:[%s11404_s15 + $0x2b0] ss:$8 sps:$4 sm:$0xff]  }
 0x161   : > { %v9643_v15 = vld [vmem:[%s11404_s15 + $0x3b0] ss:$8 sps:$4 sm:$0xff]  }
 0x162   : > { %7837 = vmatmul.mubr.bf16.vlgmr.msra.gmra.mxu0 %v8841_v3  ;;  %7890 = vmatmul.mubr.bf16.vlgmr.msra.gmra.mxu1 %v8843_v6  ;;  %v8873_v3 = vcombine.low %v4380_v16, %v4396_v17  ;;  %v9591_v6 = vld [vmem:[%s11404_s15 + $0x344] ss:$8 sps:$4 sm:$0xff]  }
 0x163   : > { %7911 = vmatpush1.bf16.msra.mxu0 %v9568_v20  ;;  %7964 = vmatpush1.bf16.msra.mxu1 %v9571_v21  ;;  %v9648_v16 = vld [vmem:[%s11404_s15 + $0x2a4] ss:$8 sps:$4 sm:$0xff]   ;;  %v9654_v20 = vld [vmem:[%s11404_s15 + $0x294] ss:$8 sps:$4 sm:$0xff]  }
 0x164   : > { %7912 = vmatprep.subr.bf16.mxu0 %v9576_v22  ;;  %7965 = vmatprep.subr.bf16.mxu1 %v9579_v23  ;;  %v9651_v17 = vld [vmem:[%s11404_s15 + $0x3a4] ss:$8 sps:$4 sm:$0xff]   ;;  %v9657_v21 = vld [vmem:[%s11404_s15 + $0x394] ss:$8 sps:$4 sm:$0xff]   ;;  %v9652_v22 = vld [vmem:[%s11404_s15 + $0x290] ss:$8 sps:$4 sm:$0xff]  }
 0x165   : > { %7846 = vmatprep.mubr.bf16.mxu0 %v8874_v24  ;;  %7899 = vmatprep.mubr.bf16.mxu1 %v8876_v25  ;;  %v9655_v23 = vld [vmem:[%s11404_s15 + $0x390] ss:$8 sps:$4 sm:$0xff]   ;;  %v9660_v24 = vld [vmem:[%s11404_s15 + $0x284] ss:$8 sps:$4 sm:$0xff]  }
 0x166   : > { %v9663_v25 = vld [vmem:[%s11404_s15 + $0x384] ss:$8 sps:$4 sm:$0xff]  }
 0x167   : > { %7913 = vmatpush1.bf16.msra.mxu0 %v9574_v26  ;;  %7966 = vmatpush1.bf16.msra.mxu1 %v9577_v27  ;;  %v9658_v26 = vld [vmem:[%s11404_s15 + $0x280] ss:$8 sps:$4 sm:$0xff]  }
 0x168   : > { %7914 = vmatprep.subr.bf16.mxu0 %v9582_v28  ;;  %7967 = vmatprep.subr.bf16.mxu1 %v9585_v29  ;;  %v9661_v27 = vld [vmem:[%s11404_s15 + $0x380] ss:$8 sps:$4 sm:$0xff]   ;;  %v9666_v28 = vld [vmem:[%s11404_s15 + $0x474] ss:$8 sps:$4 sm:$0xff]  }
 0x169   : > { %v9669_v29 = vld [vmem:[%s11404_s15 + $0x574] ss:$8 sps:$4 sm:$0xff]  }
 0x16a   : > { %7847 = vmatmul.mubr.bf16.gmra.mxu0 %v8873_v3  ;;  %7900 = vmatmul.mubr.bf16.gmra.mxu1 %v8875_v2  ;;  %v4398_v3 = vld [vmem:[%s12498_s0 + $0x190] sm:$0xff]  ;;  %v8845_v2 = vcombine.low %v11513_v38, %v11522_v43 }
 0x16b   : > { %7915 = vmatpush1.bf16.msra.mxu0 %v9580_v0  ;;  %7968 = vmatpush1.bf16.msra.mxu1 %v9583_v1  ;;  %v4382_v0 = vld [vmem:[%s12498_s0 + $0x110] sm:$0xff] }
 0x16c   : > { %7916 = vmatprep.subr.bf16.mxu0 %v9588_v5  ;;  %7969 = vmatprep.subr.bf16.mxu1 %v9591_v6  ;;  %v9664_v1 = vld [vmem:[%s11404_s15 + $0x470] ss:$8 sps:$4 sm:$0xff]   ;;  %v8847_v5 = vcombine.low %v11527_v44, %v11534_v46  ;;  %v9678_v38 = vld [vmem:[%s11404_s15 + $0x454] ss:$8 sps:$4 sm:$0xff]   ;;  %v11615_v44 = vld [vmem:[%s12498_s0 + $0x28] sm:$0xff] }
 0x16d   : > { %7942 = vmatprep.mubr.bf16.mxu0 %v8846_v45  ;;  %7995 = vmatprep.mubr.bf16.mxu1 %v8848_v48  ;;  %v4383_v6 = vld [vmem:[%s12498_s0 + $0x118] sm:$0xff]  ;;  %v11620_v45 = vld [vmem:[%s12498_s0 + $0xa8] sm:$0xff] }
 0x16e   : > { %v9676_v46 = vld [vmem:[%s11404_s15 + $0x450] ss:$8 sps:$4 sm:$0xff]   ;;  %v9684_v48 = vld [vmem:[%s11404_s15 + $0x444] ss:$8 sps:$4 sm:$0xff]  }
 0x16f   : > { %7917 = vmatpush1.bf16.msra.mxu0 %v9586_v30  ;;  %7970 = vmatpush1.bf16.msra.mxu1 %v9589_v31  ;;  %v4399_v30 = vld [vmem:[%s12498_s0 + $0x198] sm:$0xff] }
 0x170   : > { %7918 = vmatprep.subr.bf16.mxu0 %v9594_v32  ;;  %7971 = vmatprep.subr.bf16.mxu1 %v9597_v33  ;;  %v9667_v31 = vld [vmem:[%s11404_s15 + $0x570] ss:$8 sps:$4 sm:$0xff]   ;;  %v9672_v32 = vld [vmem:[%s11404_s15 + $0x464] ss:$8 sps:$4 sm:$0xff]   ;;  %v8879_v43 = vcombine.low %v4383_v6, %v4399_v30 }
 0x171   : > { %v9675_v33 = vld [vmem:[%s11404_s15 + $0x564] ss:$8 sps:$4 sm:$0xff]  }
 0x173   : > { %7919 = vmatpush1.bf16.msra.mxu0 %v9592_v34  ;;  %7972 = vmatpush1.bf16.msra.mxu1 %v9595_v35  ;;  %v8878_v34 = vcombine.high %v4382_v0, %v4398_v3  ;;  %v8880_v35 = vcombine.high %v4383_v6, %v4399_v30  ;;  %v9745_v6 = vld [vmem:[%s11404_s15 + $0x5a0] ss:$8 sps:$4 sm:$0xff]   ;;  %v9750_v30 = vld [vmem:[%s11404_s15 + $0x494] ss:$8 sps:$4 sm:$0xff]  }
 0x174   : > { %7920 = vmatprep.subr.bf16.mxu0 %v9600_v36  ;;  %7973 = vmatprep.subr.bf16.mxu1 %v9603_v37  ;;  %v9670_v36 = vld [vmem:[%s11404_s15 + $0x460] ss:$8 sps:$4 sm:$0xff]  }
 0x175   : > { %v9673_v37 = vld [vmem:[%s11404_s15 + $0x560] ss:$8 sps:$4 sm:$0xff]  }
 0x177   : > { %7921 = vmatpush1.bf16.msra.mxu0 %v9598_v39  ;;  %7974 = vmatpush1.bf16.msra.mxu1 %v9601_v40  ;;  %v9681_v39 = vld [vmem:[%s11404_s15 + $0x554] ss:$8 sps:$4 sm:$0xff]   ;;  %v11605_v40 = vld [vmem:[%s12498_s0 + $0x20] sm:$0xff] }
 0x178   : > { %7922 = vmatprep.subr.bf16.mxu0 %v9606_v41  ;;  %7975 = vmatprep.subr.bf16.mxu1 %v9609_v42  ;;  %v11610_v41 = vld [vmem:[%s12498_s0 + $0xa0] sm:$0xff]  ;;  %v8877_v42 = vcombine.low %v4382_v0, %v4398_v3  ;;  %v9736_v0 = vld [vmem:[%s11404_s15 + $0x4b0] ss:$8 sps:$4 sm:$0xff]  }
 0x179   : > { %v9744_v3 = vld [vmem:[%s11404_s15 + $0x4a4] ss:$8 sps:$4 sm:$0xff]  }
 0x17b   : > { %7923 = vmatpush1.bf16.msra.mxu0 %v9604_v47  ;;  %7976 = vmatpush1.bf16.msra.mxu1 %v9607_v49  ;;  %v9679_v47 = vld [vmem:[%s11404_s15 + $0x550] ss:$8 sps:$4 sm:$0xff]   ;;  %v9687_v49 = vld [vmem:[%s11404_s15 + $0x544] ss:$8 sps:$4 sm:$0xff]  }
 0x17c   : > { %7924 = vmatprep.subr.bf16.mxu0 %v9612_v50  ;;  %7977 = vmatprep.subr.bf16.mxu1 %v9615_v51  ;;  %v8850_v50 = vcombine.high %v11605_v40, %v11610_v41  ;;  %v8852_v51 = vcombine.high %v11615_v44, %v11620_v45 }
 0x17f   : > { %7925 = vmatpush1.bf16.msra.mxu0 %v9610_v52  ;;  %7978 = vmatpush1.bf16.msra.mxu1 %v9613_v53  ;;  %v9682_v52 = vld [vmem:[%s11404_s15 + $0x440] ss:$8 sps:$4 sm:$0xff]  }
 0x180   : > { %7926 = vmatprep.subr.bf16.mxu0 %v9618_v54  ;;  %7979 = vmatprep.subr.bf16.mxu1 %v9621_v55  ;;  %v9685_v53 = vld [vmem:[%s11404_s15 + $0x540] ss:$8 sps:$4 sm:$0xff]   ;;  %v9690_v54 = vld [vmem:[%s11404_s15 + $0x434] ss:$8 sps:$4 sm:$0xff]  }
 0x181   : > { %v9693_v55 = vld [vmem:[%s11404_s15 + $0x534] ss:$8 sps:$4 sm:$0xff]  }
 0x183   : > { %7927 = vmatpush2.bf16.msra.mxu0 %v9616_v56  ;;  %7980 = vmatpush2.bf16.msra.mxu1 %v9619_v57  ;;  %v9688_v56 = vld [vmem:[%s11404_s15 + $0x430] ss:$8 sps:$4 sm:$0xff]  }
 0x184   : > { %7928 = vmatprep.subr.bf16.mxu0 %v9624_v58  ;;  %7981 = vmatprep.subr.bf16.mxu1 %v9627_v59  ;;  %v9691_v57 = vld [vmem:[%s11404_s15 + $0x530] ss:$8 sps:$4 sm:$0xff]   ;;  %v9696_v58 = vld [vmem:[%s11404_s15 + $0x424] ss:$8 sps:$4 sm:$0xff]  }
 0x185   : > { %v9699_v59 = vld [vmem:[%s11404_s15 + $0x524] ss:$8 sps:$4 sm:$0xff]  }
 0x187   : > { %7929 = vmatpush2.bf16.msra.mxu0 %v9622_v60  ;;  %7982 = vmatpush2.bf16.msra.mxu1 %v9625_v61  ;;  %v9694_v60 = vld [vmem:[%s11404_s15 + $0x420] ss:$8 sps:$4 sm:$0xff]  }
 0x188   : > { %7930 = vmatprep.subr.bf16.mxu0 %v9630_v62  ;;  %7983 = vmatprep.subr.bf16.mxu1 %v9633_v63  ;;  %v9697_v61 = vld [vmem:[%s11404_s15 + $0x520] ss:$8 sps:$4 sm:$0xff]   ;;  %v9702_v62 = vld [vmem:[%s11404_s15 + $0x414] ss:$8 sps:$4 sm:$0xff]  }
 0x189   : > { %v9705_v63 = vld [vmem:[%s11404_s15 + $0x514] ss:$8 sps:$4 sm:$0xff]  }
 0x18b   : > { %7931 = vmatpush2.bf16.msra.mxu0 %v9628_v4  ;;  %7984 = vmatpush2.bf16.msra.mxu1 %v9631_v7  ;;  %v9700_v4 = vld [vmem:[%s11404_s15 + $0x410] ss:$8 sps:$4 sm:$0xff]  }
 0x18c   : > { %7932 = vmatprep.subr.bf16.mxu0 %v9636_v8  ;;  %7985 = vmatprep.subr.bf16.mxu1 %v9639_v9  ;;  %v9703_v7 = vld [vmem:[%s11404_s15 + $0x510] ss:$8 sps:$4 sm:$0xff]   ;;  %v9708_v8 = vld [vmem:[%s11404_s15 + $0x404] ss:$8 sps:$4 sm:$0xff]  }
 0x18d   : > { %v9711_v9 = vld [vmem:[%s11404_s15 + $0x504] ss:$8 sps:$4 sm:$0xff]  }
 0x18f   : > { %7933 = vmatpush2.bf16.msra.mxu0 %v9634_v10  ;;  %7986 = vmatpush2.bf16.msra.mxu1 %v9637_v11  ;;  %v9706_v10 = vld [vmem:[%s11404_s15 + $0x400] ss:$8 sps:$4 sm:$0xff]  }
 0x190   : > { %7934 = vmatprep.subr.bf16.mxu0 %v9642_v12  ;;  %7987 = vmatprep.subr.bf16.mxu1 %v9645_v13  ;;  %v9709_v11 = vld [vmem:[%s11404_s15 + $0x500] ss:$8 sps:$4 sm:$0xff]   ;;  %v9714_v12 = vld [vmem:[%s11404_s15 + $0x4f4] ss:$8 sps:$4 sm:$0xff]  }
 0x191   : > { %v9717_v13 = vld [vmem:[%s11404_s15 + $0x5f4] ss:$8 sps:$4 sm:$0xff]  }
 0x193   : > { %7935 = vmatpush2.bf16.msra.mxu0 %v9640_v14  ;;  %7988 = vmatpush2.bf16.msra.mxu1 %v9643_v15  ;;  %v9712_v14 = vld [vmem:[%s11404_s15 + $0x4f0] ss:$8 sps:$4 sm:$0xff]  }
 0x194   : > { %7936 = vmatprep.subr.bf16.mxu0 %v9648_v16  ;;  %7989 = vmatprep.subr.bf16.mxu1 %v9651_v17  ;;  %v9715_v15 = vld [vmem:[%s11404_s15 + $0x5f0] ss:$8 sps:$4 sm:$0xff]   ;;  %v9720_v16 = vld [vmem:[%s11404_s15 + $0x4e4] ss:$8 sps:$4 sm:$0xff]  }
 0x195   : > { %v9723_v17 = vld [vmem:[%s11404_s15 + $0x5e4] ss:$8 sps:$4 sm:$0xff]  }
 0x197   : > { %7937 = vmatpush2.bf16.msra.mxu0 %v9646_v18  ;;  %7990 = vmatpush2.bf16.msra.mxu1 %v9649_v19  ;;  %v9718_v18 = vld [vmem:[%s11404_s15 + $0x4e0] ss:$8 sps:$4 sm:$0xff]  }
 0x198   : > { %7938 = vmatprep.subr.bf16.mxu0 %v9654_v20  ;;  %7991 = vmatprep.subr.bf16.mxu1 %v9657_v21  ;;  %v9721_v19 = vld [vmem:[%s11404_s15 + $0x5e0] ss:$8 sps:$4 sm:$0xff]   ;;  %v9726_v20 = vld [vmem:[%s11404_s15 + $0x4d4] ss:$8 sps:$4 sm:$0xff]  }
 0x199   : > { %v9729_v21 = vld [vmem:[%s11404_s15 + $0x5d4] ss:$8 sps:$4 sm:$0xff]  }
 0x19b   : > { %7939 = vmatpush2.bf16.msra.mxu0 %v9652_v22  ;;  %7992 = vmatpush2.bf16.msra.mxu1 %v9655_v23  ;;  %v9724_v22 = vld [vmem:[%s11404_s15 + $0x4d0] ss:$8 sps:$4 sm:$0xff]  }
 0x19c   : > { %7940 = vmatprep.subr.bf16.mxu0 %v9660_v24  ;;  %7993 = vmatprep.subr.bf16.mxu1 %v9663_v25  ;;  %v9727_v23 = vld [vmem:[%s11404_s15 + $0x5d0] ss:$8 sps:$4 sm:$0xff]   ;;  %v9732_v24 = vld [vmem:[%s11404_s15 + $0x4c4] ss:$8 sps:$4 sm:$0xff]  }
 0x19d   : > { %v9735_v25 = vld [vmem:[%s11404_s15 + $0x5c4] ss:$8 sps:$4 sm:$0xff]  }
 0x19f   : > { %7941 = vmatpush2.bf16.msra.mxu0 %v9658_v26  ;;  %7994 = vmatpush2.bf16.msra.mxu1 %v9661_v27  ;;  %v9730_v26 = vld [vmem:[%s11404_s15 + $0x4c0] ss:$8 sps:$4 sm:$0xff]  }
 0x1a0   : > { %8016 = vmatprep.subr.bf16.mxu0 %v9666_v28  ;;  %8069 = vmatprep.subr.bf16.mxu1 %v9669_v29  ;;  %v9733_v27 = vld [vmem:[%s11404_s15 + $0x5c0] ss:$8 sps:$4 sm:$0xff]   ;;  %v9738_v28 = vld [vmem:[%s11404_s15 + $0x4b4] ss:$8 sps:$4 sm:$0xff]  }
 0x1a1   : > { %v9741_v29 = vld [vmem:[%s11404_s15 + $0x5b4] ss:$8 sps:$4 sm:$0xff]  }
 0x1a2   : > { %7943 = vmatmul.mubr.bf16.vlgmr.msra.gmra.mxu0 %v8845_v2  ;;  %7996 = vmatmul.mubr.bf16.vlgmr.msra.gmra.mxu1 %v8847_v5  ;;  %v9747_v2 = vld [vmem:[%s11404_s15 + $0x5a4] ss:$8 sps:$4 sm:$0xff]   ;;  %v9742_v5 = vld [vmem:[%s11404_s15 + $0x4a0] ss:$8 sps:$4 sm:$0xff]  }
 0x1a3   : > { %8017 = vmatpush1.bf16.msra.mxu0 %v9664_v1  ;;  %8070 = vmatpush1.bf16.msra.mxu1 %v9667_v31  ;;  %v9739_v1 = vld [vmem:[%s11404_s15 + $0x5b0] ss:$8 sps:$4 sm:$0xff]   ;;  %v9753_v31 = vld [vmem:[%s11404_s15 + $0x594] ss:$8 sps:$4 sm:$0xff]  }
 0x1a4   : > { %8018 = vmatprep.subr.bf16.mxu0 %v9672_v32  ;;  %8071 = vmatprep.subr.bf16.mxu1 %v9675_v33  ;;  %v9748_v32 = vld [vmem:[%s11404_s15 + $0x490] ss:$8 sps:$4 sm:$0xff]  }
 0x1a5   : > { %7952 = vmatprep.mubr.bf16.mxu0 %v8878_v34  ;;  %8005 = vmatprep.mubr.bf16.mxu1 %v8880_v35  ;;  %v9751_v33 = vld [vmem:[%s11404_s15 + $0x590] ss:$8 sps:$4 sm:$0xff]   ;;  %v9756_v34 = vld [vmem:[%s11404_s15 + $0x484] ss:$8 sps:$4 sm:$0xff]  }
 0x1a6   : > { %v9759_v35 = vld [vmem:[%s11404_s15 + $0x584] ss:$8 sps:$4 sm:$0xff]  }
 0x1a7   : > { %8019 = vmatpush1.bf16.msra.mxu0 %v9670_v36  ;;  %8072 = vmatpush1.bf16.msra.mxu1 %v9673_v37  ;;  %v9754_v36 = vld [vmem:[%s11404_s15 + $0x480] ss:$8 sps:$4 sm:$0xff]  }
 0x1a8   : > { %8020 = vmatprep.subr.bf16.mxu0 %v9678_v38  ;;  %8073 = vmatprep.subr.bf16.mxu1 %v9681_v39  ;;  %v9757_v37 = vld [vmem:[%s11404_s15 + $0x580] ss:$8 sps:$4 sm:$0xff]   ;;  %v9762_v38 = vld [vmem:[%s11404_s15 + $0x674] ss:$8 sps:$4 sm:$0xff]  }
 0x1a9   : > { %v9765_v39 = vld [vmem:[%s11404_s15 + $0x774] ss:$8 sps:$4 sm:$0xff]  }
 0x1aa   : > { %7953 = vmatmul.mubr.bf16.gmra.mxu0 %v8877_v42  ;;  %8006 = vmatmul.mubr.bf16.gmra.mxu1 %v8879_v43  ;;  %v4384_v42 = vld [vmem:[%s12498_s0 + $0x120] sm:$0xff]  ;;  %v9760_v43 = vld [vmem:[%s11404_s15 + $0x670] ss:$8 sps:$4 sm:$0xff]  }
 0x1ab   : > { %8021 = vmatpush1.bf16.msra.mxu0 %v9676_v46  ;;  %8074 = vmatpush1.bf16.msra.mxu1 %v9679_v47  ;;  %v4400_v46 = vld [vmem:[%s12498_s0 + $0x1a0] sm:$0xff]  ;;  %v8849_v47 = vcombine.low %v11605_v40, %v11610_v41 }
 0x1ac   : > { %8022 = vmatprep.subr.bf16.mxu0 %v9684_v48  ;;  %8075 = vmatprep.subr.bf16.mxu1 %v9687_v49  ;;  %v8851_v48 = vcombine.low %v11615_v44, %v11620_v45  ;;  %v4385_v49 = vld [vmem:[%s12498_s0 + $0x128] sm:$0xff]  ;;  %v8882_v41 = vcombine.high %v4384_v42, %v4400_v46 }
 0x1ad   : > { %8048 = vmatprep.mubr.bf16.mxu0 %v8850_v50  ;;  %8101 = vmatprep.mubr.bf16.mxu1 %v8852_v51  ;;  %v4401_v50 = vld [vmem:[%s12498_s0 + $0x1a8] sm:$0xff]  ;;  %v9763_v51 = vld [vmem:[%s11404_s15 + $0x770] ss:$8 sps:$4 sm:$0xff]  }
 0x1ae   : > { %v9771_v40 = vld [vmem:[%s11404_s15 + $0x764] ss:$8 sps:$4 sm:$0xff]   ;;  %v8884_v44 = vcombine.high %v4385_v49, %v4401_v50  ;;  %v9766_v45 = vld [vmem:[%s11404_s15 + $0x660] ss:$8 sps:$4 sm:$0xff]  }
 0x1af   : > { %8023 = vmatpush1.bf16.msra.mxu0 %v9682_v52  ;;  %8076 = vmatpush1.bf16.msra.mxu1 %v9685_v53  ;;  %v9768_v52 = vld [vmem:[%s11404_s15 + $0x664] ss:$8 sps:$4 sm:$0xff]   ;;  %v9769_v53 = vld [vmem:[%s11404_s15 + $0x760] ss:$8 sps:$4 sm:$0xff]  }
 0x1b0   : > { %8024 = vmatprep.subr.bf16.mxu0 %v9690_v54  ;;  %8077 = vmatprep.subr.bf16.mxu1 %v9693_v55  ;;  %v9774_v54 = vld [vmem:[%s11404_s15 + $0x654] ss:$8 sps:$4 sm:$0xff]  }
 0x1b1   : > { %v9777_v55 = vld [vmem:[%s11404_s15 + $0x754] ss:$8 sps:$4 sm:$0xff]  }
 0x1b3   : > { %8025 = vmatpush1.bf16.msra.mxu0 %v9688_v56  ;;  %8078 = vmatpush1.bf16.msra.mxu1 %v9691_v57  ;;  %v11709_v56 = vld [vmem:[%s12498_s0 + $0x30] sm:$0xff] }
 0x1b4   : > { %8026 = vmatprep.subr.bf16.mxu0 %v9696_v58  ;;  %8079 = vmatprep.subr.bf16.mxu1 %v9699_v59  ;;  %v9772_v57 = vld [vmem:[%s11404_s15 + $0x650] ss:$8 sps:$4 sm:$0xff]   ;;  %v8881_v59 = vcombine.low %v4384_v42, %v4400_v46  ;;  %v9840_v46 = vld [vmem:[%s11404_s15 + $0x6a4] ss:$8 sps:$4 sm:$0xff]  }
 0x1b5   : > { %v11715_v58 = vld [vmem:[%s12498_s0 + $0xb0] sm:$0xff] }
 0x1b6   : > { %v9832_v42 = vld [vmem:[%s11404_s15 + $0x6b0] ss:$8 sps:$4 sm:$0xff]  }
 0x1b7   : > { %8027 = vmatpush1.bf16.msra.mxu0 %v9694_v60  ;;  %8080 = vmatpush1.bf16.msra.mxu1 %v9697_v61  ;;  %v8883_v60 = vcombine.low %v4385_v49, %v4401_v50  ;;  %v11720_v61 = vld [vmem:[%s12498_s0 + $0x38] sm:$0xff]  ;;  %v9841_v49 = vld [vmem:[%s11404_s15 + $0x7a0] ss:$8 sps:$4 sm:$0xff]  }
 0x1b8   : > { %8028 = vmatprep.subr.bf16.mxu0 %v9702_v62  ;;  %8081 = vmatprep.subr.bf16.mxu1 %v9705_v63  ;;  %v11725_v62 = vld [vmem:[%s12498_s0 + $0xb8] sm:$0xff] }
 0x1b9   : > { %v9775_v63 = vld [vmem:[%s11404_s15 + $0x750] ss:$8 sps:$4 sm:$0xff]   ;;  %v9846_v50 = vld [vmem:[%s11404_s15 + $0x694] ss:$8 sps:$4 sm:$0xff]  }
 0x1bb   : > { %8029 = vmatpush1.bf16.msra.mxu0 %v9700_v4  ;;  %8082 = vmatpush1.bf16.msra.mxu1 %v9703_v7  ;;  %v9780_v4 = vld [vmem:[%s11404_s15 + $0x644] ss:$8 sps:$4 sm:$0xff]  }
 0x1bc   : > { %8030 = vmatprep.subr.bf16.mxu0 %v9708_v8  ;;  %8083 = vmatprep.subr.bf16.mxu1 %v9711_v9  ;;  %v9783_v7 = vld [vmem:[%s11404_s15 + $0x744] ss:$8 sps:$4 sm:$0xff]   ;;  %v8854_v8 = vcombine.high %v11709_v56, %v11715_v58  ;;  %v8856_v9 = vcombine.high %v11720_v61, %v11725_v62 }
 0x1bf   : > { %8031 = vmatpush1.bf16.msra.mxu0 %v9706_v10  ;;  %8084 = vmatpush1.bf16.msra.mxu1 %v9709_v11  ;;  %v9778_v10 = vld [vmem:[%s11404_s15 + $0x640] ss:$8 sps:$4 sm:$0xff]  }
 0x1c0   : > { %8032 = vmatprep.subr.bf16.mxu0 %v9714_v12  ;;  %8085 = vmatprep.subr.bf16.mxu1 %v9717_v13  ;;  %v9781_v11 = vld [vmem:[%s11404_s15 + $0x740] ss:$8 sps:$4 sm:$0xff]   ;;  %v9786_v12 = vld [vmem:[%s11404_s15 + $0x634] ss:$8 sps:$4 sm:$0xff]  }
 0x1c1   : > { %v9789_v13 = vld [vmem:[%s11404_s15 + $0x734] ss:$8 sps:$4 sm:$0xff]  }
 0x1c3   : > { %8033 = vmatpush2.bf16.msra.mxu0 %v9712_v14  ;;  %8086 = vmatpush2.bf16.msra.mxu1 %v9715_v15  ;;  %v9784_v14 = vld [vmem:[%s11404_s15 + $0x630] ss:$8 sps:$4 sm:$0xff]  }
 0x1c4   : > { %8034 = vmatprep.subr.bf16.mxu0 %v9720_v16  ;;  %8087 = vmatprep.subr.bf16.mxu1 %v9723_v17  ;;  %v9787_v15 = vld [vmem:[%s11404_s15 + $0x730] ss:$8 sps:$4 sm:$0xff]   ;;  %v9792_v16 = vld [vmem:[%s11404_s15 + $0x624] ss:$8 sps:$4 sm:$0xff]  }
 0x1c5   : > { %v9795_v17 = vld [vmem:[%s11404_s15 + $0x724] ss:$8 sps:$4 sm:$0xff]  }
 0x1c7   : > { %8035 = vmatpush2.bf16.msra.mxu0 %v9718_v18  ;;  %8088 = vmatpush2.bf16.msra.mxu1 %v9721_v19  ;;  %v9790_v18 = vld [vmem:[%s11404_s15 + $0x620] ss:$8 sps:$4 sm:$0xff]  }
 0x1c8   : > { %8036 = vmatprep.subr.bf16.mxu0 %v9726_v20  ;;  %8089 = vmatprep.subr.bf16.mxu1 %v9729_v21  ;;  %v9793_v19 = vld [vmem:[%s11404_s15 + $0x720] ss:$8 sps:$4 sm:$0xff]   ;;  %v9798_v20 = vld [vmem:[%s11404_s15 + $0x614] ss:$8 sps:$4 sm:$0xff]  }
 0x1c9   : > { %v9801_v21 = vld [vmem:[%s11404_s15 + $0x714] ss:$8 sps:$4 sm:$0xff]  }
 0x1cb   : > { %8037 = vmatpush2.bf16.msra.mxu0 %v9724_v22  ;;  %8090 = vmatpush2.bf16.msra.mxu1 %v9727_v23  ;;  %v9796_v22 = vld [vmem:[%s11404_s15 + $0x610] ss:$8 sps:$4 sm:$0xff]  }
 0x1cc   : > { %8038 = vmatprep.subr.bf16.mxu0 %v9732_v24  ;;  %8091 = vmatprep.subr.bf16.mxu1 %v9735_v25  ;;  %v9799_v23 = vld [vmem:[%s11404_s15 + $0x710] ss:$8 sps:$4 sm:$0xff]   ;;  %v9804_v24 = vld [vmem:[%s11404_s15 + $0x604] ss:$8 sps:$4 sm:$0xff]  }
 0x1cd   : > { %v9807_v25 = vld [vmem:[%s11404_s15 + $0x704] ss:$8 sps:$4 sm:$0xff]  }
 0x1cf   : > { %8039 = vmatpush2.bf16.msra.mxu0 %v9730_v26  ;;  %8092 = vmatpush2.bf16.msra.mxu1 %v9733_v27  ;;  %v9802_v26 = vld [vmem:[%s11404_s15 + $0x600] ss:$8 sps:$4 sm:$0xff]  }
 0x1d0   : > { %8040 = vmatprep.subr.bf16.mxu0 %v9738_v28  ;;  %8093 = vmatprep.subr.bf16.mxu1 %v9741_v29  ;;  %v9805_v27 = vld [vmem:[%s11404_s15 + $0x700] ss:$8 sps:$4 sm:$0xff]   ;;  %v9810_v28 = vld [vmem:[%s11404_s15 + $0x6f4] ss:$8 sps:$4 sm:$0xff]  }
 0x1d1   : > { %v9813_v29 = vld [vmem:[%s11404_s15 + $0x7f4] ss:$8 sps:$4 sm:$0xff]  }
 0x1d3   : > { %8041 = vmatpush2.bf16.msra.mxu0 %v9736_v0  ;;  %8094 = vmatpush2.bf16.msra.mxu1 %v9739_v1  ;;  %v9808_v0 = vld [vmem:[%s11404_s15 + $0x6f0] ss:$8 sps:$4 sm:$0xff]  }
 0x1d4   : > { %8042 = vmatprep.subr.bf16.mxu0 %v9744_v3  ;;  %8095 = vmatprep.subr.bf16.mxu1 %v9747_v2  ;;  %v9811_v1 = vld [vmem:[%s11404_s15 + $0x7f0] ss:$8 sps:$4 sm:$0xff]   ;;  %v9816_v3 = vld [vmem:[%s11404_s15 + $0x6e4] ss:$8 sps:$4 sm:$0xff]  }
 0x1d5   : > { %v9819_v2 = vld [vmem:[%s11404_s15 + $0x7e4] ss:$8 sps:$4 sm:$0xff]  }
 0x1d7   : > { %8043 = vmatpush2.bf16.msra.mxu0 %v9742_v5  ;;  %8096 = vmatpush2.bf16.msra.mxu1 %v9745_v6  ;;  %v9814_v5 = vld [vmem:[%s11404_s15 + $0x6e0] ss:$8 sps:$4 sm:$0xff]  }
 0x1d8   : > { %8044 = vmatprep.subr.bf16.mxu0 %v9750_v30  ;;  %8097 = vmatprep.subr.bf16.mxu1 %v9753_v31  ;;  %v9817_v6 = vld [vmem:[%s11404_s15 + $0x7e0] ss:$8 sps:$4 sm:$0xff]   ;;  %v9822_v30 = vld [vmem:[%s11404_s15 + $0x6d4] ss:$8 sps:$4 sm:$0xff]  }
 0x1d9   : > { %v9825_v31 = vld [vmem:[%s11404_s15 + $0x7d4] ss:$8 sps:$4 sm:$0xff]  }
 0x1db   : > { %8045 = vmatpush2.bf16.msra.mxu0 %v9748_v32  ;;  %8098 = vmatpush2.bf16.msra.mxu1 %v9751_v33  ;;  %v9820_v32 = vld [vmem:[%s11404_s15 + $0x6d0] ss:$8 sps:$4 sm:$0xff]  }
 0x1dc   : > { %8046 = vmatprep.subr.bf16.mxu0 %v9756_v34  ;;  %8099 = vmatprep.subr.bf16.mxu1 %v9759_v35  ;;  %v9823_v33 = vld [vmem:[%s11404_s15 + $0x7d0] ss:$8 sps:$4 sm:$0xff]   ;;  %v9828_v34 = vld [vmem:[%s11404_s15 + $0x6c4] ss:$8 sps:$4 sm:$0xff]  }
 0x1dd   : > { %v9831_v35 = vld [vmem:[%s11404_s15 + $0x7c4] ss:$8 sps:$4 sm:$0xff]  }
 0x1df   : > { %8047 = vmatpush2.bf16.msra.mxu0 %v9754_v36  ;;  %8100 = vmatpush2.bf16.msra.mxu1 %v9757_v37  ;;  %v9826_v36 = vld [vmem:[%s11404_s15 + $0x6c0] ss:$8 sps:$4 sm:$0xff]  }
 0x1e0   : > { %8122 = vmatprep.subr.bf16.mxu0 %v9762_v38  ;;  %8175 = vmatprep.subr.bf16.mxu1 %v9765_v39  ;;  %v9829_v37 = vld [vmem:[%s11404_s15 + $0x7c0] ss:$8 sps:$4 sm:$0xff]   ;;  %v9834_v38 = vld [vmem:[%s11404_s15 + $0x6b4] ss:$8 sps:$4 sm:$0xff]  }
 0x1e1   : > { %v9837_v39 = vld [vmem:[%s11404_s15 + $0x7b4] ss:$8 sps:$4 sm:$0xff]  }
 0x1e2   : > { %8049 = vmatmul.mubr.bf16.vlgmr.msra.gmra.mxu0 %v8849_v47  ;;  %8102 = vmatmul.mubr.bf16.vlgmr.msra.gmra.mxu1 %v8851_v48  ;;  %v9843_v47 = vld [vmem:[%s11404_s15 + $0x7a4] ss:$8 sps:$4 sm:$0xff]   ;;  %v9838_v48 = vld [vmem:[%s11404_s15 + $0x6a0] ss:$8 sps:$4 sm:$0xff]  }
 0x1e3   : > { %8123 = vmatpush1.bf16.msra.mxu0 %v9760_v43  ;;  %8176 = vmatpush1.bf16.msra.mxu1 %v9763_v51  ;;  %v9835_v43 = vld [vmem:[%s11404_s15 + $0x7b0] ss:$8 sps:$4 sm:$0xff]   ;;  %v9849_v51 = vld [vmem:[%s11404_s15 + $0x794] ss:$8 sps:$4 sm:$0xff]  }
 0x1e4   : > { %8124 = vmatprep.subr.bf16.mxu0 %v9768_v52  ;;  %8177 = vmatprep.subr.bf16.mxu1 %v9771_v40  ;;  %v9844_v52 = vld [vmem:[%s11404_s15 + $0x690] ss:$8 sps:$4 sm:$0xff]  }
 0x1e5   : > { %8058 = vmatprep.mubr.bf16.mxu0 %v8882_v41  ;;  %8111 = vmatprep.mubr.bf16.mxu1 %v8884_v44  ;;  %v9847_v40 = vld [vmem:[%s11404_s15 + $0x790] ss:$8 sps:$4 sm:$0xff]   ;;  %v9852_v41 = vld [vmem:[%s11404_s15 + $0x684] ss:$8 sps:$4 sm:$0xff]  }
 0x1e6   : > { %v9855_v44 = vld [vmem:[%s11404_s15 + $0x784] ss:$8 sps:$4 sm:$0xff]  }
 0x1e7   : > { %8125 = vmatpush1.bf16.msra.mxu0 %v9766_v45  ;;  %8178 = vmatpush1.bf16.msra.mxu1 %v9769_v53  ;;  %v9850_v45 = vld [vmem:[%s11404_s15 + $0x680] ss:$8 sps:$4 sm:$0xff]  }
 0x1e8   : > { %8126 = vmatprep.subr.bf16.mxu0 %v9774_v54  ;;  %8179 = vmatprep.subr.bf16.mxu1 %v9777_v55  ;;  %v9853_v53 = vld [vmem:[%s11404_s15 + $0x780] ss:$8 sps:$4 sm:$0xff]   ;;  %v9858_v54 = vld [vmem:[%s11404_s15 + $0x874] ss:$8 sps:$4 sm:$0xff]  }
 0x1e9   : > { %v9861_v55 = vld [vmem:[%s11404_s15 + $0x974] ss:$8 sps:$4 sm:$0xff]  }
 0x1ea   : > { %8059 = vmatmul.mubr.bf16.gmra.mxu0 %v8881_v59  ;;  %8112 = vmatmul.mubr.bf16.gmra.mxu1 %v8883_v60  ;;  %v9856_v59 = vld [vmem:[%s11404_s15 + $0x870] ss:$8 sps:$4 sm:$0xff]  }
 0x1eb   : > { %8127 = vmatpush1.bf16.msra.mxu0 %v9772_v57  ;;  %8180 = vmatpush1.bf16.msra.mxu1 %v9775_v63  ;;  %v4386_v57 = vld [vmem:[%s12498_s0 + $0x130] sm:$0xff]  ;;  %v8853_v63 = vcombine.low %v11709_v56, %v11715_v58  ;;  %v9867_v56 = vld [vmem:[%s11404_s15 + $0x964] ss:$8 sps:$4 sm:$0xff]  }
 0x1ec   : > { %8128 = vmatprep.subr.bf16.mxu0 %v9780_v4  ;;  %8181 = vmatprep.subr.bf16.mxu1 %v9783_v7  ;;  %v4402_v60 = vld [vmem:[%s12498_s0 + $0x1b0] sm:$0xff]  ;;  %v8855_v4 = vcombine.low %v11720_v61, %v11725_v62  ;;  %v4387_v7 = vld [vmem:[%s12498_s0 + $0x138] sm:$0xff] }
 0x1ed   : > { %8154 = vmatprep.mubr.bf16.mxu0 %v8854_v8  ;;  %8207 = vmatprep.mubr.bf16.mxu1 %v8856_v9  ;;  %v4403_v8 = vld [vmem:[%s12498_s0 + $0x1b8] sm:$0xff]  ;;  %v8886_v58 = vcombine.high %v4386_v57, %v4402_v60 }
 0x1ee   : > { %v9859_v9 = vld [vmem:[%s11404_s15 + $0x970] ss:$8 sps:$4 sm:$0xff]   ;;  %v8888_v61 = vcombine.high %v4387_v7, %v4403_v8 }
 0x1ef   : > { %8129 = vmatpush1.bf16.msra.mxu0 %v9778_v10  ;;  %8182 = vmatpush1.bf16.msra.mxu1 %v9781_v11  ;;  %v9864_v10 = vld [vmem:[%s11404_s15 + $0x864] ss:$8 sps:$4 sm:$0xff]  }
 0x1f0   : > { %8130 = vmatprep.subr.bf16.mxu0 %v9786_v12  ;;  %8183 = vmatprep.subr.bf16.mxu1 %v9789_v13  ;;  %v9862_v12 = vld [vmem:[%s11404_s15 + $0x860] ss:$8 sps:$4 sm:$0xff]  }
 0x1f1   : > { %v9865_v13 = vld [vmem:[%s11404_s15 + $0x960] ss:$8 sps:$4 sm:$0xff]  }
 0x1f3   : > { %8131 = vmatpush1.bf16.msra.mxu0 %v9784_v14  ;;  %8184 = vmatpush1.bf16.msra.mxu1 %v9787_v15  ;;  %v9870_v15 = vld [vmem:[%s11404_s15 + $0x854] ss:$8 sps:$4 sm:$0xff]  }
 0x1f4   : > { %8132 = vmatprep.subr.bf16.mxu0 %v9792_v16  ;;  %8185 = vmatprep.subr.bf16.mxu1 %v9795_v17  ;;  %v9873_v16 = vld [vmem:[%s11404_s15 + $0x954] ss:$8 sps:$4 sm:$0xff]  }
 0x1f7   : > { %8133 = vmatpush1.bf16.msra.mxu0 %v9790_v18  ;;  %8186 = vmatpush1.bf16.msra.mxu1 %v9793_v19  ;;  %v11815_v19 = vld [vmem:[%s12498_s0 + $0x40] sm:$0xff] }
 0x1f8   : > { %8134 = vmatprep.subr.bf16.mxu0 %v9798_v20  ;;  %8187 = vmatprep.subr.bf16.mxu1 %v9801_v21  ;;  %v9868_v21 = vld [vmem:[%s11404_s15 + $0x850] ss:$8 sps:$4 sm:$0xff]  }
 0x1fb   : > { %8135 = vmatpush1.bf16.msra.mxu0 %v9796_v22  ;;  %8188 = vmatpush1.bf16.msra.mxu1 %v9799_v23  ;;  %v11823_v22 = vld [vmem:[%s12498_s0 + $0xc0] sm:$0xff] }
 0x1fc   : > { %8136 = vmatprep.subr.bf16.mxu0 %v9804_v24  ;;  %8189 = vmatprep.subr.bf16.mxu1 %v9807_v25  ;;  %v8885_v25 = vcombine.low %v4386_v57, %v4402_v60  ;;  %v9892_v57 = vld [vmem:[%s11404_s15 + $0x810] ss:$8 sps:$4 sm:$0xff]   ;;  %v9900_v60 = vld [vmem:[%s11404_s15 + $0x804] ss:$8 sps:$4 sm:$0xff]  }
 0x1ff   : > { %8137 = vmatpush1.bf16.msra.mxu0 %v9802_v26  ;;  %8190 = vmatpush1.bf16.msra.mxu1 %v9805_v27  ;;  %v8887_v26 = vcombine.low %v4387_v7, %v4403_v8  ;;  %v11828_v27 = vld [vmem:[%s12498_s0 + $0x48] sm:$0xff]  ;;  %v9906_v8 = vld [vmem:[%s11404_s15 + $0x8f4] ss:$8 sps:$4 sm:$0xff]  }
 0x200   : > { %8138 = vmatprep.subr.bf16.mxu0 %v9810_v28  ;;  %8191 = vmatprep.subr.bf16.mxu1 %v9813_v29  ;;  %v11833_v28 = vld [vmem:[%s12498_s0 + $0xc8] sm:$0xff] }
 0x201   : > { %v9901_v7 = vld [vmem:[%s11404_s15 + $0x900] ss:$8 sps:$4 sm:$0xff]  }
 0x203   : > { %8139 = vmatpush2.bf16.msra.mxu0 %v9808_v0  ;;  %8192 = vmatpush2.bf16.msra.mxu1 %v9811_v1  ;;  %v9871_v0 = vld [vmem:[%s11404_s15 + $0x950] ss:$8 sps:$4 sm:$0xff]   ;;  %v9876_v1 = vld [vmem:[%s11404_s15 + $0x844] ss:$8 sps:$4 sm:$0xff]  }
 0x204   : > { %8140 = vmatprep.subr.bf16.mxu0 %v9816_v3  ;;  %8193 = vmatprep.subr.bf16.mxu1 %v9819_v2 }
 0x207   : > { %8141 = vmatpush2.bf16.msra.mxu0 %v9814_v5  ;;  %8194 = vmatpush2.bf16.msra.mxu1 %v9817_v6  ;;  %v9879_v5 = vld [vmem:[%s11404_s15 + $0x944] ss:$8 sps:$4 sm:$0xff]  }
 0x208   : > { %8142 = vmatprep.subr.bf16.mxu0 %v9822_v30  ;;  %8195 = vmatprep.subr.bf16.mxu1 %v9825_v31  ;;  %v8858_v30 = vcombine.high %v11815_v19, %v11823_v22  ;;  %v8860_v31 = vcombine.high %v11828_v27, %v11833_v28 }
 0x20b   : > { %8143 = vmatpush2.bf16.msra.mxu0 %v9820_v32  ;;  %8196 = vmatpush2.bf16.msra.mxu1 %v9823_v33  ;;  %v9874_v32 = vld [vmem:[%s11404_s15 + $0x840] ss:$8 sps:$4 sm:$0xff]  }
 0x20c   : > { %8144 = vmatprep.subr.bf16.mxu0 %v9828_v34  ;;  %8197 = vmatprep.subr.bf16.mxu1 %v9831_v35  ;;  %v9877_v35 = vld [vmem:[%s11404_s15 + $0x940] ss:$8 sps:$4 sm:$0xff]  }
 0x20f   : > { %8145 = vmatpush2.bf16.msra.mxu0 %v9826_v36  ;;  %8198 = vmatpush2.bf16.msra.mxu1 %v9829_v37  ;;  %v9882_v36 = vld [vmem:[%s11404_s15 + $0x834] ss:$8 sps:$4 sm:$0xff]  }
 0x210   : > { %8146 = vmatprep.subr.bf16.mxu0 %v9834_v38  ;;  %8199 = vmatprep.subr.bf16.mxu1 %v9837_v39  ;;  %v9885_v38 = vld [vmem:[%s11404_s15 + $0x934] ss:$8 sps:$4 sm:$0xff]  }
 0x213   : > { %8147 = vmatpush2.bf16.msra.mxu0 %v9832_v42  ;;  %8200 = vmatpush2.bf16.msra.mxu1 %v9835_v43 }
 0x214   : > { %8148 = vmatprep.subr.bf16.mxu0 %v9840_v46  ;;  %8201 = vmatprep.subr.bf16.mxu1 %v9843_v47 }
 0x217   : > { %8149 = vmatpush2.bf16.msra.mxu0 %v9838_v48  ;;  %8202 = vmatpush2.bf16.msra.mxu1 %v9841_v49  ;;  %v9880_v48 = vld [vmem:[%s11404_s15 + $0x830] ss:$8 sps:$4 sm:$0xff]  }
 0x218   : > { %8150 = vmatprep.subr.bf16.mxu0 %v9846_v50  ;;  %8203 = vmatprep.subr.bf16.mxu1 %v9849_v51  ;;  %v9883_v49 = vld [vmem:[%s11404_s15 + $0x930] ss:$8 sps:$4 sm:$0xff]   ;;  %v9888_v51 = vld [vmem:[%s11404_s15 + $0x824] ss:$8 sps:$4 sm:$0xff]  }
 0x21b   : > { %8151 = vmatpush2.bf16.msra.mxu0 %v9844_v52  ;;  %8204 = vmatpush2.bf16.msra.mxu1 %v9847_v40  ;;  %v9891_v52 = vld [vmem:[%s11404_s15 + $0x924] ss:$8 sps:$4 sm:$0xff]  }
 0x21c   : > { %8152 = vmatprep.subr.bf16.mxu0 %v9852_v41  ;;  %8205 = vmatprep.subr.bf16.mxu1 %v9855_v44 }
 0x21f   : > { %8153 = vmatpush2.bf16.msra.mxu0 %v9850_v45  ;;  %8206 = vmatpush2.bf16.msra.mxu1 %v9853_v53  ;;  %v9886_v45 = vld [vmem:[%s11404_s15 + $0x820] ss:$8 sps:$4 sm:$0xff]  }
 0x220   : > { %8228 = vmatprep.subr.bf16.mxu0 %v9858_v54  ;;  %8281 = vmatprep.subr.bf16.mxu1 %v9861_v55  ;;  %v9889_v53 = vld [vmem:[%s11404_s15 + $0x920] ss:$8 sps:$4 sm:$0xff]   ;;  %v9894_v54 = vld [vmem:[%s11404_s15 + $0x814] ss:$8 sps:$4 sm:$0xff]  }
 0x221   : > { %v9897_v55 = vld [vmem:[%s11404_s15 + $0x914] ss:$8 sps:$4 sm:$0xff]  }
 0x222   : > { %v7838_v62 = vpop.f32.mrf.mxu0  ;;  %v7891_v11 = vpop.f32.mrf.mxu1  ;;  %8155 = vmatmul.mubr.bf16.vlgmr.msra.gmra.mxu0 %v8853_v63  ;;  %8208 = vmatmul.mubr.bf16.vlgmr.msra.gmra.mxu1 %v8855_v4  ;;  %v9903_v63 = vld [vmem:[%s11404_s15 + $0x904] ss:$8 sps:$4 sm:$0xff]   ;;  %v9898_v4 = vld [vmem:[%s11404_s15 + $0x800] ss:$8 sps:$4 sm:$0xff]  }
 0x223   : > { %v11808_v14 = vadd.f32 %v7891_v11, %v7838_v62  ;;  %8229 = vmatpush1.bf16.msra.mxu0 %v9856_v59  ;;  %8282 = vmatpush1.bf16.msra.mxu1 %v9859_v9  ;;  %v9895_v59 = vld [vmem:[%s11404_s15 + $0x910] ss:$8 sps:$4 sm:$0xff]   ;;  %v9909_v9 = vld [vmem:[%s11404_s15 + $0x9f4] ss:$8 sps:$4 sm:$0xff]   ;;  %v9910_v62 = vld [vmem:[%s11404_s15 + $0x8e0] ss:$8 sps:$4 sm:$0xff]  }
 0x224   : > { %v7840_v17 = vpop.f32.mrf.mxu0  ;;  %v7893_v18 = vpop.f32.mrf.mxu1  ;;  %8230 = vmatprep.subr.bf16.mxu0 %v9864_v10  ;;  %8283 = vmatprep.subr.bf16.mxu1 %v9867_v56  ;;  %v9904_v10 = vld [vmem:[%s11404_s15 + $0x8f0] ss:$8 sps:$4 sm:$0xff]   ;;  %v9913_v11 = vld [vmem:[%s11404_s15 + $0x9e0] ss:$8 sps:$4 sm:$0xff]  }
 0x225   : > { %v11817_v20 = vadd.f32 %v7893_v18, %v7840_v17  ;;  %8164 = vmatprep.mubr.bf16.mxu0 %v8886_v58  ;;  %8217 = vmatprep.mubr.bf16.mxu1 %v8888_v61  ;;  %v9907_v56 = vld [vmem:[%s11404_s15 + $0x9f0] ss:$8 sps:$4 sm:$0xff]   ;;  %v9912_v58 = vld [vmem:[%s11404_s15 + $0x8e4] ss:$8 sps:$4 sm:$0xff]  }
 0x226   : > { %v7842_v23 = vpop.f32.mrf.mxu0  ;;  %v7895_v24 = vpop.f32.mrf.mxu1  ;;  %v9915_v61 = vld [vmem:[%s11404_s15 + $0x9e4] ss:$8 sps:$4 sm:$0xff]  }
 0x227   : > { %v11835_v29 = vadd.f32 %v7895_v24, %v7842_v23  ;;  %8231 = vmatpush1.bf16.msra.mxu0 %v9862_v12  ;;  %8284 = vmatpush1.bf16.msra.mxu1 %v9865_v13  ;;  %v9918_v12 = vld [vmem:[%s11404_s15 + $0x8d4] ss:$8 sps:$4 sm:$0xff]   ;;  %v9924_v17 = vld [vmem:[%s11404_s15 + $0x8c4] ss:$8 sps:$4 sm:$0xff]   ;;  %v9925_v23 = vld [vmem:[%s11404_s15 + $0x9c0] ss:$8 sps:$4 sm:$0xff]  }
 0x228   : > { %v7844_v3 = vpop.f32.mrf.mxu0  ;;  %v7897_v2 = vpop.f32.mrf.mxu1  ;;  %8232 = vmatprep.subr.bf16.mxu0 %v9870_v15  ;;  %8285 = vmatprep.subr.bf16.mxu1 %v9873_v16  ;;  %v9921_v13 = vld [vmem:[%s11404_s15 + $0x9d4] ss:$8 sps:$4 sm:$0xff]   ;;  %v9916_v15 = vld [vmem:[%s11404_s15 + $0x8d0] ss:$8 sps:$4 sm:$0xff]   ;;  %v9927_v18 = vld [vmem:[%s11404_s15 + $0x9c4] ss:$8 sps:$4 sm:$0xff]  }
 0x229   : > { %v11840_v6 = vadd.f32 %v7897_v2, %v7844_v3  ;;  %v9919_v16 = vld [vmem:[%s11404_s15 + $0x9d0] ss:$8 sps:$4 sm:$0xff]   ;;  %v9930_v24 = vld [vmem:[%s11404_s15 + $0x8b4] ss:$8 sps:$4 sm:$0xff]   ;;  %v9939_v3 = vld [vmem:[%s11404_s15 + $0x9a4] ss:$8 sps:$4 sm:$0xff]  }
 0x22a   : > { %8165 = vmatmul.mubr.bf16.gmra.mxu0 %v8885_v25  ;;  %8218 = vmatmul.mubr.bf16.gmra.mxu1 %v8887_v26  ;;  %v7848_v33 = vpop.f32.mrf.mxu0  ;;  %v7901_v34 = vpop.f32.mrf.mxu1  ;;  %v9933_v25 = vld [vmem:[%s11404_s15 + $0x9b4] ss:$8 sps:$4 sm:$0xff]   ;;  %v9928_v26 = vld [vmem:[%s11404_s15 + $0x8b0] ss:$8 sps:$4 sm:$0xff]   ;;  %v9934_v2 = vld [vmem:[%s11404_s15 + $0x8a0] ss:$8 sps:$4 sm:$0xff]  }
 0x22b   : > { %8233 = vmatpush1.bf16.msra.mxu0 %v9868_v21  ;;  %8286 = vmatpush1.bf16.msra.mxu1 %v9871_v0  ;;  %v11849_v37 = vadd.f32 %v7901_v34, %v7848_v33  ;;  %v9922_v21 = vld [vmem:[%s11404_s15 + $0x8c0] ss:$8 sps:$4 sm:$0xff]   ;;  %v9931_v0 = vld [vmem:[%s11404_s15 + $0x9b0] ss:$8 sps:$4 sm:$0xff]   ;;  %v9948_v34 = vld [vmem:[%s11404_s15 + $0x884] ss:$8 sps:$4 sm:$0xff]  }
 0x22c   : > { %8234 = vmatprep.subr.bf16.mxu0 %v9876_v1  ;;  %8287 = vmatprep.subr.bf16.mxu1 %v9879_v5  ;;  %v7850_v39 = vpop.f32.mrf.mxu0  ;;  %v7903_v42 = vpop.f32.mrf.mxu1  ;;  %v9936_v1 = vld [vmem:[%s11404_s15 + $0x8a4] ss:$8 sps:$4 sm:$0xff]   ;;  %v9937_v5 = vld [vmem:[%s11404_s15 + $0x9a0] ss:$8 sps:$4 sm:$0xff]   ;;  %v9943_v33 = vld [vmem:[%s11404_s15 + $0x990] ss:$8 sps:$4 sm:$0xff]  }
 0x22d   : > { %v11852_v43 = vadd.f32 %v7903_v42, %v7850_v39  ;;  %8260 = vmatprep.mubr.bf16.mxu0 %v8858_v30  ;;  %8313 = vmatprep.mubr.bf16.mxu1 %v8860_v31  ;;  %v9942_v30 = vld [vmem:[%s11404_s15 + $0x894] ss:$8 sps:$4 sm:$0xff]  }
 0x22e   : > { %v7852_v46 = vpop.f32.mrf.mxu0  ;;  %v7905_v47 = vpop.f32.mrf.mxu1  ;;  %v9945_v31 = vld [vmem:[%s11404_s15 + $0x994] ss:$8 sps:$4 sm:$0xff]  }
 0x22f   : > { %8235 = vmatpush1.bf16.msra.mxu0 %v9874_v32  ;;  %8288 = vmatpush1.bf16.msra.mxu1 %v9877_v35  ;;  %v11856_v50 = vadd.f32 %v7905_v47, %v7852_v46  ;;  %v9940_v32 = vld [vmem:[%s11404_s15 + $0x890] ss:$8 sps:$4 sm:$0xff]   ;;  %v9951_v35 = vld [vmem:[%s11404_s15 + $0x984] ss:$8 sps:$4 sm:$0xff]   ;;  %v9954_v39 = vld [vmem:[%s11404_s15 + $0xa74] ss:$8 sps:$4 sm:$0xff]  }
 0x230   : > { %8236 = vmatprep.subr.bf16.mxu0 %v9882_v36  ;;  %8289 = vmatprep.subr.bf16.mxu1 %v9885_v38  ;;  %v7854_v40 = vpop.f32.mrf.mxu0  ;;  %v7907_v41 = vpop.f32.mrf.mxu1  ;;  %v9946_v36 = vld [vmem:[%s11404_s15 + $0x880] ss:$8 sps:$4 sm:$0xff]   ;;  %v9957_v42 = vld [vmem:[%s11404_s15 + $0xb74] ss:$8 sps:$4 sm:$0xff]   ;;  %v9952_v47 = vld [vmem:[%s11404_s15 + $0xa70] ss:$8 sps:$4 sm:$0xff]  }
 0x231   : > { %v11860_v44 = vadd.f32 %v7907_v41, %v7854_v40  ;;  %v9949_v38 = vld [vmem:[%s11404_s15 + $0x980] ss:$8 sps:$4 sm:$0xff]   ;;  %v9955_v41 = vld [vmem:[%s11404_s15 + $0xb70] ss:$8 sps:$4 sm:$0xff]  }
 0x232   : > { %v4388_v46 = vld [vmem:[%s12498_s0 + $0x140] sm:$0xff]  ;;  %v4405_v40 = vld [vmem:[%s12498_s0 + $0x1c8] sm:$0xff] }
 0x233   : > { %8237 = vmatpush1.bf16.msra.mxu0 %v9880_v48  ;;  %8290 = vmatpush1.bf16.msra.mxu1 %v9883_v49  ;;  %v8857_v48 = vcombine.low %v11815_v19, %v11823_v22  ;;  %v8859_v49 = vcombine.low %v11828_v27, %v11833_v28  ;;  %v9960_v19 = vld [vmem:[%s11404_s15 + $0xa64] ss:$8 sps:$4 sm:$0xff]   ;;  %v9958_v27 = vld [vmem:[%s11404_s15 + $0xa60] ss:$8 sps:$4 sm:$0xff]  }
 0x234   : > { %8238 = vmatprep.subr.bf16.mxu0 %v9888_v51  ;;  %8291 = vmatprep.subr.bf16.mxu1 %v9891_v52  ;;  %v4404_v51 = vld [vmem:[%s12498_s0 + $0x1c0] sm:$0xff]  ;;  %v4389_v52 = vld [vmem:[%s12498_s0 + $0x148] sm:$0xff] }
 0x235   : > { %v9963_v22 = vld [vmem:[%s11404_s15 + $0xb64] ss:$8 sps:$4 sm:$0xff]   ;;  %v9961_v28 = vld [vmem:[%s11404_s15 + $0xb60] ss:$8 sps:$4 sm:$0xff]  }
 0x237   : > { %8239 = vmatpush1.bf16.msra.mxu0 %v9886_v45  ;;  %8292 = vmatpush1.bf16.msra.mxu1 %v9889_v53  ;;  %v8890_v45 = vcombine.high %v4388_v46, %v4404_v51  ;;  %v8892_v53 = vcombine.high %v4389_v52, %v4405_v40 }
 0x238   : > { %8240 = vmatprep.subr.bf16.mxu0 %v9894_v54  ;;  %8293 = vmatprep.subr.bf16.mxu1 %v9897_v55 }
 0x23b   : > { %8241 = vmatpush1.bf16.msra.mxu0 %v9892_v57  ;;  %8294 = vmatpush1.bf16.msra.mxu1 %v9895_v59 }
 0x23c   : > { %8242 = vmatprep.subr.bf16.mxu0 %v9900_v60  ;;  %8295 = vmatprep.subr.bf16.mxu1 %v9903_v63  ;;  %v9966_v63 = vld [vmem:[%s11404_s15 + $0xa54] ss:$8 sps:$4 sm:$0xff]  }
 0x23f   : > { %8243 = vmatpush1.bf16.msra.mxu0 %v9898_v4  ;;  %8296 = vmatpush1.bf16.msra.mxu1 %v9901_v7  ;;  %v9969_v4 = vld [vmem:[%s11404_s15 + $0xb54] ss:$8 sps:$4 sm:$0xff]  }
 0x240   : > { %8244 = vmatprep.subr.bf16.mxu0 %v9906_v8  ;;  %8297 = vmatprep.subr.bf16.mxu1 %v9909_v9  ;;  %v9964_v9 = vld [vmem:[%s11404_s15 + $0xa50] ss:$8 sps:$4 sm:$0xff]  }
 0x243   : > { %8245 = vmatpush2.bf16.msra.mxu0 %v9904_v10  ;;  %8298 = vmatpush2.bf16.msra.mxu1 %v9907_v56  ;;  %v9967_v10 = vld [vmem:[%s11404_s15 + $0xb50] ss:$8 sps:$4 sm:$0xff]  }
 0x244   : > { %8246 = vmatprep.subr.bf16.mxu0 %v9912_v58  ;;  %8299 = vmatprep.subr.bf16.mxu1 %v9915_v61  ;;  %v11944_v56 = vld [vmem:[%s12498_s0 + $0xd0] sm:$0xff] }
 0x247   : > { %8247 = vmatpush2.bf16.msra.mxu0 %v9910_v62  ;;  %8300 = vmatpush2.bf16.msra.mxu1 %v9913_v11  ;;  %v8889_v62 = vcombine.low %v4388_v46, %v4404_v51  ;;  %v11949_v11 = vld [vmem:[%s12498_s0 + $0x58] sm:$0xff] }
 0x248   : > { %8248 = vmatprep.subr.bf16.mxu0 %v9918_v12  ;;  %8301 = vmatprep.subr.bf16.mxu1 %v9921_v13  ;;  %v11954_v12 = vld [vmem:[%s12498_s0 + $0xd8] sm:$0xff] }
 0x24b   : > { %8249 = vmatpush2.bf16.msra.mxu0 %v9916_v15  ;;  %8302 = vmatpush2.bf16.msra.mxu1 %v9919_v16 }
 0x24c   : > { %8250 = vmatprep.subr.bf16.mxu0 %v9924_v17  ;;  %8303 = vmatprep.subr.bf16.mxu1 %v9927_v18  ;;  %v9972_v18 = vld [vmem:[%s11404_s15 + $0xa44] ss:$8 sps:$4 sm:$0xff]  }
 0x24f   : > { %8251 = vmatpush2.bf16.msra.mxu0 %v9922_v21  ;;  %8304 = vmatpush2.bf16.msra.mxu1 %v9925_v23  ;;  %v9975_v21 = vld [vmem:[%s11404_s15 + $0xb44] ss:$8 sps:$4 sm:$0xff]  }
 0x250   : > { %8252 = vmatprep.subr.bf16.mxu0 %v9930_v24  ;;  %8305 = vmatprep.subr.bf16.mxu1 %v9933_v25  ;;  %v9970_v25 = vld [vmem:[%s11404_s15 + $0xa40] ss:$8 sps:$4 sm:$0xff]  }
 0x253   : > { %8253 = vmatpush2.bf16.msra.mxu0 %v9928_v26  ;;  %8306 = vmatpush2.bf16.msra.mxu1 %v9931_v0  ;;  %v9973_v26 = vld [vmem:[%s11404_s15 + $0xb40] ss:$8 sps:$4 sm:$0xff]  }
 0x254   : > { %8254 = vmatprep.subr.bf16.mxu0 %v9936_v1  ;;  %8307 = vmatprep.subr.bf16.mxu1 %v9939_v3 }
 0x257   : > { %8255 = vmatpush2.bf16.msra.mxu0 %v9934_v2  ;;  %8308 = vmatpush2.bf16.msra.mxu1 %v9937_v5 }
 0x258   : > { %8256 = vmatprep.subr.bf16.mxu0 %v9942_v30  ;;  %8309 = vmatprep.subr.bf16.mxu1 %v9945_v31  ;;  %v9978_v31 = vld [vmem:[%s11404_s15 + $0xa34] ss:$8 sps:$4 sm:$0xff]  }
 0x25b   : > { %8257 = vmatpush2.bf16.msra.mxu0 %v9940_v32  ;;  %8310 = vmatpush2.bf16.msra.mxu1 %v9943_v33  ;;  %v9981_v32 = vld [vmem:[%s11404_s15 + $0xb34] ss:$8 sps:$4 sm:$0xff]  }
 0x25c   : > { %8258 = vmatprep.subr.bf16.mxu0 %v9948_v34  ;;  %8311 = vmatprep.subr.bf16.mxu1 %v9951_v35  ;;  %v9976_v35 = vld [vmem:[%s11404_s15 + $0xa30] ss:$8 sps:$4 sm:$0xff]  }
 0x25f   : > { %8259 = vmatpush2.bf16.msra.mxu0 %v9946_v36  ;;  %8312 = vmatpush2.bf16.msra.mxu1 %v9949_v38  ;;  %v9979_v36 = vld [vmem:[%s11404_s15 + $0xb30] ss:$8 sps:$4 sm:$0xff]  }
 0x260   : > { %8334 = vmatprep.subr.bf16.mxu0 %v9954_v39  ;;  %8387 = vmatprep.subr.bf16.mxu1 %v9957_v42 }
 0x262   : > { %v7944_v54 = vpop.f32.mrf.mxu0  ;;  %v7997_v55 = vpop.f32.mrf.mxu1  ;;  %8261 = vmatmul.mubr.bf16.vlgmr.msra.gmra.mxu0 %v8857_v48  ;;  %8314 = vmatmul.mubr.bf16.vlgmr.msra.gmra.mxu1 %v8859_v49  ;;  %v9987_v48 = vld [vmem:[%s11404_s15 + $0xb24] ss:$8 sps:$4 sm:$0xff]  }
 0x263   : > { %v7945_v57 = vadd.f32 %v7944_v54, %v11808_v14  ;;  %8335 = vmatpush1.bf16.msra.mxu0 %v9952_v47  ;;  %8388 = vmatpush1.bf16.msra.mxu1 %v9955_v41  ;;  %v11939_v14 = vld [vmem:[%s12498_s0 + $0x50] sm:$0xff]  ;;  %v9984_v47 = vld [vmem:[%s11404_s15 + $0xa24] ss:$8 sps:$4 sm:$0xff]  }
 0x264   : > { %v7946_v59 = vpop.f32.mrf.mxu0  ;;  %v7999_v60 = vpop.f32.mrf.mxu1  ;;  %8336 = vmatprep.subr.bf16.mxu0 %v9960_v19  ;;  %8389 = vmatprep.subr.bf16.mxu1 %v9963_v22  ;;  %v8862_v0 = vcombine.high %v11939_v14, %v11944_v56  ;;  %v9990_v41 = vld [vmem:[%s11404_s15 + $0xa14] ss:$8 sps:$4 sm:$0xff]   ;;  %v9991_v22 = vld [vmem:[%s11404_s15 + $0xb10] ss:$8 sps:$4 sm:$0xff]  }
 0x265   : > { %v11931_v7 = vadd.f32 %v7997_v55, %v7945_v57  ;;  %v7947_v8 = vadd.f32 %v7946_v59, %v11817_v20  ;;  %8270 = vmatprep.mubr.bf16.mxu0 %v8890_v45  ;;  %8323 = vmatprep.mubr.bf16.mxu1 %v8892_v53  ;;  %v8891_v20 = vcombine.low %v4389_v52, %v4405_v40  ;;  %v9982_v52 = vld [vmem:[%s11404_s15 + $0xa20] ss:$8 sps:$4 sm:$0xff]   ;;  %v9993_v19 = vld [vmem:[%s11404_s15 + $0xb14] ss:$8 sps:$4 sm:$0xff]   ;;  %v10000_v57 = vld [vmem:[%s11404_s15 + $0xaf0] ss:$8 sps:$4 sm:$0xff]  }
 0x266   : > { %v7948_v58 = vpop.f32.mrf.mxu0  ;;  %v8001_v61 = vpop.f32.mrf.mxu1  ;;  %v9985_v40 = vld [vmem:[%s11404_s15 + $0xb20] ss:$8 sps:$4 sm:$0xff]   ;;  %v10002_v54 = vld [vmem:[%s11404_s15 + $0xaf4] ss:$8 sps:$4 sm:$0xff]   ;;  %v10003_v59 = vld [vmem:[%s11404_s15 + $0xbf0] ss:$8 sps:$4 sm:$0xff]  }
 0x267   : > { %v11956_v13 = vadd.f32 %v7999_v60, %v7947_v8  ;;  %v7949_v15 = vadd.f32 %v7948_v58, %v11835_v29  ;;  %8337 = vmatpush1.bf16.msra.mxu0 %v9958_v27  ;;  %8390 = vmatpush1.bf16.msra.mxu1 %v9961_v28  ;;  %v8864_v29 = vcombine.high %v11949_v11, %v11954_v12  ;;  %v9996_v27 = vld [vmem:[%s11404_s15 + $0xa04] ss:$8 sps:$4 sm:$0xff]   ;;  %v9994_v45 = vld [vmem:[%s11404_s15 + $0xa00] ss:$8 sps:$4 sm:$0xff]   ;;  %v10005_v55 = vld [vmem:[%s11404_s15 + $0xbf4] ss:$8 sps:$4 sm:$0xff]  }
 0x268   : > { %v7950_v16 = vpop.f32.mrf.mxu0  ;;  %v8003_v17 = vpop.f32.mrf.mxu1  ;;  %8338 = vmatprep.subr.bf16.mxu0 %v9966_v63  ;;  %8391 = vmatprep.subr.bf16.mxu1 %v9969_v4  ;;  %v9999_v28 = vld [vmem:[%s11404_s15 + $0xb04] ss:$8 sps:$4 sm:$0xff]   ;;  %v9997_v53 = vld [vmem:[%s11404_s15 + $0xb00] ss:$8 sps:$4 sm:$0xff]   ;;  %v10012_v58 = vld [vmem:[%s11404_s15 + $0xad0] ss:$8 sps:$4 sm:$0xff]  }
 0x269   : > { %v11961_v23 = vadd.f32 %v8001_v61, %v7949_v15  ;;  %v7951_v24 = vadd.f32 %v7950_v16, %v11840_v6  ;;  %v10008_v60 = vld [vmem:[%s11404_s15 + $0xae4] ss:$8 sps:$4 sm:$0xff]   ;;  %v10006_v4 = vld [vmem:[%s11404_s15 + $0xae0] ss:$8 sps:$4 sm:$0xff]   ;;  %v10015_v61 = vld [vmem:[%s11404_s15 + $0xbd0] ss:$8 sps:$4 sm:$0xff]  }
 0x26a   : > { %v7954_v1 = vpop.f32.mrf.mxu0  ;;  %8271 = vmatmul.mubr.bf16.gmra.mxu0 %v8889_v62  ;;  %v8007_v3 = vpop.f32.mrf.mxu1  ;;  %8324 = vmatmul.mubr.bf16.gmra.mxu1 %v8891_v20  ;;  %v10011_v63 = vld [vmem:[%s11404_s15 + $0xbe4] ss:$8 sps:$4 sm:$0xff]   ;;  %v10009_v8 = vld [vmem:[%s11404_s15 + $0xbe0] ss:$8 sps:$4 sm:$0xff]  }
 0x26b   : > { %v11970_v2 = vadd.f32 %v8003_v17, %v7951_v24  ;;  %v7955_v6 = vadd.f32 %v7954_v1, %v11849_v37  ;;  %8339 = vmatpush1.bf16.msra.mxu0 %v9964_v9  ;;  %8392 = vmatpush1.bf16.msra.mxu1 %v9967_v10  ;;  %v10014_v9 = vld [vmem:[%s11404_s15 + $0xad4] ss:$8 sps:$4 sm:$0xff]   ;;  %v10020_v62 = vld [vmem:[%s11404_s15 + $0xac4] ss:$8 sps:$4 sm:$0xff]   ;;  %v10018_v15 = vld [vmem:[%s11404_s15 + $0xac0] ss:$8 sps:$4 sm:$0xff]  }
 0x26c   : > { %v7956_v5 = vpop.f32.mrf.mxu0  ;;  %v8009_v30 = vpop.f32.mrf.mxu1  ;;  %8340 = vmatprep.subr.bf16.mxu0 %v9972_v18  ;;  %8393 = vmatprep.subr.bf16.mxu1 %v9975_v21  ;;  %v10017_v10 = vld [vmem:[%s11404_s15 + $0xbd4] ss:$8 sps:$4 sm:$0xff]   ;;  %v10023_v20 = vld [vmem:[%s11404_s15 + $0xbc4] ss:$8 sps:$4 sm:$0xff]   ;;  %v10021_v16 = vld [vmem:[%s11404_s15 + $0xbc0] ss:$8 sps:$4 sm:$0xff]  }
 0x26d   : > { %v7957_v33 = vadd.f32 %v7956_v5, %v11852_v43  ;;  %v11976_v34 = vadd.f32 %v8007_v3, %v7955_v6  ;;  %8366 = vmatprep.mubr.bf16.mxu0 %v8862_v0  ;;  %8419 = vmatprep.mubr.bf16.mxu1 %v8864_v29  ;;  %v10026_v17 = vld [vmem:[%s11404_s15 + $0xab4] ss:$8 sps:$4 sm:$0xff]   ;;  %v10024_v21 = vld [vmem:[%s11404_s15 + $0xab0] ss:$8 sps:$4 sm:$0xff]   ;;  %v10030_v0 = vld [vmem:[%s11404_s15 + $0xaa0] ss:$8 sps:$4 sm:$0xff]  }
 0x26e   : > { %v7958_v38 = vpop.f32.mrf.mxu0  ;;  %v8011_v37 = vpop.f32.mrf.mxu1  ;;  %v10029_v18 = vld [vmem:[%s11404_s15 + $0xbb4] ss:$8 sps:$4 sm:$0xff]   ;;  %v10027_v24 = vld [vmem:[%s11404_s15 + $0xbb0] ss:$8 sps:$4 sm:$0xff]   ;;  %v10033_v29 = vld [vmem:[%s11404_s15 + $0xba0] ss:$8 sps:$4 sm:$0xff]  }
 0x26f   : > { %v7959_v39 = vadd.f32 %v7958_v38, %v11856_v50  ;;  %v11981_v42 = vadd.f32 %v8009_v30, %v7957_v33  ;;  %8341 = vmatpush1.bf16.msra.mxu0 %v9970_v25  ;;  %8394 = vmatpush1.bf16.msra.mxu1 %v9973_v26  ;;  %v10032_v25 = vld [vmem:[%s11404_s15 + $0xaa4] ss:$8 sps:$4 sm:$0xff]   ;;  %v10038_v1 = vld [vmem:[%s11404_s15 + $0xa94] ss:$8 sps:$4 sm:$0xff]   ;;  %v10036_v6 = vld [vmem:[%s11404_s15 + $0xa90] ss:$8 sps:$4 sm:$0xff]  }
 0x270   : > { %v7960_v43 = vpop.f32.mrf.mxu0  ;;  %v8013_v46 = vpop.f32.mrf.mxu1  ;;  %8342 = vmatprep.subr.bf16.mxu0 %v9978_v31  ;;  %8395 = vmatprep.subr.bf16.mxu1 %v9981_v32  ;;  %v10035_v26 = vld [vmem:[%s11404_s15 + $0xba4] ss:$8 sps:$4 sm:$0xff]   ;;  %v10041_v3 = vld [vmem:[%s11404_s15 + $0xb94] ss:$8 sps:$4 sm:$0xff]   ;;  %v10039_v5 = vld [vmem:[%s11404_s15 + $0xb90] ss:$8 sps:$4 sm:$0xff]  }
 0x271   : > { %v7961_v49 = vadd.f32 %v7960_v43, %v11860_v44  ;;  %v11986_v51 = vadd.f32 %v8011_v37, %v7959_v39  ;;  %v9988_v44 = vld [vmem:[%s11404_s15 + $0xa10] ss:$8 sps:$4 sm:$0xff]   ;;  %v10044_v30 = vld [vmem:[%s11404_s15 + $0xa84] ss:$8 sps:$4 sm:$0xff]   ;;  %v10042_v32 = vld [vmem:[%s11404_s15 + $0xa80] ss:$8 sps:$4 sm:$0xff]   ;;  %v8861_v37 = vcombine.low %v11939_v14, %v11944_v56  ;;  %v8863_v39 = vcombine.low %v11949_v11, %v11954_v12 }
 0x272   : > { %v10047_v31 = vld [vmem:[%s11404_s15 + $0xb84] ss:$8 sps:$4 sm:$0xff]   ;;  %v10045_v33 = vld [vmem:[%s11404_s15 + $0xb80] ss:$8 sps:$4 sm:$0xff]   ;;  %v4390_v38 = vld [vmem:[%s12498_s0 + $0x150] sm:$0xff] }
 0x273   : > { %v11988_v50 = vadd.f32 %v8013_v46, %v7961_v49  ;;  %8343 = vmatpush1.bf16.msra.mxu0 %v9976_v35  ;;  %8396 = vmatpush1.bf16.msra.mxu1 %v9979_v36  ;;  %v10050_v35 = vld [vmem:[%s11404_s15 + $0xc74] ss:$8 sps:$4 sm:$0xff]   ;;  %v10048_v14 = vld [vmem:[%s11404_s15 + $0xc70] ss:$8 sps:$4 sm:$0xff]   ;;  %v10056_v11 = vld [vmem:[%s11404_s15 + $0xc64] ss:$8 sps:$4 sm:$0xff]  }
 0x274   : > { %8344 = vmatprep.subr.bf16.mxu0 %v9984_v47  ;;  %8397 = vmatprep.subr.bf16.mxu1 %v9987_v48  ;;  %v10053_v36 = vld [vmem:[%s11404_s15 + $0xd74] ss:$8 sps:$4 sm:$0xff]   ;;  %v10051_v56 = vld [vmem:[%s11404_s15 + $0xd70] ss:$8 sps:$4 sm:$0xff]   ;;  %v10059_v12 = vld [vmem:[%s11404_s15 + $0xd64] ss:$8 sps:$4 sm:$0xff]  }
 0x275   : > { %v4406_v43 = vld [vmem:[%s12498_s0 + $0x1d0] sm:$0xff]  ;;  %v4391_v46 = vld [vmem:[%s12498_s0 + $0x158] sm:$0xff] }
 0x276   : > { %v4407_v47 = vld [vmem:[%s12498_s0 + $0x1d8] sm:$0xff]  ;;  %v8894_v48 = vcombine.high %v4390_v38, %v4406_v43 }
 0x277   : > { %8345 = vmatpush1.bf16.msra.mxu0 %v9982_v52  ;;  %8398 = vmatpush1.bf16.msra.mxu1 %v9985_v40  ;;  %v8896_v49 = vcombine.high %v4391_v46, %v4407_v47  ;;  %v10054_v52 = vld [vmem:[%s11404_s15 + $0xc60] ss:$8 sps:$4 sm:$0xff]  }
 0x278   : > { %8346 = vmatprep.subr.bf16.mxu0 %v9990_v41  ;;  %8399 = vmatprep.subr.bf16.mxu1 %v9993_v19  ;;  %v10057_v40 = vld [vmem:[%s11404_s15 + $0xd60] ss:$8 sps:$4 sm:$0xff]   ;;  %v10062_v41 = vld [vmem:[%s11404_s15 + $0xc54] ss:$8 sps:$4 sm:$0xff]  }
 0x279   : > { %v10065_v19 = vld [vmem:[%s11404_s15 + $0xd54] ss:$8 sps:$4 sm:$0xff]  }
 0x27b   : > { %8347 = vmatpush1.bf16.msra.mxu0 %v9988_v44  ;;  %8400 = vmatpush1.bf16.msra.mxu1 %v9991_v22  ;;  %v12061_v44 = vld [vmem:[%s12498_s0 + $0x60] sm:$0xff]  ;;  %v8893_v22 = vcombine.low %v4390_v38, %v4406_v43  ;;  %v10108_v38 = vld [vmem:[%s11404_s15 + $0xcd0] ss:$8 sps:$4 sm:$0xff]  }
 0x27c   : > { %8348 = vmatprep.subr.bf16.mxu0 %v9996_v27  ;;  %8401 = vmatprep.subr.bf16.mxu1 %v9999_v28  ;;  %v8895_v27 = vcombine.low %v4391_v46, %v4407_v47  ;;  %v12066_v28 = vld [vmem:[%s12498_s0 + $0xe0] sm:$0xff] }
 0x27d   : > { %v10119_v43 = vld [vmem:[%s11404_s15 + $0xdc4] ss:$8 sps:$4 sm:$0xff]   ;;  %v10114_v46 = vld [vmem:[%s11404_s15 + $0xcc0] ss:$8 sps:$4 sm:$0xff]  }
 0x27e   : > { %v10117_v47 = vld [vmem:[%s11404_s15 + $0xdc0] ss:$8 sps:$4 sm:$0xff]  }
 0x27f   : > { %8349 = vmatpush1.bf16.msra.mxu0 %v9994_v45  ;;  %8402 = vmatpush1.bf16.msra.mxu1 %v9997_v53  ;;  %v12071_v45 = vld [vmem:[%s12498_s0 + $0x68] sm:$0xff] }
 0x280   : > { %8350 = vmatprep.subr.bf16.mxu0 %v10002_v54  ;;  %8403 = vmatprep.subr.bf16.mxu1 %v10005_v55  ;;  %v12076_v53 = vld [vmem:[%s12498_s0 + $0xe8] sm:$0xff]  ;;  %v10060_v54 = vld [vmem:[%s11404_s15 + $0xc50] ss:$8 sps:$4 sm:$0xff]  }
 0x281   : > { %v10063_v55 = vld [vmem:[%s11404_s15 + $0xd50] ss:$8 sps:$4 sm:$0xff]  }
 0x283   : > { %8351 = vmatpush2.bf16.msra.mxu0 %v10000_v57  ;;  %8404 = vmatpush2.bf16.msra.mxu1 %v10003_v59  ;;  %v10068_v57 = vld [vmem:[%s11404_s15 + $0xc44] ss:$8 sps:$4 sm:$0xff]  }
 0x284   : > { %8352 = vmatprep.subr.bf16.mxu0 %v10008_v60  ;;  %8405 = vmatprep.subr.bf16.mxu1 %v10011_v63  ;;  %v10071_v59 = vld [vmem:[%s11404_s15 + $0xd44] ss:$8 sps:$4 sm:$0xff]   ;;  %v8866_v60 = vcombine.high %v12061_v44, %v12066_v28  ;;  %v8868_v63 = vcombine.high %v12071_v45, %v12076_v53 }
 0x287   : > { %8353 = vmatpush2.bf16.msra.mxu0 %v10006_v4  ;;  %8406 = vmatpush2.bf16.msra.mxu1 %v10009_v8  ;;  %v10066_v4 = vld [vmem:[%s11404_s15 + $0xc40] ss:$8 sps:$4 sm:$0xff]  }
 0x288   : > { %8354 = vmatprep.subr.bf16.mxu0 %v10014_v9  ;;  %8407 = vmatprep.subr.bf16.mxu1 %v10017_v10  ;;  %v10069_v8 = vld [vmem:[%s11404_s15 + $0xd40] ss:$8 sps:$4 sm:$0xff]   ;;  %v10074_v9 = vld [vmem:[%s11404_s15 + $0xc34] ss:$8 sps:$4 sm:$0xff]  }
 0x289   : > { %v10077_v10 = vld [vmem:[%s11404_s15 + $0xd34] ss:$8 sps:$4 sm:$0xff]  }
 0x28b   : > { %8355 = vmatpush2.bf16.msra.mxu0 %v10012_v58  ;;  %8408 = vmatpush2.bf16.msra.mxu1 %v10015_v61  ;;  %v10072_v58 = vld [vmem:[%s11404_s15 + $0xc30] ss:$8 sps:$4 sm:$0xff]  }
 0x28c   : > { %8356 = vmatprep.subr.bf16.mxu0 %v10020_v62  ;;  %8409 = vmatprep.subr.bf16.mxu1 %v10023_v20  ;;  %v10075_v61 = vld [vmem:[%s11404_s15 + $0xd30] ss:$8 sps:$4 sm:$0xff]   ;;  %v10080_v62 = vld [vmem:[%s11404_s15 + $0xc24] ss:$8 sps:$4 sm:$0xff]  }
 0x28d   : > { %v10083_v20 = vld [vmem:[%s11404_s15 + $0xd24] ss:$8 sps:$4 sm:$0xff]  }
 0x28f   : > { %8357 = vmatpush2.bf16.msra.mxu0 %v10018_v15  ;;  %8410 = vmatpush2.bf16.msra.mxu1 %v10021_v16  ;;  %v10078_v15 = vld [vmem:[%s11404_s15 + $0xc20] ss:$8 sps:$4 sm:$0xff]  }
 0x290   : > { %8358 = vmatprep.subr.bf16.mxu0 %v10026_v17  ;;  %8411 = vmatprep.subr.bf16.mxu1 %v10029_v18  ;;  %v10081_v16 = vld [vmem:[%s11404_s15 + $0xd20] ss:$8 sps:$4 sm:$0xff]   ;;  %v10086_v17 = vld [vmem:[%s11404_s15 + $0xc14] ss:$8 sps:$4 sm:$0xff]  }
 0x291   : > { %v10089_v18 = vld [vmem:[%s11404_s15 + $0xd14] ss:$8 sps:$4 sm:$0xff]  }
 0x293   : > { %8359 = vmatpush2.bf16.msra.mxu0 %v10024_v21  ;;  %8412 = vmatpush2.bf16.msra.mxu1 %v10027_v24  ;;  %v10084_v21 = vld [vmem:[%s11404_s15 + $0xc10] ss:$8 sps:$4 sm:$0xff]  }
 0x294   : > { %8360 = vmatprep.subr.bf16.mxu0 %v10032_v25  ;;  %8413 = vmatprep.subr.bf16.mxu1 %v10035_v26  ;;  %v10087_v24 = vld [vmem:[%s11404_s15 + $0xd10] ss:$8 sps:$4 sm:$0xff]   ;;  %v10092_v25 = vld [vmem:[%s11404_s15 + $0xc04] ss:$8 sps:$4 sm:$0xff]  }
 0x295   : > { %v10095_v26 = vld [vmem:[%s11404_s15 + $0xd04] ss:$8 sps:$4 sm:$0xff]  }
 0x297   : > { %8361 = vmatpush2.bf16.msra.mxu0 %v10030_v0  ;;  %8414 = vmatpush2.bf16.msra.mxu1 %v10033_v29  ;;  %v10090_v0 = vld [vmem:[%s11404_s15 + $0xc00] ss:$8 sps:$4 sm:$0xff]  }
 0x298   : > { %8362 = vmatprep.subr.bf16.mxu0 %v10038_v1  ;;  %8415 = vmatprep.subr.bf16.mxu1 %v10041_v3  ;;  %v10093_v29 = vld [vmem:[%s11404_s15 + $0xd00] ss:$8 sps:$4 sm:$0xff]   ;;  %v10098_v1 = vld [vmem:[%s11404_s15 + $0xcf4] ss:$8 sps:$4 sm:$0xff]  }
 0x299   : > { %v10101_v3 = vld [vmem:[%s11404_s15 + $0xdf4] ss:$8 sps:$4 sm:$0xff]  }
 0x29b   : > { %8363 = vmatpush2.bf16.msra.mxu0 %v10036_v6  ;;  %8416 = vmatpush2.bf16.msra.mxu1 %v10039_v5  ;;  %v10096_v6 = vld [vmem:[%s11404_s15 + $0xcf0] ss:$8 sps:$4 sm:$0xff]  }
 0x29c   : > { %8364 = vmatprep.subr.bf16.mxu0 %v10044_v30  ;;  %8417 = vmatprep.subr.bf16.mxu1 %v10047_v31  ;;  %v10099_v5 = vld [vmem:[%s11404_s15 + $0xdf0] ss:$8 sps:$4 sm:$0xff]   ;;  %v10104_v30 = vld [vmem:[%s11404_s15 + $0xce4] ss:$8 sps:$4 sm:$0xff]  }
 0x29d   : > { %v10107_v31 = vld [vmem:[%s11404_s15 + $0xde4] ss:$8 sps:$4 sm:$0xff]  }
 0x29f   : > { %8365 = vmatpush2.bf16.msra.mxu0 %v10042_v32  ;;  %8418 = vmatpush2.bf16.msra.mxu1 %v10045_v33  ;;  %v10102_v32 = vld [vmem:[%s11404_s15 + $0xce0] ss:$8 sps:$4 sm:$0xff]  }
 0x2a0   : > { %8440 = vmatprep.subr.bf16.mxu0 %v10050_v35  ;;  %8493 = vmatprep.subr.bf16.mxu1 %v10053_v36  ;;  %v10105_v33 = vld [vmem:[%s11404_s15 + $0xde0] ss:$8 sps:$4 sm:$0xff]   ;;  %v10110_v35 = vld [vmem:[%s11404_s15 + $0xcd4] ss:$8 sps:$4 sm:$0xff]  }
 0x2a1   : > { %v10113_v36 = vld [vmem:[%s11404_s15 + $0xdd4] ss:$8 sps:$4 sm:$0xff]  }
 0x2a2   : > { %8367 = vmatmul.mubr.bf16.vlgmr.msra.gmra.mxu0 %v8861_v37  ;;  %8420 = vmatmul.mubr.bf16.vlgmr.msra.gmra.mxu1 %v8863_v39  ;;  %v10111_v37 = vld [vmem:[%s11404_s15 + $0xdd0] ss:$8 sps:$4 sm:$0xff]   ;;  %v10116_v39 = vld [vmem:[%s11404_s15 + $0xcc4] ss:$8 sps:$4 sm:$0xff]  }
 0x2a3   : > { %8441 = vmatpush1.bf16.msra.mxu0 %v10048_v14  ;;  %8494 = vmatpush1.bf16.msra.mxu1 %v10051_v56  ;;  %v10122_v14 = vld [vmem:[%s11404_s15 + $0xcb4] ss:$8 sps:$4 sm:$0xff]  }
 0x2a4   : > { %8442 = vmatprep.subr.bf16.mxu0 %v10056_v11  ;;  %8495 = vmatprep.subr.bf16.mxu1 %v10059_v12  ;;  %v10125_v56 = vld [vmem:[%s11404_s15 + $0xdb4] ss:$8 sps:$4 sm:$0xff]   ;;  %v10120_v11 = vld [vmem:[%s11404_s15 + $0xcb0] ss:$8 sps:$4 sm:$0xff]  }
 0x2a5   : > { %8376 = vmatprep.mubr.bf16.mxu0 %v8894_v48  ;;  %8429 = vmatprep.mubr.bf16.mxu1 %v8896_v49  ;;  %v10123_v12 = vld [vmem:[%s11404_s15 + $0xdb0] ss:$8 sps:$4 sm:$0xff]   ;;  %v10128_v48 = vld [vmem:[%s11404_s15 + $0xca4] ss:$8 sps:$4 sm:$0xff]  }
 0x2a6   : > { %v10131_v49 = vld [vmem:[%s11404_s15 + $0xda4] ss:$8 sps:$4 sm:$0xff]  }
 0x2a7   : > { %8443 = vmatpush1.bf16.msra.mxu0 %v10054_v52  ;;  %8496 = vmatpush1.bf16.msra.mxu1 %v10057_v40  ;;  %v10126_v52 = vld [vmem:[%s11404_s15 + $0xca0] ss:$8 sps:$4 sm:$0xff]  }
 0x2a8   : > { %8444 = vmatprep.subr.bf16.mxu0 %v10062_v41  ;;  %8497 = vmatprep.subr.bf16.mxu1 %v10065_v19  ;;  %v10129_v40 = vld [vmem:[%s11404_s15 + $0xda0] ss:$8 sps:$4 sm:$0xff]   ;;  %v10134_v41 = vld [vmem:[%s11404_s15 + $0xc94] ss:$8 sps:$4 sm:$0xff]  }
 0x2a9   : > { %v10137_v19 = vld [vmem:[%s11404_s15 + $0xd94] ss:$8 sps:$4 sm:$0xff]  }
 0x2aa   : > { %8377 = vmatmul.mubr.bf16.gmra.mxu0 %v8893_v22  ;;  %8430 = vmatmul.mubr.bf16.gmra.mxu1 %v8895_v27  ;;  %v10132_v22 = vld [vmem:[%s11404_s15 + $0xc90] ss:$8 sps:$4 sm:$0xff]  }
 0x2ab   : > { %8445 = vmatpush1.bf16.msra.mxu0 %v10060_v54  ;;  %8498 = vmatpush1.bf16.msra.mxu1 %v10063_v55  ;;  %v10135_v27 = vld [vmem:[%s11404_s15 + $0xd90] ss:$8 sps:$4 sm:$0xff]   ;;  %v10140_v54 = vld [vmem:[%s11404_s15 + $0xc84] ss:$8 sps:$4 sm:$0xff]  }
 0x2ac   : > { %8446 = vmatprep.subr.bf16.mxu0 %v10068_v57  ;;  %8499 = vmatprep.subr.bf16.mxu1 %v10071_v59  ;;  %v10143_v55 = vld [vmem:[%s11404_s15 + $0xd84] ss:$8 sps:$4 sm:$0xff]   ;;  %v10138_v57 = vld [vmem:[%s11404_s15 + $0xc80] ss:$8 sps:$4 sm:$0xff]  }
 0x2ad   : > { %8472 = vmatprep.mubr.bf16.mxu0 %v8866_v60  ;;  %8525 = vmatprep.mubr.bf16.mxu1 %v8868_v63  ;;  %v10141_v59 = vld [vmem:[%s11404_s15 + $0xd80] ss:$8 sps:$4 sm:$0xff]   ;;  %v10146_v60 = vld [vmem:[%s11404_s15 + $0xe74] ss:$8 sps:$4 sm:$0xff]  }
 0x2ae   : > { %v10149_v63 = vld [vmem:[%s11404_s15 + $0xf74] ss:$8 sps:$4 sm:$0xff]  }
 0x2af   : > { %8447 = vmatpush1.bf16.msra.mxu0 %v10066_v4  ;;  %8500 = vmatpush1.bf16.msra.mxu1 %v10069_v8  ;;  %v4392_v4 = vld [vmem:[%s12498_s0 + $0x160] sm:$0xff]  ;;  %v8865_v8 = vcombine.low %v12061_v44, %v12066_v28  ;;  %v10144_v44 = vld [vmem:[%s11404_s15 + $0xe70] ss:$8 sps:$4 sm:$0xff]  }
 0x2b0   : > { %8448 = vmatprep.subr.bf16.mxu0 %v10074_v9  ;;  %8501 = vmatprep.subr.bf16.mxu1 %v10077_v10  ;;  %v8867_v9 = vcombine.low %v12071_v45, %v12076_v53  ;;  %v4408_v10 = vld [vmem:[%s12498_s0 + $0x1e0] sm:$0xff]  ;;  %v10147_v28 = vld [vmem:[%s11404_s15 + $0xf70] ss:$8 sps:$4 sm:$0xff]  }
 0x2b1   : > { %v10152_v45 = vld [vmem:[%s11404_s15 + $0xe64] ss:$8 sps:$4 sm:$0xff]  }
 0x2b2   : > { %v10155_v53 = vld [vmem:[%s11404_s15 + $0xf64] ss:$8 sps:$4 sm:$0xff]  }
 0x2b3   : > { %8449 = vmatpush1.bf16.msra.mxu0 %v10072_v58  ;;  %8502 = vmatpush1.bf16.msra.mxu1 %v10075_v61  ;;  %v4393_v58 = vld [vmem:[%s12498_s0 + $0x168] sm:$0xff] }
 0x2b4   : > { %8450 = vmatprep.subr.bf16.mxu0 %v10080_v62  ;;  %8503 = vmatprep.subr.bf16.mxu1 %v10083_v20  ;;  %v4409_v61 = vld [vmem:[%s12498_s0 + $0x1e8] sm:$0xff]  ;;  %v8898_v62 = vcombine.high %v4392_v4, %v4408_v10 }
 0x2b5   : > { %v8900_v20 = vcombine.high %v4393_v58, %v4409_v61 }
 0x2b7   : > { %8451 = vmatpush1.bf16.msra.mxu0 %v10078_v15  ;;  %8504 = vmatpush1.bf16.msra.mxu1 %v10081_v16  ;;  %v10150_v15 = vld [vmem:[%s11404_s15 + $0xe60] ss:$8 sps:$4 sm:$0xff]  }
 0x2b8   : > { %8452 = vmatprep.subr.bf16.mxu0 %v10086_v17  ;;  %8505 = vmatprep.subr.bf16.mxu1 %v10089_v18  ;;  %v10153_v16 = vld [vmem:[%s11404_s15 + $0xf60] ss:$8 sps:$4 sm:$0xff]   ;;  %v10158_v17 = vld [vmem:[%s11404_s15 + $0xe54] ss:$8 sps:$4 sm:$0xff]  }
 0x2b9   : > { %v10161_v18 = vld [vmem:[%s11404_s15 + $0xf54] ss:$8 sps:$4 sm:$0xff]  }
 0x2bb   : > { %8453 = vmatpush1.bf16.msra.mxu0 %v10084_v21  ;;  %8506 = vmatpush1.bf16.msra.mxu1 %v10087_v24  ;;  %v12165_v21 = vld [vmem:[%s12498_s0 + $0x70] sm:$0xff]  ;;  %v8897_v24 = vcombine.low %v4392_v4, %v4408_v10  ;;  %v10215_v10 = vld [vmem:[%s11404_s15 + $0xfc4] ss:$8 sps:$4 sm:$0xff]  }
 0x2bc   : > { %8454 = vmatprep.subr.bf16.mxu0 %v10092_v25  ;;  %8507 = vmatprep.subr.bf16.mxu1 %v10095_v26  ;;  %v8899_v25 = vcombine.low %v4393_v58, %v4409_v61  ;;  %v12170_v26 = vld [vmem:[%s12498_s0 + $0xf0] sm:$0xff]  ;;  %v10210_v58 = vld [vmem:[%s11404_s15 + $0xec0] ss:$8 sps:$4 sm:$0xff]  }
 0x2bd   : > { %v10204_v4 = vld [vmem:[%s11404_s15 + $0xed0] ss:$8 sps:$4 sm:$0xff]   ;;  %v10213_v61 = vld [vmem:[%s11404_s15 + $0xfc0] ss:$8 sps:$4 sm:$0xff]  }
 0x2bf   : > { %8455 = vmatpush1.bf16.msra.mxu0 %v10090_v0  ;;  %8508 = vmatpush1.bf16.msra.mxu1 %v10093_v29  ;;  %v12175_v0 = vld [vmem:[%s12498_s0 + $0x78] sm:$0xff] }
 0x2c0   : > { %8456 = vmatprep.subr.bf16.mxu0 %v10098_v1  ;;  %8509 = vmatprep.subr.bf16.mxu1 %v10101_v3  ;;  %v12180_v29 = vld [vmem:[%s12498_s0 + $0xf8] sm:$0xff] }
 0x2c1   : > { %v10156_v1 = vld [vmem:[%s11404_s15 + $0xe50] ss:$8 sps:$4 sm:$0xff]  }
 0x2c2   : > { %v10159_v3 = vld [vmem:[%s11404_s15 + $0xf50] ss:$8 sps:$4 sm:$0xff]  }
 0x2c3   : > { %8457 = vmatpush2.bf16.msra.mxu0 %v10096_v6  ;;  %8510 = vmatpush2.bf16.msra.mxu1 %v10099_v5  ;;  %v10164_v6 = vld [vmem:[%s11404_s15 + $0xe44] ss:$8 sps:$4 sm:$0xff]  }
 0x2c4   : > { %8458 = vmatprep.subr.bf16.mxu0 %v10104_v30  ;;  %8511 = vmatprep.subr.bf16.mxu1 %v10107_v31  ;;  %v10167_v5 = vld [vmem:[%s11404_s15 + $0xf44] ss:$8 sps:$4 sm:$0xff]   ;;  %v8870_v30 = vcombine.high %v12165_v21, %v12170_v26  ;;  %v8872_v31 = vcombine.high %v12175_v0, %v12180_v29 }
 0x2c7   : > { %8459 = vmatpush2.bf16.msra.mxu0 %v10102_v32  ;;  %8512 = vmatpush2.bf16.msra.mxu1 %v10105_v33  ;;  %v10162_v32 = vld [vmem:[%s11404_s15 + $0xe40] ss:$8 sps:$4 sm:$0xff]  }
 0x2c8   : > { %8460 = vmatprep.subr.bf16.mxu0 %v10110_v35  ;;  %8513 = vmatprep.subr.bf16.mxu1 %v10113_v36  ;;  %v10165_v33 = vld [vmem:[%s11404_s15 + $0xf40] ss:$8 sps:$4 sm:$0xff]   ;;  %v10170_v35 = vld [vmem:[%s11404_s15 + $0xe34] ss:$8 sps:$4 sm:$0xff]  }
 0x2c9   : > { %v10173_v36 = vld [vmem:[%s11404_s15 + $0xf34] ss:$8 sps:$4 sm:$0xff]  }
 0x2cb   : > { %8461 = vmatpush2.bf16.msra.mxu0 %v10108_v38  ;;  %8514 = vmatpush2.bf16.msra.mxu1 %v10111_v37  ;;  %v10168_v38 = vld [vmem:[%s11404_s15 + $0xe30] ss:$8 sps:$4 sm:$0xff]  }
 0x2cc   : > { %8462 = vmatprep.subr.bf16.mxu0 %v10116_v39  ;;  %8515 = vmatprep.subr.bf16.mxu1 %v10119_v43  ;;  %v10171_v37 = vld [vmem:[%s11404_s15 + $0xf30] ss:$8 sps:$4 sm:$0xff]   ;;  %v10176_v39 = vld [vmem:[%s11404_s15 + $0xe24] ss:$8 sps:$4 sm:$0xff]  }
 0x2cd   : > { %v10179_v43 = vld [vmem:[%s11404_s15 + $0xf24] ss:$8 sps:$4 sm:$0xff]  }
 0x2cf   : > { %8463 = vmatpush2.bf16.msra.mxu0 %v10114_v46  ;;  %8516 = vmatpush2.bf16.msra.mxu1 %v10117_v47  ;;  %v10174_v46 = vld [vmem:[%s11404_s15 + $0xe20] ss:$8 sps:$4 sm:$0xff]  }
 0x2d0   : > { %8464 = vmatprep.subr.bf16.mxu0 %v10122_v14  ;;  %8517 = vmatprep.subr.bf16.mxu1 %v10125_v56  ;;  %v10177_v47 = vld [vmem:[%s11404_s15 + $0xf20] ss:$8 sps:$4 sm:$0xff]   ;;  %v10182_v14 = vld [vmem:[%s11404_s15 + $0xe14] ss:$8 sps:$4 sm:$0xff]  }
 0x2d1   : > { %v10185_v56 = vld [vmem:[%s11404_s15 + $0xf14] ss:$8 sps:$4 sm:$0xff]  }
 0x2d3   : > { %8465 = vmatpush2.bf16.msra.mxu0 %v10120_v11  ;;  %8518 = vmatpush2.bf16.msra.mxu1 %v10123_v12  ;;  %v10180_v11 = vld [vmem:[%s11404_s15 + $0xe10] ss:$8 sps:$4 sm:$0xff]  }
 0x2d4   : > { %8466 = vmatprep.subr.bf16.mxu0 %v10128_v48  ;;  %8519 = vmatprep.subr.bf16.mxu1 %v10131_v49  ;;  %v10183_v12 = vld [vmem:[%s11404_s15 + $0xf10] ss:$8 sps:$4 sm:$0xff]   ;;  %v10188_v48 = vld [vmem:[%s11404_s15 + $0xe04] ss:$8 sps:$4 sm:$0xff]  }
 0x2d5   : > { %v10191_v49 = vld [vmem:[%s11404_s15 + $0xf04] ss:$8 sps:$4 sm:$0xff]  }
 0x2d7   : > { %8467 = vmatpush2.bf16.msra.mxu0 %v10126_v52  ;;  %8520 = vmatpush2.bf16.msra.mxu1 %v10129_v40  ;;  %v10186_v52 = vld [vmem:[%s11404_s15 + $0xe00] ss:$8 sps:$4 sm:$0xff]  }
 0x2d8   : > { %8468 = vmatprep.subr.bf16.mxu0 %v10134_v41  ;;  %8521 = vmatprep.subr.bf16.mxu1 %v10137_v19  ;;  %v10189_v40 = vld [vmem:[%s11404_s15 + $0xf00] ss:$8 sps:$4 sm:$0xff]   ;;  %v10194_v41 = vld [vmem:[%s11404_s15 + $0xef4] ss:$8 sps:$4 sm:$0xff]  }
 0x2d9   : > { %v10197_v19 = vld [vmem:[%s11404_s15 + $0xff4] ss:$8 sps:$4 sm:$0xff]  }
 0x2db   : > { %8469 = vmatpush2.bf16.msra.mxu0 %v10132_v22  ;;  %8522 = vmatpush2.bf16.msra.mxu1 %v10135_v27  ;;  %v10192_v22 = vld [vmem:[%s11404_s15 + $0xef0] ss:$8 sps:$4 sm:$0xff]  }
 0x2dc   : > { %8470 = vmatprep.subr.bf16.mxu0 %v10140_v54  ;;  %8523 = vmatprep.subr.bf16.mxu1 %v10143_v55  ;;  %v10195_v27 = vld [vmem:[%s11404_s15 + $0xff0] ss:$8 sps:$4 sm:$0xff]   ;;  %v10200_v54 = vld [vmem:[%s11404_s15 + $0xee4] ss:$8 sps:$4 sm:$0xff]  }
 0x2dd   : > { %v10203_v55 = vld [vmem:[%s11404_s15 + $0xfe4] ss:$8 sps:$4 sm:$0xff]  }
 0x2df   : > { %8471 = vmatpush2.bf16.msra.mxu0 %v10138_v57  ;;  %8524 = vmatpush2.bf16.msra.mxu1 %v10141_v59  ;;  %v10198_v57 = vld [vmem:[%s11404_s15 + $0xee0] ss:$8 sps:$4 sm:$0xff]  }
 0x2e0   : > { %8546 = vmatprep.subr.bf16.mxu0 %v10146_v60  ;;  %8599 = vmatprep.subr.bf16.mxu1 %v10149_v63  ;;  %v10201_v59 = vld [vmem:[%s11404_s15 + $0xfe0] ss:$8 sps:$4 sm:$0xff]   ;;  %v10206_v60 = vld [vmem:[%s11404_s15 + $0xed4] ss:$8 sps:$4 sm:$0xff]  }
 0x2e1   : > { %v10209_v63 = vld [vmem:[%s11404_s15 + $0xfd4] ss:$8 sps:$4 sm:$0xff]  }
 0x2e2   : > { %8473 = vmatmul.mubr.bf16.vlgmr.msra.gmra.mxu0 %v8865_v8  ;;  %8526 = vmatmul.mubr.bf16.vlgmr.msra.gmra.mxu1 %v8867_v9  ;;  %v10207_v8 = vld [vmem:[%s11404_s15 + $0xfd0] ss:$8 sps:$4 sm:$0xff]   ;;  %v10212_v9 = vld [vmem:[%s11404_s15 + $0xec4] ss:$8 sps:$4 sm:$0xff]  }
 0x2e3   : > { %8547 = vmatpush1.bf16.msra.mxu0 %v10144_v44  ;;  %8600 = vmatpush1.bf16.msra.mxu1 %v10147_v28  ;;  %v10218_v44 = vld [vmem:[%s11404_s15 + $0xeb4] ss:$8 sps:$4 sm:$0xff]  }
 0x2e4   : > { %8548 = vmatprep.subr.bf16.mxu0 %v10152_v45  ;;  %8601 = vmatprep.subr.bf16.mxu1 %v10155_v53  ;;  %v10221_v28 = vld [vmem:[%s11404_s15 + $0xfb4] ss:$8 sps:$4 sm:$0xff]   ;;  %v10216_v45 = vld [vmem:[%s11404_s15 + $0xeb0] ss:$8 sps:$4 sm:$0xff]  }
 0x2e5   : > { %8482 = vmatprep.mubr.bf16.mxu0 %v8898_v62  ;;  %8535 = vmatprep.mubr.bf16.mxu1 %v8900_v20  ;;  %v10219_v53 = vld [vmem:[%s11404_s15 + $0xfb0] ss:$8 sps:$4 sm:$0xff]   ;;  %v10224_v62 = vld [vmem:[%s11404_s15 + $0xea4] ss:$8 sps:$4 sm:$0xff]  }
 0x2e6   : > { %v10227_v20 = vld [vmem:[%s11404_s15 + $0xfa4] ss:$8 sps:$4 sm:$0xff]  }
 0x2e7   : > { %8549 = vmatpush1.bf16.msra.mxu0 %v10150_v15  ;;  %8602 = vmatpush1.bf16.msra.mxu1 %v10153_v16  ;;  %v10222_v15 = vld [vmem:[%s11404_s15 + $0xea0] ss:$8 sps:$4 sm:$0xff]  }
 0x2e8   : > { %8550 = vmatprep.subr.bf16.mxu0 %v10158_v17  ;;  %8603 = vmatprep.subr.bf16.mxu1 %v10161_v18  ;;  %v10225_v16 = vld [vmem:[%s11404_s15 + $0xfa0] ss:$8 sps:$4 sm:$0xff]   ;;  %v10230_v17 = vld [vmem:[%s11404_s15 + $0xe94] ss:$8 sps:$4 sm:$0xff]  }
 0x2e9   : > { %v10233_v18 = vld [vmem:[%s11404_s15 + $0xf94] ss:$8 sps:$4 sm:$0xff]  }
 0x2ea   : > { %8483 = vmatmul.mubr.bf16.gmra.mxu0 %v8897_v24  ;;  %8536 = vmatmul.mubr.bf16.gmra.mxu1 %v8899_v25  ;;  %v10228_v24 = vld [vmem:[%s11404_s15 + $0xe90] ss:$8 sps:$4 sm:$0xff]  }
 0x2eb   : > { %8551 = vmatpush1.bf16.msra.mxu0 %v10156_v1  ;;  %8604 = vmatpush1.bf16.msra.mxu1 %v10159_v3  ;;  %v10231_v25 = vld [vmem:[%s11404_s15 + $0xf90] ss:$8 sps:$4 sm:$0xff]   ;;  %v10236_v1 = vld [vmem:[%s11404_s15 + $0xe84] ss:$8 sps:$4 sm:$0xff]  }
 0x2ec   : > { %8552 = vmatprep.subr.bf16.mxu0 %v10164_v6  ;;  %8605 = vmatprep.subr.bf16.mxu1 %v10167_v5  ;;  %v10239_v3 = vld [vmem:[%s11404_s15 + $0xf84] ss:$8 sps:$4 sm:$0xff]   ;;  %v10234_v6 = vld [vmem:[%s11404_s15 + $0xe80] ss:$8 sps:$4 sm:$0xff]  }
 0x2ed   : > { %8578 = vmatprep.mubr.bf16.mxu0 %v8870_v30  ;;  %8631 = vmatprep.mubr.bf16.mxu1 %v8872_v31  ;;  %v10237_v5 = vld [vmem:[%s11404_s15 + $0xf80] ss:$8 sps:$4 sm:$0xff]   ;;  %v4394_v30 = vld [vmem:[%s12498_s0 + $0x170] sm:$0xff]  ;;  %s8840_s15 = sshll.u32 %s4312_s27, 5  ;;  %s9431_s27 = sshll.u32 (%p10330_p6), %s10270_s11, 3 }
 0x2ee   : > { %v4410_v31 = vld [vmem:[%s12498_s0 + $0x1f0] sm:$0xff]  ;;  %s12467_s9 = scalar_lea.vmem [#allocation3], %s8840_s15  ;;  %s8692_s5 = scalar_lea.vmem (%p10330_p6), %s12500_s2, %s9431_s27 }
 0x2ef   : > { %8553 = vmatpush1.bf16.msra.mxu0 %v10162_v32  ;;  %8606 = vmatpush1.bf16.msra.mxu1 %v10165_v33  ;;  %v4395_v32 = vld [vmem:[%s12498_s0 + $0x178] sm:$0xff] }
 0x2f0   : > { %8554 = vmatprep.subr.bf16.mxu0 %v10170_v35  ;;  %8607 = vmatprep.subr.bf16.mxu1 %v10173_v36  ;;  %v4411_v33 = vld [vmem:[%s12498_s0 + $0x1f8] sm:$0xff]  ;;  %v8869_v35 = vcombine.low %v12165_v21, %v12170_v26  ;;  %v8871_v36 = vcombine.low %v12175_v0, %v12180_v29  ;;  %v12262_v26 = vpop.f32.mrf.mxu1 }
 0x2f2   : > { %v12266_v29 = vpop.f32.mrf.mxu1 }
 0x2f3   : > { %8555 = vmatpush1.bf16.msra.mxu0 %v10168_v38  ;;  %8608 = vmatpush1.bf16.msra.mxu1 %v10171_v37  ;;  %v8902_v38 = vcombine.high %v4394_v30, %v4410_v31  ;;  %v8904_v37 = vcombine.high %v4395_v32, %v4411_v33 }
 0x2f4   : > { %8556 = vmatprep.subr.bf16.mxu0 %v10176_v39  ;;  %8609 = vmatprep.subr.bf16.mxu1 %v10179_v43  ;;  %v8901_v39 = vcombine.low %v4394_v30, %v4410_v31  ;;  %v8903_v43 = vcombine.low %v4395_v32, %v4411_v33 }
 0x2f7   : > { %8557 = vmatpush1.bf16.msra.mxu0 %v10174_v46  ;;  %8610 = vmatpush1.bf16.msra.mxu1 %v10177_v47  ;;  %v12256_v46 = vpop.f32.mrf.mxu0 }
 0x2f8   : > { %8558 = vmatprep.subr.bf16.mxu0 %v10182_v14  ;;  %8611 = vmatprep.subr.bf16.mxu1 %v10185_v56  ;;  %v12270_v56 = vpop.f32.mrf.mxu1 }
 0x2f9   : > { %v12258_v47 = vpop.f32.mrf.mxu0 }
 0x2fb   : > { %8559 = vmatpush1.bf16.msra.mxu0 %v10180_v11  ;;  %8612 = vmatpush1.bf16.msra.mxu1 %v10183_v12  ;;  %v12260_v21 = vpop.f32.mrf.mxu0  ;;  %v12274_v12 = vpop.f32.mrf.mxu1 }
 0x2fc   : > { %8560 = vmatprep.subr.bf16.mxu0 %v10188_v48  ;;  %8613 = vmatprep.subr.bf16.mxu1 %v10191_v49 }
 0x2fd   : > { %v12264_v0 = vpop.f32.mrf.mxu0  ;;  %v12276_v48 = vpop.f32.mrf.mxu1 }
 0x2ff   : > { %8561 = vmatpush1.bf16.msra.mxu0 %v10186_v52  ;;  %8614 = vmatpush1.bf16.msra.mxu1 %v10189_v40  ;;  %v12268_v14 = vpop.f32.mrf.mxu0  ;;  %v12280_v52 = vpop.f32.mrf.mxu1 }
 0x300   : > { %8562 = vmatprep.subr.bf16.mxu0 %v10194_v41  ;;  %8615 = vmatprep.subr.bf16.mxu1 %v10197_v19 }
 0x301   : > { %v12272_v11 = vpop.f32.mrf.mxu0  ;;  %v12284_v19 = vpop.f32.mrf.mxu1 }
 0x303   : > { %8563 = vmatpush2.bf16.msra.mxu0 %v10192_v22  ;;  %8616 = vmatpush2.bf16.msra.mxu1 %v10195_v27  ;;  %v12278_v49 = vpop.f32.mrf.mxu0  ;;  %v12286_v27 = vpop.f32.mrf.mxu1 }
 0x304   : > { %8564 = vmatprep.subr.bf16.mxu0 %v10200_v54  ;;  %8617 = vmatprep.subr.bf16.mxu1 %v10203_v55 }
 0x305   : > { %v12282_v40 = vpop.f32.mrf.mxu0  ;;  %v12288_v54 = vpop.f32.mrf.mxu1 }
 0x307   : > { %8565 = vmatpush2.bf16.msra.mxu0 %v10198_v57  ;;  %8618 = vmatpush2.bf16.msra.mxu1 %v10201_v59  ;;  %v8156_v41 = vpop.f32.mrf.mxu0  ;;  %v12292_v57 = vpop.f32.mrf.mxu1 }
 0x308   : > { %8566 = vmatprep.subr.bf16.mxu0 %v10206_v60  ;;  %8619 = vmatprep.subr.bf16.mxu1 %v10209_v63 }
 0x309   : > { %v8158_v22 = vpop.f32.mrf.mxu0  ;;  %v12296_v60 = vpop.f32.mrf.mxu1 }
 0x30b   : > { %8567 = vmatpush2.bf16.msra.mxu0 %v10204_v4  ;;  %8620 = vmatpush2.bf16.msra.mxu1 %v10207_v8  ;;  %v12290_v55 = vpop.f32.mrf.mxu0  ;;  %v12300_v4 = vpop.f32.mrf.mxu1 }
 0x30c   : > { %8568 = vmatprep.subr.bf16.mxu0 %v10212_v9  ;;  %8621 = vmatprep.subr.bf16.mxu1 %v10215_v10 }
 0x30d   : > { %v12294_v59 = vpop.f32.mrf.mxu0  ;;  %v12304_v9 = vpop.f32.mrf.mxu1 }
 0x30f   : > { %8569 = vmatpush2.bf16.msra.mxu0 %v10210_v58  ;;  %8622 = vmatpush2.bf16.msra.mxu1 %v10213_v61  ;;  %v12298_v63 = vpop.f32.mrf.mxu0  ;;  %v12308_v58 = vpop.f32.mrf.mxu1 }
 0x310   : > { %8570 = vmatprep.subr.bf16.mxu0 %v10218_v44  ;;  %8623 = vmatprep.subr.bf16.mxu1 %v10221_v28 }
 0x311   : > { %v12302_v8 = vpop.f32.mrf.mxu0  ;;  %v12312_v44 = vpop.f32.mrf.mxu1 }
 0x313   : > { %8571 = vmatpush2.bf16.msra.mxu0 %v10216_v45  ;;  %8624 = vmatpush2.bf16.msra.mxu1 %v10219_v53  ;;  %v12306_v10 = vpop.f32.mrf.mxu0  ;;  %v12314_v45 = vpop.f32.mrf.mxu1 }
 0x314   : > { %8572 = vmatprep.subr.bf16.mxu0 %v10224_v62  ;;  %8625 = vmatprep.subr.bf16.mxu1 %v10227_v20  ;;  %12502 = vst [vmem:[#allocation4_spill] sm:$0xff] %v12314_v45 }
 0x315   : > { %v12310_v61 = vpop.f32.mrf.mxu0 }
 0x317   : > { %8573 = vmatpush2.bf16.msra.mxu0 %v10222_v15  ;;  %8626 = vmatpush2.bf16.msra.mxu1 %v10225_v16 }
 0x318   : > { %8574 = vmatprep.subr.bf16.mxu0 %v10230_v17  ;;  %8627 = vmatprep.subr.bf16.mxu1 %v10233_v18 }
 0x31b   : > { %8575 = vmatpush2.bf16.msra.mxu0 %v10228_v24  ;;  %8628 = vmatpush2.bf16.msra.mxu1 %v10231_v25 }
 0x31c   : > { %8576 = vmatprep.subr.bf16.mxu0 %v10236_v1  ;;  %8629 = vmatprep.subr.bf16.mxu1 %v10239_v3 }
 0x31f   : > { %8577 = vmatpush2.bf16.msra.mxu0 %v10234_v6  ;;  %8630 = vmatpush2.bf16.msra.mxu1 %v10237_v5 }
 0x322   : > { %8579 = vmatmul.mubr.bf16.vlgmr.msra.gmra.mxu0 %v8869_v35  ;;  %8632 = vmatmul.mubr.bf16.vlgmr.msra.gmra.mxu1 %v8871_v36  ;;  %v8262_v28 = vpop.f32.mrf.mxu0  ;;  %v12316_v62 = vpop.f32.mrf.mxu1 }
 0x323   : > { %8588 = vmatprep.mubr.bf16.mxu0 %v8902_v38  ;;  %8641 = vmatprep.mubr.bf16.mxu1 %v8904_v37 }
 0x324   : > { %v8264_v53 = vpop.f32.mrf.mxu0  ;;  %v12320_v15 = vpop.f32.mrf.mxu1 }
 0x326   : > { %v12318_v20 = vpop.f32.mrf.mxu0  ;;  %v12324_v17 = vpop.f32.mrf.mxu1 }
 0x328   : > { %v12322_v16 = vpop.f32.mrf.mxu0  ;;  %v12328_v24 = vpop.f32.mrf.mxu1 }
 0x32a   : > { %8589 = vmatmul.mubr.bf16.gmra.mxu0 %v8901_v39  ;;  %8642 = vmatmul.mubr.bf16.gmra.mxu1 %v8903_v43  ;;  %v12326_v18 = vpop.f32.mrf.mxu0  ;;  %v12332_v1 = vpop.f32.mrf.mxu1 }
 0x32b   : > { %12503 = vst [vmem:[#allocation5_spill] sm:$0xff] %v12332_v1 }
 0x32c   : > { %v12330_v25 = vpop.f32.mrf.mxu0  ;;  %v12336_v6 = vpop.f32.mrf.mxu1 }
 0x32d   : > { %12505 = vst [vmem:[#allocation7_spill] sm:$0xff] %v12336_v6 }
 0x32e   : > { %v12334_v3 = vpop.f32.mrf.mxu0  ;;  %v12340_v30 = vpop.f32.mrf.mxu1 }
 0x32f   : > { %12504 = vst [vmem:[#allocation6_spill] sm:$0xff] %v12334_v3  ;;  %12507 = vst [vmem:[#allocation9_spill] sm:$0xff] %v12340_v30 }
 0x330   : > { %v12338_v5 = vpop.f32.mrf.mxu0  ;;  %v12342_v32 = vpop.f32.mrf.mxu1 }
 0x331   : > { %12506 = vst [vmem:[#allocation8_spill] sm:$0xff] %v12338_v5  ;;  %12508 = vst [vmem:[#allocation10_spill] sm:$0xff] %v12342_v32 }
 0x362   : > { %v8368_v31 = vpop.f32.mrf.mxu0  ;;  %v12344_v33 = vpop.f32.mrf.mxu1 }
 0x364   : > { %v12346_v35 = vpop.f32.mrf.mxu0  ;;  %v12348_v36 = vpop.f32.mrf.mxu1 }
 0x365   : > { %12509 = vst [vmem:[#allocation11_spill] sm:$0xff] %v12348_v36 }
 0x366   : > { %v12350_v38 = vpop.f32.mrf.mxu0  ;;  %v12352_v37 = vpop.f32.mrf.mxu1 }
 0x367   : > { %12510 = vst [vmem:[#allocation12_spill] sm:$0xff] %v12352_v37 }
 0x368   : > { %v12354_v39 = vpop.f32.mrf.mxu0  ;;  %v12356_v43 = vpop.f32.mrf.mxu1 }
 0x369   : > { %12511 = vst [vmem:[#allocation13_spill] sm:$0xff] %v12356_v43  ;;  %v8051_v43 = vadd.f32 %v12256_v46, %v11931_v7 }
 0x36a   : > { %v12358_v5 = vpop.f32.mrf.mxu0  ;;  %v12360_v30 = vpop.f32.mrf.mxu1 }
 0x36b   : > { %12512 = vst [vmem:[#allocation14_spill] sm:$0xff] %v12358_v5  ;;  %12513 = vst [vmem:[#allocation15_spill] sm:$0xff] %v12360_v30  ;;  %v8053_v30 = vadd.f32 %v12258_v47, %v11956_v13  ;;  %v8061_v13 = vadd.f32 %v12268_v14, %v11976_v34 }
 0x36c   : > { %v12362_v6 = vpop.f32.mrf.mxu0  ;;  %v12364_v32 = vpop.f32.mrf.mxu1 }
 0x36d   : > { %12514 = vst [vmem:[#allocation16_spill] sm:$0xff] %v12362_v6  ;;  %12515 = vst [vmem:[#allocation17_spill] sm:$0xff] %v12364_v32  ;;  %v8104_v32 = vadd.f32 %v12262_v26, %v8051_v43  ;;  %v8063_v26 = vadd.f32 %v12272_v11, %v11981_v42  ;;  %v8067_v11 = vadd.f32 %v12282_v40, %v11988_v50  ;;  %v12523_v43 = vld [vmem:[#allocation5_spill] sm:$0xff] }
 0x36e   : > { %v12366_v1 = vpop.f32.mrf.mxu0  ;;  %v12368_v3 = vpop.f32.mrf.mxu1 }
 0x36f   : > { %12516 = vst [vmem:[#allocation18_spill] sm:$0xff] %v12366_v1  ;;  %12517 = vst [vmem:[#allocation19_spill] sm:$0xff] %v12368_v3  ;;  %v8055_v3 = vadd.f32 %v12260_v21, %v11961_v23  ;;  %v8057_v1 = vadd.f32 %v12264_v0, %v11970_v2  ;;  %v8157_v7 = vadd.f32 %v8156_v41, %v8104_v32 }
 0x370   : > { %v12370_v36 = vpop.f32.mrf.mxu0  ;;  %v12372_v45 = vpop.f32.mrf.mxu1  ;;  %v8065_v0 = vadd.f32 %v12278_v49, %v11986_v51  ;;  %v8116_v42 = vadd.f32 %v12280_v52, %v8063_v26  ;;  %v8120_v40 = vadd.f32 %v12286_v27, %v8067_v11  ;;  %v12527_v26 = vld [vmem:[#allocation12_spill] sm:$0xff]  ;;  %v12531_v11 = vld [vmem:[#allocation13_spill] sm:$0xff] }
 0x371   : > { %12518 = vst [vmem:[#allocation20_spill] sm:$0xff] %v12370_v36  ;;  %12519 = vst [vmem:[#allocation21_spill] sm:$0xff] %v12372_v45  ;;  %v8106_v45 = vadd.f32 %v12266_v29, %v8053_v30  ;;  %v8110_v21 = vadd.f32 %v12274_v12, %v8057_v1  ;;  %v8210_v29 = vadd.f32 %v12288_v54, %v8157_v7  ;;  %v12522_v30 = vld [vmem:[#allocation6_spill] sm:$0xff]  ;;  %v12524_v7 = vld [vmem:[#allocation11_spill] sm:$0xff] }
 0x372   : > { %v8118_v49 = vadd.f32 %v12284_v19, %v8065_v0  ;;  %v8173_v1 = vadd.f32 %v12310_v61, %v8120_v40  ;;  %v12529_v0 = vld [vmem:[#allocation9_spill] sm:$0xff] }
 0x373   : > { %v8159_v47 = vadd.f32 %v8158_v22, %v8106_v45  ;;  %v8163_v14 = vadd.f32 %v12294_v59, %v8110_v21  ;;  %v8263_v22 = vadd.f32 %v8262_v28, %v8210_v29  ;;  %v12528_v21 = vld [vmem:[#allocation14_spill] sm:$0xff] }
 0x375   : > { %v8212_v34 = vadd.f32 %v12292_v57, %v8159_v47  ;;  %v8216_v59 = vadd.f32 %v12300_v4, %v8163_v14  ;;  %v8316_v52 = vadd.f32 %v12316_v62, %v8263_v22  ;;  %v12526_v47 = vld [vmem:[#allocation8_spill] sm:$0xff] }
 0x377   : > { %v8265_v51 = vadd.f32 %v8264_v53, %v8212_v34  ;;  %v8269_v19 = vadd.f32 %v12322_v16, %v8216_v59  ;;  %v12530_v34 = vld [vmem:[#allocation16_spill] sm:$0xff] }
 0x379   : > { %v8318_v28 = vadd.f32 %v12320_v15, %v8265_v51  ;;  %v8322_v15 = vadd.f32 %v12328_v24, %v8269_v19  ;;  %v12533_v51 = vld [vmem:[#allocation10_spill] sm:$0xff]  ;;  %v12536_v19 = vld [vmem:[#allocation17_spill] sm:$0xff] }
 0x37b   : > { %v8371_v27 = vadd.f32 %v12346_v35, %v8318_v28 }
 0x37d   : > { %v8424_v35 = vadd.f32 %v12524_v7, %v8371_v27 }
 0x3a2   : > { %v12374_v37 = vpop.f32.mrf.mxu0  ;;  %v12378_v5 = vpop.f32.mrf.mxu1 }
 0x3a3   : > { %12520 = vst [vmem:[#allocation22_spill] sm:$0xff] %v12378_v5  ;;  %v8108_v5 = vadd.f32 %v12270_v56, %v8055_v3  ;;  %v8114_v56 = vadd.f32 %v12276_v48, %v8061_v13  ;;  %v8169_v48 = vadd.f32 %v12302_v8, %v8116_v42  ;;  %v8369_v8 = vadd.f32 %v8368_v31, %v8316_v52  ;;  %v12525_v13 = vld [vmem:[#allocation7_spill] sm:$0xff] }
 0x3a4   : > { %v12382_v6 = vpop.f32.mrf.mxu0  ;;  %v12387_v36 = vpop.f32.mrf.mxu1 }
 0x3a5   : > { %v8161_v2 = vadd.f32 %v12290_v55, %v8108_v5  ;;  %v8167_v55 = vadd.f32 %v12298_v63, %v8114_v56  ;;  %v8222_v53 = vadd.f32 %v12308_v58, %v8169_v48  ;;  %v8422_v16 = vadd.f32 %v12344_v33, %v8369_v8  ;;  %v12521_v5 = vld [vmem:[#allocation4_spill] sm:$0xff]  ;;  %v12534_v48 = vld [vmem:[#allocation18_spill] sm:$0xff] }
 0x3a6   : > { %v12392_v46 = vpop.f32.mrf.mxu0  ;;  %v12399_v23 = vpop.f32.mrf.mxu1  ;;  %v8226_v61 = vadd.f32 %v12521_v5, %v8173_v1 }
 0x3a7   : > { %v8214_v54 = vadd.f32 %v12296_v60, %v8161_v2  ;;  %v8171_v60 = vadd.f32 %v12306_v10, %v8118_v49  ;;  %v8220_v63 = vadd.f32 %v12304_v9, %v8167_v55  ;;  %v8275_v9 = vadd.f32 %v12330_v25, %v8222_v53  ;;  %v12537_v53 = vld [vmem:[#allocation20_spill] sm:$0xff] }
 0x3a8   : > { %v8480_v41 = vpop.f32.mrf.mxu0  ;;  %v12412_v12 = vpop.f32.mrf.mxu1  ;;  %v8475_v25 = vadd.f32 %v12374_v37, %v8422_v16  ;;  %v8279_v33 = vadd.f32 %v12526_v47, %v8226_v61  ;;  %v8477_v2 = vadd.f32 %v12382_v6, %v8424_v35  ;;  %v12535_v6 = vld [vmem:[#allocation15_spill] sm:$0xff] }
 0x3a9   : > { %v8267_v50 = vadd.f32 %v12318_v20, %v8214_v54  ;;  %v8273_v20 = vadd.f32 %v12326_v18, %v8220_v63  ;;  %v8224_v10 = vadd.f32 %v12312_v44, %v8171_v60  ;;  %v8375_v44 = vadd.f32 %v12354_v39, %v8322_v15 }
 0x3aa   : > { %v8484_v57 = vpop.f32.mrf.mxu0  ;;  %v12418_v45 = vpop.f32.mrf.mxu1  ;;  %v8328_v24 = vadd.f32 %v12525_v13, %v8275_v9  ;;  %v12532_v54 = vld [vmem:[#allocation22_spill] sm:$0xff]  ;;  %v8332_v49 = vadd.f32 %v12533_v51, %v8279_v33  ;;  %v8530_v60 = vadd.f32 %v12387_v36, %v8477_v2  ;;  %v12538_v9 = vld [vmem:[#allocation19_spill] sm:$0xff] }
 0x3ab   : > { %v8320_v62 = vadd.f32 %v12324_v17, %v8267_v50  ;;  %v8277_v31 = vadd.f32 %v12522_v30, %v8224_v10  ;;  %v8326_v18 = vadd.f32 %v12523_v43, %v8273_v20  ;;  %v8428_v39 = vadd.f32 %v12531_v11, %v8375_v44 }
 0x3ac   : > { %v8486_v4 = vpop.f32.mrf.mxu0  ;;  %v8539_v3 = vpop.f32.mrf.mxu1  ;;  %v8381_v14 = vadd.f32 %v12530_v34, %v8328_v24  ;;  %v8528_v37 = vadd.f32 %v12532_v54, %v8475_v25  ;;  %v8385_v1 = vadd.f32 %v12537_v53, %v8332_v49 }
 0x3ad   : > { %v8373_v58 = vadd.f32 %v12350_v38, %v8320_v62  ;;  %v8379_v29 = vadd.f32 %v12528_v21, %v8326_v18  ;;  %v8330_v56 = vadd.f32 %v12529_v0, %v8277_v31  ;;  %v8481_v63 = vadd.f32 %v8480_v41, %v8428_v39  ;;  %v12539_v31 = vld [vmem:[#allocation21_spill] sm:$0xff] }
 0x3ae   : > { %v8488_v32 = vpop.f32.mrf.mxu0  ;;  %v8541_v17 = vpop.f32.mrf.mxu1  ;;  %v8434_v8 = vadd.f32 %v12536_v19, %v8381_v14  ;;  %v8438_v43 = vadd.f32 %v12539_v31, %v8385_v1 }
 0x3af   : > { %v8426_v38 = vadd.f32 %v12527_v26, %v8373_v58  ;;  %v8383_v59 = vadd.f32 %v12534_v48, %v8330_v56  ;;  %v8432_v40 = vadd.f32 %v12535_v6, %v8379_v29  ;;  %v8534_v36 = vadd.f32 %v12412_v12, %v8481_v63 }
 0x3b0   : > { %v8490_v22 = vpop.f32.mrf.mxu0  ;;  %v8543_v42 = vpop.f32.mrf.mxu1  ;;  %v8487_v16 = vadd.f32 %v8486_v4, %v8434_v8 }
 0x3b1   : > { %v8479_v55 = vadd.f32 %v12392_v46, %v8426_v38  ;;  %v8485_v27 = vadd.f32 %v8484_v57, %v8432_v40  ;;  %v8436_v15 = vadd.f32 %v12538_v9, %v8383_v59  ;;  %v8491_v4 = vadd.f32 %v8490_v22, %v8438_v43 }
 0x3b2   : > { %v8540_v25 = vadd.f32 %v8539_v3, %v8487_v16 }
 0x3b3   : > { %v8532_v46 = vadd.f32 %v12399_v23, %v8479_v55  ;;  %v8538_v23 = vadd.f32 %v12418_v45, %v8485_v27  ;;  %v8489_v57 = vadd.f32 %v8488_v32, %v8436_v15  ;;  %v8544_v2 = vadd.f32 %v8543_v42, %v8491_v4 }
 0x3b5   : > { %v8542_v21 = vadd.f32 %v8541_v17, %v8489_v57 }
 0x3e2   : > { %v8580_v52 = vpop.f32.mrf.mxu0  ;;  %v8633_v50 = vpop.f32.mrf.mxu1 }
 0x3e3   : > { %v8581_v28 = vadd.f32 %v8580_v52, %v8528_v37 }
 0x3e4   : > { %v8582_v62 = vpop.f32.mrf.mxu0  ;;  %v8635_v20 = vpop.f32.mrf.mxu1 }
 0x3e5   : > { %v8583_v10 = vadd.f32 %v8582_v62, %v8530_v60  ;;  %v8634_v41 = vadd.f32 %v8633_v50, %v8581_v28 }
 0x3e6   : > { %v8584_v58 = vpop.f32.mrf.mxu0  ;;  %v8637_v5 = vpop.f32.mrf.mxu1 }
 0x3e7   : > { %v8636_v61 = vadd.f32 %v8635_v20, %v8583_v10  ;;  %v8585_v30 = vadd.f32 %v8584_v58, %v8532_v46 }
 0x3e8   : > { %v8586_v18 = vpop.f32.mrf.mxu0  ;;  %v8639_v7 = vpop.f32.mrf.mxu1 }
 0x3e9   : > { %v9427_v35 = vpack.c.bf16 %v8636_v61, %v8634_v41  ;;  %v8587_v44 = vadd.f32 %v8586_v18, %v8534_v36  ;;  %v8638_v12 = vadd.f32 %v8637_v5, %v8585_v30 }
 0x3ea   : > { %v8590_v13 = vpop.f32.mrf.mxu0  ;;  %v8643_v24 = vpop.f32.mrf.mxu1 }
 0x3eb   : > { %8676 = vst [vmem:[%s12467_s9] sm:$0xff] %v9427_v35  ;;  %v8640_v47 = vadd.f32 %v8639_v7, %v8587_v44  ;;  %v8591_v33 = vadd.f32 %v8590_v13, %v8538_v23 }
 0x3ec   : > { %v8592_v26 = vpop.f32.mrf.mxu0  ;;  %v8645_v38 = vpop.f32.mrf.mxu1 }
 0x3ed   : > { %v9428_v45 = vpack.c.bf16 %v8640_v47, %v8638_v12  ;;  %v8593_v32 = vadd.f32 %v8592_v26, %v8540_v25  ;;  %v8644_v0 = vadd.f32 %v8643_v24, %v8591_v33 }
 0x3ee   : > { %v8594_v29 = vpop.f32.mrf.mxu0  ;;  %v8647_v3 = vpop.f32.mrf.mxu1 }
 0x3ef   : > { %8677 = vst [vmem:[%s12467_s9 + $0x8] sm:$0xff] %v9428_v45  ;;  %v8646_v56 = vadd.f32 %v8645_v38, %v8593_v32  ;;  %v8595_v34 = vadd.f32 %v8594_v29, %v8542_v21 }
 0x3f0   : > { %v8596_v14 = vpop.f32.mrf.mxu0  ;;  %v8649_v39 = vpop.f32.mrf.mxu1 }
 0x3f1   : > { %v9429_v22 = vpack.c.bf16 %v8646_v56, %v8644_v0  ;;  %v8597_v11 = vadd.f32 %v8596_v14, %v8544_v2  ;;  %v8648_v54 = vadd.f32 %v8647_v3, %v8595_v34 }
 0x3f2   : > { %v8727_v17 = vld [vmem:[%s12467_s9] sm:$0xff] (%p10330_p6) }
 0x3f3   : > { %8678 = vst [vmem:[%s12467_s9 + $0x10] sm:$0xff] %v9429_v22  ;;  %v8650_v37 = vadd.f32 %v8649_v39, %v8597_v11  ;;  %8686 = sbr.rel (!%p10330_p6) target bundleno = 1024 (0x400), region = 84  ;;  %8728 = vst [vmem:[%s8692_s5] sm:$0xff] (%p10330_p6), %v8727_v17 }
 0x3f5   : > { %v9430_v55 = vpack.c.bf16 %v8650_v37, %v8648_v54 }
 0x3f6   : > { %v8729_v42 = vld [vmem:[%s12467_s9 + $0x8] sm:$0xff] (%p10330_p6) }
 0x3f7   : > { %8679 = vst [vmem:[%s12467_s9 + $0x18] sm:$0xff] %v9430_v55  ;;  %8730 = vst [vmem:[%s8692_s5 + $0x10] sm:$0xff] (%p10330_p6), %v8729_v42 }
 0x3fa   : > { %v8731_v51 = vld [vmem:[%s12467_s9 + $0x10] sm:$0xff] }
 0x3fb   : > { %8732 = vst [vmem:[%s8692_s5 + $0x20] sm:$0xff] %v8731_v51 }
 0x3fe   : > { %v8733_v49 = vld [vmem:[%s12467_s9 + $0x18] sm:$0xff] }
 0x3ff   : > { %8734 = vst [vmem:[%s8692_s5 + $0x30] sm:$0xff] %v8733_v49 }
 0x400 PF: > { %s12_s13 = sadd.s32 1, %s10278_s13   ;;  %s12540_s9 = smov %s10266_s10 }
 0x401   : > { %p9_p11 = scmp.ge.s32.totalorder %s12_s13, 4   ;;  %s12541_s10 = smov %s10335_s19 }
 0x402   : > { %s12542_s11 = smov %s10274_s12  ;;  %s12543_s12 = smov %s12545_s14 }
 0x403   :  { %11 = sbr.rel (!%p9_p11) target bundleno = 3 (0x3), region = 162 }

// kernel: d2_forward.21
= control target key start
LH: loop header
LB: loop body
LE: loop exit
PB: predicated region body
PF: predicated region fallthrough
CT: control target
= control target key end

     0   :  { %s9643_s1 = inlined_call_operand.vmem [shape: bf16[8192,128], index: 1, kind: input, shape index: {}]   ;;  %s9644_s0 = inlined_call_operand.vmem [shape: bf16[16,8192], index: 0, kind: input, shape index: {}]   ;;  %s9645_s2 = inlined_call_operand.vmem [shape: f32[16,128], index: 2, kind: output, shape index: {}]  }
   0x1   :  { %v7104_v0 = vld [vmem:[%s9643_s1 + $0x78] sm:$0xff]   ;;  %v7108_v4 = vld [vmem:[%s9643_s1 + $0x70] sm:$0xff]   ;;  %v7112_v8 = vld [vmem:[%s9643_s1 + $0x68] sm:$0xff]  }
   0x2   :  { %v7105_v1 = vld [vmem:[%s9643_s1 + $0xf8] sm:$0xff]   ;;  %6400 = vmatprep.subr.bf16.mxu0 %v7104_v0  ;;  %v7109_v5 = vld [vmem:[%s9643_s1 + $0xf0] sm:$0xff]   ;;  %v7113_v9 = vld [vmem:[%s9643_s1 + $0xe8] sm:$0xff]  }
   0x3   :  { %v7106_v2 = vld [vmem:[%s9643_s1 + $0x38] sm:$0xff]   ;;  %6422 = vmatprep.subr.bf16.mxu1 %v7105_v1  ;;  %v7110_v6 = vld [vmem:[%s9643_s1 + $0x30] sm:$0xff]   ;;  %v7114_v10 = vld [vmem:[%s9643_s1 + $0x28] sm:$0xff]  }
   0x4   :  { %v7107_v3 = vld [vmem:[%s9643_s1 + $0xb8] sm:$0xff]   ;;  %6401 = vmatpush3.bf16.msra.mxu0 %v7106_v2  ;;  %v7111_v7 = vld [vmem:[%s9643_s1 + $0xb0] sm:$0xff]   ;;  %v7115_v11 = vld [vmem:[%s9643_s1 + $0xa8] sm:$0xff]  }
   0x5   :  { %6423 = vmatpush3.bf16.msra.mxu1 %v7107_v3  ;;  %6402 = vmatprep.subr.bf16.mxu0 %v7108_v4  ;;  %v7116_v12 = vld [vmem:[%s9643_s1 + $0x60] sm:$0xff]   ;;  %v7120_v16 = vld [vmem:[%s9643_s1 + $0x58] sm:$0xff]   ;;  %v7124_v20 = vld [vmem:[%s9643_s1 + $0x50] sm:$0xff]  }
   0x6   :  { %6424 = vmatprep.subr.bf16.mxu1 %v7109_v5  ;;  %v7117_v13 = vld [vmem:[%s9643_s1 + $0xe0] sm:$0xff]   ;;  %v7121_v17 = vld [vmem:[%s9643_s1 + $0xd8] sm:$0xff]   ;;  %v7125_v21 = vld [vmem:[%s9643_s1 + $0xd0] sm:$0xff]  }
   0x7   :  { %v7118_v14 = vld [vmem:[%s9643_s1 + $0x20] sm:$0xff]   ;;  %v7122_v18 = vld [vmem:[%s9643_s1 + $0x18] sm:$0xff]   ;;  %v7126_v22 = vld [vmem:[%s9643_s1 + $0x10] sm:$0xff]  }
   0x8   :  { %6403 = vmatpush3.bf16.msra.mxu0 %v7110_v6  ;;  %v7119_v15 = vld [vmem:[%s9643_s1 + $0xa0] sm:$0xff]   ;;  %v7123_v19 = vld [vmem:[%s9643_s1 + $0x98] sm:$0xff]   ;;  %v7127_v23 = vld [vmem:[%s9643_s1 + $0x90] sm:$0xff]  }
   0x9   :  { %6425 = vmatpush3.bf16.msra.mxu1 %v7111_v7  ;;  %6404 = vmatprep.subr.bf16.mxu0 %v7112_v8  ;;  %v7128_v24 = vld [vmem:[%s9643_s1 + $0x48] sm:$0xff]   ;;  %v7132_v28 = vld [vmem:[%s9643_s1 + $0x40] sm:$0xff]   ;;  %v7136_v40 = vld [vmem:[%s9643_s1 + $0x178] sm:$0xff]  }
   0xa   :  { %6426 = vmatprep.subr.bf16.mxu1 %v7113_v9  ;;  %v7129_v25 = vld [vmem:[%s9643_s1 + $0xc8] sm:$0xff]   ;;  %v7133_v29 = vld [vmem:[%s9643_s1 + $0xc0] sm:$0xff]   ;;  %v7137_v41 = vld [vmem:[%s9643_s1 + $0x1f8] sm:$0xff]  }
   0xb   :  { %v7130_v26 = vld [vmem:[%s9643_s1 + $0x8] sm:$0xff]   ;;  %v7134_v30 = vld [vmem:[%s9643_s1] sm:$0xff]   ;;  %v7138_v42 = vld [vmem:[%s9643_s1 + $0x138] sm:$0xff]  }
   0xc   :  { %6405 = vmatpush3.bf16.msra.mxu0 %v7114_v10  ;;  %v7131_v27 = vld [vmem:[%s9643_s1 + $0x88] sm:$0xff]   ;;  %v7135_v31 = vld [vmem:[%s9643_s1 + $0x80] sm:$0xff]   ;;  %v7139_v43 = vld [vmem:[%s9643_s1 + $0x1b8] sm:$0xff]  }
   0xd   :  { %6427 = vmatpush3.bf16.msra.mxu1 %v7115_v11  ;;  %6406 = vmatprep.subr.bf16.mxu0 %v7116_v12  ;;  %v12_v32 = vld [vmem:[%s9644_s0] sm:$0xff]  ;;  %v13_v34 = vld [vmem:[%s9644_s0 + $0x8] sm:$0xff]  ;;  %v7140_v44 = vld [vmem:[%s9643_s1 + $0x170] sm:$0xff]  }
   0xe   :  { %6428 = vmatprep.subr.bf16.mxu1 %v7117_v13  ;;  %v44_v33 = vld [vmem:[%s9644_s0 + $0x100] sm:$0xff]  ;;  %v45_v37 = vld [vmem:[%s9644_s0 + $0x108] sm:$0xff]  ;;  %v7141_v45 = vld [vmem:[%s9643_s1 + $0x1f0] sm:$0xff]  }
   0xf   :  { %v5822_v35 = vcombine.low %v12_v32, %v44_v33  ;;  %v5823_v36 = vcombine.high %v12_v32, %v44_v33  ;;  %v5824_v38 = vcombine.low %v13_v34, %v45_v37  ;;  %v5825_v39 = vcombine.high %v13_v34, %v45_v37  ;;  %v7142_v46 = vld [vmem:[%s9643_s1 + $0x130] sm:$0xff]   ;;  %v7144_v48 = vld [vmem:[%s9643_s1 + $0x168] sm:$0xff]   ;;  %v7148_v52 = vld [vmem:[%s9643_s1 + $0x160] sm:$0xff]  }
  0x10   :  { %6407 = vmatpush3.bf16.msra.mxu0 %v7118_v14  ;;  %v7143_v47 = vld [vmem:[%s9643_s1 + $0x1b0] sm:$0xff]   ;;  %v7145_v49 = vld [vmem:[%s9643_s1 + $0x1e8] sm:$0xff]   ;;  %v7149_v53 = vld [vmem:[%s9643_s1 + $0x1e0] sm:$0xff]  }
  0x11   :  { %6429 = vmatpush3.bf16.msra.mxu1 %v7119_v15  ;;  %6408 = vmatprep.subr.bf16.mxu0 %v7120_v16  ;;  %v7146_v50 = vld [vmem:[%s9643_s1 + $0x128] sm:$0xff]   ;;  %v7150_v54 = vld [vmem:[%s9643_s1 + $0x120] sm:$0xff]   ;;  %v7152_v56 = vld [vmem:[%s9643_s1 + $0x158] sm:$0xff]  }
  0x12   :  { %6430 = vmatprep.subr.bf16.mxu1 %v7121_v17  ;;  %4524 = vmatprep.mubr.bf16.mxu0 %v5823_v36  ;;  %v7147_v51 = vld [vmem:[%s9643_s1 + $0x1a8] sm:$0xff]   ;;  %v7151_v55 = vld [vmem:[%s9643_s1 + $0x1a0] sm:$0xff]   ;;  %v7153_v57 = vld [vmem:[%s9643_s1 + $0x1d8] sm:$0xff]  }
  0x13   :  { %4565 = vmatprep.mubr.bf16.mxu1 %v5825_v39  ;;  %v7154_v58 = vld [vmem:[%s9643_s1 + $0x118] sm:$0xff]   ;;  %v7156_v60 = vld [vmem:[%s9643_s1 + $0x150] sm:$0xff]   ;;  %v7160_v0 = vld [vmem:[%s9643_s1 + $0x148] sm:$0xff]  }
  0x14   :  { %6409 = vmatpush3.bf16.msra.mxu0 %v7122_v18  ;;  %v7155_v59 = vld [vmem:[%s9643_s1 + $0x198] sm:$0xff]   ;;  %v7157_v61 = vld [vmem:[%s9643_s1 + $0x1d0] sm:$0xff]   ;;  %v7161_v1 = vld [vmem:[%s9643_s1 + $0x1c8] sm:$0xff]  }
  0x15   :  { %6431 = vmatpush3.bf16.msra.mxu1 %v7123_v19  ;;  %6410 = vmatprep.subr.bf16.mxu0 %v7124_v20  ;;  %v7158_v62 = vld [vmem:[%s9643_s1 + $0x110] sm:$0xff]   ;;  %v7162_v2 = vld [vmem:[%s9643_s1 + $0x108] sm:$0xff]   ;;  %v7164_v4 = vld [vmem:[%s9643_s1 + $0x140] sm:$0xff]  }
  0x16   :  { %6432 = vmatprep.subr.bf16.mxu1 %v7125_v21  ;;  %v7159_v63 = vld [vmem:[%s9643_s1 + $0x190] sm:$0xff]   ;;  %v7163_v3 = vld [vmem:[%s9643_s1 + $0x188] sm:$0xff]   ;;  %v7165_v5 = vld [vmem:[%s9643_s1 + $0x1c0] sm:$0xff]  }
  0x17   :  { %v7166_v6 = vld [vmem:[%s9643_s1 + $0x100] sm:$0xff]   ;;  %v14_v8 = vld [vmem:[%s9644_s0 + $0x10] sm:$0xff]  ;;  %v15_v12 = vld [vmem:[%s9644_s0 + $0x18] sm:$0xff] }
  0x18   :  { %6411 = vmatpush3.bf16.msra.mxu0 %v7126_v22  ;;  %v7167_v7 = vld [vmem:[%s9643_s1 + $0x180] sm:$0xff]   ;;  %v46_v9 = vld [vmem:[%s9644_s0 + $0x110] sm:$0xff]  ;;  %v47_v13 = vld [vmem:[%s9644_s0 + $0x118] sm:$0xff] }
  0x19   :  { %6433 = vmatpush3.bf16.msra.mxu1 %v7127_v23  ;;  %6412 = vmatprep.subr.bf16.mxu0 %v7128_v24  ;;  %v5826_v10 = vcombine.low %v14_v8, %v46_v9  ;;  %v5827_v11 = vcombine.high %v14_v8, %v46_v9  ;;  %v5828_v14 = vcombine.low %v15_v12, %v47_v13  ;;  %v7168_v16 = vld [vmem:[%s9643_s1 + $0x278] sm:$0xff]   ;;  %v7172_v20 = vld [vmem:[%s9643_s1 + $0x270] sm:$0xff]   ;;  %v7176_v24 = vld [vmem:[%s9643_s1 + $0x268] sm:$0xff]  }
  0x1a   :  { %6434 = vmatprep.subr.bf16.mxu1 %v7129_v25  ;;  %v5829_v15 = vcombine.high %v15_v12, %v47_v13  ;;  %v7169_v17 = vld [vmem:[%s9643_s1 + $0x2f8] sm:$0xff]   ;;  %v7173_v21 = vld [vmem:[%s9643_s1 + $0x2f0] sm:$0xff]   ;;  %v7177_v25 = vld [vmem:[%s9643_s1 + $0x2e8] sm:$0xff]  }
  0x1b   :  { %v7170_v18 = vld [vmem:[%s9643_s1 + $0x238] sm:$0xff]   ;;  %v7174_v22 = vld [vmem:[%s9643_s1 + $0x230] sm:$0xff]  }
  0x1c   :  { %6413 = vmatpush3.bf16.msra.mxu0 %v7130_v26  ;;  %v7171_v19 = vld [vmem:[%s9643_s1 + $0x2b8] sm:$0xff]   ;;  %v7175_v23 = vld [vmem:[%s9643_s1 + $0x2b0] sm:$0xff]   ;;  %v7178_v26 = vld [vmem:[%s9643_s1 + $0x228] sm:$0xff]  }
  0x1d   :  { %6435 = vmatpush3.bf16.msra.mxu1 %v7131_v27  ;;  %6414 = vmatprep.subr.bf16.mxu0 %v7132_v28  ;;  %v7179_v27 = vld [vmem:[%s9643_s1 + $0x2a8] sm:$0xff]   ;;  %v7180_v28 = vld [vmem:[%s9643_s1 + $0x260] sm:$0xff]   ;;  %v7184_v32 = vld [vmem:[%s9643_s1 + $0x258] sm:$0xff]  }
  0x1e   :  { %6436 = vmatprep.subr.bf16.mxu1 %v7133_v29  ;;  %v7181_v29 = vld [vmem:[%s9643_s1 + $0x2e0] sm:$0xff]   ;;  %v7185_v33 = vld [vmem:[%s9643_s1 + $0x2d8] sm:$0xff]   ;;  %v7188_v36 = vld [vmem:[%s9643_s1 + $0x250] sm:$0xff]  }
  0x1f   :  { %v7186_v34 = vld [vmem:[%s9643_s1 + $0x218] sm:$0xff]   ;;  %v7189_v37 = vld [vmem:[%s9643_s1 + $0x2d0] sm:$0xff]  }
  0x20   :  { %6415 = vmatpush3.bf16.msra.mxu0 %v7134_v30  ;;  %v7182_v30 = vld [vmem:[%s9643_s1 + $0x220] sm:$0xff]   ;;  %v7191_v39 = vld [vmem:[%s9643_s1 + $0x290] sm:$0xff]   ;;  %v7216_v8 = vld [vmem:[%s9643_s1 + $0x358] sm:$0xff]  }
  0x21   :  { %6437 = vmatpush3.bf16.msra.mxu1 %v7135_v31  ;;  %6444 = vmatprep.subr.bf16.mxu0 %v7136_v40  ;;  %v7183_v31 = vld [vmem:[%s9643_s1 + $0x2a0] sm:$0xff]   ;;  %v7192_v40 = vld [vmem:[%s9643_s1 + $0x248] sm:$0xff]   ;;  %v7217_v9 = vld [vmem:[%s9643_s1 + $0x3d8] sm:$0xff]  }
  0x22   :  { %6466 = vmatprep.subr.bf16.mxu1 %v7137_v41  ;;  %v7193_v41 = vld [vmem:[%s9643_s1 + $0x2c8] sm:$0xff]   ;;  %v7220_v12 = vld [vmem:[%s9643_s1 + $0x350] sm:$0xff]  }
  0x23   :  { %4525 = vmatmul.mubr.bf16.vlgmr.msra.gmra.mxu0 %v5822_v35  ;;  %v7187_v35 = vld [vmem:[%s9643_s1 + $0x298] sm:$0xff]   ;;  %v7221_v13 = vld [vmem:[%s9643_s1 + $0x3d0] sm:$0xff]  }
  0x24   :  { %4566 = vmatmul.mubr.bf16.vlgmr.msra.gmra.mxu1 %v5824_v38  ;;  %6445 = vmatpush3.bf16.msra.mxu0 %v7138_v42  ;;  %v7190_v38 = vld [vmem:[%s9643_s1 + $0x210] sm:$0xff]   ;;  %v7194_v42 = vld [vmem:[%s9643_s1 + $0x208] sm:$0xff]  }
  0x25   :  { %6467 = vmatpush3.bf16.msra.mxu1 %v7139_v43  ;;  %6446 = vmatprep.subr.bf16.mxu0 %v7140_v44  ;;  %v7195_v43 = vld [vmem:[%s9643_s1 + $0x288] sm:$0xff]   ;;  %v7196_v44 = vld [vmem:[%s9643_s1 + $0x240] sm:$0xff]  }
  0x26   :  { %6468 = vmatprep.subr.bf16.mxu1 %v7141_v45  ;;  %4606 = vmatprep.mubr.bf16.mxu0 %v5827_v11  ;;  %v7197_v45 = vld [vmem:[%s9643_s1 + $0x2c0] sm:$0xff]   ;;  %v7219_v11 = vld [vmem:[%s9643_s1 + $0x398] sm:$0xff]  }
  0x27   :  { %4647 = vmatprep.mubr.bf16.mxu1 %v5829_v15  ;;  %v7223_v15 = vld [vmem:[%s9643_s1 + $0x390] sm:$0xff]  }
  0x28   :  { %6447 = vmatpush3.bf16.msra.mxu0 %v7142_v46  ;;  %v7198_v46 = vld [vmem:[%s9643_s1 + $0x200] sm:$0xff]  }
  0x29   :  { %6469 = vmatpush3.bf16.msra.mxu1 %v7143_v47  ;;  %6448 = vmatprep.subr.bf16.mxu0 %v7144_v48  ;;  %v7199_v47 = vld [vmem:[%s9643_s1 + $0x280] sm:$0xff]  }
  0x2a   :  { %6470 = vmatprep.subr.bf16.mxu1 %v7145_v49  ;;  %v16_v48 = vld [vmem:[%s9644_s0 + $0x20] sm:$0xff] }
  0x2b   :  { %v48_v49 = vld [vmem:[%s9644_s0 + $0x120] sm:$0xff] }
  0x2c   :  { %6449 = vmatpush3.bf16.msra.mxu0 %v7146_v50  ;;  %v17_v50 = vld [vmem:[%s9644_s0 + $0x28] sm:$0xff] }
  0x2d   :  { %6471 = vmatpush3.bf16.msra.mxu1 %v7147_v51  ;;  %6450 = vmatprep.subr.bf16.mxu0 %v7148_v52  ;;  %v49_v51 = vld [vmem:[%s9644_s0 + $0x128] sm:$0xff]  ;;  %v5830_v52 = vcombine.low %v16_v48, %v48_v49 }
  0x2e   :  { %6472 = vmatprep.subr.bf16.mxu1 %v7149_v53  ;;  %v5831_v53 = vcombine.high %v16_v48, %v48_v49  ;;  %v7248_v48 = vld [vmem:[%s9643_s1 + $0x458] sm:$0xff]  }
  0x2f   :  { %v7249_v49 = vld [vmem:[%s9643_s1 + $0x4d8] sm:$0xff]  }
  0x30   :  { %6451 = vmatpush3.bf16.msra.mxu0 %v7150_v54  ;;  %v5832_v54 = vcombine.low %v17_v50, %v49_v51 }
  0x31   :  { %6473 = vmatpush3.bf16.msra.mxu1 %v7151_v55  ;;  %6452 = vmatprep.subr.bf16.mxu0 %v7152_v56  ;;  %v5833_v55 = vcombine.high %v17_v50, %v49_v51  ;;  %v7200_v56 = vld [vmem:[%s9643_s1 + $0x378] sm:$0xff]  }
  0x32   :  { %6474 = vmatprep.subr.bf16.mxu1 %v7153_v57  ;;  %v7201_v57 = vld [vmem:[%s9643_s1 + $0x3f8] sm:$0xff]  }
  0x33   :  { %v7250_v50 = vld [vmem:[%s9643_s1 + $0x418] sm:$0xff]  }
  0x34   :  { %6453 = vmatpush3.bf16.msra.mxu0 %v7154_v58  ;;  %v7202_v58 = vld [vmem:[%s9643_s1 + $0x338] sm:$0xff]  }
  0x35   :  { %6475 = vmatpush3.bf16.msra.mxu1 %v7155_v59  ;;  %6454 = vmatprep.subr.bf16.mxu0 %v7156_v60  ;;  %v7203_v59 = vld [vmem:[%s9643_s1 + $0x3b8] sm:$0xff]   ;;  %v7204_v60 = vld [vmem:[%s9643_s1 + $0x370] sm:$0xff]  }
  0x36   :  { %6476 = vmatprep.subr.bf16.mxu1 %v7157_v61  ;;  %v7205_v61 = vld [vmem:[%s9643_s1 + $0x3f0] sm:$0xff]   ;;  %v7251_v51 = vld [vmem:[%s9643_s1 + $0x498] sm:$0xff]  }
  0x38   :  { %6455 = vmatpush3.bf16.msra.mxu0 %v7158_v62  ;;  %v7206_v62 = vld [vmem:[%s9643_s1 + $0x330] sm:$0xff]  }
  0x39   :  { %6477 = vmatpush3.bf16.msra.mxu1 %v7159_v63  ;;  %6456 = vmatprep.subr.bf16.mxu0 %v7160_v0  ;;  %v7207_v63 = vld [vmem:[%s9643_s1 + $0x3b0] sm:$0xff]   ;;  %v7208_v0 = vld [vmem:[%s9643_s1 + $0x368] sm:$0xff]  }
  0x3a   :  { %6478 = vmatprep.subr.bf16.mxu1 %v7161_v1  ;;  %v7209_v1 = vld [vmem:[%s9643_s1 + $0x3e8] sm:$0xff]  }
  0x3c   :  { %6457 = vmatpush3.bf16.msra.mxu0 %v7162_v2  ;;  %v7210_v2 = vld [vmem:[%s9643_s1 + $0x328] sm:$0xff]  }
  0x3d   :  { %6479 = vmatpush3.bf16.msra.mxu1 %v7163_v3  ;;  %6458 = vmatprep.subr.bf16.mxu0 %v7164_v4  ;;  %v7211_v3 = vld [vmem:[%s9643_s1 + $0x3a8] sm:$0xff]   ;;  %v7212_v4 = vld [vmem:[%s9643_s1 + $0x360] sm:$0xff]  }
  0x3e   :  { %6480 = vmatprep.subr.bf16.mxu1 %v7165_v5  ;;  %v7213_v5 = vld [vmem:[%s9643_s1 + $0x3e0] sm:$0xff]  }
  0x40   :  { %6459 = vmatpush3.bf16.msra.mxu0 %v7166_v6  ;;  %v7214_v6 = vld [vmem:[%s9643_s1 + $0x320] sm:$0xff]  }
  0x41   :  { %6481 = vmatpush3.bf16.msra.mxu1 %v7167_v7  ;;  %6488 = vmatprep.subr.bf16.mxu0 %v7168_v16  ;;  %v7215_v7 = vld [vmem:[%s9643_s1 + $0x3a0] sm:$0xff]   ;;  %v7224_v16 = vld [vmem:[%s9643_s1 + $0x348] sm:$0xff]  }
  0x42   :  { %6510 = vmatprep.subr.bf16.mxu1 %v7169_v17  ;;  %v7225_v17 = vld [vmem:[%s9643_s1 + $0x3c8] sm:$0xff]  }
  0x43   :  { %4607 = vmatmul.mubr.bf16.vlgmr.msra.gmra.mxu0 %v5826_v10  ;;  %v7218_v10 = vld [vmem:[%s9643_s1 + $0x318] sm:$0xff]  }
  0x44   :  { %4648 = vmatmul.mubr.bf16.vlgmr.msra.gmra.mxu1 %v5828_v14  ;;  %6489 = vmatpush3.bf16.msra.mxu0 %v7170_v18  ;;  %v7222_v14 = vld [vmem:[%s9643_s1 + $0x310] sm:$0xff]   ;;  %v7226_v18 = vld [vmem:[%s9643_s1 + $0x308] sm:$0xff]  }
  0x45   :  { %6511 = vmatpush3.bf16.msra.mxu1 %v7171_v19  ;;  %6490 = vmatprep.subr.bf16.mxu0 %v7172_v20  ;;  %v7227_v19 = vld [vmem:[%s9643_s1 + $0x388] sm:$0xff]   ;;  %v7228_v20 = vld [vmem:[%s9643_s1 + $0x340] sm:$0xff]  }
  0x46   :  { %6512 = vmatprep.subr.bf16.mxu1 %v7173_v21  ;;  %4688 = vmatprep.mubr.bf16.mxu0 %v5831_v53  ;;  %v7229_v21 = vld [vmem:[%s9643_s1 + $0x3c0] sm:$0xff]   ;;  %v7253_v53 = vld [vmem:[%s9643_s1 + $0x4d0] sm:$0xff]  }
  0x47   :  { %4729 = vmatprep.mubr.bf16.mxu1 %v5833_v55  ;;  %v7255_v55 = vld [vmem:[%s9643_s1 + $0x490] sm:$0xff]  }
  0x48   :  { %6491 = vmatpush3.bf16.msra.mxu0 %v7174_v22  ;;  %v7230_v22 = vld [vmem:[%s9643_s1 + $0x300] sm:$0xff]  }
  0x49   :  { %6513 = vmatpush3.bf16.msra.mxu1 %v7175_v23  ;;  %6492 = vmatprep.subr.bf16.mxu0 %v7176_v24  ;;  %v7231_v23 = vld [vmem:[%s9643_s1 + $0x380] sm:$0xff]   ;;  %v18_v24 = vld [vmem:[%s9644_s0 + $0x30] sm:$0xff] }
  0x4a   :  { %6514 = vmatprep.subr.bf16.mxu1 %v7177_v25  ;;  %v50_v25 = vld [vmem:[%s9644_s0 + $0x130] sm:$0xff] }
  0x4c   :  { %6493 = vmatpush3.bf16.msra.mxu0 %v7178_v26  ;;  %v19_v26 = vld [vmem:[%s9644_s0 + $0x38] sm:$0xff] }
  0x4d   :  { %6515 = vmatpush3.bf16.msra.mxu1 %v7179_v27  ;;  %6494 = vmatprep.subr.bf16.mxu0 %v7180_v28  ;;  %v5834_v27 = vcombine.low %v18_v24, %v50_v25  ;;  %v5835_v28 = vcombine.high %v18_v24, %v50_v25  ;;  %v7280_v24 = vld [vmem:[%s9643_s1 + $0x558] sm:$0xff]  }
  0x4e   :  { %6516 = vmatprep.subr.bf16.mxu1 %v7181_v29  ;;  %v51_v29 = vld [vmem:[%s9644_s0 + $0x138] sm:$0xff] }
  0x4f   :  { %v7281_v25 = vld [vmem:[%s9643_s1 + $0x5d8] sm:$0xff]  }
  0x50   :  { %6495 = vmatpush3.bf16.msra.mxu0 %v7182_v30  ;;  %v5836_v30 = vcombine.low %v19_v26, %v51_v29 }
  0x51   :  { %6517 = vmatpush3.bf16.msra.mxu1 %v7183_v31  ;;  %6496 = vmatprep.subr.bf16.mxu0 %v7184_v32  ;;  %v5837_v31 = vcombine.high %v19_v26, %v51_v29  ;;  %v7232_v32 = vld [vmem:[%s9643_s1 + $0x478] sm:$0xff]   ;;  %v7285_v29 = vld [vmem:[%s9643_s1 + $0x5d0] sm:$0xff]  }
  0x52   :  { %6518 = vmatprep.subr.bf16.mxu1 %v7185_v33  ;;  %v7233_v33 = vld [vmem:[%s9643_s1 + $0x4f8] sm:$0xff]  }
  0x53   :  { %v7282_v26 = vld [vmem:[%s9643_s1 + $0x518] sm:$0xff]  }
  0x54   :  { %6497 = vmatpush3.bf16.msra.mxu0 %v7186_v34  ;;  %v7234_v34 = vld [vmem:[%s9643_s1 + $0x438] sm:$0xff]  }
  0x55   :  { %6519 = vmatpush3.bf16.msra.mxu1 %v7187_v35  ;;  %6498 = vmatprep.subr.bf16.mxu0 %v7188_v36  ;;  %v7235_v35 = vld [vmem:[%s9643_s1 + $0x4b8] sm:$0xff]   ;;  %v7236_v36 = vld [vmem:[%s9643_s1 + $0x470] sm:$0xff]  }
  0x56   :  { %6520 = vmatprep.subr.bf16.mxu1 %v7189_v37  ;;  %v7237_v37 = vld [vmem:[%s9643_s1 + $0x4f0] sm:$0xff]  }
  0x58   :  { %6499 = vmatpush3.bf16.msra.mxu0 %v7190_v38  ;;  %v7238_v38 = vld [vmem:[%s9643_s1 + $0x430] sm:$0xff]  }
  0x59   :  { %6521 = vmatpush3.bf16.msra.mxu1 %v7191_v39  ;;  %6500 = vmatprep.subr.bf16.mxu0 %v7192_v40  ;;  %v7239_v39 = vld [vmem:[%s9643_s1 + $0x4b0] sm:$0xff]   ;;  %v7240_v40 = vld [vmem:[%s9643_s1 + $0x468] sm:$0xff]  }
  0x5a   :  { %6522 = vmatprep.subr.bf16.mxu1 %v7193_v41  ;;  %v7241_v41 = vld [vmem:[%s9643_s1 + $0x4e8] sm:$0xff]  }
  0x5c   :  { %6501 = vmatpush3.bf16.msra.mxu0 %v7194_v42  ;;  %v7242_v42 = vld [vmem:[%s9643_s1 + $0x428] sm:$0xff]  }
  0x5d   :  { %6523 = vmatpush3.bf16.msra.mxu1 %v7195_v43  ;;  %6502 = vmatprep.subr.bf16.mxu0 %v7196_v44  ;;  %v7243_v43 = vld [vmem:[%s9643_s1 + $0x4a8] sm:$0xff]   ;;  %v7244_v44 = vld [vmem:[%s9643_s1 + $0x460] sm:$0xff]  }
  0x5e   :  { %6524 = vmatprep.subr.bf16.mxu1 %v7197_v45  ;;  %v7245_v45 = vld [vmem:[%s9643_s1 + $0x4e0] sm:$0xff]  }
  0x60   :  { %6503 = vmatpush3.bf16.msra.mxu0 %v7198_v46  ;;  %v7246_v46 = vld [vmem:[%s9643_s1 + $0x420] sm:$0xff]  }
  0x61   :  { %6525 = vmatpush3.bf16.msra.mxu1 %v7199_v47  ;;  %6532 = vmatprep.subr.bf16.mxu0 %v7200_v56  ;;  %v7247_v47 = vld [vmem:[%s9643_s1 + $0x4a0] sm:$0xff]   ;;  %v7256_v56 = vld [vmem:[%s9643_s1 + $0x448] sm:$0xff]  }
  0x62   :  { %6554 = vmatprep.subr.bf16.mxu1 %v7201_v57  ;;  %v7257_v57 = vld [vmem:[%s9643_s1 + $0x4c8] sm:$0xff]  }
  0x63   :  { %4689 = vmatmul.mubr.bf16.vlgmr.msra.gmra.mxu0 %v5830_v52  ;;  %v7252_v52 = vld [vmem:[%s9643_s1 + $0x450] sm:$0xff]  }
  0x64   :  { %4730 = vmatmul.mubr.bf16.vlgmr.msra.gmra.mxu1 %v5832_v54  ;;  %6533 = vmatpush3.bf16.msra.mxu0 %v7202_v58  ;;  %v7254_v54 = vld [vmem:[%s9643_s1 + $0x410] sm:$0xff]   ;;  %v7258_v58 = vld [vmem:[%s9643_s1 + $0x408] sm:$0xff]  }
  0x65   :  { %6555 = vmatpush3.bf16.msra.mxu1 %v7203_v59  ;;  %6534 = vmatprep.subr.bf16.mxu0 %v7204_v60  ;;  %v7259_v59 = vld [vmem:[%s9643_s1 + $0x488] sm:$0xff]   ;;  %v7260_v60 = vld [vmem:[%s9643_s1 + $0x440] sm:$0xff]  }
  0x66   :  { %6556 = vmatprep.subr.bf16.mxu1 %v7205_v61  ;;  %4770 = vmatprep.mubr.bf16.mxu0 %v5835_v28  ;;  %v7261_v61 = vld [vmem:[%s9643_s1 + $0x4c0] sm:$0xff]   ;;  %v7284_v28 = vld [vmem:[%s9643_s1 + $0x550] sm:$0xff]  }
  0x67   :  { %4811 = vmatprep.mubr.bf16.mxu1 %v5837_v31  ;;  %v7287_v31 = vld [vmem:[%s9643_s1 + $0x590] sm:$0xff]  }
  0x68   :  { %6535 = vmatpush3.bf16.msra.mxu0 %v7206_v62  ;;  %v7262_v62 = vld [vmem:[%s9643_s1 + $0x400] sm:$0xff]  }
  0x69   :  { %6557 = vmatpush3.bf16.msra.mxu1 %v7207_v63  ;;  %6536 = vmatprep.subr.bf16.mxu0 %v7208_v0  ;;  %v7263_v63 = vld [vmem:[%s9643_s1 + $0x480] sm:$0xff]  }
  0x6a   :  { %6558 = vmatprep.subr.bf16.mxu1 %v7209_v1  ;;  %v20_v0 = vld [vmem:[%s9644_s0 + $0x40] sm:$0xff] }
  0x6b   :  { %v52_v1 = vld [vmem:[%s9644_s0 + $0x140] sm:$0xff] }
  0x6c   :  { %6537 = vmatpush3.bf16.msra.mxu0 %v7210_v2  ;;  %v5838_v2 = vcombine.low %v20_v0, %v52_v1 }
  0x6d   :  { %6559 = vmatpush3.bf16.msra.mxu1 %v7211_v3  ;;  %6538 = vmatprep.subr.bf16.mxu0 %v7212_v4  ;;  %v5839_v3 = vcombine.high %v20_v0, %v52_v1  ;;  %v21_v4 = vld [vmem:[%s9644_s0 + $0x48] sm:$0xff]  ;;  %v7312_v0 = vld [vmem:[%s9643_s1 + $0x658] sm:$0xff]  }
  0x6e   :  { %6560 = vmatprep.subr.bf16.mxu1 %v7213_v5  ;;  %v53_v5 = vld [vmem:[%s9644_s0 + $0x148] sm:$0xff]  ;;  %v7313_v1 = vld [vmem:[%s9643_s1 + $0x6d8] sm:$0xff]  }
  0x70   :  { %6539 = vmatpush3.bf16.msra.mxu0 %v7214_v6  ;;  %v5840_v6 = vcombine.low %v21_v4, %v53_v5 }
  0x71   :  { %6561 = vmatpush3.bf16.msra.mxu1 %v7215_v7  ;;  %6540 = vmatprep.subr.bf16.mxu0 %v7216_v8  ;;  %v5841_v7 = vcombine.high %v21_v4, %v53_v5  ;;  %v7264_v8 = vld [vmem:[%s9643_s1 + $0x578] sm:$0xff]   ;;  %v7316_v4 = vld [vmem:[%s9643_s1 + $0x650] sm:$0xff]  }
  0x72   :  { %6562 = vmatprep.subr.bf16.mxu1 %v7217_v9  ;;  %v7265_v9 = vld [vmem:[%s9643_s1 + $0x5f8] sm:$0xff]   ;;  %v7317_v5 = vld [vmem:[%s9643_s1 + $0x6d0] sm:$0xff]  }
  0x74   :  { %6541 = vmatpush3.bf16.msra.mxu0 %v7218_v10  ;;  %v7266_v10 = vld [vmem:[%s9643_s1 + $0x538] sm:$0xff]  }
  0x75   :  { %6563 = vmatpush3.bf16.msra.mxu1 %v7219_v11  ;;  %6542 = vmatprep.subr.bf16.mxu0 %v7220_v12  ;;  %v7267_v11 = vld [vmem:[%s9643_s1 + $0x5b8] sm:$0xff]   ;;  %v7268_v12 = vld [vmem:[%s9643_s1 + $0x570] sm:$0xff]  }
  0x76   :  { %6564 = vmatprep.subr.bf16.mxu1 %v7221_v13  ;;  %v7269_v13 = vld [vmem:[%s9643_s1 + $0x5f0] sm:$0xff]  }
  0x78   :  { %6543 = vmatpush3.bf16.msra.mxu0 %v7222_v14  ;;  %v7270_v14 = vld [vmem:[%s9643_s1 + $0x530] sm:$0xff]  }
  0x79   :  { %6565 = vmatpush3.bf16.msra.mxu1 %v7223_v15  ;;  %6544 = vmatprep.subr.bf16.mxu0 %v7224_v16  ;;  %v7271_v15 = vld [vmem:[%s9643_s1 + $0x5b0] sm:$0xff]   ;;  %v7272_v16 = vld [vmem:[%s9643_s1 + $0x568] sm:$0xff]  }
  0x7a   :  { %6566 = vmatprep.subr.bf16.mxu1 %v7225_v17  ;;  %v7273_v17 = vld [vmem:[%s9643_s1 + $0x5e8] sm:$0xff]  }
  0x7c   :  { %6545 = vmatpush3.bf16.msra.mxu0 %v7226_v18  ;;  %v7274_v18 = vld [vmem:[%s9643_s1 + $0x528] sm:$0xff]  }
  0x7d   :  { %6567 = vmatpush3.bf16.msra.mxu1 %v7227_v19  ;;  %6546 = vmatprep.subr.bf16.mxu0 %v7228_v20  ;;  %v7275_v19 = vld [vmem:[%s9643_s1 + $0x5a8] sm:$0xff]   ;;  %v7276_v20 = vld [vmem:[%s9643_s1 + $0x560] sm:$0xff]  }
  0x7e   :  { %6568 = vmatprep.subr.bf16.mxu1 %v7229_v21  ;;  %v7277_v21 = vld [vmem:[%s9643_s1 + $0x5e0] sm:$0xff]  }
  0x80   :  { %6547 = vmatpush3.bf16.msra.mxu0 %v7230_v22  ;;  %v7278_v22 = vld [vmem:[%s9643_s1 + $0x520] sm:$0xff]  }
  0x81   :  { %6569 = vmatpush3.bf16.msra.mxu1 %v7231_v23  ;;  %6576 = vmatprep.subr.bf16.mxu0 %v7232_v32  ;;  %v7279_v23 = vld [vmem:[%s9643_s1 + $0x5a0] sm:$0xff]   ;;  %v7288_v32 = vld [vmem:[%s9643_s1 + $0x548] sm:$0xff]  }
  0x82   :  { %6598 = vmatprep.subr.bf16.mxu1 %v7233_v33  ;;  %v7289_v33 = vld [vmem:[%s9643_s1 + $0x5c8] sm:$0xff]  }
  0x83   :  { %4771 = vmatmul.mubr.bf16.vlgmr.msra.gmra.mxu0 %v5834_v27  ;;  %v7283_v27 = vld [vmem:[%s9643_s1 + $0x598] sm:$0xff]  }
  0x84   :  { %4812 = vmatmul.mubr.bf16.vlgmr.msra.gmra.mxu1 %v5836_v30  ;;  %6577 = vmatpush3.bf16.msra.mxu0 %v7234_v34  ;;  %v7286_v30 = vld [vmem:[%s9643_s1 + $0x510] sm:$0xff]   ;;  %v7290_v34 = vld [vmem:[%s9643_s1 + $0x508] sm:$0xff]  }
  0x85   :  { %6599 = vmatpush3.bf16.msra.mxu1 %v7235_v35  ;;  %6578 = vmatprep.subr.bf16.mxu0 %v7236_v36  ;;  %v7291_v35 = vld [vmem:[%s9643_s1 + $0x588] sm:$0xff]   ;;  %v7292_v36 = vld [vmem:[%s9643_s1 + $0x540] sm:$0xff]  }
  0x86   :  { %6600 = vmatprep.subr.bf16.mxu1 %v7237_v37  ;;  %4852 = vmatprep.mubr.bf16.mxu0 %v5839_v3  ;;  %v7293_v37 = vld [vmem:[%s9643_s1 + $0x5c0] sm:$0xff]   ;;  %v7315_v3 = vld [vmem:[%s9643_s1 + $0x698] sm:$0xff]  }
  0x87   :  { %4893 = vmatprep.mubr.bf16.mxu1 %v5841_v7  ;;  %v7319_v7 = vld [vmem:[%s9643_s1 + $0x690] sm:$0xff]  }
  0x88   :  { %6579 = vmatpush3.bf16.msra.mxu0 %v7238_v38  ;;  %v7294_v38 = vld [vmem:[%s9643_s1 + $0x500] sm:$0xff]  }
  0x89   :  { %6601 = vmatpush3.bf16.msra.mxu1 %v7239_v39  ;;  %6580 = vmatprep.subr.bf16.mxu0 %v7240_v40  ;;  %v7295_v39 = vld [vmem:[%s9643_s1 + $0x580] sm:$0xff]   ;;  %v22_v40 = vld [vmem:[%s9644_s0 + $0x50] sm:$0xff] }
  0x8a   :  { %6602 = vmatprep.subr.bf16.mxu1 %v7241_v41  ;;  %v54_v41 = vld [vmem:[%s9644_s0 + $0x150] sm:$0xff] }
  0x8c   :  { %6581 = vmatpush3.bf16.msra.mxu0 %v7242_v42  ;;  %v23_v42 = vld [vmem:[%s9644_s0 + $0x58] sm:$0xff] }
  0x8d   :  { %6603 = vmatpush3.bf16.msra.mxu1 %v7243_v43  ;;  %6582 = vmatprep.subr.bf16.mxu0 %v7244_v44  ;;  %v55_v43 = vld [vmem:[%s9644_s0 + $0x158] sm:$0xff]  ;;  %v5842_v44 = vcombine.low %v22_v40, %v54_v41 }
  0x8e   :  { %6604 = vmatprep.subr.bf16.mxu1 %v7245_v45  ;;  %v5843_v45 = vcombine.high %v22_v40, %v54_v41  ;;  %v7344_v40 = vld [vmem:[%s9643_s1 + $0x758] sm:$0xff]  }
  0x8f   :  { %v7345_v41 = vld [vmem:[%s9643_s1 + $0x7d8] sm:$0xff]  }
  0x90   :  { %6583 = vmatpush3.bf16.msra.mxu0 %v7246_v46  ;;  %v5844_v46 = vcombine.low %v23_v42, %v55_v43 }
  0x91   :  { %6605 = vmatpush3.bf16.msra.mxu1 %v7247_v47  ;;  %6584 = vmatprep.subr.bf16.mxu0 %v7248_v48  ;;  %v5845_v47 = vcombine.high %v23_v42, %v55_v43  ;;  %v7296_v48 = vld [vmem:[%s9643_s1 + $0x678] sm:$0xff]  }
  0x92   :  { %6606 = vmatprep.subr.bf16.mxu1 %v7249_v49  ;;  %v7297_v49 = vld [vmem:[%s9643_s1 + $0x6f8] sm:$0xff]  }
  0x93   :  { %v7346_v42 = vld [vmem:[%s9643_s1 + $0x718] sm:$0xff]  }
  0x94   :  { %6585 = vmatpush3.bf16.msra.mxu0 %v7250_v50  ;;  %v7298_v50 = vld [vmem:[%s9643_s1 + $0x638] sm:$0xff]  }
  0x95   :  { %6607 = vmatpush3.bf16.msra.mxu1 %v7251_v51  ;;  %6586 = vmatprep.subr.bf16.mxu0 %v7252_v52  ;;  %v7299_v51 = vld [vmem:[%s9643_s1 + $0x6b8] sm:$0xff]   ;;  %v7300_v52 = vld [vmem:[%s9643_s1 + $0x670] sm:$0xff]  }
  0x96   :  { %6608 = vmatprep.subr.bf16.mxu1 %v7253_v53  ;;  %v7301_v53 = vld [vmem:[%s9643_s1 + $0x6f0] sm:$0xff]   ;;  %v7347_v43 = vld [vmem:[%s9643_s1 + $0x798] sm:$0xff]  }
  0x98   :  { %6587 = vmatpush3.bf16.msra.mxu0 %v7254_v54  ;;  %v7302_v54 = vld [vmem:[%s9643_s1 + $0x630] sm:$0xff]  }
  0x99   :  { %6609 = vmatpush3.bf16.msra.mxu1 %v7255_v55  ;;  %6588 = vmatprep.subr.bf16.mxu0 %v7256_v56  ;;  %v7303_v55 = vld [vmem:[%s9643_s1 + $0x6b0] sm:$0xff]   ;;  %v7304_v56 = vld [vmem:[%s9643_s1 + $0x668] sm:$0xff]  }
  0x9a   :  { %6610 = vmatprep.subr.bf16.mxu1 %v7257_v57  ;;  %v7305_v57 = vld [vmem:[%s9643_s1 + $0x6e8] sm:$0xff]  }
  0x9c   :  { %6589 = vmatpush3.bf16.msra.mxu0 %v7258_v58  ;;  %v7306_v58 = vld [vmem:[%s9643_s1 + $0x628] sm:$0xff]  }
  0x9d   :  { %6611 = vmatpush3.bf16.msra.mxu1 %v7259_v59  ;;  %6590 = vmatprep.subr.bf16.mxu0 %v7260_v60  ;;  %v7307_v59 = vld [vmem:[%s9643_s1 + $0x6a8] sm:$0xff]   ;;  %v7308_v60 = vld [vmem:[%s9643_s1 + $0x660] sm:$0xff]  }
  0x9e   :  { %6612 = vmatprep.subr.bf16.mxu1 %v7261_v61  ;;  %v7309_v61 = vld [vmem:[%s9643_s1 + $0x6e0] sm:$0xff]  }
  0xa0   :  { %6591 = vmatpush3.bf16.msra.mxu0 %v7262_v62  ;;  %v7310_v62 = vld [vmem:[%s9643_s1 + $0x620] sm:$0xff]  }
  0xa1   :  { %6613 = vmatpush3.bf16.msra.mxu1 %v7263_v63  ;;  %6620 = vmatprep.subr.bf16.mxu0 %v7264_v8  ;;  %v7311_v63 = vld [vmem:[%s9643_s1 + $0x6a0] sm:$0xff]   ;;  %v7320_v8 = vld [vmem:[%s9643_s1 + $0x648] sm:$0xff]  }
  0xa2   :  { %6642 = vmatprep.subr.bf16.mxu1 %v7265_v9  ;;  %v7321_v9 = vld [vmem:[%s9643_s1 + $0x6c8] sm:$0xff]  }
  0xa3   :  { %4853 = vmatmul.mubr.bf16.vlgmr.msra.gmra.mxu0 %v5838_v2  ;;  %v7314_v2 = vld [vmem:[%s9643_s1 + $0x618] sm:$0xff]  }
  0xa4   :  { %4894 = vmatmul.mubr.bf16.vlgmr.msra.gmra.mxu1 %v5840_v6  ;;  %6621 = vmatpush3.bf16.msra.mxu0 %v7266_v10  ;;  %v7318_v6 = vld [vmem:[%s9643_s1 + $0x610] sm:$0xff]   ;;  %v7322_v10 = vld [vmem:[%s9643_s1 + $0x608] sm:$0xff]  }
  0xa5   :  { %6643 = vmatpush3.bf16.msra.mxu1 %v7267_v11  ;;  %6622 = vmatprep.subr.bf16.mxu0 %v7268_v12  ;;  %v7323_v11 = vld [vmem:[%s9643_s1 + $0x688] sm:$0xff]   ;;  %v7324_v12 = vld [vmem:[%s9643_s1 + $0x640] sm:$0xff]  }
  0xa6   :  { %6644 = vmatprep.subr.bf16.mxu1 %v7269_v13  ;;  %4934 = vmatprep.mubr.bf16.mxu0 %v5843_v45  ;;  %v7325_v13 = vld [vmem:[%s9643_s1 + $0x6c0] sm:$0xff]   ;;  %v7349_v45 = vld [vmem:[%s9643_s1 + $0x7d0] sm:$0xff]  }
  0xa7   :  { %4975 = vmatprep.mubr.bf16.mxu1 %v5845_v47  ;;  %v7351_v47 = vld [vmem:[%s9643_s1 + $0x790] sm:$0xff]  }
  0xa8   :  { %6623 = vmatpush3.bf16.msra.mxu0 %v7270_v14  ;;  %v7326_v14 = vld [vmem:[%s9643_s1 + $0x600] sm:$0xff]  }
  0xa9   :  { %6645 = vmatpush3.bf16.msra.mxu1 %v7271_v15  ;;  %6624 = vmatprep.subr.bf16.mxu0 %v7272_v16  ;;  %v7327_v15 = vld [vmem:[%s9643_s1 + $0x680] sm:$0xff]  }
  0xaa   :  { %6646 = vmatprep.subr.bf16.mxu1 %v7273_v17  ;;  %v24_v16 = vld [vmem:[%s9644_s0 + $0x60] sm:$0xff] }
  0xab   :  { %v56_v17 = vld [vmem:[%s9644_s0 + $0x160] sm:$0xff] }
  0xac   :  { %6625 = vmatpush3.bf16.msra.mxu0 %v7274_v18  ;;  %v25_v18 = vld [vmem:[%s9644_s0 + $0x68] sm:$0xff] }
  0xad   :  { %6647 = vmatpush3.bf16.msra.mxu1 %v7275_v19  ;;  %6626 = vmatprep.subr.bf16.mxu0 %v7276_v20  ;;  %v5846_v19 = vcombine.low %v24_v16, %v56_v17  ;;  %v5847_v20 = vcombine.high %v24_v16, %v56_v17  ;;  %v7376_v16 = vld [vmem:[%s9643_s1 + $0x858] sm:$0xff]  }
  0xae   :  { %6648 = vmatprep.subr.bf16.mxu1 %v7277_v21  ;;  %v57_v21 = vld [vmem:[%s9644_s0 + $0x168] sm:$0xff]  ;;  %v7377_v17 = vld [vmem:[%s9643_s1 + $0x8d8] sm:$0xff]  }
  0xb0   :  { %6627 = vmatpush3.bf16.msra.mxu0 %v7278_v22  ;;  %v5848_v22 = vcombine.low %v25_v18, %v57_v21 }
  0xb1   :  { %6649 = vmatpush3.bf16.msra.mxu1 %v7279_v23  ;;  %6628 = vmatprep.subr.bf16.mxu0 %v7280_v24  ;;  %v5849_v23 = vcombine.high %v25_v18, %v57_v21  ;;  %v7328_v24 = vld [vmem:[%s9643_s1 + $0x778] sm:$0xff]   ;;  %v7381_v21 = vld [vmem:[%s9643_s1 + $0x8d0] sm:$0xff]  }
  0xb2   :  { %6650 = vmatprep.subr.bf16.mxu1 %v7281_v25  ;;  %v7329_v25 = vld [vmem:[%s9643_s1 + $0x7f8] sm:$0xff]  }
  0xb3   :  { %v7378_v18 = vld [vmem:[%s9643_s1 + $0x818] sm:$0xff]  }
  0xb4   :  { %6629 = vmatpush3.bf16.msra.mxu0 %v7282_v26  ;;  %v7330_v26 = vld [vmem:[%s9643_s1 + $0x738] sm:$0xff]  }
  0xb5   :  { %6651 = vmatpush3.bf16.msra.mxu1 %v7283_v27  ;;  %6630 = vmatprep.subr.bf16.mxu0 %v7284_v28  ;;  %v7331_v27 = vld [vmem:[%s9643_s1 + $0x7b8] sm:$0xff]   ;;  %v7332_v28 = vld [vmem:[%s9643_s1 + $0x770] sm:$0xff]  }
  0xb6   :  { %6652 = vmatprep.subr.bf16.mxu1 %v7285_v29  ;;  %v7333_v29 = vld [vmem:[%s9643_s1 + $0x7f0] sm:$0xff]  }
  0xb8   :  { %6631 = vmatpush3.bf16.msra.mxu0 %v7286_v30  ;;  %v7334_v30 = vld [vmem:[%s9643_s1 + $0x730] sm:$0xff]  }
  0xb9   :  { %6653 = vmatpush3.bf16.msra.mxu1 %v7287_v31  ;;  %6632 = vmatprep.subr.bf16.mxu0 %v7288_v32  ;;  %v7335_v31 = vld [vmem:[%s9643_s1 + $0x7b0] sm:$0xff]   ;;  %v7336_v32 = vld [vmem:[%s9643_s1 + $0x768] sm:$0xff]  }
  0xba   :  { %6654 = vmatprep.subr.bf16.mxu1 %v7289_v33  ;;  %v7337_v33 = vld [vmem:[%s9643_s1 + $0x7e8] sm:$0xff]  }
  0xbc   :  { %6633 = vmatpush3.bf16.msra.mxu0 %v7290_v34  ;;  %v7338_v34 = vld [vmem:[%s9643_s1 + $0x728] sm:$0xff]  }
  0xbd   :  { %6655 = vmatpush3.bf16.msra.mxu1 %v7291_v35  ;;  %6634 = vmatprep.subr.bf16.mxu0 %v7292_v36  ;;  %v7339_v35 = vld [vmem:[%s9643_s1 + $0x7a8] sm:$0xff]   ;;  %v7340_v36 = vld [vmem:[%s9643_s1 + $0x760] sm:$0xff]  }
  0xbe   :  { %6656 = vmatprep.subr.bf16.mxu1 %v7293_v37  ;;  %v7341_v37 = vld [vmem:[%s9643_s1 + $0x7e0] sm:$0xff]  }
  0xc0   :  { %6635 = vmatpush3.bf16.msra.mxu0 %v7294_v38  ;;  %v7342_v38 = vld [vmem:[%s9643_s1 + $0x720] sm:$0xff]  }
  0xc1   :  { %6657 = vmatpush3.bf16.msra.mxu1 %v7295_v39  ;;  %6664 = vmatprep.subr.bf16.mxu0 %v7296_v48  ;;  %v7343_v39 = vld [vmem:[%s9643_s1 + $0x7a0] sm:$0xff]   ;;  %v7352_v48 = vld [vmem:[%s9643_s1 + $0x748] sm:$0xff]  }
  0xc2   :  { %6686 = vmatprep.subr.bf16.mxu1 %v7297_v49  ;;  %v7353_v49 = vld [vmem:[%s9643_s1 + $0x7c8] sm:$0xff]  }
  0xc3   :  { %4935 = vmatmul.mubr.bf16.vlgmr.msra.gmra.mxu0 %v5842_v44  ;;  %v7348_v44 = vld [vmem:[%s9643_s1 + $0x750] sm:$0xff]  }
  0xc4   :  { %4976 = vmatmul.mubr.bf16.vlgmr.msra.gmra.mxu1 %v5844_v46  ;;  %6665 = vmatpush3.bf16.msra.mxu0 %v7298_v50  ;;  %v7350_v46 = vld [vmem:[%s9643_s1 + $0x710] sm:$0xff]   ;;  %v7354_v50 = vld [vmem:[%s9643_s1 + $0x708] sm:$0xff]  }
  0xc5   :  { %6687 = vmatpush3.bf16.msra.mxu1 %v7299_v51  ;;  %6666 = vmatprep.subr.bf16.mxu0 %v7300_v52  ;;  %v7355_v51 = vld [vmem:[%s9643_s1 + $0x788] sm:$0xff]   ;;  %v7356_v52 = vld [vmem:[%s9643_s1 + $0x740] sm:$0xff]  }
  0xc6   :  { %6688 = vmatprep.subr.bf16.mxu1 %v7301_v53  ;;  %5016 = vmatprep.mubr.bf16.mxu0 %v5847_v20  ;;  %v7357_v53 = vld [vmem:[%s9643_s1 + $0x7c0] sm:$0xff]   ;;  %v7380_v20 = vld [vmem:[%s9643_s1 + $0x850] sm:$0xff]  }
  0xc7   :  { %5057 = vmatprep.mubr.bf16.mxu1 %v5849_v23  ;;  %v7383_v23 = vld [vmem:[%s9643_s1 + $0x890] sm:$0xff]  }
  0xc8   :  { %6667 = vmatpush3.bf16.msra.mxu0 %v7302_v54  ;;  %v7358_v54 = vld [vmem:[%s9643_s1 + $0x700] sm:$0xff]  }
  0xc9   :  { %6689 = vmatpush3.bf16.msra.mxu1 %v7303_v55  ;;  %6668 = vmatprep.subr.bf16.mxu0 %v7304_v56  ;;  %v7359_v55 = vld [vmem:[%s9643_s1 + $0x780] sm:$0xff]   ;;  %v26_v56 = vld [vmem:[%s9644_s0 + $0x70] sm:$0xff] }
  0xca   :  { %6690 = vmatprep.subr.bf16.mxu1 %v7305_v57  ;;  %v58_v57 = vld [vmem:[%s9644_s0 + $0x170] sm:$0xff] }
  0xcc   :  { %6669 = vmatpush3.bf16.msra.mxu0 %v7306_v58  ;;  %v5850_v58 = vcombine.low %v26_v56, %v58_v57 }
  0xcd   :  { %6691 = vmatpush3.bf16.msra.mxu1 %v7307_v59  ;;  %6670 = vmatprep.subr.bf16.mxu0 %v7308_v60  ;;  %v5851_v59 = vcombine.high %v26_v56, %v58_v57  ;;  %v27_v60 = vld [vmem:[%s9644_s0 + $0x78] sm:$0xff] }
  0xce   :  { %6692 = vmatprep.subr.bf16.mxu1 %v7309_v61  ;;  %v59_v61 = vld [vmem:[%s9644_s0 + $0x178] sm:$0xff] }
  0xcf   :  { %v7408_v56 = vld [vmem:[%s9643_s1 + $0x958] sm:$0xff]  }
  0xd0   :  { %6671 = vmatpush3.bf16.msra.mxu0 %v7310_v62  ;;  %v5852_v62 = vcombine.low %v27_v60, %v59_v61  ;;  %v7409_v57 = vld [vmem:[%s9643_s1 + $0x9d8] sm:$0xff]  }
  0xd1   :  { %6693 = vmatpush3.bf16.msra.mxu1 %v7311_v63  ;;  %6672 = vmatprep.subr.bf16.mxu0 %v7312_v0  ;;  %v5853_v63 = vcombine.high %v27_v60, %v59_v61  ;;  %v7360_v0 = vld [vmem:[%s9643_s1 + $0x878] sm:$0xff]   ;;  %v7412_v60 = vld [vmem:[%s9643_s1 + $0x950] sm:$0xff]  }
  0xd2   :  { %6694 = vmatprep.subr.bf16.mxu1 %v7313_v1  ;;  %v7361_v1 = vld [vmem:[%s9643_s1 + $0x8f8] sm:$0xff]   ;;  %v7413_v61 = vld [vmem:[%s9643_s1 + $0x9d0] sm:$0xff]  }
  0xd4   :  { %6673 = vmatpush3.bf16.msra.mxu0 %v7314_v2  ;;  %v7362_v2 = vld [vmem:[%s9643_s1 + $0x838] sm:$0xff]  }
  0xd5   :  { %6695 = vmatpush3.bf16.msra.mxu1 %v7315_v3  ;;  %6674 = vmatprep.subr.bf16.mxu0 %v7316_v4  ;;  %v7363_v3 = vld [vmem:[%s9643_s1 + $0x8b8] sm:$0xff]   ;;  %v7364_v4 = vld [vmem:[%s9643_s1 + $0x870] sm:$0xff]  }
  0xd6   :  { %6696 = vmatprep.subr.bf16.mxu1 %v7317_v5  ;;  %v7365_v5 = vld [vmem:[%s9643_s1 + $0x8f0] sm:$0xff]  }
  0xd8   :  { %6675 = vmatpush3.bf16.msra.mxu0 %v7318_v6  ;;  %v7366_v6 = vld [vmem:[%s9643_s1 + $0x830] sm:$0xff]  }
  0xd9   :  { %6697 = vmatpush3.bf16.msra.mxu1 %v7319_v7  ;;  %6676 = vmatprep.subr.bf16.mxu0 %v7320_v8  ;;  %v7367_v7 = vld [vmem:[%s9643_s1 + $0x8b0] sm:$0xff]   ;;  %v7368_v8 = vld [vmem:[%s9643_s1 + $0x868] sm:$0xff]  }
  0xda   :  { %6698 = vmatprep.subr.bf16.mxu1 %v7321_v9  ;;  %v7369_v9 = vld [vmem:[%s9643_s1 + $0x8e8] sm:$0xff]  }
  0xdc   :  { %6677 = vmatpush3.bf16.msra.mxu0 %v7322_v10  ;;  %v7370_v10 = vld [vmem:[%s9643_s1 + $0x828] sm:$0xff]  }
  0xdd   :  { %6699 = vmatpush3.bf16.msra.mxu1 %v7323_v11  ;;  %6678 = vmatprep.subr.bf16.mxu0 %v7324_v12  ;;  %v7371_v11 = vld [vmem:[%s9643_s1 + $0x8a8] sm:$0xff]   ;;  %v7372_v12 = vld [vmem:[%s9643_s1 + $0x860] sm:$0xff]  }
  0xde   :  { %6700 = vmatprep.subr.bf16.mxu1 %v7325_v13  ;;  %v7373_v13 = vld [vmem:[%s9643_s1 + $0x8e0] sm:$0xff]  }
  0xe0   :  { %6679 = vmatpush3.bf16.msra.mxu0 %v7326_v14  ;;  %v7374_v14 = vld [vmem:[%s9643_s1 + $0x820] sm:$0xff]  }
  0xe1   :  { %6701 = vmatpush3.bf16.msra.mxu1 %v7327_v15  ;;  %6708 = vmatprep.subr.bf16.mxu0 %v7328_v24  ;;  %v7375_v15 = vld [vmem:[%s9643_s1 + $0x8a0] sm:$0xff]   ;;  %v7384_v24 = vld [vmem:[%s9643_s1 + $0x848] sm:$0xff]  }
  0xe2   :  { %6730 = vmatprep.subr.bf16.mxu1 %v7329_v25  ;;  %v7385_v25 = vld [vmem:[%s9643_s1 + $0x8c8] sm:$0xff]  }
  0xe3   :  { %5017 = vmatmul.mubr.bf16.vlgmr.msra.gmra.mxu0 %v5846_v19  ;;  %v7379_v19 = vld [vmem:[%s9643_s1 + $0x898] sm:$0xff]  }
  0xe4   :  { %5058 = vmatmul.mubr.bf16.vlgmr.msra.gmra.mxu1 %v5848_v22  ;;  %6709 = vmatpush3.bf16.msra.mxu0 %v7330_v26  ;;  %v7382_v22 = vld [vmem:[%s9643_s1 + $0x810] sm:$0xff]   ;;  %v7386_v26 = vld [vmem:[%s9643_s1 + $0x808] sm:$0xff]  }
  0xe5   :  { %6731 = vmatpush3.bf16.msra.mxu1 %v7331_v27  ;;  %6710 = vmatprep.subr.bf16.mxu0 %v7332_v28  ;;  %v7387_v27 = vld [vmem:[%s9643_s1 + $0x888] sm:$0xff]   ;;  %v7388_v28 = vld [vmem:[%s9643_s1 + $0x840] sm:$0xff]  }
  0xe6   :  { %6732 = vmatprep.subr.bf16.mxu1 %v7333_v29  ;;  %5098 = vmatprep.mubr.bf16.mxu0 %v5851_v59  ;;  %v7389_v29 = vld [vmem:[%s9643_s1 + $0x8c0] sm:$0xff]   ;;  %v7411_v59 = vld [vmem:[%s9643_s1 + $0x998] sm:$0xff]  }
  0xe7   :  { %5139 = vmatprep.mubr.bf16.mxu1 %v5853_v63  ;;  %v7415_v63 = vld [vmem:[%s9643_s1 + $0x990] sm:$0xff]  }
  0xe8   :  { %6711 = vmatpush3.bf16.msra.mxu0 %v7334_v30  ;;  %v7390_v30 = vld [vmem:[%s9643_s1 + $0x800] sm:$0xff]  }
  0xe9   :  { %6733 = vmatpush3.bf16.msra.mxu1 %v7335_v31  ;;  %6712 = vmatprep.subr.bf16.mxu0 %v7336_v32  ;;  %v7391_v31 = vld [vmem:[%s9643_s1 + $0x880] sm:$0xff]  }
  0xea   :  { %6734 = vmatprep.subr.bf16.mxu1 %v7337_v33  ;;  %v28_v32 = vld [vmem:[%s9644_s0 + $0x80] sm:$0xff] }
  0xeb   :  { %v60_v33 = vld [vmem:[%s9644_s0 + $0x180] sm:$0xff] }
  0xec   :  { %6713 = vmatpush3.bf16.msra.mxu0 %v7338_v34  ;;  %v29_v34 = vld [vmem:[%s9644_s0 + $0x88] sm:$0xff] }
  0xed   :  { %6735 = vmatpush3.bf16.msra.mxu1 %v7339_v35  ;;  %6714 = vmatprep.subr.bf16.mxu0 %v7340_v36  ;;  %v61_v35 = vld [vmem:[%s9644_s0 + $0x188] sm:$0xff]  ;;  %v5854_v36 = vcombine.low %v28_v32, %v60_v33 }
  0xee   :  { %6736 = vmatprep.subr.bf16.mxu1 %v7341_v37  ;;  %v5855_v37 = vcombine.high %v28_v32, %v60_v33  ;;  %v7440_v32 = vld [vmem:[%s9643_s1 + $0xa58] sm:$0xff]  }
  0xef   :  { %v7441_v33 = vld [vmem:[%s9643_s1 + $0xad8] sm:$0xff]  }
  0xf0   :  { %6715 = vmatpush3.bf16.msra.mxu0 %v7342_v38  ;;  %v5856_v38 = vcombine.low %v29_v34, %v61_v35 }
  0xf1   :  { %6737 = vmatpush3.bf16.msra.mxu1 %v7343_v39  ;;  %6716 = vmatprep.subr.bf16.mxu0 %v7344_v40  ;;  %v5857_v39 = vcombine.high %v29_v34, %v61_v35  ;;  %v7392_v40 = vld [vmem:[%s9643_s1 + $0x978] sm:$0xff]  }
  0xf2   :  { %6738 = vmatprep.subr.bf16.mxu1 %v7345_v41  ;;  %v7393_v41 = vld [vmem:[%s9643_s1 + $0x9f8] sm:$0xff]  }
  0xf3   :  { %v7442_v34 = vld [vmem:[%s9643_s1 + $0xa18] sm:$0xff]  }
  0xf4   :  { %6717 = vmatpush3.bf16.msra.mxu0 %v7346_v42  ;;  %v7394_v42 = vld [vmem:[%s9643_s1 + $0x938] sm:$0xff]  }
  0xf5   :  { %6739 = vmatpush3.bf16.msra.mxu1 %v7347_v43  ;;  %6718 = vmatprep.subr.bf16.mxu0 %v7348_v44  ;;  %v7395_v43 = vld [vmem:[%s9643_s1 + $0x9b8] sm:$0xff]   ;;  %v7396_v44 = vld [vmem:[%s9643_s1 + $0x970] sm:$0xff]  }
  0xf6   :  { %6740 = vmatprep.subr.bf16.mxu1 %v7349_v45  ;;  %v7397_v45 = vld [vmem:[%s9643_s1 + $0x9f0] sm:$0xff]   ;;  %v7443_v35 = vld [vmem:[%s9643_s1 + $0xa98] sm:$0xff]  }
  0xf8   :  { %6719 = vmatpush3.bf16.msra.mxu0 %v7350_v46  ;;  %v7398_v46 = vld [vmem:[%s9643_s1 + $0x930] sm:$0xff]  }
  0xf9   :  { %6741 = vmatpush3.bf16.msra.mxu1 %v7351_v47  ;;  %6720 = vmatprep.subr.bf16.mxu0 %v7352_v48  ;;  %v7399_v47 = vld [vmem:[%s9643_s1 + $0x9b0] sm:$0xff]   ;;  %v7400_v48 = vld [vmem:[%s9643_s1 + $0x968] sm:$0xff]  }
  0xfa   :  { %6742 = vmatprep.subr.bf16.mxu1 %v7353_v49  ;;  %v7401_v49 = vld [vmem:[%s9643_s1 + $0x9e8] sm:$0xff]  }
  0xfc   :  { %6721 = vmatpush3.bf16.msra.mxu0 %v7354_v50  ;;  %v7402_v50 = vld [vmem:[%s9643_s1 + $0x928] sm:$0xff]  }
  0xfd   :  { %6743 = vmatpush3.bf16.msra.mxu1 %v7355_v51  ;;  %6722 = vmatprep.subr.bf16.mxu0 %v7356_v52  ;;  %v7403_v51 = vld [vmem:[%s9643_s1 + $0x9a8] sm:$0xff]   ;;  %v7404_v52 = vld [vmem:[%s9643_s1 + $0x960] sm:$0xff]  }
  0xfe   :  { %6744 = vmatprep.subr.bf16.mxu1 %v7357_v53  ;;  %v7405_v53 = vld [vmem:[%s9643_s1 + $0x9e0] sm:$0xff]  }
 0x100   :  { %6723 = vmatpush3.bf16.msra.mxu0 %v7358_v54  ;;  %v7406_v54 = vld [vmem:[%s9643_s1 + $0x920] sm:$0xff]  }
 0x101   :  { %6745 = vmatpush3.bf16.msra.mxu1 %v7359_v55  ;;  %6752 = vmatprep.subr.bf16.mxu0 %v7360_v0  ;;  %v7407_v55 = vld [vmem:[%s9643_s1 + $0x9a0] sm:$0xff]   ;;  %v7416_v0 = vld [vmem:[%s9643_s1 + $0x948] sm:$0xff]  }
 0x102   :  { %6774 = vmatprep.subr.bf16.mxu1 %v7361_v1  ;;  %v7417_v1 = vld [vmem:[%s9643_s1 + $0x9c8] sm:$0xff]  }
 0x103   :  { %5099 = vmatmul.mubr.bf16.vlgmr.msra.gmra.mxu0 %v5850_v58  ;;  %v7410_v58 = vld [vmem:[%s9643_s1 + $0x918] sm:$0xff]  }
 0x104   :  { %5140 = vmatmul.mubr.bf16.vlgmr.msra.gmra.mxu1 %v5852_v62  ;;  %6753 = vmatpush3.bf16.msra.mxu0 %v7362_v2  ;;  %v7414_v62 = vld [vmem:[%s9643_s1 + $0x910] sm:$0xff]   ;;  %v7418_v2 = vld [vmem:[%s9643_s1 + $0x908] sm:$0xff]  }
 0x105   :  { %6775 = vmatpush3.bf16.msra.mxu1 %v7363_v3  ;;  %6754 = vmatprep.subr.bf16.mxu0 %v7364_v4  ;;  %v7419_v3 = vld [vmem:[%s9643_s1 + $0x988] sm:$0xff]   ;;  %v7420_v4 = vld [vmem:[%s9643_s1 + $0x940] sm:$0xff]  }
 0x106   :  { %6776 = vmatprep.subr.bf16.mxu1 %v7365_v5  ;;  %5180 = vmatprep.mubr.bf16.mxu0 %v5855_v37  ;;  %v7421_v5 = vld [vmem:[%s9643_s1 + $0x9c0] sm:$0xff]   ;;  %v7445_v37 = vld [vmem:[%s9643_s1 + $0xad0] sm:$0xff]  }
 0x107   :  { %5221 = vmatprep.mubr.bf16.mxu1 %v5857_v39  ;;  %v7447_v39 = vld [vmem:[%s9643_s1 + $0xa90] sm:$0xff]  }
 0x108   :  { %6755 = vmatpush3.bf16.msra.mxu0 %v7366_v6  ;;  %v7422_v6 = vld [vmem:[%s9643_s1 + $0x900] sm:$0xff]  }
 0x109   :  { %6777 = vmatpush3.bf16.msra.mxu1 %v7367_v7  ;;  %6756 = vmatprep.subr.bf16.mxu0 %v7368_v8  ;;  %v7423_v7 = vld [vmem:[%s9643_s1 + $0x980] sm:$0xff]   ;;  %v30_v8 = vld [vmem:[%s9644_s0 + $0x90] sm:$0xff] }
 0x10a   :  { %6778 = vmatprep.subr.bf16.mxu1 %v7369_v9  ;;  %v62_v9 = vld [vmem:[%s9644_s0 + $0x190] sm:$0xff] }
 0x10c   :  { %6757 = vmatpush3.bf16.msra.mxu0 %v7370_v10  ;;  %v31_v10 = vld [vmem:[%s9644_s0 + $0x98] sm:$0xff] }
 0x10d   :  { %6779 = vmatpush3.bf16.msra.mxu1 %v7371_v11  ;;  %6758 = vmatprep.subr.bf16.mxu0 %v7372_v12  ;;  %v5858_v11 = vcombine.low %v30_v8, %v62_v9  ;;  %v5859_v12 = vcombine.high %v30_v8, %v62_v9  ;;  %v7472_v8 = vld [vmem:[%s9643_s1 + $0xb58] sm:$0xff]  }
 0x10e   :  { %6780 = vmatprep.subr.bf16.mxu1 %v7373_v13  ;;  %v63_v13 = vld [vmem:[%s9644_s0 + $0x198] sm:$0xff] }
 0x10f   :  { %v7473_v9 = vld [vmem:[%s9643_s1 + $0xbd8] sm:$0xff]  }
 0x110   :  { %6759 = vmatpush3.bf16.msra.mxu0 %v7374_v14  ;;  %v5860_v14 = vcombine.low %v31_v10, %v63_v13 }
 0x111   :  { %6781 = vmatpush3.bf16.msra.mxu1 %v7375_v15  ;;  %6760 = vmatprep.subr.bf16.mxu0 %v7376_v16  ;;  %v5861_v15 = vcombine.high %v31_v10, %v63_v13  ;;  %v7424_v16 = vld [vmem:[%s9643_s1 + $0xa78] sm:$0xff]   ;;  %v7477_v13 = vld [vmem:[%s9643_s1 + $0xbd0] sm:$0xff]  }
 0x112   :  { %6782 = vmatprep.subr.bf16.mxu1 %v7377_v17  ;;  %v7425_v17 = vld [vmem:[%s9643_s1 + $0xaf8] sm:$0xff]  }
 0x113   :  { %v7474_v10 = vld [vmem:[%s9643_s1 + $0xb18] sm:$0xff]  }
 0x114   :  { %6761 = vmatpush3.bf16.msra.mxu0 %v7378_v18  ;;  %v7426_v18 = vld [vmem:[%s9643_s1 + $0xa38] sm:$0xff]  }
 0x115   :  { %6783 = vmatpush3.bf16.msra.mxu1 %v7379_v19  ;;  %6762 = vmatprep.subr.bf16.mxu0 %v7380_v20  ;;  %v7427_v19 = vld [vmem:[%s9643_s1 + $0xab8] sm:$0xff]   ;;  %v7428_v20 = vld [vmem:[%s9643_s1 + $0xa70] sm:$0xff]  }
 0x116   :  { %6784 = vmatprep.subr.bf16.mxu1 %v7381_v21  ;;  %v7429_v21 = vld [vmem:[%s9643_s1 + $0xaf0] sm:$0xff]  }
 0x118   :  { %6763 = vmatpush3.bf16.msra.mxu0 %v7382_v22  ;;  %v7430_v22 = vld [vmem:[%s9643_s1 + $0xa30] sm:$0xff]  }
 0x119   :  { %6785 = vmatpush3.bf16.msra.mxu1 %v7383_v23  ;;  %6764 = vmatprep.subr.bf16.mxu0 %v7384_v24  ;;  %v7431_v23 = vld [vmem:[%s9643_s1 + $0xab0] sm:$0xff]   ;;  %v7432_v24 = vld [vmem:[%s9643_s1 + $0xa68] sm:$0xff]  }
 0x11a   :  { %6786 = vmatprep.subr.bf16.mxu1 %v7385_v25  ;;  %v7433_v25 = vld [vmem:[%s9643_s1 + $0xae8] sm:$0xff]  }
 0x11c   :  { %6765 = vmatpush3.bf16.msra.mxu0 %v7386_v26  ;;  %v7434_v26 = vld [vmem:[%s9643_s1 + $0xa28] sm:$0xff]  }
 0x11d   :  { %6787 = vmatpush3.bf16.msra.mxu1 %v7387_v27  ;;  %6766 = vmatprep.subr.bf16.mxu0 %v7388_v28  ;;  %v7435_v27 = vld [vmem:[%s9643_s1 + $0xaa8] sm:$0xff]   ;;  %v7436_v28 = vld [vmem:[%s9643_s1 + $0xa60] sm:$0xff]  }
 0x11e   :  { %6788 = vmatprep.subr.bf16.mxu1 %v7389_v29  ;;  %v7437_v29 = vld [vmem:[%s9643_s1 + $0xae0] sm:$0xff]  }
 0x120   :  { %6767 = vmatpush3.bf16.msra.mxu0 %v7390_v30  ;;  %v7438_v30 = vld [vmem:[%s9643_s1 + $0xa20] sm:$0xff]  }
 0x121   :  { %6789 = vmatpush3.bf16.msra.mxu1 %v7391_v31  ;;  %6796 = vmatprep.subr.bf16.mxu0 %v7392_v40  ;;  %v7439_v31 = vld [vmem:[%s9643_s1 + $0xaa0] sm:$0xff]   ;;  %v7448_v40 = vld [vmem:[%s9643_s1 + $0xa48] sm:$0xff]  }
 0x122   :  { %6818 = vmatprep.subr.bf16.mxu1 %v7393_v41  ;;  %v7449_v41 = vld [vmem:[%s9643_s1 + $0xac8] sm:$0xff]  }
 0x123   :  { %5181 = vmatmul.mubr.bf16.vlgmr.msra.gmra.mxu0 %v5854_v36  ;;  %v7444_v36 = vld [vmem:[%s9643_s1 + $0xa50] sm:$0xff]  }
 0x124   :  { %5222 = vmatmul.mubr.bf16.vlgmr.msra.gmra.mxu1 %v5856_v38  ;;  %6797 = vmatpush3.bf16.msra.mxu0 %v7394_v42  ;;  %v7446_v38 = vld [vmem:[%s9643_s1 + $0xa10] sm:$0xff]   ;;  %v7450_v42 = vld [vmem:[%s9643_s1 + $0xa08] sm:$0xff]  }
 0x125   :  { %6819 = vmatpush3.bf16.msra.mxu1 %v7395_v43  ;;  %6798 = vmatprep.subr.bf16.mxu0 %v7396_v44  ;;  %v7451_v43 = vld [vmem:[%s9643_s1 + $0xa88] sm:$0xff]   ;;  %v7452_v44 = vld [vmem:[%s9643_s1 + $0xa40] sm:$0xff]  }
 0x126   :  { %6820 = vmatprep.subr.bf16.mxu1 %v7397_v45  ;;  %5262 = vmatprep.mubr.bf16.mxu0 %v5859_v12  ;;  %v7453_v45 = vld [vmem:[%s9643_s1 + $0xac0] sm:$0xff]   ;;  %v7476_v12 = vld [vmem:[%s9643_s1 + $0xb50] sm:$0xff]  }
 0x127   :  { %5303 = vmatprep.mubr.bf16.mxu1 %v5861_v15  ;;  %v7479_v15 = vld [vmem:[%s9643_s1 + $0xb90] sm:$0xff]  }
 0x128   :  { %6799 = vmatpush3.bf16.msra.mxu0 %v7398_v46  ;;  %v7454_v46 = vld [vmem:[%s9643_s1 + $0xa00] sm:$0xff]  }
 0x129   :  { %6821 = vmatpush3.bf16.msra.mxu1 %v7399_v47  ;;  %6800 = vmatprep.subr.bf16.mxu0 %v7400_v48  ;;  %v7455_v47 = vld [vmem:[%s9643_s1 + $0xa80] sm:$0xff]  }
 0x12a   :  { %6822 = vmatprep.subr.bf16.mxu1 %v7401_v49  ;;  %v32_v48 = vld [vmem:[%s9644_s0 + $0xa0] sm:$0xff] }
 0x12b   :  { %v64_v49 = vld [vmem:[%s9644_s0 + $0x1a0] sm:$0xff] }
 0x12c   :  { %6801 = vmatpush3.bf16.msra.mxu0 %v7402_v50  ;;  %v5862_v50 = vcombine.low %v32_v48, %v64_v49 }
 0x12d   :  { %6823 = vmatpush3.bf16.msra.mxu1 %v7403_v51  ;;  %6802 = vmatprep.subr.bf16.mxu0 %v7404_v52  ;;  %v5863_v51 = vcombine.high %v32_v48, %v64_v49  ;;  %v33_v52 = vld [vmem:[%s9644_s0 + $0xa8] sm:$0xff]  ;;  %v7504_v48 = vld [vmem:[%s9643_s1 + $0xc58] sm:$0xff]  }
 0x12e   :  { %6824 = vmatprep.subr.bf16.mxu1 %v7405_v53  ;;  %v65_v53 = vld [vmem:[%s9644_s0 + $0x1a8] sm:$0xff]  ;;  %v7505_v49 = vld [vmem:[%s9643_s1 + $0xcd8] sm:$0xff]  }
 0x130   :  { %6803 = vmatpush3.bf16.msra.mxu0 %v7406_v54  ;;  %v5864_v54 = vcombine.low %v33_v52, %v65_v53 }
 0x131   :  { %6825 = vmatpush3.bf16.msra.mxu1 %v7407_v55  ;;  %6804 = vmatprep.subr.bf16.mxu0 %v7408_v56  ;;  %v5865_v55 = vcombine.high %v33_v52, %v65_v53  ;;  %v7456_v56 = vld [vmem:[%s9643_s1 + $0xb78] sm:$0xff]   ;;  %v7508_v52 = vld [vmem:[%s9643_s1 + $0xc50] sm:$0xff]  }
 0x132   :  { %6826 = vmatprep.subr.bf16.mxu1 %v7409_v57  ;;  %v7457_v57 = vld [vmem:[%s9643_s1 + $0xbf8] sm:$0xff]   ;;  %v7509_v53 = vld [vmem:[%s9643_s1 + $0xcd0] sm:$0xff]  }
 0x134   :  { %6805 = vmatpush3.bf16.msra.mxu0 %v7410_v58  ;;  %v7458_v58 = vld [vmem:[%s9643_s1 + $0xb38] sm:$0xff]  }
 0x135   :  { %6827 = vmatpush3.bf16.msra.mxu1 %v7411_v59  ;;  %6806 = vmatprep.subr.bf16.mxu0 %v7412_v60  ;;  %v7459_v59 = vld [vmem:[%s9643_s1 + $0xbb8] sm:$0xff]   ;;  %v7460_v60 = vld [vmem:[%s9643_s1 + $0xb70] sm:$0xff]  }
 0x136   :  { %6828 = vmatprep.subr.bf16.mxu1 %v7413_v61  ;;  %v7461_v61 = vld [vmem:[%s9643_s1 + $0xbf0] sm:$0xff]  }
 0x138   :  { %6807 = vmatpush3.bf16.msra.mxu0 %v7414_v62  ;;  %v7462_v62 = vld [vmem:[%s9643_s1 + $0xb30] sm:$0xff]  }
 0x139   :  { %6829 = vmatpush3.bf16.msra.mxu1 %v7415_v63  ;;  %6808 = vmatprep.subr.bf16.mxu0 %v7416_v0  ;;  %v7463_v63 = vld [vmem:[%s9643_s1 + $0xbb0] sm:$0xff]   ;;  %v7464_v0 = vld [vmem:[%s9643_s1 + $0xb68] sm:$0xff]  }
 0x13a   :  { %6830 = vmatprep.subr.bf16.mxu1 %v7417_v1  ;;  %v7465_v1 = vld [vmem:[%s9643_s1 + $0xbe8] sm:$0xff]  }
 0x13c   :  { %6809 = vmatpush3.bf16.msra.mxu0 %v7418_v2  ;;  %v7466_v2 = vld [vmem:[%s9643_s1 + $0xb28] sm:$0xff]  }
 0x13d   :  { %6831 = vmatpush3.bf16.msra.mxu1 %v7419_v3  ;;  %6810 = vmatprep.subr.bf16.mxu0 %v7420_v4  ;;  %v7467_v3 = vld [vmem:[%s9643_s1 + $0xba8] sm:$0xff]   ;;  %v7468_v4 = vld [vmem:[%s9643_s1 + $0xb60] sm:$0xff]  }
 0x13e   :  { %6832 = vmatprep.subr.bf16.mxu1 %v7421_v5  ;;  %v7469_v5 = vld [vmem:[%s9643_s1 + $0xbe0] sm:$0xff]  }
 0x140   :  { %6811 = vmatpush3.bf16.msra.mxu0 %v7422_v6  ;;  %v7470_v6 = vld [vmem:[%s9643_s1 + $0xb20] sm:$0xff]  }
 0x141   :  { %6833 = vmatpush3.bf16.msra.mxu1 %v7423_v7  ;;  %6840 = vmatprep.subr.bf16.mxu0 %v7424_v16  ;;  %v7471_v7 = vld [vmem:[%s9643_s1 + $0xba0] sm:$0xff]   ;;  %v7480_v16 = vld [vmem:[%s9643_s1 + $0xb48] sm:$0xff]  }
 0x142   :  { %6862 = vmatprep.subr.bf16.mxu1 %v7425_v17  ;;  %v7481_v17 = vld [vmem:[%s9643_s1 + $0xbc8] sm:$0xff]  }
 0x143   :  { %5263 = vmatmul.mubr.bf16.vlgmr.msra.gmra.mxu0 %v5858_v11  ;;  %v7475_v11 = vld [vmem:[%s9643_s1 + $0xb98] sm:$0xff]  }
 0x144   :  { %5304 = vmatmul.mubr.bf16.vlgmr.msra.gmra.mxu1 %v5860_v14  ;;  %6841 = vmatpush3.bf16.msra.mxu0 %v7426_v18  ;;  %v7478_v14 = vld [vmem:[%s9643_s1 + $0xb10] sm:$0xff]   ;;  %v7482_v18 = vld [vmem:[%s9643_s1 + $0xb08] sm:$0xff]  }
 0x145   :  { %6863 = vmatpush3.bf16.msra.mxu1 %v7427_v19  ;;  %6842 = vmatprep.subr.bf16.mxu0 %v7428_v20  ;;  %v7483_v19 = vld [vmem:[%s9643_s1 + $0xb88] sm:$0xff]   ;;  %v7484_v20 = vld [vmem:[%s9643_s1 + $0xb40] sm:$0xff]  }
 0x146   :  { %6864 = vmatprep.subr.bf16.mxu1 %v7429_v21  ;;  %5344 = vmatprep.mubr.bf16.mxu0 %v5863_v51  ;;  %v7485_v21 = vld [vmem:[%s9643_s1 + $0xbc0] sm:$0xff]   ;;  %v7507_v51 = vld [vmem:[%s9643_s1 + $0xc98] sm:$0xff]  }
 0x147   :  { %5385 = vmatprep.mubr.bf16.mxu1 %v5865_v55  ;;  %v7511_v55 = vld [vmem:[%s9643_s1 + $0xc90] sm:$0xff]  }
 0x148   :  { %6843 = vmatpush3.bf16.msra.mxu0 %v7430_v22  ;;  %v7486_v22 = vld [vmem:[%s9643_s1 + $0xb00] sm:$0xff]  }
 0x149   :  { %6865 = vmatpush3.bf16.msra.mxu1 %v7431_v23  ;;  %6844 = vmatprep.subr.bf16.mxu0 %v7432_v24  ;;  %v7487_v23 = vld [vmem:[%s9643_s1 + $0xb80] sm:$0xff]   ;;  %v34_v24 = vld [vmem:[%s9644_s0 + $0xb0] sm:$0xff] }
 0x14a   :  { %6866 = vmatprep.subr.bf16.mxu1 %v7433_v25  ;;  %v66_v25 = vld [vmem:[%s9644_s0 + $0x1b0] sm:$0xff] }
 0x14c   :  { %6845 = vmatpush3.bf16.msra.mxu0 %v7434_v26  ;;  %v35_v26 = vld [vmem:[%s9644_s0 + $0xb8] sm:$0xff] }
 0x14d   :  { %6867 = vmatpush3.bf16.msra.mxu1 %v7435_v27  ;;  %6846 = vmatprep.subr.bf16.mxu0 %v7436_v28  ;;  %v67_v27 = vld [vmem:[%s9644_s0 + $0x1b8] sm:$0xff]  ;;  %v5866_v28 = vcombine.low %v34_v24, %v66_v25 }
 0x14e   :  { %6868 = vmatprep.subr.bf16.mxu1 %v7437_v29  ;;  %v5867_v29 = vcombine.high %v34_v24, %v66_v25  ;;  %v7536_v24 = vld [vmem:[%s9643_s1 + $0xd58] sm:$0xff]  }
 0x14f   :  { %v7537_v25 = vld [vmem:[%s9643_s1 + $0xdd8] sm:$0xff]  }
 0x150   :  { %6847 = vmatpush3.bf16.msra.mxu0 %v7438_v30  ;;  %v5868_v30 = vcombine.low %v35_v26, %v67_v27 }
 0x151   :  { %6869 = vmatpush3.bf16.msra.mxu1 %v7439_v31  ;;  %6848 = vmatprep.subr.bf16.mxu0 %v7440_v32  ;;  %v5869_v31 = vcombine.high %v35_v26, %v67_v27  ;;  %v7488_v32 = vld [vmem:[%s9643_s1 + $0xc78] sm:$0xff]  }
 0x152   :  { %6870 = vmatprep.subr.bf16.mxu1 %v7441_v33  ;;  %v7489_v33 = vld [vmem:[%s9643_s1 + $0xcf8] sm:$0xff]  }
 0x153   :  { %v7538_v26 = vld [vmem:[%s9643_s1 + $0xd18] sm:$0xff]  }
 0x154   :  { %6849 = vmatpush3.bf16.msra.mxu0 %v7442_v34  ;;  %v7490_v34 = vld [vmem:[%s9643_s1 + $0xc38] sm:$0xff]  }
 0x155   :  { %6871 = vmatpush3.bf16.msra.mxu1 %v7443_v35  ;;  %6850 = vmatprep.subr.bf16.mxu0 %v7444_v36  ;;  %v7491_v35 = vld [vmem:[%s9643_s1 + $0xcb8] sm:$0xff]   ;;  %v7492_v36 = vld [vmem:[%s9643_s1 + $0xc70] sm:$0xff]  }
 0x156   :  { %6872 = vmatprep.subr.bf16.mxu1 %v7445_v37  ;;  %v7493_v37 = vld [vmem:[%s9643_s1 + $0xcf0] sm:$0xff]   ;;  %v7539_v27 = vld [vmem:[%s9643_s1 + $0xd98] sm:$0xff]  }
 0x158   :  { %6851 = vmatpush3.bf16.msra.mxu0 %v7446_v38  ;;  %v7494_v38 = vld [vmem:[%s9643_s1 + $0xc30] sm:$0xff]  }
 0x159   :  { %6873 = vmatpush3.bf16.msra.mxu1 %v7447_v39  ;;  %6852 = vmatprep.subr.bf16.mxu0 %v7448_v40  ;;  %v7495_v39 = vld [vmem:[%s9643_s1 + $0xcb0] sm:$0xff]   ;;  %v7496_v40 = vld [vmem:[%s9643_s1 + $0xc68] sm:$0xff]  }
 0x15a   :  { %6874 = vmatprep.subr.bf16.mxu1 %v7449_v41  ;;  %v7497_v41 = vld [vmem:[%s9643_s1 + $0xce8] sm:$0xff]  }
 0x15c   :  { %6853 = vmatpush3.bf16.msra.mxu0 %v7450_v42  ;;  %v7498_v42 = vld [vmem:[%s9643_s1 + $0xc28] sm:$0xff]  }
 0x15d   :  { %6875 = vmatpush3.bf16.msra.mxu1 %v7451_v43  ;;  %6854 = vmatprep.subr.bf16.mxu0 %v7452_v44  ;;  %v7499_v43 = vld [vmem:[%s9643_s1 + $0xca8] sm:$0xff]   ;;  %v7500_v44 = vld [vmem:[%s9643_s1 + $0xc60] sm:$0xff]  }
 0x15e   :  { %6876 = vmatprep.subr.bf16.mxu1 %v7453_v45  ;;  %v7501_v45 = vld [vmem:[%s9643_s1 + $0xce0] sm:$0xff]  }
 0x160   :  { %6855 = vmatpush3.bf16.msra.mxu0 %v7454_v46  ;;  %v7502_v46 = vld [vmem:[%s9643_s1 + $0xc20] sm:$0xff]  }
 0x161   :  { %6877 = vmatpush3.bf16.msra.mxu1 %v7455_v47  ;;  %6884 = vmatprep.subr.bf16.mxu0 %v7456_v56  ;;  %v7503_v47 = vld [vmem:[%s9643_s1 + $0xca0] sm:$0xff]   ;;  %v7512_v56 = vld [vmem:[%s9643_s1 + $0xc48] sm:$0xff]  }
 0x162   :  { %6906 = vmatprep.subr.bf16.mxu1 %v7457_v57  ;;  %v7513_v57 = vld [vmem:[%s9643_s1 + $0xcc8] sm:$0xff]  }
 0x163   :  { %5345 = vmatmul.mubr.bf16.vlgmr.msra.gmra.mxu0 %v5862_v50  ;;  %v7506_v50 = vld [vmem:[%s9643_s1 + $0xc18] sm:$0xff]  }
 0x164   :  { %5386 = vmatmul.mubr.bf16.vlgmr.msra.gmra.mxu1 %v5864_v54  ;;  %6885 = vmatpush3.bf16.msra.mxu0 %v7458_v58  ;;  %v7510_v54 = vld [vmem:[%s9643_s1 + $0xc10] sm:$0xff]   ;;  %v7514_v58 = vld [vmem:[%s9643_s1 + $0xc08] sm:$0xff]  }
 0x165   :  { %6907 = vmatpush3.bf16.msra.mxu1 %v7459_v59  ;;  %6886 = vmatprep.subr.bf16.mxu0 %v7460_v60  ;;  %v7515_v59 = vld [vmem:[%s9643_s1 + $0xc88] sm:$0xff]   ;;  %v7516_v60 = vld [vmem:[%s9643_s1 + $0xc40] sm:$0xff]  }
 0x166   :  { %6908 = vmatprep.subr.bf16.mxu1 %v7461_v61  ;;  %5426 = vmatprep.mubr.bf16.mxu0 %v5867_v29  ;;  %v7517_v61 = vld [vmem:[%s9643_s1 + $0xcc0] sm:$0xff]   ;;  %v7541_v29 = vld [vmem:[%s9643_s1 + $0xdd0] sm:$0xff]  }
 0x167   :  { %5467 = vmatprep.mubr.bf16.mxu1 %v5869_v31  ;;  %v7543_v31 = vld [vmem:[%s9643_s1 + $0xd90] sm:$0xff]  }
 0x168   :  { %6887 = vmatpush3.bf16.msra.mxu0 %v7462_v62  ;;  %v7518_v62 = vld [vmem:[%s9643_s1 + $0xc00] sm:$0xff]  }
 0x169   :  { %6909 = vmatpush3.bf16.msra.mxu1 %v7463_v63  ;;  %6888 = vmatprep.subr.bf16.mxu0 %v7464_v0  ;;  %v7519_v63 = vld [vmem:[%s9643_s1 + $0xc80] sm:$0xff]  }
 0x16a   :  { %6910 = vmatprep.subr.bf16.mxu1 %v7465_v1  ;;  %v36_v0 = vld [vmem:[%s9644_s0 + $0xc0] sm:$0xff] }
 0x16b   :  { %v68_v1 = vld [vmem:[%s9644_s0 + $0x1c0] sm:$0xff] }
 0x16c   :  { %6889 = vmatpush3.bf16.msra.mxu0 %v7466_v2  ;;  %v37_v2 = vld [vmem:[%s9644_s0 + $0xc8] sm:$0xff] }
 0x16d   :  { %6911 = vmatpush3.bf16.msra.mxu1 %v7467_v3  ;;  %6890 = vmatprep.subr.bf16.mxu0 %v7468_v4  ;;  %v5870_v3 = vcombine.low %v36_v0, %v68_v1  ;;  %v5871_v4 = vcombine.high %v36_v0, %v68_v1  ;;  %v7568_v0 = vld [vmem:[%s9643_s1 + $0xe58] sm:$0xff]  }
 0x16e   :  { %6912 = vmatprep.subr.bf16.mxu1 %v7469_v5  ;;  %v69_v5 = vld [vmem:[%s9644_s0 + $0x1c8] sm:$0xff]  ;;  %v7569_v1 = vld [vmem:[%s9643_s1 + $0xed8] sm:$0xff]  }
 0x170   :  { %6891 = vmatpush3.bf16.msra.mxu0 %v7470_v6  ;;  %v5872_v6 = vcombine.low %v37_v2, %v69_v5 }
 0x171   :  { %6913 = vmatpush3.bf16.msra.mxu1 %v7471_v7  ;;  %6892 = vmatprep.subr.bf16.mxu0 %v7472_v8  ;;  %v5873_v7 = vcombine.high %v37_v2, %v69_v5  ;;  %v7520_v8 = vld [vmem:[%s9643_s1 + $0xd78] sm:$0xff]   ;;  %v7573_v5 = vld [vmem:[%s9643_s1 + $0xed0] sm:$0xff]  }
 0x172   :  { %6914 = vmatprep.subr.bf16.mxu1 %v7473_v9  ;;  %v7521_v9 = vld [vmem:[%s9643_s1 + $0xdf8] sm:$0xff]  }
 0x173   :  { %v7570_v2 = vld [vmem:[%s9643_s1 + $0xe18] sm:$0xff]  }
 0x174   :  { %6893 = vmatpush3.bf16.msra.mxu0 %v7474_v10  ;;  %v7522_v10 = vld [vmem:[%s9643_s1 + $0xd38] sm:$0xff]  }
 0x175   :  { %6915 = vmatpush3.bf16.msra.mxu1 %v7475_v11  ;;  %6894 = vmatprep.subr.bf16.mxu0 %v7476_v12  ;;  %v7523_v11 = vld [vmem:[%s9643_s1 + $0xdb8] sm:$0xff]   ;;  %v7524_v12 = vld [vmem:[%s9643_s1 + $0xd70] sm:$0xff]  }
 0x176   :  { %6916 = vmatprep.subr.bf16.mxu1 %v7477_v13  ;;  %v7525_v13 = vld [vmem:[%s9643_s1 + $0xdf0] sm:$0xff]  }
 0x178   :  { %6895 = vmatpush3.bf16.msra.mxu0 %v7478_v14  ;;  %v7526_v14 = vld [vmem:[%s9643_s1 + $0xd30] sm:$0xff]  }
 0x179   :  { %6917 = vmatpush3.bf16.msra.mxu1 %v7479_v15  ;;  %6896 = vmatprep.subr.bf16.mxu0 %v7480_v16  ;;  %v7527_v15 = vld [vmem:[%s9643_s1 + $0xdb0] sm:$0xff]   ;;  %v7528_v16 = vld [vmem:[%s9643_s1 + $0xd68] sm:$0xff]  }
 0x17a   :  { %6918 = vmatprep.subr.bf16.mxu1 %v7481_v17  ;;  %v7529_v17 = vld [vmem:[%s9643_s1 + $0xde8] sm:$0xff]  }
 0x17c   :  { %6897 = vmatpush3.bf16.msra.mxu0 %v7482_v18  ;;  %v7530_v18 = vld [vmem:[%s9643_s1 + $0xd28] sm:$0xff]  }
 0x17d   :  { %6919 = vmatpush3.bf16.msra.mxu1 %v7483_v19  ;;  %6898 = vmatprep.subr.bf16.mxu0 %v7484_v20  ;;  %v7531_v19 = vld [vmem:[%s9643_s1 + $0xda8] sm:$0xff]   ;;  %v7532_v20 = vld [vmem:[%s9643_s1 + $0xd60] sm:$0xff]  }
 0x17e   :  { %6920 = vmatprep.subr.bf16.mxu1 %v7485_v21  ;;  %v7533_v21 = vld [vmem:[%s9643_s1 + $0xde0] sm:$0xff]  }
 0x180   :  { %6899 = vmatpush3.bf16.msra.mxu0 %v7486_v22  ;;  %v7534_v22 = vld [vmem:[%s9643_s1 + $0xd20] sm:$0xff]  }
 0x181   :  { %6921 = vmatpush3.bf16.msra.mxu1 %v7487_v23  ;;  %6928 = vmatprep.subr.bf16.mxu0 %v7488_v32  ;;  %v7535_v23 = vld [vmem:[%s9643_s1 + $0xda0] sm:$0xff]   ;;  %v7544_v32 = vld [vmem:[%s9643_s1 + $0xd48] sm:$0xff]  }
 0x182   :  { %6950 = vmatprep.subr.bf16.mxu1 %v7489_v33  ;;  %v7545_v33 = vld [vmem:[%s9643_s1 + $0xdc8] sm:$0xff]  }
 0x183   :  { %5427 = vmatmul.mubr.bf16.vlgmr.msra.gmra.mxu0 %v5866_v28  ;;  %v7540_v28 = vld [vmem:[%s9643_s1 + $0xd50] sm:$0xff]  }
 0x184   :  { %5468 = vmatmul.mubr.bf16.vlgmr.msra.gmra.mxu1 %v5868_v30  ;;  %6929 = vmatpush3.bf16.msra.mxu0 %v7490_v34  ;;  %v7542_v30 = vld [vmem:[%s9643_s1 + $0xd10] sm:$0xff]   ;;  %v7546_v34 = vld [vmem:[%s9643_s1 + $0xd08] sm:$0xff]  }
 0x185   :  { %6951 = vmatpush3.bf16.msra.mxu1 %v7491_v35  ;;  %6930 = vmatprep.subr.bf16.mxu0 %v7492_v36  ;;  %v7547_v35 = vld [vmem:[%s9643_s1 + $0xd88] sm:$0xff]   ;;  %v7548_v36 = vld [vmem:[%s9643_s1 + $0xd40] sm:$0xff]  }
 0x186   :  { %6952 = vmatprep.subr.bf16.mxu1 %v7493_v37  ;;  %5508 = vmatprep.mubr.bf16.mxu0 %v5871_v4  ;;  %v7549_v37 = vld [vmem:[%s9643_s1 + $0xdc0] sm:$0xff]   ;;  %v7572_v4 = vld [vmem:[%s9643_s1 + $0xe50] sm:$0xff]  }
 0x187   :  { %5549 = vmatprep.mubr.bf16.mxu1 %v5873_v7  ;;  %v7575_v7 = vld [vmem:[%s9643_s1 + $0xe90] sm:$0xff]  }
 0x188   :  { %6931 = vmatpush3.bf16.msra.mxu0 %v7494_v38  ;;  %v7550_v38 = vld [vmem:[%s9643_s1 + $0xd00] sm:$0xff]  }
 0x189   :  { %6953 = vmatpush3.bf16.msra.mxu1 %v7495_v39  ;;  %6932 = vmatprep.subr.bf16.mxu0 %v7496_v40  ;;  %v7551_v39 = vld [vmem:[%s9643_s1 + $0xd80] sm:$0xff]   ;;  %v38_v40 = vld [vmem:[%s9644_s0 + $0xd0] sm:$0xff] }
 0x18a   :  { %6954 = vmatprep.subr.bf16.mxu1 %v7497_v41  ;;  %v70_v41 = vld [vmem:[%s9644_s0 + $0x1d0] sm:$0xff] }
 0x18c   :  { %6933 = vmatpush3.bf16.msra.mxu0 %v7498_v42  ;;  %v5874_v42 = vcombine.low %v38_v40, %v70_v41 }
 0x18d   :  { %6955 = vmatpush3.bf16.msra.mxu1 %v7499_v43  ;;  %6934 = vmatprep.subr.bf16.mxu0 %v7500_v44  ;;  %v5875_v43 = vcombine.high %v38_v40, %v70_v41  ;;  %v39_v44 = vld [vmem:[%s9644_s0 + $0xd8] sm:$0xff]  ;;  %v9307_v40 = vpop.f32.mrf.mxu0 }
 0x18e   :  { %6956 = vmatprep.subr.bf16.mxu1 %v7501_v45  ;;  %v71_v45 = vld [vmem:[%s9644_s0 + $0x1d8] sm:$0xff] }
 0x18f   :  { %v7600_v41 = vld [vmem:[%s9643_s1 + $0xf58] sm:$0xff]  }
 0x190   :  { %6935 = vmatpush3.bf16.msra.mxu0 %v7502_v46  ;;  %v5876_v46 = vcombine.low %v39_v44, %v71_v45 }
 0x191   :  { %6957 = vmatpush3.bf16.msra.mxu1 %v7503_v47  ;;  %6936 = vmatprep.subr.bf16.mxu0 %v7504_v48  ;;  %v5877_v47 = vcombine.high %v39_v44, %v71_v45  ;;  %v7552_v48 = vld [vmem:[%s9643_s1 + $0xe78] sm:$0xff]   ;;  %v9318_v44 = vpop.f32.mrf.mxu1 }
 0x192   :  { %6958 = vmatprep.subr.bf16.mxu1 %v7505_v49  ;;  %v7553_v49 = vld [vmem:[%s9643_s1 + $0xef8] sm:$0xff]  }
 0x193   :  { %v7603_v45 = vld [vmem:[%s9643_s1 + $0xf98] sm:$0xff]  }
 0x194   :  { %6937 = vmatpush3.bf16.msra.mxu0 %v7506_v50  ;;  %v7554_v50 = vld [vmem:[%s9643_s1 + $0xe38] sm:$0xff]  }
 0x195   :  { %6959 = vmatpush3.bf16.msra.mxu1 %v7507_v51  ;;  %6938 = vmatprep.subr.bf16.mxu0 %v7508_v52  ;;  %v7555_v51 = vld [vmem:[%s9643_s1 + $0xeb8] sm:$0xff]   ;;  %v7556_v52 = vld [vmem:[%s9643_s1 + $0xe70] sm:$0xff]  }
 0x196   :  { %6960 = vmatprep.subr.bf16.mxu1 %v7509_v53  ;;  %v7557_v53 = vld [vmem:[%s9643_s1 + $0xef0] sm:$0xff]  }
 0x198   :  { %6939 = vmatpush3.bf16.msra.mxu0 %v7510_v54  ;;  %v7558_v54 = vld [vmem:[%s9643_s1 + $0xe30] sm:$0xff]  }
 0x199   :  { %6961 = vmatpush3.bf16.msra.mxu1 %v7511_v55  ;;  %6940 = vmatprep.subr.bf16.mxu0 %v7512_v56  ;;  %v7559_v55 = vld [vmem:[%s9643_s1 + $0xeb0] sm:$0xff]   ;;  %v7560_v56 = vld [vmem:[%s9643_s1 + $0xe68] sm:$0xff]  }
 0x19a   :  { %6962 = vmatprep.subr.bf16.mxu1 %v7513_v57  ;;  %v7561_v57 = vld [vmem:[%s9643_s1 + $0xee8] sm:$0xff]  }
 0x19c   :  { %6941 = vmatpush3.bf16.msra.mxu0 %v7514_v58  ;;  %v7562_v58 = vld [vmem:[%s9643_s1 + $0xe28] sm:$0xff]  }
 0x19d   :  { %6963 = vmatpush3.bf16.msra.mxu1 %v7515_v59  ;;  %6942 = vmatprep.subr.bf16.mxu0 %v7516_v60  ;;  %v7563_v59 = vld [vmem:[%s9643_s1 + $0xea8] sm:$0xff]   ;;  %v7564_v60 = vld [vmem:[%s9643_s1 + $0xe60] sm:$0xff]  }
 0x19e   :  { %6964 = vmatprep.subr.bf16.mxu1 %v7517_v61  ;;  %v7565_v61 = vld [vmem:[%s9643_s1 + $0xee0] sm:$0xff]  }
 0x1a0   :  { %6943 = vmatpush3.bf16.msra.mxu0 %v7518_v62  ;;  %v7566_v62 = vld [vmem:[%s9643_s1 + $0xe20] sm:$0xff]  }
 0x1a1   :  { %6965 = vmatpush3.bf16.msra.mxu1 %v7519_v63  ;;  %6972 = vmatprep.subr.bf16.mxu0 %v7520_v8  ;;  %v7567_v63 = vld [vmem:[%s9643_s1 + $0xea0] sm:$0xff]   ;;  %v7576_v8 = vld [vmem:[%s9643_s1 + $0xe48] sm:$0xff]  }
 0x1a2   :  { %6994 = vmatprep.subr.bf16.mxu1 %v7521_v9  ;;  %v7577_v9 = vld [vmem:[%s9643_s1 + $0xec8] sm:$0xff]  }
 0x1a3   :  { %5509 = vmatmul.mubr.bf16.vlgmr.msra.gmra.mxu0 %v5870_v3  ;;  %v7571_v3 = vld [vmem:[%s9643_s1 + $0xe98] sm:$0xff]  }
 0x1a4   :  { %5550 = vmatmul.mubr.bf16.vlgmr.msra.gmra.mxu1 %v5872_v6  ;;  %6973 = vmatpush3.bf16.msra.mxu0 %v7522_v10  ;;  %v7574_v6 = vld [vmem:[%s9643_s1 + $0xe10] sm:$0xff]   ;;  %v7578_v10 = vld [vmem:[%s9643_s1 + $0xe08] sm:$0xff]  }
 0x1a5   :  { %6995 = vmatpush3.bf16.msra.mxu1 %v7523_v11  ;;  %6974 = vmatprep.subr.bf16.mxu0 %v7524_v12  ;;  %v7579_v11 = vld [vmem:[%s9643_s1 + $0xe88] sm:$0xff]   ;;  %v7580_v12 = vld [vmem:[%s9643_s1 + $0xe40] sm:$0xff]  }
 0x1a6   :  { %6996 = vmatprep.subr.bf16.mxu1 %v7525_v13  ;;  %5590 = vmatprep.mubr.bf16.mxu0 %v5875_v43  ;;  %v7581_v13 = vld [vmem:[%s9643_s1 + $0xec0] sm:$0xff]   ;;  %v7602_v43 = vld [vmem:[%s9643_s1 + $0xf18] sm:$0xff]  }
 0x1a7   :  { %5631 = vmatprep.mubr.bf16.mxu1 %v5877_v47  ;;  %v7604_v47 = vld [vmem:[%s9643_s1 + $0xf50] sm:$0xff]  }
 0x1a8   :  { %6975 = vmatpush3.bf16.msra.mxu0 %v7526_v14  ;;  %v7582_v14 = vld [vmem:[%s9643_s1 + $0xe00] sm:$0xff]  }
 0x1a9   :  { %6997 = vmatpush3.bf16.msra.mxu1 %v7527_v15  ;;  %6976 = vmatprep.subr.bf16.mxu0 %v7528_v16  ;;  %v7583_v15 = vld [vmem:[%s9643_s1 + $0xe80] sm:$0xff]  }
 0x1aa   :  { %6998 = vmatprep.subr.bf16.mxu1 %v7529_v17  ;;  %v40_v16 = vld [vmem:[%s9644_s0 + $0xe0] sm:$0xff] }
 0x1ab   :  { %v72_v17 = vld [vmem:[%s9644_s0 + $0x1e0] sm:$0xff] }
 0x1ac   :  { %6977 = vmatpush3.bf16.msra.mxu0 %v7530_v18  ;;  %v41_v18 = vld [vmem:[%s9644_s0 + $0xe8] sm:$0xff] }
 0x1ad   :  { %6999 = vmatpush3.bf16.msra.mxu1 %v7531_v19  ;;  %6978 = vmatprep.subr.bf16.mxu0 %v7532_v20  ;;  %v73_v19 = vld [vmem:[%s9644_s0 + $0x1e8] sm:$0xff]  ;;  %v5878_v20 = vcombine.low %v40_v16, %v72_v17 }
 0x1ae   :  { %7000 = vmatprep.subr.bf16.mxu1 %v7533_v21  ;;  %v5879_v21 = vcombine.high %v40_v16, %v72_v17 }
 0x1b0   :  { %6979 = vmatpush3.bf16.msra.mxu0 %v7534_v22  ;;  %v5880_v22 = vcombine.low %v41_v18, %v73_v19 }
 0x1b1   :  { %7001 = vmatpush3.bf16.msra.mxu1 %v7535_v23  ;;  %6980 = vmatprep.subr.bf16.mxu0 %v7536_v24  ;;  %v5881_v23 = vcombine.high %v41_v18, %v73_v19  ;;  %v7584_v24 = vld [vmem:[%s9643_s1 + $0xf78] sm:$0xff]  }
 0x1b2   :  { %7002 = vmatprep.subr.bf16.mxu1 %v7537_v25  ;;  %v7585_v25 = vld [vmem:[%s9643_s1 + $0xff8] sm:$0xff]  }
 0x1b4   :  { %6981 = vmatpush3.bf16.msra.mxu0 %v7538_v26  ;;  %v7586_v26 = vld [vmem:[%s9643_s1 + $0xf38] sm:$0xff]  }
 0x1b5   :  { %7003 = vmatpush3.bf16.msra.mxu1 %v7539_v27  ;;  %6982 = vmatprep.subr.bf16.mxu0 %v7540_v28  ;;  %v7587_v27 = vld [vmem:[%s9643_s1 + $0xfb8] sm:$0xff]   ;;  %v7588_v28 = vld [vmem:[%s9643_s1 + $0xf70] sm:$0xff]  }
 0x1b6   :  { %7004 = vmatprep.subr.bf16.mxu1 %v7541_v29  ;;  %v7589_v29 = vld [vmem:[%s9643_s1 + $0xff0] sm:$0xff]  }
 0x1b8   :  { %6983 = vmatpush3.bf16.msra.mxu0 %v7542_v30  ;;  %v7590_v30 = vld [vmem:[%s9643_s1 + $0xf30] sm:$0xff]  }
 0x1b9   :  { %7005 = vmatpush3.bf16.msra.mxu1 %v7543_v31  ;;  %6984 = vmatprep.subr.bf16.mxu0 %v7544_v32  ;;  %v7591_v31 = vld [vmem:[%s9643_s1 + $0xfb0] sm:$0xff]   ;;  %v7592_v32 = vld [vmem:[%s9643_s1 + $0xf68] sm:$0xff]  }
 0x1ba   :  { %7006 = vmatprep.subr.bf16.mxu1 %v7545_v33  ;;  %v7593_v33 = vld [vmem:[%s9643_s1 + $0xfe8] sm:$0xff]  }
 0x1bc   :  { %6985 = vmatpush3.bf16.msra.mxu0 %v7546_v34  ;;  %v7594_v34 = vld [vmem:[%s9643_s1 + $0xf28] sm:$0xff]  }
 0x1bd   :  { %7007 = vmatpush3.bf16.msra.mxu1 %v7547_v35  ;;  %6986 = vmatprep.subr.bf16.mxu0 %v7548_v36  ;;  %v7595_v35 = vld [vmem:[%s9643_s1 + $0xfa8] sm:$0xff]   ;;  %v7596_v36 = vld [vmem:[%s9643_s1 + $0xf60] sm:$0xff]  }
 0x1be   :  { %7008 = vmatprep.subr.bf16.mxu1 %v7549_v37  ;;  %v7597_v37 = vld [vmem:[%s9643_s1 + $0xfe0] sm:$0xff]  }
 0x1c0   :  { %6987 = vmatpush3.bf16.msra.mxu0 %v7550_v38  ;;  %v7598_v38 = vld [vmem:[%s9643_s1 + $0xf20] sm:$0xff]  }
 0x1c1   :  { %7009 = vmatpush3.bf16.msra.mxu1 %v7551_v39  ;;  %7016 = vmatprep.subr.bf16.mxu0 %v7552_v48  ;;  %v7599_v39 = vld [vmem:[%s9643_s1 + $0xfa0] sm:$0xff]   ;;  %v7605_v48 = vld [vmem:[%s9643_s1 + $0xfd0] sm:$0xff]  }
 0x1c2   :  { %7038 = vmatprep.subr.bf16.mxu1 %v7553_v49  ;;  %v7606_v49 = vld [vmem:[%s9643_s1 + $0xf10] sm:$0xff]  }
 0x1c3   :  { %5591 = vmatmul.mubr.bf16.vlgmr.msra.gmra.mxu0 %v5874_v42  ;;  %v7601_v42 = vld [vmem:[%s9643_s1 + $0xfd8] sm:$0xff]  }
 0x1c4   :  { %5632 = vmatmul.mubr.bf16.vlgmr.msra.gmra.mxu1 %v5876_v46  ;;  %7017 = vmatpush3.bf16.msra.mxu0 %v7554_v50  ;;  %v9323_v46 = vpop.f32.mrf.mxu0  ;;  %v9334_v50 = vpop.f32.mrf.mxu1 }
 0x1c5   :  { %7039 = vmatpush3.bf16.msra.mxu1 %v7555_v51  ;;  %7018 = vmatprep.subr.bf16.mxu0 %v7556_v52  ;;  %v7607_v51 = vld [vmem:[%s9643_s1 + $0xf90] sm:$0xff]  }
 0x1c6   :  { %7040 = vmatprep.subr.bf16.mxu1 %v7557_v53  ;;  %5672 = vmatprep.mubr.bf16.mxu0 %v5879_v21  ;;  %v9339_v52 = vpop.f32.mrf.mxu0  ;;  %v7608_v53 = vld [vmem:[%s9643_s1 + $0xf48] sm:$0xff]  }
 0x1c7   :  { %5713 = vmatprep.mubr.bf16.mxu1 %v5881_v23 }
 0x1c8   :  { %7019 = vmatpush3.bf16.msra.mxu0 %v7558_v54  ;;  %v7609_v54 = vld [vmem:[%s9643_s1 + $0xfc8] sm:$0xff]  }
 0x1c9   :  { %7041 = vmatpush3.bf16.msra.mxu1 %v7559_v55  ;;  %7020 = vmatprep.subr.bf16.mxu0 %v7560_v56  ;;  %v7610_v55 = vld [vmem:[%s9643_s1 + $0xf08] sm:$0xff]   ;;  %v9350_v56 = vpop.f32.mrf.mxu1 }
 0x1ca   :  { %7042 = vmatprep.subr.bf16.mxu1 %v7561_v57  ;;  %v7611_v57 = vld [vmem:[%s9643_s1 + $0xf88] sm:$0xff]  }
 0x1cc   :  { %7021 = vmatpush3.bf16.msra.mxu0 %v7562_v58  ;;  %v9355_v58 = vpop.f32.mrf.mxu0 }
 0x1cd   :  { %7043 = vmatpush3.bf16.msra.mxu1 %v7563_v59  ;;  %7022 = vmatprep.subr.bf16.mxu0 %v7564_v60  ;;  %v7612_v59 = vld [vmem:[%s9643_s1 + $0xf40] sm:$0xff]  }
 0x1ce   :  { %7044 = vmatprep.subr.bf16.mxu1 %v7565_v61  ;;  %v7613_v60 = vld [vmem:[%s9643_s1 + $0xfc0] sm:$0xff]   ;;  %v9363_v61 = vpop.f32.mrf.mxu0 }
 0x1d0   :  { %7023 = vmatpush3.bf16.msra.mxu0 %v7566_v62  ;;  %v7614_v62 = vld [vmem:[%s9643_s1 + $0xf00] sm:$0xff]  }
 0x1d1   :  { %7045 = vmatpush3.bf16.msra.mxu1 %v7567_v63  ;;  %7024 = vmatprep.subr.bf16.mxu0 %v7568_v0  ;;  %v9368_v63 = vpop.f32.mrf.mxu1  ;;  %v7615_v0 = vld [vmem:[%s9643_s1 + $0xf80] sm:$0xff]  }
 0x1d2   :  { %7046 = vmatprep.subr.bf16.mxu1 %v7569_v1  ;;  %v42_v1 = vld [vmem:[%s9644_s0 + $0xf0] sm:$0xff] }
 0x1d4   :  { %7025 = vmatpush3.bf16.msra.mxu0 %v7570_v2  ;;  %v74_v2 = vld [vmem:[%s9644_s0 + $0x1f0] sm:$0xff] }
 0x1d5   :  { %7047 = vmatpush3.bf16.msra.mxu1 %v7571_v3  ;;  %7026 = vmatprep.subr.bf16.mxu0 %v7572_v4  ;;  %v43_v3 = vld [vmem:[%s9644_s0 + $0xf8] sm:$0xff]  ;;  %v9382_v4 = vpop.f32.mrf.mxu1 }
 0x1d6   :  { %7048 = vmatprep.subr.bf16.mxu1 %v7573_v5  ;;  %v5882_v5 = vcombine.low %v42_v1, %v74_v2 }
 0x1d8   :  { %7027 = vmatpush3.bf16.msra.mxu0 %v7574_v6  ;;  %v5883_v6 = vcombine.high %v42_v1, %v74_v2 }
 0x1d9   :  { %7049 = vmatpush3.bf16.msra.mxu1 %v7575_v7  ;;  %7028 = vmatprep.subr.bf16.mxu0 %v7576_v8  ;;  %v75_v7 = vld [vmem:[%s9644_s0 + $0x1f8] sm:$0xff]  ;;  %v9387_v8 = vpop.f32.mrf.mxu0 }
 0x1da   :  { %7050 = vmatprep.subr.bf16.mxu1 %v7577_v9  ;;  %v5884_v9 = vcombine.low %v43_v3, %v75_v7 }
 0x1dc   :  { %7029 = vmatpush3.bf16.msra.mxu0 %v7578_v10  ;;  %v5885_v10 = vcombine.high %v43_v3, %v75_v7 }
 0x1dd   :  { %7051 = vmatpush3.bf16.msra.mxu1 %v7579_v11  ;;  %7030 = vmatprep.subr.bf16.mxu0 %v7580_v12  ;;  %v9389_v11 = vpop.f32.mrf.mxu1  ;;  %v9391_v12 = vpop.f32.mrf.mxu0 }
 0x1de   :  { %7052 = vmatprep.subr.bf16.mxu1 %v7581_v13 }
 0x1df   :  { %v9393_v13 = vpop.f32.mrf.mxu1 }
 0x1e0   :  { %7031 = vmatpush3.bf16.msra.mxu0 %v7582_v14  ;;  %v9395_v14 = vpop.f32.mrf.mxu0 }
 0x1e1   :  { %7053 = vmatpush3.bf16.msra.mxu1 %v7583_v15  ;;  %7060 = vmatprep.subr.bf16.mxu0 %v7584_v24  ;;  %v9399_v16 = vpop.f32.mrf.mxu1 }
 0x1e2   :  { %7082 = vmatprep.subr.bf16.mxu1 %v7585_v25  ;;  %v9397_v15 = vpop.f32.mrf.mxu0 }
 0x1e3   :  { %5673 = vmatmul.mubr.bf16.vlgmr.msra.gmra.mxu0 %v5878_v20  ;;  %v9401_v17 = vpop.f32.mrf.mxu1 }
 0x1e4   :  { %5714 = vmatmul.mubr.bf16.vlgmr.msra.gmra.mxu1 %v5880_v22  ;;  %7061 = vmatpush3.bf16.msra.mxu0 %v7586_v26  ;;  %v9403_v18 = vpop.f32.mrf.mxu0 }
 0x1e5   :  { %7083 = vmatpush3.bf16.msra.mxu1 %v7587_v27  ;;  %7062 = vmatprep.subr.bf16.mxu0 %v7588_v28  ;;  %v9405_v19 = vpop.f32.mrf.mxu1 }
 0x1e6   :  { %7084 = vmatprep.subr.bf16.mxu1 %v7589_v29  ;;  %5754 = vmatprep.mubr.bf16.mxu0 %v5883_v6  ;;  %v9407_v20 = vpop.f32.mrf.mxu0 }
 0x1e7   :  { %5795 = vmatprep.mubr.bf16.mxu1 %v5885_v10  ;;  %v9409_v21 = vpop.f32.mrf.mxu1 }
 0x1e8   :  { %7063 = vmatpush3.bf16.msra.mxu0 %v7590_v30  ;;  %v9411_v22 = vpop.f32.mrf.mxu0 }
 0x1e9   :  { %7085 = vmatpush3.bf16.msra.mxu1 %v7591_v31  ;;  %7064 = vmatprep.subr.bf16.mxu0 %v7592_v32  ;;  %v9415_v24 = vpop.f32.mrf.mxu1 }
 0x1ea   :  { %7086 = vmatprep.subr.bf16.mxu1 %v7593_v33  ;;  %v9413_v23 = vpop.f32.mrf.mxu0 }
 0x1eb   :  { %v9417_v25 = vpop.f32.mrf.mxu1 }
 0x1ec   :  { %7065 = vmatpush3.bf16.msra.mxu0 %v7594_v34  ;;  %v9419_v26 = vpop.f32.mrf.mxu0 }
 0x1ed   :  { %7087 = vmatpush3.bf16.msra.mxu1 %v7595_v35  ;;  %7066 = vmatprep.subr.bf16.mxu0 %v7596_v36  ;;  %v9421_v27 = vpop.f32.mrf.mxu1 }
 0x1ee   :  { %7088 = vmatprep.subr.bf16.mxu1 %v7597_v37  ;;  %v9423_v28 = vpop.f32.mrf.mxu0 }
 0x1ef   :  { %v9425_v29 = vpop.f32.mrf.mxu1 }
 0x1f0   :  { %7067 = vmatpush3.bf16.msra.mxu0 %v7598_v38  ;;  %v9427_v30 = vpop.f32.mrf.mxu0 }
 0x1f1   :  { %7089 = vmatpush3.bf16.msra.mxu1 %v7599_v39  ;;  %7068 = vmatprep.subr.bf16.mxu0 %v7600_v41  ;;  %v9431_v32 = vpop.f32.mrf.mxu1 }
 0x1f2   :  { %7090 = vmatprep.subr.bf16.mxu1 %v7601_v42  ;;  %v9429_v31 = vpop.f32.mrf.mxu0 }
 0x1f3   :  { %v9433_v33 = vpop.f32.mrf.mxu1 }
 0x1f4   :  { %7069 = vmatpush3.bf16.msra.mxu0 %v7602_v43  ;;  %v9435_v34 = vpop.f32.mrf.mxu0 }
 0x1f5   :  { %7091 = vmatpush3.bf16.msra.mxu1 %v7603_v45  ;;  %7070 = vmatprep.subr.bf16.mxu0 %v7604_v47  ;;  %v9437_v35 = vpop.f32.mrf.mxu1 }
 0x1f6   :  { %7092 = vmatprep.subr.bf16.mxu1 %v7605_v48  ;;  %v9439_v36 = vpop.f32.mrf.mxu0 }
 0x1f7   :  { %v9441_v37 = vpop.f32.mrf.mxu1 }
 0x1f8   :  { %7071 = vmatpush3.bf16.msra.mxu0 %v7606_v49  ;;  %v9443_v38 = vpop.f32.mrf.mxu0 }
 0x1f9   :  { %7093 = vmatpush3.bf16.msra.mxu1 %v7607_v51  ;;  %7072 = vmatprep.subr.bf16.mxu0 %v7608_v53  ;;  %v9447_v41 = vpop.f32.mrf.mxu1 }
 0x1fa   :  { %7094 = vmatprep.subr.bf16.mxu1 %v7609_v54  ;;  %v9445_v39 = vpop.f32.mrf.mxu0 }
 0x1fb   :  { %v9449_v42 = vpop.f32.mrf.mxu1 }
 0x1fc   :  { %7073 = vmatpush3.bf16.msra.mxu0 %v7610_v55  ;;  %v9451_v43 = vpop.f32.mrf.mxu0 }
 0x1fd   :  { %7095 = vmatpush3.bf16.msra.mxu1 %v7611_v57  ;;  %7074 = vmatprep.subr.bf16.mxu0 %v7612_v59  ;;  %v9453_v45 = vpop.f32.mrf.mxu1 }
 0x1fe   :  { %7096 = vmatprep.subr.bf16.mxu1 %v7613_v60  ;;  %v9455_v47 = vpop.f32.mrf.mxu0 }
 0x1ff   :  { %v9457_v48 = vpop.f32.mrf.mxu1 }
 0x200   :  { %7075 = vmatpush3.bf16.msra.mxu0 %v7614_v62  ;;  %v9459_v49 = vpop.f32.mrf.mxu0 }
 0x201   :  { %7097 = vmatpush3.bf16.msra.mxu1 %v7615_v0  ;;  %v9463_v53 = vpop.f32.mrf.mxu1 }
 0x202   :  { %v9461_v51 = vpop.f32.mrf.mxu0 }
 0x203   :  { %5755 = vmatmul.mubr.bf16.vlgmr.msra.gmra.mxu0 %v5882_v5  ;;  %v9465_v54 = vpop.f32.mrf.mxu1 }
 0x204   :  { %5796 = vmatmul.mubr.bf16.vlgmr.msra.gmra.mxu1 %v5884_v9  ;;  %v9467_v55 = vpop.f32.mrf.mxu0 }
 0x205   :  { %v9469_v57 = vpop.f32.mrf.mxu1 }
 0x206   :  { %v9471_v59 = vpop.f32.mrf.mxu0 }
 0x207   :  { %v9473_v60 = vpop.f32.mrf.mxu1 }
 0x208   :  { %9646 = vst [vmem:[#allocation2_spill] sm:$0xff] %v9473_v60  ;;  %v9475_v62 = vpop.f32.mrf.mxu0 }
 0x209   :  { %9647 = vst [vmem:[#allocation3_spill] sm:$0xff] %v9475_v62  ;;  %v9479_v1 = vpop.f32.mrf.mxu1 }
 0x20a   :  { %v9477_v0 = vpop.f32.mrf.mxu0  ;;  %9649 = vst [vmem:[#allocation5_spill] sm:$0xff] %v9479_v1 }
 0x20b   :  { %9648 = vst [vmem:[#allocation4_spill] sm:$0xff] %v9477_v0  ;;  %v9481_v2 = vpop.f32.mrf.mxu1 }
 0x20c   :  { %9650 = vst [vmem:[#allocation6_spill] sm:$0xff] %v9481_v2  ;;  %v9483_v3 = vpop.f32.mrf.mxu0 }
 0x20d   :  { %9651 = vst [vmem:[#allocation7_spill] sm:$0xff] %v9483_v3  ;;  %v9485_v5 = vpop.f32.mrf.mxu1 }
 0x20e   :  { %9652 = vst [vmem:[#allocation8_spill] sm:$0xff] %v9485_v5  ;;  %v9487_v6 = vpop.f32.mrf.mxu0 }
 0x20f   :  { %9653 = vst [vmem:[#allocation9_spill] sm:$0xff] %v9487_v6  ;;  %v9489_v7 = vpop.f32.mrf.mxu1 }
 0x210   :  { %9654 = vst [vmem:[#allocation10_spill] sm:$0xff] %v9489_v7  ;;  %v9491_v9 = vpop.f32.mrf.mxu0  ;;  %v6418_v7 = vadd.f32 %v9323_v46, %v9307_v40  ;;  %v6465_v46 = vadd.f32 %v9395_v14, %v9391_v12  ;;  %v6509_v12 = vadd.f32 %v9411_v22, %v9407_v20  ;;  %v6553_v20 = vadd.f32 %v9427_v30, %v9423_v28 }
 0x211   :  { %v9495_v60 = vpop.f32.mrf.mxu1 }
 0x212   :  { %v9493_v10 = vpop.f32.mrf.mxu0  ;;  %9656 = vst [vmem:[#allocation12_spill] sm:$0xff] %v9495_v60  ;;  %v6440_v60 = vadd.f32 %v9334_v50, %v9318_v44  ;;  %v6484_v44 = vadd.f32 %v9389_v11, %v9382_v4  ;;  %v6528_v11 = vadd.f32 %v9405_v19, %v9401_v17  ;;  %v6572_v19 = vadd.f32 %v9421_v27, %v9417_v25 }
 0x213   :  { %9655 = vst [vmem:[#allocation11_spill] sm:$0xff] %v9493_v10  ;;  %v9497_v62 = vpop.f32.mrf.mxu1  ;;  %v6616_v25 = vadd.f32 %v9437_v35, %v9433_v33  ;;  %v6597_v27 = vadd.f32 %v9443_v38, %v9439_v36  ;;  %v6660_v35 = vadd.f32 %v9453_v45, %v9449_v42  ;;  %v6641_v36 = vadd.f32 %v9459_v49, %v9455_v47  ;;  %v9663_v45 = vld [vmem:[#allocation3_spill] sm:$0xff] }
 0x214   :  { %9657 = vst [vmem:[#allocation13_spill] sm:$0xff] %v9497_v62  ;;  %v9499_v0 = vpop.f32.mrf.mxu0  ;;  %v6462_v62 = vadd.f32 %v9387_v8, %v9363_v61  ;;  %v6704_v42 = vadd.f32 %v9469_v57, %v9465_v54  ;;  %v6685_v47 = vadd.f32 %v9663_v45, %v9471_v59 }
 0x215   :  { %v9501_v1 = vpop.f32.mrf.mxu1 }
 0x216   :  { %9658 = vst [vmem:[#allocation14_spill] sm:$0xff] %v9501_v1  ;;  %v9503_v2 = vpop.f32.mrf.mxu0  ;;  %v9670_v54 = vld [vmem:[#allocation9_spill] sm:$0xff] }
 0x217   :  { %9659 = vst [vmem:[#allocation15_spill] sm:$0xff] %v9503_v2  ;;  %v9505_v3 = vpop.f32.mrf.mxu1  ;;  %v6729_v57 = vadd.f32 %v9491_v9, %v9670_v54 }
 0x218   :  { %9660 = vst [vmem:[#allocation16_spill] sm:$0xff] %v9505_v3  ;;  %v9507_v5 = vpop.f32.mrf.mxu0  ;;  %v4568_v3 = vadd.f32 %v6440_v60, %v6418_v7  ;;  %v6506_v60 = vadd.f32 %v9403_v18, %v9397_v15  ;;  %v6550_v15 = vadd.f32 %v9419_v26, %v9413_v23  ;;  %v6594_v23 = vadd.f32 %v9435_v34, %v9429_v31 }
 0x219   :  { %9661 = vst [vmem:[#allocation17_spill] sm:$0xff] %v9507_v5  ;;  %v9515_v10 = vpop.f32.mrf.mxu1  ;;  %v6421_v5 = vadd.f32 %v9355_v58, %v9339_v52  ;;  %v6638_v34 = vadd.f32 %v9451_v43, %v9445_v39  ;;  %v6682_v43 = vadd.f32 %v9467_v55, %v9461_v51 }
 0x21a   :  { %v9509_v6 = vpop.f32.mrf.mxu0  ;;  %v4609_v40 = vadd.f32 %v6462_v62, %v4568_v3 }
 0x21b   :  { %9662 = vst [vmem:[#allocation18_spill] sm:$0xff] %v9509_v6  ;;  %v9519_v1 = vpop.f32.mrf.mxu1  ;;  %v6443_v6 = vadd.f32 %v9368_v63, %v9350_v56  ;;  %v6487_v63 = vadd.f32 %v9399_v16, %v9393_v13  ;;  %v6531_v16 = vadd.f32 %v9415_v24, %v9409_v21  ;;  %v6575_v21 = vadd.f32 %v9431_v32, %v9425_v29 }
 0x21c   :  { %v9521_v2 = vpop.f32.mrf.mxu0  ;;  %v4650_v7 = vadd.f32 %v6484_v44, %v4609_v40  ;;  %v6619_v32 = vadd.f32 %v9447_v41, %v9441_v37  ;;  %v6663_v37 = vadd.f32 %v9463_v53, %v9457_v48  ;;  %v9668_v53 = vld [vmem:[#allocation6_spill] sm:$0xff] }
 0x21d   :  { %v9531_v50 = vpop.f32.mrf.mxu1  ;;  %v4571_v8 = vadd.f32 %v6443_v6, %v6421_v5 }
 0x21e   :  { %v9533_v61 = vpop.f32.mrf.mxu0  ;;  %v4691_v4 = vadd.f32 %v6506_v60, %v4650_v7 }
 0x21f   :  { %v4612_v52 = vadd.f32 %v6465_v46, %v4571_v8  ;;  %v9537_v58 = vpop.f32.mrf.mxu1 }
 0x220   :  { %v9539_v56 = vpop.f32.mrf.mxu0  ;;  %v4732_v3 = vadd.f32 %v6528_v11, %v4691_v4 }
 0x221   :  { %v4653_v62 = vadd.f32 %v6487_v63, %v4612_v52  ;;  %v9551_v18 = vpop.f32.mrf.mxu1 }
 0x222   :  { %v4773_v17 = vadd.f32 %v6550_v15, %v4732_v3  ;;  %v9665_v15 = vld [vmem:[#allocation7_spill] sm:$0xff] }
 0x223   :  { %v9547_v14 = vpop.f32.mrf.mxu0  ;;  %v4694_v5 = vadd.f32 %v6509_v12, %v4653_v62  ;;  %v9664_v62 = vld [vmem:[#allocation4_spill] sm:$0xff] }
 0x224   :  { %v9553_v6 = vpop.f32.mrf.mxu1  ;;  %v4814_v44 = vadd.f32 %v6572_v19, %v4773_v17  ;;  %v6726_v3 = vadd.f32 %v9665_v15, %v9664_v62  ;;  %v9666_v19 = vld [vmem:[#allocation2_spill] sm:$0xff]  ;;  %v9679_v15 = vld [vmem:[#allocation16_spill] sm:$0xff] }
 0x225   :  { %v9555_v13 = vpop.f32.mrf.mxu0  ;;  %v4735_v22 = vadd.f32 %v6531_v16, %v4694_v5 }
 0x226   :  { %v9565_v26 = vpop.f32.mrf.mxu1  ;;  %v4855_v24 = vadd.f32 %v6594_v23, %v4814_v44  ;;  %v9669_v23 = vld [vmem:[#allocation8_spill] sm:$0xff] }
 0x227   :  { %v9567_v40 = vpop.f32.mrf.mxu0  ;;  %v4776_v46 = vadd.f32 %v6553_v20, %v4735_v22  ;;  %v9667_v20 = vld [vmem:[#allocation5_spill] sm:$0xff]  ;;  %v6748_v44 = vadd.f32 %v9669_v23, %v9668_v53 }
 0x228   :  { %v9575_v28 = vpop.f32.mrf.mxu1  ;;  %v4896_v60 = vadd.f32 %v6616_v25, %v4855_v24  ;;  %v6707_v22 = vadd.f32 %v9667_v20, %v9666_v19  ;;  %v6817_v19 = vadd.f32 %v9539_v56, %v9533_v61 }
 0x229   :  { %v9577_v30 = vpop.f32.mrf.mxu0  ;;  %v4817_v31 = vadd.f32 %v6575_v21, %v4776_v46  ;;  %v9671_v21 = vld [vmem:[#allocation11_spill] sm:$0xff] }
 0x22a   :  { %v9583_v29 = vpop.f32.mrf.mxu1  ;;  %v4937_v33 = vadd.f32 %v6638_v34, %v4896_v60  ;;  %v6770_v24 = vadd.f32 %v9499_v0, %v9671_v21  ;;  %v9672_v60 = vld [vmem:[#allocation10_spill] sm:$0xff] }
 0x22b   :  { %v4858_v7 = vadd.f32 %v6597_v27, %v4817_v31 }
 0x22c   :  { %v4978_v63 = vadd.f32 %v6660_v35, %v4937_v33  ;;  %v9674_v35 = vld [vmem:[#allocation13_spill] sm:$0xff] }
 0x22d   :  { %v4899_v39 = vadd.f32 %v6619_v32, %v4858_v7  ;;  %v9673_v7 = vld [vmem:[#allocation12_spill] sm:$0xff] }
 0x22e   :  { %v5019_v41 = vadd.f32 %v6682_v43, %v4978_v63  ;;  %v6751_v32 = vadd.f32 %v9673_v7, %v9672_v60  ;;  %v9676_v43 = vld [vmem:[#allocation15_spill] sm:$0xff]  ;;  %v9677_v63 = vld [vmem:[#allocation17_spill] sm:$0xff] }
 0x22f   :  { %v4940_v4 = vadd.f32 %v6641_v36, %v4899_v39  ;;  %v9675_v36 = vld [vmem:[#allocation14_spill] sm:$0xff] }
 0x230   :  { %v5060_v55 = vadd.f32 %v6704_v42, %v5019_v41  ;;  %v6792_v39 = vadd.f32 %v9675_v36, %v9674_v35  ;;  %v9678_v42 = vld [vmem:[#allocation18_spill] sm:$0xff] }
 0x231   :  { %v4981_v49 = vadd.f32 %v6663_v37, %v4940_v4  ;;  %v6773_v4 = vadd.f32 %v9677_v63, %v9676_v43  ;;  %v6814_v0 = vadd.f32 %v9521_v2, %v9678_v42 }
 0x232   :  { %v5101_v48 = vadd.f32 %v6726_v3, %v5060_v55  ;;  %v6795_v3 = vadd.f32 %v9515_v10, %v9679_v15  ;;  %v6839_v10 = vadd.f32 %v9551_v18, %v9537_v58 }
 0x233   :  { %v5022_v16 = vadd.f32 %v6685_v47, %v4981_v49 }
 0x234   :  { %v5142_v31 = vadd.f32 %v6748_v44, %v5101_v48  ;;  %v6858_v48 = vadd.f32 %v9555_v13, %v9547_v14 }
 0x235   :  { %v5063_v46 = vadd.f32 %v6707_v22, %v5022_v16  ;;  %v6836_v16 = vadd.f32 %v9531_v50, %v9519_v1  ;;  %v6880_v1 = vadd.f32 %v9565_v26, %v9553_v6  ;;  %v6861_v50 = vadd.f32 %v9577_v30, %v9567_v40 }
 0x236   :  { %v5183_v33 = vadd.f32 %v6770_v24, %v5142_v31  ;;  %v6883_v24 = vadd.f32 %v9583_v29, %v9575_v28 }
 0x237   :  { %v5104_v34 = vadd.f32 %v6729_v57, %v5063_v46 }
 0x238   :  { %v5224_v45 = vadd.f32 %v6792_v39, %v5183_v33 }
 0x239   :  { %v5145_v41 = vadd.f32 %v6751_v32, %v5104_v34 }
 0x23a   :  { %v5265_v55 = vadd.f32 %v6814_v0, %v5224_v45 }
 0x23b   :  { %v5186_v47 = vadd.f32 %v6773_v4, %v5145_v41 }
 0x23c   :  { %v5306_v53 = vadd.f32 %v6836_v16, %v5265_v55 }
 0x23d   :  { %v5227_v22 = vadd.f32 %v6795_v3, %v5186_v47 }
 0x23e   :  { %v5347_v57 = vadd.f32 %v6858_v48, %v5306_v53 }
 0x23f   :  { %v5268_v23 = vadd.f32 %v6817_v19, %v5227_v22 }
 0x240   :  { %v5388_v13 = vadd.f32 %v6880_v1, %v5347_v57 }
 0x241   :  { %v5309_v61 = vadd.f32 %v6839_v10, %v5268_v23 }
 0x243   :  { %v9581_v8 = vpop.f32.mrf.mxu0  ;;  %v5350_v21 = vadd.f32 %v6861_v50, %v5309_v61 }
 0x244   :  { %v9591_v38 = vpop.f32.mrf.mxu1 }
 0x245   :  { %v6901_v52 = vpop.f32.mrf.mxu0  ;;  %v5391_v6 = vadd.f32 %v6883_v24, %v5350_v21 }
 0x246   :  { %v6923_v11 = vpop.f32.mrf.mxu1  ;;  %v6902_v56 = vadd.f32 %v6901_v52, %v9581_v8 }
 0x247   :  { %v6903_v12 = vpop.f32.mrf.mxu0  ;;  %v6924_v58 = vadd.f32 %v6923_v11, %v9591_v38 }
 0x248   :  { %v6925_v5 = vpop.f32.mrf.mxu1  ;;  %v5429_v31 = vadd.f32 %v6902_v56, %v5388_v13 }
 0x249   :  { %v6904_v51 = vpop.f32.mrf.mxu0 }
 0x24a   :  { %v6926_v59 = vpop.f32.mrf.mxu1  ;;  %v6905_v18 = vadd.f32 %v6904_v51, %v6903_v12  ;;  %v5470_v40 = vadd.f32 %v6924_v58, %v5429_v31 }
 0x24b   :  { %v6927_v8 = vadd.f32 %v6926_v59, %v6925_v5 }
 0x24c   :  { %v5432_v30 = vadd.f32 %v6905_v18, %v5391_v6 }
 0x24e   :  { %v5473_v43 = vadd.f32 %v6927_v8, %v5432_v30 }
 0x263   :  { %v6944_v17 = vpop.f32.mrf.mxu0 }
 0x264   :  { %v6966_v25 = vpop.f32.mrf.mxu1 }
 0x265   :  { %v6945_v27 = vpop.f32.mrf.mxu0 }
 0x266   :  { %v6967_v9 = vpop.f32.mrf.mxu1  ;;  %v6946_v26 = vadd.f32 %v6945_v27, %v6944_v17 }
 0x267   :  { %v6947_v37 = vpop.f32.mrf.mxu0  ;;  %v6968_v33 = vadd.f32 %v6967_v9, %v6966_v25 }
 0x268   :  { %v6969_v49 = vpop.f32.mrf.mxu1  ;;  %v5511_v52 = vadd.f32 %v6946_v26, %v5470_v40 }
 0x269   :  { %v6948_v62 = vpop.f32.mrf.mxu0 }
 0x26a   :  { %v6970_v2 = vpop.f32.mrf.mxu1  ;;  %v6949_v35 = vadd.f32 %v6948_v62, %v6947_v37  ;;  %v5552_v29 = vadd.f32 %v6968_v33, %v5511_v52 }
 0x26b   :  { %v6971_v12 = vadd.f32 %v6970_v2, %v6969_v49 }
 0x26c   :  { %v5514_v63 = vadd.f32 %v6949_v35, %v5473_v43 }
 0x26e   :  { %v5555_v27 = vadd.f32 %v6971_v12, %v5514_v63 }
 0x283   :  { %v6988_v20 = vpop.f32.mrf.mxu0 }
 0x284   :  { %v7010_v44 = vpop.f32.mrf.mxu1 }
 0x285   :  { %v6989_v54 = vpop.f32.mrf.mxu0 }
 0x286   :  { %v7011_v46 = vpop.f32.mrf.mxu1  ;;  %v6990_v28 = vadd.f32 %v6989_v54, %v6988_v20 }
 0x287   :  { %v6991_v14 = vpop.f32.mrf.mxu0  ;;  %v7012_v4 = vadd.f32 %v7011_v46, %v7010_v44 }
 0x288   :  { %v7013_v34 = vpop.f32.mrf.mxu1  ;;  %v5593_v51 = vadd.f32 %v6990_v28, %v5552_v29 }
 0x289   :  { %v6992_v60 = vpop.f32.mrf.mxu0 }
 0x28a   :  { %v7014_v32 = vpop.f32.mrf.mxu1  ;;  %v6993_v17 = vadd.f32 %v6992_v60, %v6991_v14  ;;  %v5634_v5 = vadd.f32 %v7012_v4, %v5593_v51 }
 0x28b   :  { %v7015_v25 = vadd.f32 %v7014_v32, %v7013_v34 }
 0x28c   :  { %v5596_v59 = vadd.f32 %v6993_v17, %v5555_v27 }
 0x28e   :  { %v5637_v15 = vadd.f32 %v7015_v25, %v5596_v59 }
 0x2a3   :  { %v7032_v7 = vpop.f32.mrf.mxu0 }
 0x2a4   :  { %v7054_v36 = vpop.f32.mrf.mxu1 }
 0x2a5   :  { %v7033_v39 = vpop.f32.mrf.mxu0 }
 0x2a6   :  { %v7055_v38 = vpop.f32.mrf.mxu1  ;;  %v7034_v41 = vadd.f32 %v7033_v39, %v7032_v7 }
 0x2a7   :  { %v7035_v11 = vpop.f32.mrf.mxu0  ;;  %v7056_v37 = vadd.f32 %v7055_v38, %v7054_v36 }
 0x2a8   :  { %v7057_v42 = vpop.f32.mrf.mxu1  ;;  %v5675_v9 = vadd.f32 %v7034_v41, %v5634_v5 }
 0x2a9   :  { %v7036_v0 = vpop.f32.mrf.mxu0 }
 0x2aa   :  { %v7037_v45 = vadd.f32 %v7036_v0, %v7035_v11  ;;  %v7058_v47 = vpop.f32.mrf.mxu1  ;;  %v5716_v16 = vadd.f32 %v7056_v37, %v5675_v9 }
 0x2ab   :  { %v7059_v48 = vadd.f32 %v7058_v47, %v7057_v42 }
 0x2ac   :  { %v5678_v49 = vadd.f32 %v7037_v45, %v5637_v15 }
 0x2ae   :  { %v5719_v54 = vadd.f32 %v7059_v48, %v5678_v49 }
 0x2c3   :  { %v7076_v62 = vpop.f32.mrf.mxu0 }
 0x2c4   :  { %v7098_v3 = vpop.f32.mrf.mxu1 }
 0x2c5   :  { %v7077_v55 = vpop.f32.mrf.mxu0 }
 0x2c6   :  { %v7078_v19 = vadd.f32 %v7077_v55, %v7076_v62  ;;  %v7099_v20 = vpop.f32.mrf.mxu1 }
 0x2c7   :  { %v7079_v22 = vpop.f32.mrf.mxu0  ;;  %v7100_v53 = vadd.f32 %v7099_v20, %v7098_v3 }
 0x2c8   :  { %v5757_v2 = vadd.f32 %v7078_v19, %v5716_v16  ;;  %v7101_v23 = vpop.f32.mrf.mxu1 }
 0x2c9   :  { %v7080_v44 = vpop.f32.mrf.mxu0 }
 0x2ca   :  { %v5798_v10 = vadd.f32 %v7100_v53, %v5757_v2  ;;  %v7081_v57 = vadd.f32 %v7080_v44, %v7079_v22  ;;  %v7102_v1 = vpop.f32.mrf.mxu1 }
 0x2cb   :  { %v7103_v56 = vadd.f32 %v7102_v1, %v7101_v23 }
 0x2cc   :  { %v6398_v50 = vmul.f32 -1.442695, %v5798_v10  ;;  %v5760_v61 = vadd.f32 %v7081_v57, %v5719_v54 }
 0x2ce   :  { %7616 = vpow2.f32 %v6398_v50  ;;  %v5801_v46 = vadd.f32 %v7103_v56, %v5760_v61 }
 0x2d0   :  { %v6399_v14 = vmul.f32 -1.442695, %v5801_v46 }
 0x2d2   :  { %7618 = vpow2.f32 %v6399_v14 }
 0x2db   :  { %v7617_v13 = vpop.eup %7616 }
 0x2dc   :  { %v5810_v21 = vadd.f32 1.0, %v7617_v13 }
 0x2de   :  { %7620 = vrcp.f32 %v5810_v21 }
 0x2df   :  { %v7619_v24 = vpop.eup %7618 }
 0x2e0   :  { %v5811_v31 = vadd.f32 1.0, %v7619_v24 }
 0x2e2   :  { %7622 = vrcp.f32 %v5811_v31 }
 0x2eb   :  { %v7621_v58 = vpop.eup %7620 }
 0x2ec   :  { %5816 = vst [vmem:[%s9645_s2] sm:$0xff] %v7621_v58 }
 0x2ef   :  { %v7623_v18 = vpop.eup %7622 }
 0x2f0   :  { %5817 = vst [vmem:[%s9645_s2 + $0x8] sm:$0xff] %v7623_v18 }

</bundles_post_ra>
